<compile_context>
chip_gen: v7x
topology: tpu7x:2x2x1
jax: 0.10.0
libtpu: 0.0.40
codegen_flags: <defaults>
</compile_context>

<pallas_src>
import jax
import jax.numpy as jnp
from jax import lax
from jax.experimental import pallas as pl
from jax.experimental.pallas import tpu as pltpu

# Full-f32 matmul passes everywhere (wrapper, reference) so they match the
# f32 MXU matmuls inside the Pallas kernel.
jax.config.update("jax_default_matmul_precision", "highest")


def _tgcn_recurrence_kernel(xru_ref, xc_ref, a_ref, w1h_ref, w2h_ref, hout_ref):
    """Serial-in-T part of the T-GCN cell for ONE batch element.

    grid = (B,), one invocation per batch element ("parallel" -> v7x megacore
    shards batches across TensorCores).  Block shapes:
      xru  : (1, T, N, 2H)  precomputed  (A x_t) W1x + b1   (r|u fused on lanes)
      xc   : (1, T, N, H)   precomputed  (A x_t) W2x + b2
      a    : (N, N)         normalized adjacency
      w1h  : (H, 2H)        fused r|u h-side weights
      w2h  : (H, H)         candidate h-side weights
      hout : (1, T, N, H)   hidden state per time step (lane-dense, H = 128)
    """
    T = xc_ref.shape[1]
    N = a_ref.shape[0]
    H = w2h_ref.shape[0]

    # Hoist all weight loads out of the recurrence (loaded once per batch).
    a = a_ref[...]        # (N, N)
    w1h = w1h_ref[...]    # (H, 2H)
    w2h = w2h_ref[...]    # (H, H)

    def step(t, h):
        # r/u gates: sigmoid( (A x_t) W1x + b1  +  (A h) W1h ), one fused matmul.
        ah = jnp.dot(a, h, preferred_element_type=jnp.float32)             # (N, H)
        g = jax.nn.sigmoid(
            xru_ref[0, t] + jnp.dot(ah, w1h, preferred_element_type=jnp.float32))
        r = g[:, :H]           # lane slice at 128 boundary
        u = g[:, H:]
        # candidate: tanh( (A x_t) W2x + b2  +  (A (r*h)) W2h )
        arh = jnp.dot(a, r * h, preferred_element_type=jnp.float32)        # (N, H)
        c = jnp.tanh(
            xc_ref[0, t] + jnp.dot(arh, w2h, preferred_element_type=jnp.float32))
        h_new = u * h + (1.0 - u) * c                                      # (N, H)
        hout_ref[0, t] = h_new                      # lane-dense (N, 128) store
        return h_new

    lax.fori_loop(0, T, step, jnp.zeros((N, H), jnp.float32), unroll=True)


def tgcn_model_forward(x_bntc, a_hat, w1, b1, w2, b2, wo, bo, *,
                       hidden_size, horizon_size):
    """Equivalent of TGCNModel.forward.

    x_bntc: (B, N, T, C) in the PyTorch layout.  Returns (B, horizon, T, O):
    the module's final `x[:, -horizon:, :]` slices dim 1 of its (B, N, T, O)
    tensor (the node axis), and we faithfully reproduce that.
    """
    B, N, T, C = x_bntc.shape
    H = hidden_size
    assert w1.shape == (C + H, 2 * H) and w2.shape == (C + H, H)
    f32 = jnp.float32
    hp = lax.Precision.HIGHEST

    # Kernel layout (B, T, N, C).
    x = jnp.transpose(x_bntc, (0, 2, 1, 3)).astype(f32)
    a_hat = a_hat.astype(f32)

    # Split stacked GRU weights:  [x, h] @ W  =  x @ Wx + h @ Wh.
    w1x, w1h = w1[:C], w1[C:]          # (C, 2H), (H, 2H)  -- r|u kept fused
    w2x, w2h = w2[:C], w2[C:]          # (C, H),  (H, H)

    # Non-recurrent GCN terms, hoisted out of the serial loop and batched over
    # all (B, T): large MXU-friendly matmuls, biases folded in.
    ax = jnp.einsum('nm,btmc->btnc', a_hat, x, precision=hp)               # (B,T,N,C)
    xp_ru = jnp.einsum('btnc,ch->btnh', ax, w1x, precision=hp) + b1        # (B,T,N,2H)
    xp_c = jnp.einsum('btnc,ch->btnh', ax, w2x, precision=hp) + b2         # (B,T,N,H)

    # Serial GRU recurrence: one Pallas invocation per batch element.
    h_all = pl.pallas_call(
        _tgcn_recurrence_kernel,
        out_shape=jax.ShapeDtypeStruct((B, T, N, H), f32),
        grid_spec=pltpu.PrefetchScalarGridSpec(
            num_scalar_prefetch=0,
            grid=(B,),
            in_specs=[
                pl.BlockSpec((1, T, N, 2 * H), lambda b: (b, 0, 0, 0)),   # xp_ru
                pl.BlockSpec((1, T, N, H), lambda b: (b, 0, 0, 0)),       # xp_c
                pl.BlockSpec((N, N), lambda b: (0, 0)),                   # A_hat
                pl.BlockSpec((H, 2 * H), lambda b: (0, 0)),               # W1h (r|u)
                pl.BlockSpec((H, H), lambda b: (0, 0)),                   # W2h
            ],
            out_specs=pl.BlockSpec((1, T, N, H), lambda b: (b, 0, 0, 0)),
        ),
        compiler_params=pltpu.CompilerParams(
            dimension_semantics=("parallel",)),   # v7x: shard batches over 2 TCs
    )(xp_ru, xp_c, a_hat, w1h, w2h)

    # Output projection hoisted out of the recurrence: one (B*T*N, H) @ (H, O).
    y = jnp.einsum('btnh,ho->btno', h_all, wo, precision=hp) + bo          # (B,T,N,O)

    # Back to PyTorch layout (B, N, T, O), then the module's slice on dim 1.
    out = jnp.transpose(y, (0, 2, 1, 3))
    return out[:, -horizon_size:, :]


def _reference_forward(x_bntc, a_hat, w1, b1, w2, b2, wo, bo, *,
                       hidden_size, horizon_size):
    """Pure-JAX reference of the same reconstructed forward pass (concat form)."""
    B, N, T, C = x_bntc.shape
    H = hidden_size
    x_btnc = jnp.transpose(x_bntc, (0, 2, 1, 3)).astype(jnp.float32)

    def step(h, xt):
        xh = jnp.concatenate([xt, h], axis=1)
        gates = jax.nn.sigmoid(a_hat @ xh @ w1 + b1)
        r, u = gates[:, :H], gates[:, H:]
        c = jnp.tanh(a_hat @ jnp.concatenate([xt, r * h], axis=1) @ w2 + b2)
        h_new = u * h + (1.0 - u) * c
        return h_new, h_new @ wo + bo

    def per_batch(xb):  # xb: (T, N, C)
        h0 = jnp.zeros((N, H), jnp.float32)
        _, ys = jax.lax.scan(step, h0, xb)
        return ys  # (T, N, O)

    out_btno = jax.vmap(per_batch)(x_btnc)
    out = jnp.transpose(out_btno, (0, 2, 1, 3))
    return out[:, -horizon_size:, :]


def _normalized_adjacency(adj):
    """calculate_laplacian_with_self_loop: D^-1/2 (A + I) D^-1/2."""
    a = adj + jnp.eye(adj.shape[0], dtype=adj.dtype)
    d = jnp.sum(a, axis=1)
    d_inv_sqrt = 1.0 / jnp.sqrt(d)
    return a * d_inv_sqrt[:, None] * d_inv_sqrt[None, :]


if __name__ == "__main__":
    # Shape-consistent configuration (hidden = num_nodes * channels = 128,
    # so the hidden state is lane-dense and the Linear in_features matches).
    batch = 2
    input_size = 16            # num_nodes N
    seq_len = 8                # T
    input_channels = 8         # C
    hidden_size = input_size * input_channels   # 128 = linear_out in_features
    output_channels = 8
    horizon_size = 4

    key = jax.random.PRNGKey(0)
    k_adj, k_x, k_w1, k_b1, k_w2, k_b2, k_wo, k_bo = jax.random.split(key, 8)

    adj_raw = (jax.random.uniform(k_adj, (input_size, input_size)) > 0.6)
    adj_raw = jnp.maximum(adj_raw, adj_raw.T).astype(jnp.float32)
    a_hat = _normalized_adjacency(adj_raw)

    C, H, O = input_channels, hidden_size, output_channels
    w1 = jax.random.normal(k_w1, (C + H, 2 * H), jnp.float32) * 0.1
    b1 = jax.random.normal(k_b1, (2 * H,), jnp.float32) * 0.1 + 1.0
    w2 = jax.random.normal(k_w2, (C + H, H), jnp.float32) * 0.1
    b2 = jax.random.normal(k_b2, (H,), jnp.float32) * 0.1
    wo = jax.random.normal(k_wo, (H, O), jnp.float32) * 0.1
    bo = jax.random.normal(k_bo, (O,), jnp.float32) * 0.1

    # Input in the PyTorch layout: (batch, num_nodes, seq_len, input_channels).
    x = jax.random.normal(k_x, (batch, input_size, seq_len, input_channels),
                          jnp.float32)

    out = tgcn_model_forward(x, a_hat, w1, b1, w2, b2, wo, bo,
                             hidden_size=hidden_size,
                             horizon_size=horizon_size)
    out = jax.block_until_ready(out)

    ref = _reference_forward(x, a_hat, w1, b1, w2, b2, wo, bo,
                             hidden_size=hidden_size,
                             horizon_size=horizon_size)
    ref = jax.block_until_ready(ref)

    assert out.shape == (batch, horizon_size, seq_len, output_channels), out.shape
    max_err = float(jnp.max(jnp.abs(out - ref)))
    assert jnp.allclose(out, ref, atol=1e-4, rtol=1e-4), max_err

    print("KERNEL_OK")
</pallas_src>

<mosaic_0001>
module attributes {stable_mosaic.version = 11 : i64} {
  func.func @_tgcn_recurrence_kernel(%arg0: i32, %arg1: memref<1x8x16x256xf32, #tpu.memory_space<vmem>>, %arg2: memref<1x8x16x128xf32, #tpu.memory_space<vmem>>, %arg3: memref<16x16xf32, #tpu.memory_space<vmem>>, %arg4: memref<128x256xf32, #tpu.memory_space<vmem>>, %arg5: memref<128x128xf32, #tpu.memory_space<vmem>>, %arg6: memref<1x8x16x128xf32, #tpu.memory_space<vmem>>) attributes {dimension_semantics = [#tpu.dimension_semantics<parallel>], iteration_bounds = array<i64: 2>, scalar_prefetch = 0 : i64, scratch_operands = 0 : i64, tpu.core_type = #tpu.core_type<tc>, window_params = [{transform_indices = @transform_0, window_bounds = array<i64: 1, 8, 16, 256>}, {transform_indices = @transform_1, window_bounds = array<i64: 1, 8, 16, 128>}, {pipeline_mode = #tpu.pipeline_mode<synchronous>, transform_indices = @transform_2, window_bounds = array<i64: 16, 16>}, {pipeline_mode = #tpu.pipeline_mode<synchronous>, transform_indices = @transform_3, window_bounds = array<i64: 128, 256>}, {pipeline_mode = #tpu.pipeline_mode<synchronous>, transform_indices = @transform_4, window_bounds = array<i64: 128, 128>}, {transform_indices = @transform_5, window_bounds = array<i64: 1, 8, 16, 128>}]} {
    %c0 = arith.constant 0 : index
    %c0_0 = arith.constant 0 : index
    %0 = vector.load %arg3[%c0, %c0_0] : memref<16x16xf32, #tpu.memory_space<vmem>>, vector<16x16xf32>
    %c0_1 = arith.constant 0 : index
    %c0_2 = arith.constant 0 : index
    %1 = vector.load %arg4[%c0_1, %c0_2] : memref<128x256xf32, #tpu.memory_space<vmem>>, vector<128x256xf32>
    %c0_3 = arith.constant 0 : index
    %c0_4 = arith.constant 0 : index
    %2 = vector.load %arg5[%c0_3, %c0_4] : memref<128x128xf32, #tpu.memory_space<vmem>>, vector<128x128xf32>
    %cst = arith.constant 0.000000e+00 : f32
    %3 = vector.broadcast %cst : f32 to vector<16x128xf32>
    %c0_i32 = arith.constant 0 : i32
    %cst_5 = arith.constant dense<0.000000e+00> : vector<16x128xf32>
    %4 = tpu.matmul %0, %3, %cst_5 {dimension_numbers = #tpu.dot_dimension_numbers<[1], [0], [0], [1], [0, 0, 1, 1], [], []>, precision = #tpu.contract_precision<fp32>} : vector<16x16xf32>, vector<16x128xf32>, vector<16x128xf32> -> vector<16x128xf32>
    %c0_6 = arith.constant 0 : index
    %5 = arith.index_cast %c0_i32 : i32 to index
    %c0_7 = arith.constant 0 : index
    %c0_8 = arith.constant 0 : index
    %6 = vector.load %arg1[%c0_6, %5, %c0_7, %c0_8] : memref<1x8x16x256xf32, #tpu.memory_space<vmem>>, vector<1x1x16x256xf32>
    %7 = vector.shape_cast %6 : vector<1x1x16x256xf32> to vector<16x256xf32>
    %cst_9 = arith.constant dense<0.000000e+00> : vector<16x256xf32>
    %8 = tpu.matmul %4, %1, %cst_9 {dimension_numbers = #tpu.dot_dimension_numbers<[1], [0], [0], [1], [0, 0, 1, 1], [], []>, precision = #tpu.contract_precision<fp32>} : vector<16x128xf32>, vector<128x256xf32>, vector<16x256xf32> -> vector<16x256xf32>
    %9 = arith.addf %7, %8 : vector<16x256xf32>
    %10 = arith.negf %9 : vector<16x256xf32>
    %11 = math.exp %10 : vector<16x256xf32>
    %cst_10 = arith.constant 1.000000e+00 : f32
    %12 = vector.broadcast %cst_10 : f32 to vector<16x256xf32>
    %13 = arith.addf %12, %11 : vector<16x256xf32>
    %14 = arith.divf %12, %13 : vector<16x256xf32>
    %15 = vector.extract_strided_slice %14 {offsets = [0, 0], sizes = [16, 128], strides = [1, 1]} : vector<16x256xf32> to vector<16x128xf32>
    %16 = vector.extract_strided_slice %14 {offsets = [0, 128], sizes = [16, 128], strides = [1, 1]} : vector<16x256xf32> to vector<16x128xf32>
    %17 = arith.mulf %15, %3 : vector<16x128xf32>
    %cst_11 = arith.constant dense<0.000000e+00> : vector<16x128xf32>
    %18 = tpu.matmul %0, %17, %cst_11 {dimension_numbers = #tpu.dot_dimension_numbers<[1], [0], [0], [1], [0, 0, 1, 1], [], []>, precision = #tpu.contract_precision<fp32>} : vector<16x16xf32>, vector<16x128xf32>, vector<16x128xf32> -> vector<16x128xf32>
    %c0_12 = arith.constant 0 : index
    %19 = arith.index_cast %c0_i32 : i32 to index
    %c0_13 = arith.constant 0 : index
    %c0_14 = arith.constant 0 : index
    %20 = vector.load %arg2[%c0_12, %19, %c0_13, %c0_14] : memref<1x8x16x128xf32, #tpu.memory_space<vmem>>, vector<1x1x16x128xf32>
    %21 = vector.shape_cast %20 : vector<1x1x16x128xf32> to vector<16x128xf32>
    %cst_15 = arith.constant dense<0.000000e+00> : vector<16x128xf32>
    %22 = tpu.matmul %18, %2, %cst_15 {dimension_numbers = #tpu.dot_dimension_numbers<[1], [0], [0], [1], [0, 0, 1, 1], [], []>, precision = #tpu.contract_precision<fp32>} : vector<16x128xf32>, vector<128x128xf32>, vector<16x128xf32> -> vector<16x128xf32>
    %23 = arith.addf %21, %22 : vector<16x128xf32>
    %24 = math.tanh %23 : vector<16x128xf32>
    %25 = arith.mulf %16, %3 : vector<16x128xf32>
    %cst_16 = arith.constant 1.000000e+00 : f32
    %26 = vector.broadcast %cst_16 : f32 to vector<16x128xf32>
    %27 = arith.subf %26, %16 : vector<16x128xf32>
    %28 = arith.mulf %27, %24 : vector<16x128xf32>
    %29 = arith.addf %25, %28 : vector<16x128xf32>
    %c0_17 = arith.constant 0 : index
    %30 = arith.index_cast %c0_i32 : i32 to index
    %c0_18 = arith.constant 0 : index
    %c0_19 = arith.constant 0 : index
    %31 = vector.load %arg6[%c0_17, %30, %c0_18, %c0_19] : memref<1x8x16x128xf32, #tpu.memory_space<vmem>>, vector<1x1x16x128xf32>
    %32 = vector.shape_cast %31 : vector<1x1x16x128xf32> to vector<16x128xf32>
    %33 = vector.shape_cast %29 : vector<16x128xf32> to vector<1x1x16x128xf32>
    tpu.vector_store %arg6[%c0_17, %30, %c0_18, %c0_19], %33 {strides = array<i32>} : memref<1x8x16x128xf32, #tpu.memory_space<vmem>>, vector<1x1x16x128xf32>,
    %c1_i32 = arith.constant 1 : i32
    %cst_20 = arith.constant dense<0.000000e+00> : vector<16x128xf32>
    %34 = tpu.matmul %0, %29, %cst_20 {dimension_numbers = #tpu.dot_dimension_numbers<[1], [0], [0], [1], [0, 0, 1, 1], [], []>, precision = #tpu.contract_precision<fp32>} : vector<16x16xf32>, vector<16x128xf32>, vector<16x128xf32> -> vector<16x128xf32>
    %c0_21 = arith.constant 0 : index
    %35 = arith.index_cast %c1_i32 : i32 to index
    %c0_22 = arith.constant 0 : index
    %c0_23 = arith.constant 0 : index
    %36 = vector.load %arg1[%c0_21, %35, %c0_22, %c0_23] : memref<1x8x16x256xf32, #tpu.memory_space<vmem>>, vector<1x1x16x256xf32>
    %37 = vector.shape_cast %36 : vector<1x1x16x256xf32> to vector<16x256xf32>
    %cst_24 = arith.constant dense<0.000000e+00> : vector<16x256xf32>
    %38 = tpu.matmul %34, %1, %cst_24 {dimension_numbers = #tpu.dot_dimension_numbers<[1], [0], [0], [1], [0, 0, 1, 1], [], []>, precision = #tpu.contract_precision<fp32>} : vector<16x128xf32>, vector<128x256xf32>, vector<16x256xf32> -> vector<16x256xf32>
    %39 = arith.addf %37, %38 : vector<16x256xf32>
    %40 = arith.negf %39 : vector<16x256xf32>
    %41 = math.exp %40 : vector<16x256xf32>
    %cst_25 = arith.constant 1.000000e+00 : f32
    %42 = vector.broadcast %cst_25 : f32 to vector<16x256xf32>
    %43 = arith.addf %42, %41 : vector<16x256xf32>
    %44 = arith.divf %42, %43 : vector<16x256xf32>
    %45 = vector.extract_strided_slice %44 {offsets = [0, 0], sizes = [16, 128], strides = [1, 1]} : vector<16x256xf32> to vector<16x128xf32>
    %46 = vector.extract_strided_slice %44 {offsets = [0, 128], sizes = [16, 128], strides = [1, 1]} : vector<16x256xf32> to vector<16x128xf32>
    %47 = arith.mulf %45, %29 : vector<16x128xf32>
    %cst_26 = arith.constant dense<0.000000e+00> : vector<16x128xf32>
    %48 = tpu.matmul %0, %47, %cst_26 {dimension_numbers = #tpu.dot_dimension_numbers<[1], [0], [0], [1], [0, 0, 1, 1], [], []>, precision = #tpu.contract_precision<fp32>} : vector<16x16xf32>, vector<16x128xf32>, vector<16x128xf32> -> vector<16x128xf32>
    %c0_27 = arith.constant 0 : index
    %49 = arith.index_cast %c1_i32 : i32 to index
    %c0_28 = arith.constant 0 : index
    %c0_29 = arith.constant 0 : index
    %50 = vector.load %arg2[%c0_27, %49, %c0_28, %c0_29] : memref<1x8x16x128xf32, #tpu.memory_space<vmem>>, vector<1x1x16x128xf32>
    %51 = vector.shape_cast %50 : vector<1x1x16x128xf32> to vector<16x128xf32>
    %cst_30 = arith.constant dense<0.000000e+00> : vector<16x128xf32>
    %52 = tpu.matmul %48, %2, %cst_30 {dimension_numbers = #tpu.dot_dimension_numbers<[1], [0], [0], [1], [0, 0, 1, 1], [], []>, precision = #tpu.contract_precision<fp32>} : vector<16x128xf32>, vector<128x128xf32>, vector<16x128xf32> -> vector<16x128xf32>
    %53 = arith.addf %51, %52 : vector<16x128xf32>
    %54 = math.tanh %53 : vector<16x128xf32>
    %55 = arith.mulf %46, %29 : vector<16x128xf32>
    %cst_31 = arith.constant 1.000000e+00 : f32
    %56 = vector.broadcast %cst_31 : f32 to vector<16x128xf32>
    %57 = arith.subf %56, %46 : vector<16x128xf32>
    %58 = arith.mulf %57, %54 : vector<16x128xf32>
    %59 = arith.addf %55, %58 : vector<16x128xf32>
    %c0_32 = arith.constant 0 : index
    %60 = arith.index_cast %c1_i32 : i32 to index
    %c0_33 = arith.constant 0 : index
    %c0_34 = arith.constant 0 : index
    %61 = vector.load %arg6[%c0_32, %60, %c0_33, %c0_34] : memref<1x8x16x128xf32, #tpu.memory_space<vmem>>, vector<1x1x16x128xf32>
    %62 = vector.shape_cast %61 : vector<1x1x16x128xf32> to vector<16x128xf32>
    %63 = vector.shape_cast %59 : vector<16x128xf32> to vector<1x1x16x128xf32>
    tpu.vector_store %arg6[%c0_32, %60, %c0_33, %c0_34], %63 {strides = array<i32>} : memref<1x8x16x128xf32, #tpu.memory_space<vmem>>, vector<1x1x16x128xf32>,
    %c2_i32 = arith.constant 2 : i32
    %cst_35 = arith.constant dense<0.000000e+00> : vector<16x128xf32>
    %64 = tpu.matmul %0, %59, %cst_35 {dimension_numbers = #tpu.dot_dimension_numbers<[1], [0], [0], [1], [0, 0, 1, 1], [], []>, precision = #tpu.contract_precision<fp32>} : vector<16x16xf32>, vector<16x128xf32>, vector<16x128xf32> -> vector<16x128xf32>
    %c0_36 = arith.constant 0 : index
    %65 = arith.index_cast %c2_i32 : i32 to index
    %c0_37 = arith.constant 0 : index
    %c0_38 = arith.constant 0 : index
    %66 = vector.load %arg1[%c0_36, %65, %c0_37, %c0_38] : memref<1x8x16x256xf32, #tpu.memory_space<vmem>>, vector<1x1x16x256xf32>
    %67 = vector.shape_cast %66 : vector<1x1x16x256xf32> to vector<16x256xf32>
    %cst_39 = arith.constant dense<0.000000e+00> : vector<16x256xf32>
    %68 = tpu.matmul %64, %1, %cst_39 {dimension_numbers = #tpu.dot_dimension_numbers<[1], [0], [0], [1], [0, 0, 1, 1], [], []>, precision = #tpu.contract_precision<fp32>} : vector<16x128xf32>, vector<128x256xf32>, vector<16x256xf32> -> vector<16x256xf32>
    %69 = arith.addf %67, %68 : vector<16x256xf32>
    %70 = arith.negf %69 : vector<16x256xf32>
    %71 = math.exp %70 : vector<16x256xf32>
    %cst_40 = arith.constant 1.000000e+00 : f32
    %72 = vector.broadcast %cst_40 : f32 to vector<16x256xf32>
    %73 = arith.addf %72, %71 : vector<16x256xf32>
    %74 = arith.divf %72, %73 : vector<16x256xf32>
    %75 = vector.extract_strided_slice %74 {offsets = [0, 0], sizes = [16, 128], strides = [1, 1]} : vector<16x256xf32> to vector<16x128xf32>
    %76 = vector.extract_strided_slice %74 {offsets = [0, 128], sizes = [16, 128], strides = [1, 1]} : vector<16x256xf32> to vector<16x128xf32>
    %77 = arith.mulf %75, %59 : vector<16x128xf32>
    %cst_41 = arith.constant dense<0.000000e+00> : vector<16x128xf32>
    %78 = tpu.matmul %0, %77, %cst_41 {dimension_numbers = #tpu.dot_dimension_numbers<[1], [0], [0], [1], [0, 0, 1, 1], [], []>, precision = #tpu.contract_precision<fp32>} : vector<16x16xf32>, vector<16x128xf32>, vector<16x128xf32> -> vector<16x128xf32>
    %c0_42 = arith.constant 0 : index
    %79 = arith.index_cast %c2_i32 : i32 to index
    %c0_43 = arith.constant 0 : index
    %c0_44 = arith.constant 0 : index
    %80 = vector.load %arg2[%c0_42, %79, %c0_43, %c0_44] : memref<1x8x16x128xf32, #tpu.memory_space<vmem>>, vector<1x1x16x128xf32>
    %81 = vector.shape_cast %80 : vector<1x1x16x128xf32> to vector<16x128xf32>
    %cst_45 = arith.constant dense<0.000000e+00> : vector<16x128xf32>
    %82 = tpu.matmul %78, %2, %cst_45 {dimension_numbers = #tpu.dot_dimension_numbers<[1], [0], [0], [1], [0, 0, 1, 1], [], []>, precision = #tpu.contract_precision<fp32>} : vector<16x128xf32>, vector<128x128xf32>, vector<16x128xf32> -> vector<16x128xf32>
    %83 = arith.addf %81, %82 : vector<16x128xf32>
    %84 = math.tanh %83 : vector<16x128xf32>
    %85 = arith.mulf %76, %59 : vector<16x128xf32>
    %cst_46 = arith.constant 1.000000e+00 : f32
    %86 = vector.broadcast %cst_46 : f32 to vector<16x128xf32>
    %87 = arith.subf %86, %76 : vector<16x128xf32>
    %88 = arith.mulf %87, %84 : vector<16x128xf32>
    %89 = arith.addf %85, %88 : vector<16x128xf32>
    %c0_47 = arith.constant 0 : index
    %90 = arith.index_cast %c2_i32 : i32 to index
    %c0_48 = arith.constant 0 : index
    %c0_49 = arith.constant 0 : index
    %91 = vector.load %arg6[%c0_47, %90, %c0_48, %c0_49] : memref<1x8x16x128xf32, #tpu.memory_space<vmem>>, vector<1x1x16x128xf32>
    %92 = vector.shape_cast %91 : vector<1x1x16x128xf32> to vector<16x128xf32>
    %93 = vector.shape_cast %89 : vector<16x128xf32> to vector<1x1x16x128xf32>
    tpu.vector_store %arg6[%c0_47, %90, %c0_48, %c0_49], %93 {strides = array<i32>} : memref<1x8x16x128xf32, #tpu.memory_space<vmem>>, vector<1x1x16x128xf32>,
    %c3_i32 = arith.constant 3 : i32
    %cst_50 = arith.constant dense<0.000000e+00> : vector<16x128xf32>
    %94 = tpu.matmul %0, %89, %cst_50 {dimension_numbers = #tpu.dot_dimension_numbers<[1], [0], [0], [1], [0, 0, 1, 1], [], []>, precision = #tpu.contract_precision<fp32>} : vector<16x16xf32>, vector<16x128xf32>, vector<16x128xf32> -> vector<16x128xf32>
    %c0_51 = arith.constant 0 : index
    %95 = arith.index_cast %c3_i32 : i32 to index
    %c0_52 = arith.constant 0 : index
    %c0_53 = arith.constant 0 : index
    %96 = vector.load %arg1[%c0_51, %95, %c0_52, %c0_53] : memref<1x8x16x256xf32, #tpu.memory_space<vmem>>, vector<1x1x16x256xf32>
    %97 = vector.shape_cast %96 : vector<1x1x16x256xf32> to vector<16x256xf32>
    %cst_54 = arith.constant dense<0.000000e+00> : vector<16x256xf32>
    %98 = tpu.matmul %94, %1, %cst_54 {dimension_numbers = #tpu.dot_dimension_numbers<[1], [0], [0], [1], [0, 0, 1, 1], [], []>, precision = #tpu.contract_precision<fp32>} : vector<16x128xf32>, vector<128x256xf32>, vector<16x256xf32> -> vector<16x256xf32>
    %99 = arith.addf %97, %98 : vector<16x256xf32>
    %100 = arith.negf %99 : vector<16x256xf32>
    %101 = math.exp %100 : vector<16x256xf32>
    %cst_55 = arith.constant 1.000000e+00 : f32
    %102 = vector.broadcast %cst_55 : f32 to vector<16x256xf32>
    %103 = arith.addf %102, %101 : vector<16x256xf32>
    %104 = arith.divf %102, %103 : vector<16x256xf32>
    %105 = vector.extract_strided_slice %104 {offsets = [0, 0], sizes = [16, 128], strides = [1, 1]} : vector<16x256xf32> to vector<16x128xf32>
    %106 = vector.extract_strided_slice %104 {offsets = [0, 128], sizes = [16, 128], strides = [1, 1]} : vector<16x256xf32> to vector<16x128xf32>
    %107 = arith.mulf %105, %89 : vector<16x128xf32>
    %cst_56 = arith.constant dense<0.000000e+00> : vector<16x128xf32>
    %108 = tpu.matmul %0, %107, %cst_56 {dimension_numbers = #tpu.dot_dimension_numbers<[1], [0], [0], [1], [0, 0, 1, 1], [], []>, precision = #tpu.contract_precision<fp32>} : vector<16x16xf32>, vector<16x128xf32>, vector<16x128xf32> -> vector<16x128xf32>
    %c0_57 = arith.constant 0 : index
    %109 = arith.index_cast %c3_i32 : i32 to index
    %c0_58 = arith.constant 0 : index
    %c0_59 = arith.constant 0 : index
    %110 = vector.load %arg2[%c0_57, %109, %c0_58, %c0_59] : memref<1x8x16x128xf32, #tpu.memory_space<vmem>>, vector<1x1x16x128xf32>
    %111 = vector.shape_cast %110 : vector<1x1x16x128xf32> to vector<16x128xf32>
    %cst_60 = arith.constant dense<0.000000e+00> : vector<16x128xf32>
    %112 = tpu.matmul %108, %2, %cst_60 {dimension_numbers = #tpu.dot_dimension_numbers<[1], [0], [0], [1], [0, 0, 1, 1], [], []>, precision = #tpu.contract_precision<fp32>} : vector<16x128xf32>, vector<128x128xf32>, vector<16x128xf32> -> vector<16x128xf32>
    %113 = arith.addf %111, %112 : vector<16x128xf32>
    %114 = math.tanh %113 : vector<16x128xf32>
    %115 = arith.mulf %106, %89 : vector<16x128xf32>
    %cst_61 = arith.constant 1.000000e+00 : f32
    %116 = vector.broadcast %cst_61 : f32 to vector<16x128xf32>
    %117 = arith.subf %116, %106 : vector<16x128xf32>
    %118 = arith.mulf %117, %114 : vector<16x128xf32>
    %119 = arith.addf %115, %118 : vector<16x128xf32>
    %c0_62 = arith.constant 0 : index
    %120 = arith.index_cast %c3_i32 : i32 to index
    %c0_63 = arith.constant 0 : index
    %c0_64 = arith.constant 0 : index
    %121 = vector.load %arg6[%c0_62, %120, %c0_63, %c0_64] : memref<1x8x16x128xf32, #tpu.memory_space<vmem>>, vector<1x1x16x128xf32>
    %122 = vector.shape_cast %121 : vector<1x1x16x128xf32> to vector<16x128xf32>
    %123 = vector.shape_cast %119 : vector<16x128xf32> to vector<1x1x16x128xf32>
    tpu.vector_store %arg6[%c0_62, %120, %c0_63, %c0_64], %123 {strides = array<i32>} : memref<1x8x16x128xf32, #tpu.memory_space<vmem>>, vector<1x1x16x128xf32>,
    %c4_i32 = arith.constant 4 : i32
    %cst_65 = arith.constant dense<0.000000e+00> : vector<16x128xf32>
    %124 = tpu.matmul %0, %119, %cst_65 {dimension_numbers = #tpu.dot_dimension_numbers<[1], [0], [0], [1], [0, 0, 1, 1], [], []>, precision = #tpu.contract_precision<fp32>} : vector<16x16xf32>, vector<16x128xf32>, vector<16x128xf32> -> vector<16x128xf32>
    %c0_66 = arith.constant 0 : index
    %125 = arith.index_cast %c4_i32 : i32 to index
    %c0_67 = arith.constant 0 : index
    %c0_68 = arith.constant 0 : index
    %126 = vector.load %arg1[%c0_66, %125, %c0_67, %c0_68] : memref<1x8x16x256xf32, #tpu.memory_space<vmem>>, vector<1x1x16x256xf32>
    %127 = vector.shape_cast %126 : vector<1x1x16x256xf32> to vector<16x256xf32>
    %cst_69 = arith.constant dense<0.000000e+00> : vector<16x256xf32>
    %128 = tpu.matmul %124, %1, %cst_69 {dimension_numbers = #tpu.dot_dimension_numbers<[1], [0], [0], [1], [0, 0, 1, 1], [], []>, precision = #tpu.contract_precision<fp32>} : vector<16x128xf32>, vector<128x256xf32>, vector<16x256xf32> -> vector<16x256xf32>
    %129 = arith.addf %127, %128 : vector<16x256xf32>
    %130 = arith.negf %129 : vector<16x256xf32>
    %131 = math.exp %130 : vector<16x256xf32>
    %cst_70 = arith.constant 1.000000e+00 : f32
    %132 = vector.broadcast %cst_70 : f32 to vector<16x256xf32>
    %133 = arith.addf %132, %131 : vector<16x256xf32>
    %134 = arith.divf %132, %133 : vector<16x256xf32>
    %135 = vector.extract_strided_slice %134 {offsets = [0, 0], sizes = [16, 128], strides = [1, 1]} : vector<16x256xf32> to vector<16x128xf32>
    %136 = vector.extract_strided_slice %134 {offsets = [0, 128], sizes = [16, 128], strides = [1, 1]} : vector<16x256xf32> to vector<16x128xf32>
    %137 = arith.mulf %135, %119 : vector<16x128xf32>
    %cst_71 = arith.constant dense<0.000000e+00> : vector<16x128xf32>
    %138 = tpu.matmul %0, %137, %cst_71 {dimension_numbers = #tpu.dot_dimension_numbers<[1], [0], [0], [1], [0, 0, 1, 1], [], []>, precision = #tpu.contract_precision<fp32>} : vector<16x16xf32>, vector<16x128xf32>, vector<16x128xf32> -> vector<16x128xf32>
    %c0_72 = arith.constant 0 : index
    %139 = arith.index_cast %c4_i32 : i32 to index
    %c0_73 = arith.constant 0 : index
    %c0_74 = arith.constant 0 : index
    %140 = vector.load %arg2[%c0_72, %139, %c0_73, %c0_74] : memref<1x8x16x128xf32, #tpu.memory_space<vmem>>, vector<1x1x16x128xf32>
    %141 = vector.shape_cast %140 : vector<1x1x16x128xf32> to vector<16x128xf32>
    %cst_75 = arith.constant dense<0.000000e+00> : vector<16x128xf32>
    %142 = tpu.matmul %138, %2, %cst_75 {dimension_numbers = #tpu.dot_dimension_numbers<[1], [0], [0], [1], [0, 0, 1, 1], [], []>, precision = #tpu.contract_precision<fp32>} : vector<16x128xf32>, vector<128x128xf32>, vector<16x128xf32> -> vector<16x128xf32>
    %143 = arith.addf %141, %142 : vector<16x128xf32>
    %144 = math.tanh %143 : vector<16x128xf32>
    %145 = arith.mulf %136, %119 : vector<16x128xf32>
    %cst_76 = arith.constant 1.000000e+00 : f32
    %146 = vector.broadcast %cst_76 : f32 to vector<16x128xf32>
    %147 = arith.subf %146, %136 : vector<16x128xf32>
    %148 = arith.mulf %147, %144 : vector<16x128xf32>
    %149 = arith.addf %145, %148 : vector<16x128xf32>
    %c0_77 = arith.constant 0 : index
    %150 = arith.index_cast %c4_i32 : i32 to index
    %c0_78 = arith.constant 0 : index
    %c0_79 = arith.constant 0 : index
    %151 = vector.load %arg6[%c0_77, %150, %c0_78, %c0_79] : memref<1x8x16x128xf32, #tpu.memory_space<vmem>>, vector<1x1x16x128xf32>
    %152 = vector.shape_cast %151 : vector<1x1x16x128xf32> to vector<16x128xf32>
    %153 = vector.shape_cast %149 : vector<16x128xf32> to vector<1x1x16x128xf32>
    tpu.vector_store %arg6[%c0_77, %150, %c0_78, %c0_79], %153 {strides = array<i32>} : memref<1x8x16x128xf32, #tpu.memory_space<vmem>>, vector<1x1x16x128xf32>,
    %c5_i32 = arith.constant 5 : i32
    %cst_80 = arith.constant dense<0.000000e+00> : vector<16x128xf32>
    %154 = tpu.matmul %0, %149, %cst_80 {dimension_numbers = #tpu.dot_dimension_numbers<[1], [0], [0], [1], [0, 0, 1, 1], [], []>, precision = #tpu.contract_precision<fp32>} : vector<16x16xf32>, vector<16x128xf32>, vector<16x128xf32> -> vector<16x128xf32>
    %c0_81 = arith.constant 0 : index
    %155 = arith.index_cast %c5_i32 : i32 to index
    %c0_82 = arith.constant 0 : index
    %c0_83 = arith.constant 0 : index
    %156 = vector.load %arg1[%c0_81, %155, %c0_82, %c0_83] : memref<1x8x16x256xf32, #tpu.memory_space<vmem>>, vector<1x1x16x256xf32>
    %157 = vector.shape_cast %156 : vector<1x1x16x256xf32> to vector<16x256xf32>
    %cst_84 = arith.constant dense<0.000000e+00> : vector<16x256xf32>
    %158 = tpu.matmul %154, %1, %cst_84 {dimension_numbers = #tpu.dot_dimension_numbers<[1], [0], [0], [1], [0, 0, 1, 1], [], []>, precision = #tpu.contract_precision<fp32>} : vector<16x128xf32>, vector<128x256xf32>, vector<16x256xf32> -> vector<16x256xf32>
    %159 = arith.addf %157, %158 : vector<16x256xf32>
    %160 = arith.negf %159 : vector<16x256xf32>
    %161 = math.exp %160 : vector<16x256xf32>
    %cst_85 = arith.constant 1.000000e+00 : f32
    %162 = vector.broadcast %cst_85 : f32 to vector<16x256xf32>
    %163 = arith.addf %162, %161 : vector<16x256xf32>
    %164 = arith.divf %162, %163 : vector<16x256xf32>
    %165 = vector.extract_strided_slice %164 {offsets = [0, 0], sizes = [16, 128], strides = [1, 1]} : vector<16x256xf32> to vector<16x128xf32>
    %166 = vector.extract_strided_slice %164 {offsets = [0, 128], sizes = [16, 128], strides = [1, 1]} : vector<16x256xf32> to vector<16x128xf32>
    %167 = arith.mulf %165, %149 : vector<16x128xf32>
    %cst_86 = arith.constant dense<0.000000e+00> : vector<16x128xf32>
    %168 = tpu.matmul %0, %167, %cst_86 {dimension_numbers = #tpu.dot_dimension_numbers<[1], [0], [0], [1], [0, 0, 1, 1], [], []>, precision = #tpu.contract_precision<fp32>} : vector<16x16xf32>, vector<16x128xf32>, vector<16x128xf32> -> vector<16x128xf32>
    %c0_87 = arith.constant 0 : index
    %169 = arith.index_cast %c5_i32 : i32 to index
    %c0_88 = arith.constant 0 : index
    %c0_89 = arith.constant 0 : index
    %170 = vector.load %arg2[%c0_87, %169, %c0_88, %c0_89] : memref<1x8x16x128xf32, #tpu.memory_space<vmem>>, vector<1x1x16x128xf32>
    %171 = vector.shape_cast %170 : vector<1x1x16x128xf32> to vector<16x128xf32>
    %cst_90 = arith.constant dense<0.000000e+00> : vector<16x128xf32>
    %172 = tpu.matmul %168, %2, %cst_90 {dimension_numbers = #tpu.dot_dimension_numbers<[1], [0], [0], [1], [0, 0, 1, 1], [], []>, precision = #tpu.contract_precision<fp32>} : vector<16x128xf32>, vector<128x128xf32>, vector<16x128xf32> -> vector<16x128xf32>
    %173 = arith.addf %171, %172 : vector<16x128xf32>
    %174 = math.tanh %173 : vector<16x128xf32>
    %175 = arith.mulf %166, %149 : vector<16x128xf32>
    %cst_91 = arith.constant 1.000000e+00 : f32
    %176 = vector.broadcast %cst_91 : f32 to vector<16x128xf32>
    %177 = arith.subf %176, %166 : vector<16x128xf32>
    %178 = arith.mulf %177, %174 : vector<16x128xf32>
    %179 = arith.addf %175, %178 : vector<16x128xf32>
    %c0_92 = arith.constant 0 : index
    %180 = arith.index_cast %c5_i32 : i32 to index
    %c0_93 = arith.constant 0 : index
    %c0_94 = arith.constant 0 : index
    %181 = vector.load %arg6[%c0_92, %180, %c0_93, %c0_94] : memref<1x8x16x128xf32, #tpu.memory_space<vmem>>, vector<1x1x16x128xf32>
    %182 = vector.shape_cast %181 : vector<1x1x16x128xf32> to vector<16x128xf32>
    %183 = vector.shape_cast %179 : vector<16x128xf32> to vector<1x1x16x128xf32>
    tpu.vector_store %arg6[%c0_92, %180, %c0_93, %c0_94], %183 {strides = array<i32>} : memref<1x8x16x128xf32, #tpu.memory_space<vmem>>, vector<1x1x16x128xf32>,
    %c6_i32 = arith.constant 6 : i32
    %cst_95 = arith.constant dense<0.000000e+00> : vector<16x128xf32>
    %184 = tpu.matmul %0, %179, %cst_95 {dimension_numbers = #tpu.dot_dimension_numbers<[1], [0], [0], [1], [0, 0, 1, 1], [], []>, precision = #tpu.contract_precision<fp32>} : vector<16x16xf32>, vector<16x128xf32>, vector<16x128xf32> -> vector<16x128xf32>
    %c0_96 = arith.constant 0 : index
    %185 = arith.index_cast %c6_i32 : i32 to index
    %c0_97 = arith.constant 0 : index
    %c0_98 = arith.constant 0 : index
    %186 = vector.load %arg1[%c0_96, %185, %c0_97, %c0_98] : memref<1x8x16x256xf32, #tpu.memory_space<vmem>>, vector<1x1x16x256xf32>
    %187 = vector.shape_cast %186 : vector<1x1x16x256xf32> to vector<16x256xf32>
    %cst_99 = arith.constant dense<0.000000e+00> : vector<16x256xf32>
    %188 = tpu.matmul %184, %1, %cst_99 {dimension_numbers = #tpu.dot_dimension_numbers<[1], [0], [0], [1], [0, 0, 1, 1], [], []>, precision = #tpu.contract_precision<fp32>} : vector<16x128xf32>, vector<128x256xf32>, vector<16x256xf32> -> vector<16x256xf32>
    %189 = arith.addf %187, %188 : vector<16x256xf32>
    %190 = arith.negf %189 : vector<16x256xf32>
    %191 = math.exp %190 : vector<16x256xf32>
    %cst_100 = arith.constant 1.000000e+00 : f32
    %192 = vector.broadcast %cst_100 : f32 to vector<16x256xf32>
    %193 = arith.addf %192, %191 : vector<16x256xf32>
    %194 = arith.divf %192, %193 : vector<16x256xf32>
    %195 = vector.extract_strided_slice %194 {offsets = [0, 0], sizes = [16, 128], strides = [1, 1]} : vector<16x256xf32> to vector<16x128xf32>
    %196 = vector.extract_strided_slice %194 {offsets = [0, 128], sizes = [16, 128], strides = [1, 1]} : vector<16x256xf32> to vector<16x128xf32>
    %197 = arith.mulf %195, %179 : vector<16x128xf32>
    %cst_101 = arith.constant dense<0.000000e+00> : vector<16x128xf32>
    %198 = tpu.matmul %0, %197, %cst_101 {dimension_numbers = #tpu.dot_dimension_numbers<[1], [0], [0], [1], [0, 0, 1, 1], [], []>, precision = #tpu.contract_precision<fp32>} : vector<16x16xf32>, vector<16x128xf32>, vector<16x128xf32> -> vector<16x128xf32>
    %c0_102 = arith.constant 0 : index
    %199 = arith.index_cast %c6_i32 : i32 to index
    %c0_103 = arith.constant 0 : index
    %c0_104 = arith.constant 0 : index
    %200 = vector.load %arg2[%c0_102, %199, %c0_103, %c0_104] : memref<1x8x16x128xf32, #tpu.memory_space<vmem>>, vector<1x1x16x128xf32>
    %201 = vector.shape_cast %200 : vector<1x1x16x128xf32> to vector<16x128xf32>
    %cst_105 = arith.constant dense<0.000000e+00> : vector<16x128xf32>
    %202 = tpu.matmul %198, %2, %cst_105 {dimension_numbers = #tpu.dot_dimension_numbers<[1], [0], [0], [1], [0, 0, 1, 1], [], []>, precision = #tpu.contract_precision<fp32>} : vector<16x128xf32>, vector<128x128xf32>, vector<16x128xf32> -> vector<16x128xf32>
    %203 = arith.addf %201, %202 : vector<16x128xf32>
    %204 = math.tanh %203 : vector<16x128xf32>
    %205 = arith.mulf %196, %179 : vector<16x128xf32>
    %cst_106 = arith.constant 1.000000e+00 : f32
    %206 = vector.broadcast %cst_106 : f32 to vector<16x128xf32>
    %207 = arith.subf %206, %196 : vector<16x128xf32>
    %208 = arith.mulf %207, %204 : vector<16x128xf32>
    %209 = arith.addf %205, %208 : vector<16x128xf32>
    %c0_107 = arith.constant 0 : index
    %210 = arith.index_cast %c6_i32 : i32 to index
    %c0_108 = arith.constant 0 : index
    %c0_109 = arith.constant 0 : index
    %211 = vector.load %arg6[%c0_107, %210, %c0_108, %c0_109] : memref<1x8x16x128xf32, #tpu.memory_space<vmem>>, vector<1x1x16x128xf32>
    %212 = vector.shape_cast %211 : vector<1x1x16x128xf32> to vector<16x128xf32>
    %213 = vector.shape_cast %209 : vector<16x128xf32> to vector<1x1x16x128xf32>
    tpu.vector_store %arg6[%c0_107, %210, %c0_108, %c0_109], %213 {strides = array<i32>} : memref<1x8x16x128xf32, #tpu.memory_space<vmem>>, vector<1x1x16x128xf32>,
    %c7_i32 = arith.constant 7 : i32
    %cst_110 = arith.constant dense<0.000000e+00> : vector<16x128xf32>
    %214 = tpu.matmul %0, %209, %cst_110 {dimension_numbers = #tpu.dot_dimension_numbers<[1], [0], [0], [1], [0, 0, 1, 1], [], []>, precision = #tpu.contract_precision<fp32>} : vector<16x16xf32>, vector<16x128xf32>, vector<16x128xf32> -> vector<16x128xf32>
    %c0_111 = arith.constant 0 : index
    %215 = arith.index_cast %c7_i32 : i32 to index
    %c0_112 = arith.constant 0 : index
    %c0_113 = arith.constant 0 : index
    %216 = vector.load %arg1[%c0_111, %215, %c0_112, %c0_113] : memref<1x8x16x256xf32, #tpu.memory_space<vmem>>, vector<1x1x16x256xf32>
    %217 = vector.shape_cast %216 : vector<1x1x16x256xf32> to vector<16x256xf32>
    %cst_114 = arith.constant dense<0.000000e+00> : vector<16x256xf32>
    %218 = tpu.matmul %214, %1, %cst_114 {dimension_numbers = #tpu.dot_dimension_numbers<[1], [0], [0], [1], [0, 0, 1, 1], [], []>, precision = #tpu.contract_precision<fp32>} : vector<16x128xf32>, vector<128x256xf32>, vector<16x256xf32> -> vector<16x256xf32>
    %219 = arith.addf %217, %218 : vector<16x256xf32>
    %220 = arith.negf %219 : vector<16x256xf32>
    %221 = math.exp %220 : vector<16x256xf32>
    %cst_115 = arith.constant 1.000000e+00 : f32
    %222 = vector.broadcast %cst_115 : f32 to vector<16x256xf32>
    %223 = arith.addf %222, %221 : vector<16x256xf32>
    %224 = arith.divf %222, %223 : vector<16x256xf32>
    %225 = vector.extract_strided_slice %224 {offsets = [0, 0], sizes = [16, 128], strides = [1, 1]} : vector<16x256xf32> to vector<16x128xf32>
    %226 = vector.extract_strided_slice %224 {offsets = [0, 128], sizes = [16, 128], strides = [1, 1]} : vector<16x256xf32> to vector<16x128xf32>
    %227 = arith.mulf %225, %209 : vector<16x128xf32>
    %cst_116 = arith.constant dense<0.000000e+00> : vector<16x128xf32>
    %228 = tpu.matmul %0, %227, %cst_116 {dimension_numbers = #tpu.dot_dimension_numbers<[1], [0], [0], [1], [0, 0, 1, 1], [], []>, precision = #tpu.contract_precision<fp32>} : vector<16x16xf32>, vector<16x128xf32>, vector<16x128xf32> -> vector<16x128xf32>
    %c0_117 = arith.constant 0 : index
    %229 = arith.index_cast %c7_i32 : i32 to index
    %c0_118 = arith.constant 0 : index
    %c0_119 = arith.constant 0 : index
    %230 = vector.load %arg2[%c0_117, %229, %c0_118, %c0_119] : memref<1x8x16x128xf32, #tpu.memory_space<vmem>>, vector<1x1x16x128xf32>
    %231 = vector.shape_cast %230 : vector<1x1x16x128xf32> to vector<16x128xf32>
    %cst_120 = arith.constant dense<0.000000e+00> : vector<16x128xf32>
    %232 = tpu.matmul %228, %2, %cst_120 {dimension_numbers = #tpu.dot_dimension_numbers<[1], [0], [0], [1], [0, 0, 1, 1], [], []>, precision = #tpu.contract_precision<fp32>} : vector<16x128xf32>, vector<128x128xf32>, vector<16x128xf32> -> vector<16x128xf32>
    %233 = arith.addf %231, %232 : vector<16x128xf32>
    %234 = math.tanh %233 : vector<16x128xf32>
    %235 = arith.mulf %226, %209 : vector<16x128xf32>
    %cst_121 = arith.constant 1.000000e+00 : f32
    %236 = vector.broadcast %cst_121 : f32 to vector<16x128xf32>
    %237 = arith.subf %236, %226 : vector<16x128xf32>
    %238 = arith.mulf %237, %234 : vector<16x128xf32>
    %239 = arith.addf %235, %238 : vector<16x128xf32>
    %c0_122 = arith.constant 0 : index
    %240 = arith.index_cast %c7_i32 : i32 to index
    %c0_123 = arith.constant 0 : index
    %c0_124 = arith.constant 0 : index
    %241 = vector.load %arg6[%c0_122, %240, %c0_123, %c0_124] : memref<1x8x16x128xf32, #tpu.memory_space<vmem>>, vector<1x1x16x128xf32>
    %242 = vector.shape_cast %241 : vector<1x1x16x128xf32> to vector<16x128xf32>
    %243 = vector.shape_cast %239 : vector<16x128xf32> to vector<1x1x16x128xf32>
    tpu.vector_store %arg6[%c0_122, %240, %c0_123, %c0_124], %243 {strides = array<i32>} : memref<1x8x16x128xf32, #tpu.memory_space<vmem>>, vector<1x1x16x128xf32>,
    %c8_i32 = arith.constant 8 : i32
    return
  }
  func.func @transform_0(%arg0: i32) -> (i32, i32, i32, i32) {
    %c0_i32 = arith.constant 0 : i32
    %c0_i32_0 = arith.constant 0 : i32
    %c0_i32_1 = arith.constant 0 : i32
    %c0_i32_2 = arith.constant 0 : i32
    return %arg0, %c0_i32, %c0_i32_0, %c0_i32_1 : i32, i32, i32, i32
  }
  func.func @transform_1(%arg0: i32) -> (i32, i32, i32, i32) {
    %c0_i32 = arith.constant 0 : i32
    %c0_i32_0 = arith.constant 0 : i32
    %c0_i32_1 = arith.constant 0 : i32
    %c0_i32_2 = arith.constant 0 : i32
    return %arg0, %c0_i32, %c0_i32_0, %c0_i32_1 : i32, i32, i32, i32
  }
  func.func @transform_2(%arg0: i32) -> (i32, i32) {
    %c0_i32 = arith.constant 0 : i32
    %c0_i32_0 = arith.constant 0 : i32
    %c0_i32_1 = arith.constant 0 : i32
    return %c0_i32, %c0_i32_0 : i32, i32
  }
  func.func @transform_3(%arg0: i32) -> (i32, i32) {
    %c0_i32 = arith.constant 0 : i32
    %c0_i32_0 = arith.constant 0 : i32
    %c0_i32_1 = arith.constant 0 : i32
    return %c0_i32, %c0_i32_0 : i32, i32
  }
  func.func @transform_4(%arg0: i32) -> (i32, i32) {
    %c0_i32 = arith.constant 0 : i32
    %c0_i32_0 = arith.constant 0 : i32
    %c0_i32_1 = arith.constant 0 : i32
    return %c0_i32, %c0_i32_0 : i32, i32
  }
  func.func @transform_5(%arg0: i32) -> (i32, i32, i32, i32) {
    %c0_i32 = arith.constant 0 : i32
    %c0_i32_0 = arith.constant 0 : i32
    %c0_i32_1 = arith.constant 0 : i32
    %c0_i32_2 = arith.constant 0 : i32
    return %arg0, %c0_i32, %c0_i32_0, %c0_i32_1 : i32, i32, i32, i32
  }
}

</mosaic_0001>

<bundles_post_ra>
// kernel: tpu_custom_call.1
= control target key start
LH: loop header
LB: loop body
LE: loop exit
PB: predicated region body
PF: predicated region fallthrough
CT: control target
= control target key end

     0   :  { %s33341_s0 = inlined_call_operand.hbm [shape: f32[2,8,16,256], index: 0, kind: input, shape index: {}]   ;;  %s33342_s1 = inlined_call_operand.hbm [shape: f32[2,8,16,128], index: 1, kind: input, shape index: {}]   ;;  %s33343_s2 = inlined_call_operand.hbm [shape: f32[16,16], index: 2, kind: input, shape index: {}]   ;;  %s33344_s3 = inlined_call_operand.hbm [shape: f32[128,256], index: 3, kind: input, shape index: {}]   ;;  %s33345_s4 = inlined_call_operand.hbm [shape: f32[128,128], index: 4, kind: input, shape index: {}]   ;;  %s33346_s5 = inlined_call_operand.hbm [shape: f32[2,8,16,128], index: 5, kind: output, shape index: {}]  }
   0x1   :  { %33699 = sst [smem:[#allocation98_spill]] %s33341_s0 }
   0x2   :  { %33700 = sst [smem:[#allocation99_spill]] %s33343_s2 }
   0x3   :  { %33701 = sst [smem:[#allocation100_spill]] %s33344_s3 }
   0x4   :  { %33702 = sst [smem:[#allocation101_spill]] %s33345_s4 }
   0x5   :  { %10 = vsyncpa [#allocation3], 0 }
   0x6   :  { %12 = vsyncpa [#allocation3 + $0x1], 0 }
   0x7   :  { %13 = vsyncpa [#allocation6], 0 }
   0x8   :  { %15 = vsyncpa [#allocation6 + $0x1], 0 }
   0x9   :  { %16 = vsyncpa [#allocation9], 0 }
   0xa   :  { %17 = vsyncpa [#allocation4], 0 }
   0xb   :  { %19 = vsyncpa [#allocation4 + $0x1], 0  ;;  %s29697_s18 = smov 0   ;;  %s29699_s19 = smov 0  }
   0xc   :  { %s29701_s20 = smov 0   ;;  %s29703_s21 = smov 0  }
   0xd LB: > { %s29718_s22 = sadd.s32 4294967295, %s29652_s21   ;;  %s21652_s23 = sadd.s32 4294967294, %s29652_s21   ;;  %s29652_s21 = sphi %s29703_s21, %s34426_s21   ;;  %s29648_s20 = sphi %s29701_s20, %s34425_s20   ;;  %s29644_s19 = sphi %s29699_s19, %s34424_s19   ;;  %s29640_s18 = sphi %s29697_s18, %s34423_s18  }
   0xe   : > { %p45_p0 = scmp.ne.s32.totalorder %s29644_s19, %s29640_s18  ;;  %p33347_p1 = scmp.eq.s32.totalorder %s29718_s22, 0 }
   0xf   : > { %p164_p3 = scmp.eq.s32.totalorder %s21652_s23, 1  ;;  %p21653_p5 = scmp.ge.s32.totalorder %s29652_s21, 1 }
  0x10   : > { %p29727_p4 = por %p33347_p1, %p45_p0  ;;  %p171_p7 = scmp.lt.s32.totalorder %s29652_s21, 3 }
  0x11   : > { %p29732_p6 = por %p164_p3, %p45_p0  ;;  %s29654_s27 = smov [#allocation7]  }
  0x12   : > { %s33703_s24 = scalar_select %p29727_p4, 1, 0 }
  0x13   : > { %s33704_s25 = scalar_select %p29732_p6, 1, 0 }
  0x14   : > { %p29737_p8 = pnand %p21653_p5, %p171_p7  ;;  %s183_s28 = sshll.u32 %s29654_s27, 4  ;;  %s29741_s28 = int_to_ptr.vmem [resolvable:$true] %s183_s28 }
  0x15   : > { %s29655_s30 = smov [#allocation8]   ;;  %s33707_s2 = sld [smem:[#allocation99_spill]] }
  0x16   : > { %s33705_s26 = scalar_select %p29737_p8, 1, 0 }
  0x17   : > { %p29199_p9 = pneg %p29737_p8  ;;  %s196_s6 = sshll.u32 %s29655_s30, 4  ;;  %s29752_s6 = int_to_ptr.vmem [resolvable:$true] %s196_s6 }
  0x19   : > { %p29748_p11 = pnand %p29199_p9, %p33347_p1 }
  0x1b   : > { %s29430_s9 = scalar_lea.hbm %s33707_s2, 256  ;;  %p29762_p13 = pneg %p29748_p11 }
  0x1c   : > { %p29431_p12 = scmp.ne.s32.totalorder %s33707_s2, %s29430_s9  ;;  %p29437_p5 = scmp.lt.u32.totalorder %s29430_s9, %s33707_s2 }
  0x1e   : > { %p29433_p0 = pnand %p29762_p13, %p29431_p12 }
  0x20   : > { %p29434_p3 = pneg %p29433_p0 }
  0x22   : > { %p29439_p7 = pnand %p29437_p5, %p29434_p3 }
  0x24   : > { %29442 = shalt.err (!%p29439_p7)
}
  0x25   : > { %s29443_s15 = scalar_lea.vmem %s29741_s28, 256  ;;  %p29451_p2 = scmp.lt.s32.totalorder %s29741_s28, %s29741_s28 }
  0x26   : > { %p29444_p9 = scmp.ne.s32.totalorder %s29741_s28, %s29443_s15  ;;  %p29452_p6 = scmp.lt.s32.totalorder %s29443_s15, %s29443_s15 }
  0x28   : > { %p29446_p10 = pnand %p29444_p9, %p29762_p13  ;;  %p29453_p12 = por %p29452_p6, %p29451_p2 }
  0x2a   : > { %p29447_p1 = pneg %p29446_p10 }
  0x2c   : > { %p29454_p0 = pnand %p29453_p12, %p29447_p1 }
  0x2e   : > { %29457 = shalt.err (!%p29454_p0)
}
  0x2f   : > { %s33348_s16 = smov 128   ;;  %s33350_s17 = smov 8  }
  0x30   : > { %29202 = dma.hbm_to_vmem [thread:$0]  (!%p29748_p11), %s33707_s2, 256, %s29741_s28, [#allocation6], %s33348_s16, %s33348_s16, %s33350_s17  }
  0x31   : > { %s33709_s3 = sld [smem:[#allocation100_spill]] }
  0x37   : > { %s29458_s8 = scalar_lea.hbm %s33709_s3, 4096 }
  0x38   : > { %p29459_p1 = scmp.ne.s32.totalorder %s33709_s3, %s29458_s8  ;;  %p29465_p10 = scmp.lt.u32.totalorder %s29458_s8, %s33709_s3 }
  0x3a   : > { %p29461_p2 = pnand %p29459_p1, %p29762_p13 }
  0x3c   : > { %p29462_p6 = pneg %p29461_p2 }
  0x3e   : > { %p29467_p3 = pnand %p29465_p10, %p29462_p6 }
  0x40   : > { %29470 = shalt.err (!%p29467_p3)
}
  0x41   : > { %s29471_s28 = scalar_lea.vmem %s29752_s6, 4096  ;;  %p29479_p12 = scmp.lt.s32.totalorder %s29752_s6, %s29752_s6 }
  0x42   : > { %p29472_p5 = scmp.ne.s32.totalorder %s29752_s6, %s29471_s28  ;;  %p29480_p0 = scmp.lt.s32.totalorder %s29471_s28, %s29471_s28 }
  0x44   : > { %p29474_p7 = pnand %p29472_p5, %p29762_p13  ;;  %p29481_p1 = por %p29480_p0, %p29479_p12 }
  0x46   : > { %p29475_p9 = pneg %p29474_p7 }
  0x48   : > { %p29482_p2 = pnand %p29481_p1, %p29475_p9 }
  0x4a   : > { %29485 = shalt.err (!%p29482_p2)
}
  0x4b   : > { %s33354_s14 = smov 256   ;;  %s33355_s15 = smov 16  }
  0x4c   : > { %29205 = dma.hbm_to_vmem [thread:$0]  (!%p29748_p11), %s33709_s3, 4096, %s29752_s6, [#allocation9], %s33354_s14, %s33354_s14, %s33355_s15  }
  0x4d   : > { %s29660_s30 = smov [#allocation10]   ;;  %s29813_s8 = sadd.s32 1, %s29652_s21  }
  0x4e   : > { %s209_s7 = sshll.u32 %s29660_s30, 4  ;;  %s33710_s4 = sld [smem:[#allocation101_spill]]  ;;  %s210_s7 = int_to_ptr.vmem [resolvable:$true] %s209_s7 }
  0x54   : > { %s29486_s11 = scalar_lea.hbm %s33710_s4, 2048 }
  0x55   : > { %p29487_p6 = scmp.ne.s32.totalorder %s33710_s4, %s29486_s11  ;;  %p29493_p5 = scmp.lt.u32.totalorder %s29486_s11, %s33710_s4 }
  0x57   : > { %p29489_p10 = pnand %p29487_p6, %p29762_p13 }
  0x59   : > { %p29490_p3 = pneg %p29489_p10 }
  0x5b   : > { %p29495_p7 = pnand %p29493_p5, %p29490_p3 }
  0x5d   : > { %29498 = shalt.err (!%p29495_p7)
}
  0x5e   : > { %s29499_s6 = scalar_lea.vmem %s210_s7, 2048  ;;  %p29507_p1 = scmp.lt.s32.totalorder %s210_s7, %s210_s7 }
  0x5f   : > { %p29500_p9 = scmp.ne.s32.totalorder %s210_s7, %s29499_s6  ;;  %p29508_p2 = scmp.lt.s32.totalorder %s29499_s6, %s29499_s6 }
  0x61   : > { %p29502_p12 = pnand %p29500_p9, %p29762_p13  ;;  %p29509_p4 = por %p29508_p2, %p29507_p1 }
  0x63   : > { %p29503_p0 = pneg %p29502_p12 }
  0x65   : > { %p29510_p8 = pnand %p29509_p4, %p29503_p0 }
  0x67   : > { %29513 = shalt.err (!%p29510_p8)
}
  0x68   : > { %s33711_s23 = smov 8   ;;  %s33712_s27 = smov 128  }
  0x69   : > { %29208 = dma.hbm_to_vmem [thread:$0]  (!%p29748_p11), %s33710_s4, 2048, %s210_s7, [#allocation9], %s33712_s27, %s33712_s27, %s33711_s23  }
  0x6a   : > { %s29_s12 = ssub.s32 %s29652_s21, %s29813_s8  ;;  %s32_s29 = sadd.s32 1, %s29648_s20 }
  0x6b   : > { %p30_p4 = scmp.eq.s32.totalorder %s29_s12, 0  ;;  %p39_p8 = scmp.ne.s32.totalorder %s29648_s20, %s29644_s19 }
  0x6c   : > { %p40_p13 = scmp.eq.s32.totalorder %s29652_s21, 0  ;;  %p29223_p6 = scmp.lt.s32.totalorder %s29652_s21, 2 }
  0x6d   : > { %s29844_s30 = scalar_select %p30_p4, %s29648_s20, %s32_s29  }
  0x6e   : > { %p41_p10 = por %p40_p13, %p39_p8  ;;  %p33714_p3 = scmp.eq.s32.totalorder %s29718_s22, 1 }
  0x6f   : > { %33713 = sst [smem:[#allocation17_spill]] %s29844_s30  ;;  %s29853_s10 = sand.u32 1, %s29648_s20  }
  0x70   : > { %p29848_p5 = por %p33714_p3, %p39_p8  ;;  %s21764_s7 = sshll.u32 %s29652_s21, 12 }
  0x71   : > { %s21658_s11 = sshll.u32 %s29853_s10, 8  ;;  %s33716_s0 = sld [smem:[#allocation98_spill]] }
  0x72   : > { %s227_s16 = scalar_lea.vmem [#allocation2], %s21658_s11  ;;  %p29862_p11 = pnand %p29223_p6, %p41_p10 }
  0x73   : > { %s234_s17 = sshll.u32 %s227_s16, 4  ;;  %s224_s14 = scalar_lea.sflag [#allocation3], %s29853_s10  ;;  %s29866_s17 = int_to_ptr.vmem [resolvable:$true] %s234_s17 }
  0x74   : > { %p29516_p9 = pneg %p29862_p11 }
  0x77   : > { %s29860_s6 = scalar_lea.hbm %s33716_s0, %s21764_s7  ;;  %s29519_s13 = scalar_lea.hbm %s33716_s0, 8192 }
  0x78   : > { %s29514_s15 = scalar_lea.hbm %s29860_s6, 4096  ;;  %p29520_p1 = scmp.lt.u32.totalorder %s29860_s6, %s33716_s0 }
  0x79   : > { %p29515_p7 = scmp.ne.s32.totalorder %s29860_s6, %s29514_s15  ;;  %p29521_p2 = scmp.lt.u32.totalorder %s29519_s13, %s29514_s15 }
  0x7a   : > { %p29523_p8 = scmp.lt.u32.totalorder %s29514_s15, %s29860_s6 }
  0x7b   : > { %p29517_p12 = pnand %p29516_p9, %p29515_p7  ;;  %p29522_p4 = por %p29521_p2, %p29520_p1 }
  0x7d   : > { %p29518_p0 = pneg %p29517_p12  ;;  %p29524_p13 = por %p29523_p8, %p29522_p4 }
  0x7f   : > { %p29525_p6 = pnand %p29524_p13, %p29518_p0 }
  0x81   : > { %29528 = shalt.err (!%p29525_p6)
}
  0x82   : > { %s29529_s29 = scalar_lea.vmem %s29866_s17, 4096  ;;  %s29661_s7 = smov [#allocation2]  }
  0x83   : > { %p29530_p10 = scmp.ne.s32.totalorder %s29866_s17, %s29529_s29  ;;  %s29534_s11 = sshll.u32 %s29661_s7, 4  ;;  %s29535_s11 = int_to_ptr.vmem [resolvable:$false] %s29534_s11 }
  0x84   : > { %s29536_s28 = scalar_lea.vmem %s29535_s11, 8192  ;;  %p29537_p12 = scmp.lt.s32.totalorder %s29866_s17, %s29535_s11 }
  0x85   : > { %p29532_p3 = pnand %p29530_p10, %p29516_p9  ;;  %p29538_p1 = scmp.lt.s32.totalorder %s29536_s28, %s29529_s29 }
  0x87   : > { %p29533_p7 = pneg %p29532_p3  ;;  %p29539_p2 = por %p29538_p1, %p29537_p12 }
  0x89   : > { %p29540_p4 = pnand %p29539_p2, %p29533_p7 }
  0x8b   : > { %29543 = shalt.err (!%p29540_p4)
}
  0x8c   : > { %s33718_s15 = smov 16   ;;  %s33719_s13 = smov 256  }
  0x8d   : > { %29212 = dma.hbm_to_vmem [thread:$0]  (!%p29862_p11), %s29860_s6, 4096, %s29866_s17, %s224_s14, %s33719_s13, %s33719_s13, %s33718_s15  }
  0x8e   : > { %s21661_s16 = sshll.u32 %s29853_s10, 7  ;;  %s21765_s7 = sshll.u32 %s29652_s21, 11 }
  0x8f   : > { %s29905_s28 = scalar_lea.hbm %s33342_s1, %s21765_s7  ;;  %s248_s0 = scalar_lea.vmem [#allocation5], %s21661_s16 }
  0x90   : > { %s255_s2 = sshll.u32 %s248_s0, 4  ;;  %s33720_s3 = sand.u32 1, %s29652_s21   ;;  %s29907_s2 = int_to_ptr.vmem [resolvable:$true] %s255_s2 }
  0x91   : > { %s29911_s4 = scalar_lea.sflag [#allocation6], %s33720_s3  ;;  %s29544_s30 = scalar_lea.hbm %s29905_s28, 2048 }
  0x92   : > { %p29545_p0 = scmp.ne.s32.totalorder %s29905_s28, %s29544_s30  ;;  %s29549_s6 = scalar_lea.hbm %s33342_s1, 4096 }
  0x93   : > { %p29550_p6 = scmp.lt.u32.totalorder %s29905_s28, %s33342_s1  ;;  %p29551_p10 = scmp.lt.u32.totalorder %s29549_s6, %s29544_s30 }
  0x94   : > { %p29547_p8 = pnand %p29545_p0, %p29516_p9  ;;  %p29553_p7 = scmp.lt.u32.totalorder %s29544_s30, %s29905_s28 }
  0x95   : > { %p29552_p3 = por %p29551_p10, %p29550_p6 }
  0x96   : > { %p29548_p13 = pneg %p29547_p8 }
  0x97   : > { %p29554_p12 = por %p29553_p7, %p29552_p3 }
  0x99   : > { %p29555_p1 = pnand %p29554_p12, %p29548_p13 }
  0x9b   : > { %29558 = shalt.err (!%p29555_p1)
}
  0x9c   : > { %s29559_s0 = scalar_lea.vmem %s29907_s2, 2048  ;;  %s29662_s3 = smov [#allocation5]  }
  0x9d   : > { %p29560_p2 = scmp.ne.s32.totalorder %s29907_s2, %s29559_s0  ;;  %s29564_s13 = sshll.u32 %s29662_s3, 4  ;;  %s29565_s13 = int_to_ptr.vmem [resolvable:$false] %s29564_s13 }
  0x9e   : > { %s29566_s16 = scalar_lea.vmem %s29565_s13, 4096  ;;  %p29567_p8 = scmp.lt.s32.totalorder %s29907_s2, %s29565_s13 }
  0x9f   : > { %p29562_p4 = pnand %p29560_p2, %p29516_p9  ;;  %p29568_p6 = scmp.lt.s32.totalorder %s29566_s16, %s29559_s0 }
  0xa1   : > { %p29563_p0 = pneg %p29562_p4  ;;  %p29569_p10 = por %p29568_p6, %p29567_p8 }
  0xa3   : > { %p29570_p3 = pnand %p29569_p10, %p29563_p0 }
  0xa5   : > { %29573 = shalt.err (!%p29570_p3)
}
  0xa6   : > { %29215 = dma.hbm_to_vmem [thread:$0]  (!%p29862_p11), %s29905_s28, 2048, %s29907_s2, %s29911_s4, %s33712_s27, %s33712_s27, %s33711_s23  }
  0xa7   : > { %p33721_p9 = scmp.ne.s32.totalorder %s33705_s26, 0 }
  0xa9   : > { %267 = sbr.rel (%p33721_p9) target bundleno = 10900 (0x2a94), region = 40 }
  0xb0   : > { %s29943_s30 = sand.u32 1, %s29644_s19   ;;  %p33722_p13 = scmp.ne.s32.totalorder %s33703_s24, 0 }
  0xb1   : > { %s21665_s7 = sshll.u32 %s29943_s30, 8  ;;  %s270_s29 = scalar_lea.sflag [#allocation3], %s29943_s30 }
  0xb2   : > { %s29947_s11 = scalar_lea.vmem [#allocation2], %s21665_s7 }
  0xb3   : > { %29619 = dma.done.wait (%p33722_p13), %s270_s29, 4096  }
  0xb4   : > { %29621 = vsyncadd (%p33722_p13), %s270_s29, 4294963200  ;;  %s278_s2 = sand.u32 1, %s29718_s22   ;;  %s21666_s4 = sshll.u32 %s29943_s30, 7 }
  0xb5   : > { %s279_s26 = scalar_lea.sflag [#allocation6], %s278_s2  ;;  %s29957_s23 = scalar_lea.vmem [#allocation5], %s21666_s4 }
  0xb6   : > { %29623 = dma.done.wait (%p33722_p13), %s279_s26, 2048  }
  0xb7   : > { %29625 = vsyncadd (%p33722_p13), %s279_s26, 4294965248  ;;  %p33723_p11 = scmp.eq.s32.totalorder %s29718_s22, 0 }
  0xb9   : > { %29627 = dma.done.wait (%p33723_p11), [#allocation6], 256   ;;  %p33724_p7 = pmov %p33723_p11 }
  0xbb   : > { %29629 = vsyncadd (%p33724_p7), [#allocation6], 4294967040  ;;  %p33725_p12 = pmov %p33724_p7 }
  0xbc   : > { %p33726_p1 = pmov %p33724_p7 }
  0xbd   : > { %29631 = dma.done.wait (%p33725_p12), [#allocation9], 6144  }
  0xbe   : > { %29633 = vsyncadd (%p33726_p1), [#allocation9], 4294961152  ;;  %v33356_v0 = vmov 0.0   ;;  %vm376_vm0 = vcmask 130048   ;;  %v326_v1 = vld [vmem:[#allocation7] sm:$0xff]  ;;  %v327_v2 = vld [vmem:[#allocation7 + $0x8] sm:$0xff] }
  0xbf   : > { %23024 = vmatprep.subr.mxu0 %v33356_v0  ;;  %23009 = vmatprep.subr.mxu1 %v33356_v0  ;;  %v378_v3 = vsel %vm376_vm0, %v326_v1, 0  ;;  %v381_v4 = vsel %vm376_vm0, %v327_v2, 0  ;;  %v30007_v15 = vld [vmem:[#allocation8 + $0x8] sm:$0xff]  ;;  %v30009_v16 = vld [vmem:[#allocation8 + $0x18] sm:$0xff]  ;;  %v30026_v20 = vld [vmem:[#allocation8] sm:$0xff]  ;;  %s31171_s24 = scalar_lea.vmem [#allocation11], %s21666_s4 }
  0xc0   : > { %23025 = vmatpush3.msra.mxu0 %v33356_v0  ;;  %23010 = vmatpush3.msra.mxu1 %v33356_v0  ;;  %v29977_v5 = vand.u32 4294901760, %v378_v3  ;;  %v29979_v6 = vand.u32 4294901760, %v381_v4  ;;  %v863_v17 = vand.u32 4294901760, %v30007_v15  ;;  %v867_v18 = vand.u32 4294901760, %v30009_v16  ;;  %v30028_v21 = vld [vmem:[#allocation8 + $0x10] sm:$0xff]  ;;  %v30030_v22 = vld [vmem:[#allocation8 + $0x28] sm:$0xff] }
  0xc1   : > { %23029 = vmatprep.subr.mxu0 %v33356_v0  ;;  %23014 = vmatprep.subr.mxu1 %v33356_v0  ;;  %v30032_v23 = vld [vmem:[#allocation8 + $0x38] sm:$0xff]  ;;  %v33371_v24 = vand.u32 4294901760, %v30026_v20  ;;  %v33370_v25 = vand.u32 4294901760, %v30028_v21  ;;  %v33369_v26 = vand.u32 4294901760, %v30030_v22  ;;  %v30042_v28 = vld [vmem:[#allocation8 + $0x20] sm:$0xff]  ;;  %v30044_v29 = vld [vmem:[#allocation8 + $0x30] sm:$0xff] }
  0xc2   : > { %33727 = vst [vmem:[#allocation18_spill] sm:$0xff] %v29977_v5  ;;  %33728 = vst [vmem:[#allocation19_spill] sm:$0xff] %v29979_v6  ;;  %v29982_v7 = vsub.f32 %v378_v3, %v29977_v5  ;;  %v29985_v8 = vsub.f32 %v381_v4, %v29979_v6  ;;  %v30024_v19 = vpack.c.bf16 %v867_v18, %v863_v17  ;;  %v33368_v27 = vand.u32 4294901760, %v30032_v23  ;;  %v30046_v30 = vld [vmem:[#allocation8 + $0x48] sm:$0xff]  ;;  %v30048_v31 = vld [vmem:[#allocation8 + $0x58] sm:$0xff]  ;;  %s21766_s27 = sshll.u32 %s29718_s22, 11 }
  0xc3   : > { %v30055_v32 = vpack.c.bf16 %v33370_v25, %v33371_v24  ;;  %v33367_v33 = vand.u32 4294901760, %v30042_v28  ;;  %v33366_v34 = vand.u32 4294901760, %v30044_v29  ;;  %v33365_v36 = vand.u32 4294901760, %v30046_v30  ;;  %v30068_v38 = vld [vmem:[#allocation8 + $0x40] sm:$0xff]  ;;  %v30070_v39 = vld [vmem:[#allocation8 + $0x50] sm:$0xff]  ;;  %v30072_v40 = vld [vmem:[#allocation8 + $0x68] sm:$0xff]  ;;  %s33293_s10 = scalar_lea.hbm %s33346_s5, %s21766_s27 }
  0xc4   : > { %33729 = vst [vmem:[#allocation20_spill] sm:$0xff] %v29982_v7  ;;  %33730 = vst [vmem:[#allocation21_spill] sm:$0xff] %v29985_v8  ;;  %v29988_v9 = vand.u32 4294901760, %v29982_v7  ;;  %v29991_v10 = vand.u32 4294901760, %v29985_v8  ;;  %v30064_v35 = vpack.c.bf16 %v33368_v27, %v33369_v26  ;;  %v33364_v37 = vand.u32 4294901760, %v30048_v31  ;;  %v30074_v41 = vld [vmem:[#allocation8 + $0x78] sm:$0xff] }
  0xc5   : > { %33735 = vst [vmem:[#allocation26_spill] sm:$0xff] %v30024_v19  ;;  %33736 = vst [vmem:[#allocation27_spill] sm:$0xff] %v30055_v32  ;;  %v30082_v42 = vpack.c.bf16 %v33366_v34, %v33367_v33  ;;  %v33363_v43 = vand.u32 4294901760, %v30068_v38  ;;  %v33362_v44 = vand.u32 4294901760, %v30070_v39  ;;  %v33361_v46 = vand.u32 4294901760, %v30072_v40  ;;  %v30096_v48 = vld [vmem:[#allocation8 + $0x60] sm:$0xff] }
  0xc6   : > { %33731 = vst [vmem:[#allocation22_spill] sm:$0xff] %v29988_v9  ;;  %33732 = vst [vmem:[#allocation23_spill] sm:$0xff] %v29991_v10  ;;  %23026 = vmatprep.mubr.f32.mxu0 %v29988_v9  ;;  %v451_v11 = vsub.f32 %v29982_v7, %v29988_v9  ;;  %v461_v12 = vsub.f32 %v29985_v8, %v29991_v10  ;;  %v30092_v45 = vpack.c.bf16 %v33364_v37, %v33365_v36  ;;  %v30098_v49 = vld [vmem:[#allocation8 + $0x70] sm:$0xff]  ;;  %v345_v55 = vld [vmem:[#allocation8 + $0x88] sm:$0xff]  ;;  %s21528_s12 = sshll.u32 %s31171_s24, 4  ;;  %s21515_s22 = scalar_lea.sflag [#allocation4], %s29943_s30  ;;  %s33295_s12 = int_to_ptr.vmem [resolvable:$true] %s21528_s12 }
  0xc7   : > { %23027 = vmatmul.mubr.f32.vlgmr.msra.gmra.mrb[0].mxu0 %v29991_v10  ;;  %33737 = vst [vmem:[#allocation28_spill] sm:$0xff] %v30064_v35  ;;  %33738 = vst [vmem:[#allocation29_spill] sm:$0xff] %v30082_v42  ;;  %v33360_v47 = vand.u32 4294901760, %v30074_v41  ;;  %v30105_v50 = vpack.c.bf16 %v33362_v44, %v33363_v43  ;;  %v33359_v51 = vand.u32 4294901760, %v30096_v48  ;;  %v33358_v52 = vand.u32 4294901760, %v30098_v49  ;;  %v347_v56 = vld [vmem:[#allocation8 + $0x98] sm:$0xff] }
  0xc8   : > { %v29999_v13 = vand.u32 4294901760, %v451_v11  ;;  %v30001_v14 = vand.u32 4294901760, %v461_v12  ;;  %23030 = vmatpush3.msra.mxu0 %v33356_v0  ;;  %23031 = vmatprep.mubr.f32.mxu0 %v29977_v5  ;;  %33739 = vst [vmem:[#allocation30_spill] sm:$0xff] %v30092_v45  ;;  %v895_v57 = vand.u32 4294901760, %v345_v55  ;;  %v899_v58 = vand.u32 4294901760, %v347_v56  ;;  %v344_v59 = vld [vmem:[#allocation8 + $0x80] sm:$0xff] }
  0xc9   : > { %23034 = vmatprep.subr.mxu0 %v33356_v0  ;;  %33740 = vst [vmem:[#allocation31_spill] sm:$0xff] %v30105_v50  ;;  %v30114_v53 = vpack.c.bf16 %v33360_v47, %v33361_v46  ;;  %v30121_v54 = vpack.c.bf16 %v33358_v52, %v33359_v51  ;;  %v346_v60 = vld [vmem:[#allocation8 + $0x90] sm:$0xff]  ;;  %v897_v61 = vand.u32 4294901760, %v344_v59  ;;  %v349_v2 = vld [vmem:[#allocation8 + $0xa8] sm:$0xff]  ;;  %v351_v3 = vld [vmem:[#allocation8 + $0xb8] sm:$0xff]  ;;  %v30151_v24 = vsub.f32 %v30007_v15, %v863_v17  ;;  %s29574_s6 = scalar_lea.vmem %s33295_s12, 2048 }
  0xca   : > { %33733 = vst [vmem:[#allocation24_spill] sm:$0xff] %v29999_v13  ;;  %33734 = vst [vmem:[#allocation25_spill] sm:$0xff] %v30001_v14  ;;  %23011 = vmatprep.mubr.f32.mxu1 %v29999_v13  ;;  %v901_v62 = vand.u32 4294901760, %v346_v60  ;;  %v30125_v63 = vpack.c.bf16 %v899_v58, %v895_v57  ;;  %v903_v4 = vand.u32 4294901760, %v349_v2  ;;  %v907_v11 = vand.u32 4294901760, %v351_v3  ;;  %v348_v12 = vld [vmem:[#allocation8 + $0xa0] sm:$0xff]  ;;  %p29575_p2 = scmp.ne.s32.totalorder %s33295_s12, %s29574_s6 }
  0xcb   : > { %23012 = vmatmul.mubr.f32.vlgmr.msra.gmra.mrb[0].mxu1 %v30001_v14  ;;  %33741 = vst [vmem:[#allocation32_spill] sm:$0xff] %v30114_v53  ;;  %33742 = vst [vmem:[#allocation33_spill] sm:$0xff] %v30121_v54  ;;  %v905_v52 = vand.u32 4294901760, %v348_v12  ;;  %v30135_v44 = vld [vmem:[#allocation8 + $0xc8] sm:$0xff]  ;;  %v30137_v43 = vld [vmem:[#allocation8 + $0xd8] sm:$0xff]  ;;  %v30156_v10 = vsub.f32 %v30009_v16, %v867_v18  ;;  %v33401_v17 = vand.u32 4294901760, %v30151_v24 }
  0xcc   : > { %23015 = vmatpush3.msra.mxu1 %v33356_v0  ;;  %23016 = vmatprep.mubr.f32.mxu1 %v29977_v5  ;;  %33743 = vst [vmem:[#allocation34_spill] sm:$0xff] %v30125_v63  ;;  %v30127_v1 = vpack.c.bf16 %v901_v62, %v897_v61  ;;  %v30131_v47 = vpack.c.bf16 %v907_v11, %v903_v4  ;;  %v911_v37 = vand.u32 4294901760, %v30135_v44  ;;  %v915_v36 = vand.u32 4294901760, %v30137_v43  ;;  %v352_v34 = vld [vmem:[#allocation8 + $0xc0] sm:$0xff]  ;;  %v30142_v33 = vld [vmem:[#allocation8 + $0xd0] sm:$0xff]  ;;  %p29576_p4 = pnand %p29575_p2, %p29848_p5  ;;  %s29664_s17 = smov [#allocation11]  }
  0xcd   : > { %23019 = vmatprep.subr.mxu1 %v33356_v0  ;;  %v913_v27 = vand.u32 4294901760, %v352_v34  ;;  %v917_v26 = vand.u32 4294901760, %v30142_v33  ;;  %33748 = vst [vmem:[#allocation39_spill] sm:$0xff] %v30156_v10  ;;  %v30167_v14 = vld [vmem:[#allocation8 + $0xe0] sm:$0xff]  ;;  %v30169_v15 = vld [vmem:[#allocation8 + $0xf0] sm:$0xff]  ;;  %v33404_v16 = vand.u32 4294901760, %v30156_v10 }
  0xce   : > { %33744 = vst [vmem:[#allocation35_spill] sm:$0xff] %v30127_v1  ;;  %33745 = vst [vmem:[#allocation36_spill] sm:$0xff] %v30131_v47  ;;  %v30146_v25 = vpack.c.bf16 %v915_v36, %v911_v37  ;;  %v921_v18 = vand.u32 4294901760, %v30167_v14  ;;  %p29577_p0 = pneg %p29576_p4  ;;  %s29578_s15 = sshll.u32 %s29664_s17, 4  ;;  %s29579_s15 = int_to_ptr.vmem [resolvable:$false] %s29578_s15 }
  0xcf   : > { %23032 = vmatmul.mubr.f32.vlgmr.msra.gmra.mrb[0].mxu0 %v29979_v6  ;;  %v30158_v9 = vpack.c.bf16 %v917_v26, %v913_v27  ;;  %s29580_s0 = scalar_lea.vmem %s29579_s15, 4096  ;;  %p29581_p8 = scmp.lt.s32.totalorder %s33295_s12, %s29579_s15 }
  0xd0   : > { %23035 = vmatpush3.msra.mxu0 %v33356_v0  ;;  %23036 = vmatprep.mubr.f32.mxu0 %v29977_v5  ;;  %33747 = vst [vmem:[#allocation38_spill] sm:$0xff] %v30146_v25  ;;  %p29582_p6 = scmp.lt.s32.totalorder %s29580_s0, %s29574_s6 }
  0xd1   : > { %33749 = vst [vmem:[#allocation40_spill] sm:$0xff] %v30158_v9 }
  0xd2   : > { %p29583_p10 = por %p29582_p6, %p29581_p8 }
  0xd3   : > { %23017 = vmatmul.mubr.f32.vlgmr.msra.gmra.mrb[0].mxu1 %v29979_v6 }
  0xd4   : > { %23020 = vmatpush3.msra.mxu1 %v33356_v0  ;;  %23021 = vmatprep.mubr.f32.mxu1 %v29982_v7  ;;  %v30162_v7 = vld [vmem:[#allocation8 + $0xf8] sm:$0xff]  ;;  %p29584_p3 = pnand %p29583_p10, %p29577_p0 }
  0xd5   : > { %25350 = vmatprep.subr.bf16.mxu1 %v30024_v19  ;;  %v33400_v5 = vand.u32 4294901760, %v30162_v7 }
  0xd7   : > { %23037 = vmatmul.mubr.f32.vlgmr.msra.gmra.mrb[0].mxu0 %v29979_v6 }
  0xd8   : > { %23043 = vmatprep.mubr.f32.mxu0 %v29999_v13  ;;  %v33407_v13 = vand.u32 4294901760, %v30169_v15 }
  0xdb   : > { %23022 = vmatmul.mubr.f32.vlgmr.msra.gmra.mrb[0].mxu1 %v29985_v8  ;;  %v30160_v8 = vld [vmem:[#allocation8 + $0xe8] sm:$0xff] }
  0xdc   : > { %25352 = vmatpush1.bf16.msra.mxu1 %v30055_v32  ;;  %959 = vmatprep.mubr.f32.mxu1 %v33356_v0  ;;  %v350_v0 = vld [vmem:[#allocation8 + $0xb0] sm:$0xff]  ;;  %v919_v6 = vand.u32 4294901760, %v30160_v8 }
  0xdd   : > { %25354 = vmatprep.subr.bf16.mxu1 %v30064_v35  ;;  %v909_v51 = vand.u32 4294901760, %v350_v0 }
  0xdf   : > { %v30133_v46 = vpack.c.bf16 %v909_v51, %v905_v52 }
  0xe0   : > { %25356 = vmatpush1.bf16.msra.mxu1 %v30082_v42 }
  0xe1   : > { %25358 = vmatprep.subr.bf16.mxu1 %v30092_v45  ;;  %33746 = vst [vmem:[#allocation37_spill] sm:$0xff] %v30133_v46 }
  0xe4   : > { %25360 = vmatpush1.bf16.msra.mxu1 %v30105_v50 }
  0xe5   : > { %25362 = vmatprep.subr.bf16.mxu1 %v30114_v53 }
  0xe8   : > { %25364 = vmatpush1.bf16.msra.mxu1 %v30121_v54  ;;  %v30199_v54 = vsub.f32 %v347_v56, %v899_v58 }
  0xe9   : > { %25366 = vmatprep.subr.bf16.mxu1 %v30125_v63 }
  0xea   : > { %33754 = vst [vmem:[#allocation45_spill] sm:$0xff] %v30199_v54  ;;  %v33408_v53 = vand.u32 4294901760, %v30199_v54 }
  0xec   : > { %25368 = vmatpush1.bf16.msra.mxu1 %v30127_v1 }
  0xed   : > { %25370 = vmatprep.subr.bf16.mxu1 %v30131_v47  ;;  %v997_v47 = vsub.f32 %v30156_v10, %v33404_v16 }
  0xef   : > { %v998_v63 = vand.u32 4294901760, %v997_v47  ;;  %v30208_v47 = vsub.f32 %v346_v60, %v901_v62  ;;  %v30221_v60 = vsub.f32 %v351_v3, %v907_v11  ;;  %v30223_v62 = vsub.f32 %v348_v12, %v905_v52 }
  0xf0   : > { %25372 = vmatpush1.bf16.msra.mxu1 %v30133_v46  ;;  %v985_v46 = vsub.f32 %v30151_v24, %v33401_v17  ;;  %v30197_v17 = vsub.f32 %v345_v55, %v895_v57  ;;  %v1093_v55 = vsub.f32 %v30199_v54, %v33408_v53 }
  0xf1   : > { %25374 = vmatprep.subr.bf16.mxu1 %v30146_v25  ;;  %v30178_v25 = vpack.c.bf16 %v33400_v5, %v919_v6  ;;  %33756 = vst [vmem:[#allocation47_spill] sm:$0xff] %v30208_v47  ;;  %v33423_v58 = vand.u32 4294901760, %v30208_v47  ;;  %33758 = vst [vmem:[#allocation49_spill] sm:$0xff] %v30221_v60  ;;  %v33412_v3 = vand.u32 4294901760, %v30223_v62 }
  0xf2   : > { %v986_v1 = vand.u32 4294901760, %v985_v46  ;;  %33753 = vst [vmem:[#allocation44_spill] sm:$0xff] %v30197_v17  ;;  %v33409_v16 = vand.u32 4294901760, %v30197_v17  ;;  %33759 = vst [vmem:[#allocation50_spill] sm:$0xff] %v30223_v62 }
  0xf3   : > { %33750 = vst [vmem:[#allocation41_spill] sm:$0xff] %v30178_v25 }
  0xf4   : > { %25376 = vmatpush1.bf16.msra.mxu1 %v30158_v9  ;;  %v30190_v9 = vpack.c.bf16 %v33407_v13, %v921_v18  ;;  %v30194_v5 = vpack.c.bf16 %v998_v63, %v986_v1  ;;  %v30203_v13 = vsub.f32 %v344_v59, %v897_v61  ;;  %v1081_v46 = vsub.f32 %v30197_v17, %v33409_v16 }
  0xf5   : > { %25378 = vmatprep.subr.bf16.mxu1 %v30178_v25  ;;  %v30210_v63 = vsub.f32 %v349_v2, %v903_v4  ;;  %v1094_v61 = vand.u32 4294901760, %v1093_v55  ;;  %v1099_v2 = vsub.f32 %v30208_v47, %v33423_v58  ;;  %v33422_v16 = vand.u32 4294901760, %v30221_v60 }
  0xf6   : > { %33751 = vst [vmem:[#allocation42_spill] sm:$0xff] %v30190_v9  ;;  %33752 = vst [vmem:[#allocation43_spill] sm:$0xff] %v30194_v5  ;;  %v33410_v56 = vand.u32 4294901760, %v30203_v13  ;;  %v1082_v57 = vand.u32 4294901760, %v1081_v46  ;;  %v30231_v46 = vsub.f32 %v350_v0, %v909_v51  ;;  %v1111_v0 = vsub.f32 %v30223_v62, %v33412_v3 }
  0xf7   : > { %33755 = vst [vmem:[#allocation46_spill] sm:$0xff] %v30203_v13  ;;  %33757 = vst [vmem:[#allocation48_spill] sm:$0xff] %v30210_v63  ;;  %v33411_v59 = vand.u32 4294901760, %v30210_v63  ;;  %v1100_v11 = vand.u32 4294901760, %v1099_v2  ;;  %v30248_v51 = vsub.f32 %v30137_v43, %v915_v36 }
  0xf8   : > { %25380 = vmatpush1.bf16.msra.mxu1 %v30190_v9  ;;  %v1087_v1 = vsub.f32 %v30203_v13, %v33410_v56  ;;  %33760 = vst [vmem:[#allocation51_spill] sm:$0xff] %v30231_v46  ;;  %v30233_v53 = vpack.c.bf16 %v1094_v61, %v1082_v57  ;;  %v33421_v12 = vand.u32 4294901760, %v30231_v46  ;;  %v30239_v56 = vsub.f32 %v30135_v44, %v911_v37 }
  0xf9   : > { %25382 = vmatprep.subr.bf16.mxu1 %v30194_v5  ;;  %v1105_v4 = vsub.f32 %v30210_v63, %v33411_v59  ;;  %v1117_v59 = vsub.f32 %v30221_v60, %v33422_v16  ;;  %33763 = vst [vmem:[#allocation54_spill] sm:$0xff] %v30248_v51  ;;  %v30250_v57 = vsub.f32 %v352_v34, %v913_v27  ;;  %v33414_v3 = vand.u32 4294901760, %v30248_v51 }
  0xfa   : > { %33761 = vst [vmem:[#allocation52_spill] sm:$0xff] %v30233_v53  ;;  %v1088_v55 = vand.u32 4294901760, %v1087_v1  ;;  %33762 = vst [vmem:[#allocation53_spill] sm:$0xff] %v30239_v56  ;;  %v1123_v37 = vsub.f32 %v30231_v46, %v33421_v12  ;;  %v33413_v44 = vand.u32 4294901760, %v30239_v56  ;;  %v30259_v1 = vsub.f32 %v30142_v33, %v917_v26 }
  0xfb   : > { %v1106_v52 = vand.u32 4294901760, %v1105_v4  ;;  %33764 = vst [vmem:[#allocation55_spill] sm:$0xff] %v30250_v57  ;;  %v1118_v2 = vand.u32 4294901760, %v1117_v59  ;;  %v1112_v4 = vand.u32 4294901760, %v1111_v0  ;;  %v33415_v36 = vand.u32 4294901760, %v30250_v57 }
  0xfc   : > { %v30252_v61 = vpack.c.bf16 %v1100_v11, %v1088_v55  ;;  %33766 = vst [vmem:[#allocation57_spill] sm:$0xff] %v30259_v1  ;;  %v1124_v43 = vand.u32 4294901760, %v1123_v37  ;;  %v1129_v27 = vsub.f32 %v30239_v56, %v33413_v44  ;;  %v33416_v34 = vand.u32 4294901760, %v30259_v1 }
  0xfd   : > { %v30268_v55 = vsub.f32 %v30160_v8, %v919_v6  ;;  %v30270_v11 = vpack.c.bf16 %v1118_v2, %v1106_v52  ;;  %v1141_v26 = vsub.f32 %v30248_v51, %v33414_v3  ;;  %v1135_v33 = vsub.f32 %v30250_v57, %v33415_v36 }
  0xfe   : > { %33765 = vst [vmem:[#allocation56_spill] sm:$0xff] %v30252_v61  ;;  %v33769_v59 = vand.u32 4294901760, %v30162_v7  ;;  %v30283_v37 = vpack.c.bf16 %v1124_v43, %v1112_v4  ;;  %v1130_v44 = vand.u32 4294901760, %v1129_v27  ;;  %v1147_v6 = vsub.f32 %v30259_v1, %v33416_v34 }
  0xff   : > { %33767 = vst [vmem:[#allocation58_spill] sm:$0xff] %v30268_v55  ;;  %33768 = vst [vmem:[#allocation59_spill] sm:$0xff] %v30270_v11  ;;  %v33417_v8 = vand.u32 4294901760, %v30268_v55  ;;  %v1142_v52 = vand.u32 4294901760, %v1141_v26  ;;  %v1136_v2 = vand.u32 4294901760, %v1135_v33  ;;  %v30293_v36 = vsub.f32 %v30167_v14, %v921_v18 }
 0x100   : > { %v30281_v0 = vsub.f32 %v30162_v7, %v33769_v59  ;;  %33771 = vst [vmem:[#allocation61_spill] sm:$0xff] %v30283_v37  ;;  %v1148_v7 = vand.u32 4294901760, %v1147_v6  ;;  %v33773_v43 = vand.u32 4294901760, %v30169_v15  ;;  %v33790_v16 = vand.u32 4294901760, %v30030_v22 }
 0x101   : > { %33772 = vst [vmem:[#allocation62_spill] sm:$0xff] %v30293_v36  ;;  %v1153_v4 = vsub.f32 %v30268_v55, %v33417_v8  ;;  %v30303_v59 = vpack.c.bf16 %v1142_v52, %v1130_v44  ;;  %v33419_v33 = vand.u32 4294901760, %v30293_v36  ;;  %v33791_v5 = vand.u32 4294901760, %v30032_v23 }
 0x102   : > { %33770 = vst [vmem:[#allocation60_spill] sm:$0xff] %v30281_v0  ;;  %v33420_v3 = vand.u32 4294901760, %v30281_v0  ;;  %v30301_v27 = vsub.f32 %v30169_v15, %v33773_v43  ;;  %v30309_v14 = vpack.c.bf16 %v1148_v7, %v1136_v2  ;;  %v30322_v2 = vpack.c.bf16 %v30156_v10, %v30151_v24 }
 0x103   : > { %33775 = vst [vmem:[#allocation64_spill] sm:$0xff] %v30303_v59  ;;  %v1154_v18 = vand.u32 4294901760, %v1153_v4  ;;  %v1159_v8 = vsub.f32 %v30293_v36, %v33419_v33  ;;  %v30328_v4 = vpack.c.bf16 %v30199_v54, %v30197_v17  ;;  %v30371_v58 = vsub.f32 %v30030_v22, %v33790_v16 }
 0x104   : > { %33774 = vst [vmem:[#allocation63_spill] sm:$0xff] %v30301_v27  ;;  %v1165_v26 = vsub.f32 %v30281_v0, %v33420_v3  ;;  %33776 = vst [vmem:[#allocation65_spill] sm:$0xff] %v30309_v14  ;;  %v33418_v6 = vand.u32 4294901760, %v30301_v27  ;;  %v33789_v3 = vand.u32 4294901760, %v30028_v21  ;;  %v33793_v22 = vand.u32 4294901760, %v30044_v29 }
 0x105   : > { %v1160_v52 = vand.u32 4294901760, %v1159_v8  ;;  %33778 = vst [vmem:[#allocation67_spill] sm:$0xff] %v30322_v2  ;;  %33780 = vst [vmem:[#allocation69_spill] sm:$0xff] %v30328_v4  ;;  %v30340_v8 = vpack.c.bf16 %v30231_v46, %v30223_v62  ;;  %v33800_v62 = vand.u32 4294901760, %v30068_v38 }
 0x106   : > { %v1166_v34 = vand.u32 4294901760, %v1165_v26  ;;  %v1171_v15 = vsub.f32 %v30301_v27, %v33418_v6  ;;  %v30332_v26 = vpack.c.bf16 %v30208_v47, %v30203_v13  ;;  %v33788_v6 = vand.u32 4294901760, %v30026_v20 }
 0x107   : > { %33783 = vst [vmem:[#allocation72_spill] sm:$0xff] %v30340_v8  ;;  %v30366_v12 = vsub.f32 %v30028_v21, %v33789_v3  ;;  %v33792_v21 = vand.u32 4294901760, %v30042_v28  ;;  %v30389_v16 = vsub.f32 %v30044_v29, %v33793_v22  ;;  %v33808_v47 = vand.u32 4294901760, %v30096_v48 }
 0x108   : > { %v30318_v44 = vpack.c.bf16 %v1166_v34, %v1154_v18  ;;  %v1172_v43 = vand.u32 4294901760, %v1171_v15  ;;  %33781 = vst [vmem:[#allocation70_spill] sm:$0xff] %v30332_v26  ;;  %v30336_v34 = vpack.c.bf16 %v30221_v60, %v30210_v63  ;;  %v30344_v18 = vpack.c.bf16 %v30248_v51, %v30239_v56 }
 0x109   : > { %v30348_v15 = vpack.c.bf16 %v30259_v1, %v30250_v57  ;;  %v30361_v33 = vsub.f32 %v30026_v20, %v33788_v6  ;;  %v30384_v3 = vsub.f32 %v30042_v28, %v33792_v21  ;;  %v33796_v1 = vand.u32 4294901760, %v30048_v31 }
 0x10a   : > { %33777 = vst [vmem:[#allocation66_spill] sm:$0xff] %v30318_v44  ;;  %v30324_v7 = vpack.c.bf16 %v1172_v43, %v1160_v52  ;;  %33782 = vst [vmem:[#allocation71_spill] sm:$0xff] %v30336_v34  ;;  %v30352_v52 = vpack.c.bf16 %v30281_v0, %v30268_v55  ;;  %v30356_v43 = vpack.c.bf16 %v30301_v27, %v30293_v36  ;;  %v33797_v29 = vand.u32 4294901760, %v30366_v12 }
 0x10b   : > { %33784 = vst [vmem:[#allocation73_spill] sm:$0xff] %v30344_v18  ;;  %33785 = vst [vmem:[#allocation74_spill] sm:$0xff] %v30348_v15  ;;  %v30376_v27 = vsub.f32 %v30032_v23, %v33791_v5  ;;  %v33794_v23 = vand.u32 4294901760, %v30046_v30  ;;  %v33795_v20 = vand.u32 4294901760, %v30361_v33  ;;  %v30403_v28 = vsub.f32 %v30048_v31, %v33796_v1 }
 0x10c   : > { %33779 = vst [vmem:[#allocation68_spill] sm:$0xff] %v30324_v7  ;;  %33786 = vst [vmem:[#allocation75_spill] sm:$0xff] %v30352_v52  ;;  %v1003_v22 = vsub.f32 %v30366_v12, %v33797_v29  ;;  %v33798_v51 = vand.u32 4294901760, %v30371_v58  ;;  %v33802_v1 = vand.u32 4294901760, %v30072_v40 }
 0x10d   : > { %33787 = vst [vmem:[#allocation76_spill] sm:$0xff] %v30356_v43  ;;  %v30395_v36 = vsub.f32 %v30046_v30, %v33794_v23  ;;  %v991_v55 = vsub.f32 %v30361_v33, %v33795_v20  ;;  %v33799_v46 = vand.u32 4294901760, %v30376_v27  ;;  %v33801_v23 = vand.u32 4294901760, %v30070_v39 }
 0x10e   : > { %v1009_v30 = vsub.f32 %v30371_v58, %v33798_v51  ;;  %v30435_v20 = vsub.f32 %v30072_v40, %v33802_v1 }
 0x10f   : > { %v1021_v31 = vsub.f32 %v30376_v27, %v33799_v46  ;;  %v992_v29 = vand.u32 4294901760, %v991_v55  ;;  %v1004_v46 = vand.u32 4294901760, %v1003_v22  ;;  %v33805_v22 = vand.u32 4294901760, %v30389_v16 }
 0x110   : > { %v1010_v51 = vand.u32 4294901760, %v1009_v30  ;;  %v33806_v63 = vand.u32 4294901760, %v30395_v36  ;;  %v33807_v30 = vand.u32 4294901760, %v30403_v28 }
 0x111   : > { %v1027_v60 = vsub.f32 %v30389_v16, %v33805_v22  ;;  %v1022_v1 = vand.u32 4294901760, %v1021_v31  ;;  %v30465_v22 = vsub.f32 %v30096_v48, %v33808_v47  ;;  %v30476_v54 = vpack.c.bf16 %v1004_v46, %v992_v29 }
 0x113   : > { %33810 = vst [vmem:[#allocation77_spill] sm:$0xff] %v30476_v54  ;;  %v1028_v17 = vand.u32 4294901760, %v1027_v60  ;;  %v30481_v47 = vpack.c.bf16 %v1022_v1, %v1010_v51  ;;  %v33448_v29 = vand.u32 4294901760, %v30465_v22  ;;  %v33815_v1 = vand.u32 4294901760, %v30435_v20 }
 0x115   : > { %33811 = vst [vmem:[#allocation78_spill] sm:$0xff] %v30481_v47 }
 0x1aa   : > { %v23038_v0 = vpop.f32.mrb[0].mxu0 }
 0x1ab   : > { %v849_v6 = vpop.f32.mrb[1].mxu0 }
 0x1ae   : > { %v23023_v21 = vpop.f32.mrb[0].mxu1 }
 0x1af   : > { %v28781_v5 = vadd.f32 %v23038_v0, %v23023_v21  ;;  %v613_v57 = vpop.f32.mrb[1].mxu1  ;;  %v30420_v0 = vsub.f32 %v30068_v38, %v33800_v62  ;;  %v33803_v38 = vand.u32 4294901760, %v30074_v41 }
 0x1b0   : > { %v28782_v56 = vadd.f32 %v849_v6, %v613_v57  ;;  %v30428_v57 = vsub.f32 %v30070_v39, %v33801_v23  ;;  %v33804_v39 = vand.u32 4294901760, %v30384_v3 }
 0x1b1   : > { %v30422_v21 = vand.u32 4294901760, %v28781_v5  ;;  %v30440_v62 = vsub.f32 %v30074_v41, %v33803_v38  ;;  %v1033_v41 = vsub.f32 %v30395_v36, %v33806_v63  ;;  %v1045_v38 = vsub.f32 %v30403_v28, %v33807_v30 }
 0x1b2   : > { %v30430_v6 = vand.u32 4294901760, %v28782_v56  ;;  %v1015_v23 = vsub.f32 %v30384_v3, %v33804_v39  ;;  %v33813_v13 = vand.u32 4294901760, %v30428_v57 }
 0x1b3   : > { %v30443_v55 = vsub.f32 %v28781_v5, %v30422_v21  ;;  %v1046_v5 = vand.u32 4294901760, %v1045_v38 }
 0x1b4   : > { %v30452_v40 = vsub.f32 %v28782_v56, %v30430_v6  ;;  %v33809_v56 = vand.u32 4294901760, %v30098_v49  ;;  %v1016_v39 = vand.u32 4294901760, %v1015_v23  ;;  %v1051_v30 = vsub.f32 %v30428_v57, %v33813_v13 }
 0x1b5   : > { %v33814_v23 = vand.u32 4294901760, %v30443_v55  ;;  %v33818_v13 = vmov 0.0  }
 0x1b6   : > { %v30470_v31 = vsub.f32 %v30098_v49, %v33809_v56  ;;  %v33444_v63 = vand.u32 4294901760, %v30452_v40  ;;  %v1034_v49 = vand.u32 4294901760, %v1033_v41  ;;  %v33812_v56 = vand.u32 4294901760, %v30420_v0 }
 0x1b7   : > { %v974_v51 = vsub.f32 %v30443_v55, %v33814_v23  ;;  %v1057_v41 = vsub.f32 %v30435_v20, %v33815_v1  ;;  %v1052_v60 = vand.u32 4294901760, %v1051_v30  ;;  %v1063_v23 = vsub.f32 %v30465_v22, %v33448_v29 }
 0x1b8   : > { %v963_v48 = vsub.f32 %v30452_v40, %v33444_v63  ;;  %v1039_v9 = vsub.f32 %v30420_v0, %v33812_v56  ;;  %v33816_v56 = vand.u32 4294901760, %v30440_v62  ;;  %v30500_v63 = vpack.c.bf16 %v1028_v17, %v1016_v39 }
 0x1b9   : > { %v33819_v10 = vand.u32 4294901760, %v30470_v31  ;;  %v1058_v17 = vand.u32 4294901760, %v1057_v41  ;;  %v1064_v30 = vand.u32 4294901760, %v1063_v23  ;;  %v30564_v41 = vpack.c.bf16 %v30440_v62, %v30435_v20  ;;  %v33832_v23 = vld [vmem:[#allocation33_spill] sm:$0xff] }
 0x1ba   : > { %v964_v46 = vand.u32 4294901760, %v963_v48  ;;  %v1069_v38 = vsub.f32 %v30440_v62, %v33816_v56  ;;  %33817 = vst [vmem:[#allocation79_spill] sm:$0xff] %v30500_v63  ;;  %v1040_v48 = vand.u32 4294901760, %v1039_v9  ;;  %v975_v56 = vand.u32 4294901760, %v974_v51 }
 0x1bb   : > { %v1075_v1 = vsub.f32 %v30470_v31, %v33819_v10  ;;  %v30558_v51 = vpack.c.bf16 %v30428_v57, %v30420_v0  ;;  %33829 = vst [vmem:[#allocation89_spill] sm:$0xff] %v30564_v41 }
 0x1bc   : > { %965 = vmatmul.mubr.f32.vlgmr.msra.gmra.mrb[2].mxu1 %v964_v46  ;;  %v30511_v46 = vpack.c.bf16 %v1046_v5, %v1034_v49  ;;  %v1070_v39 = vand.u32 4294901760, %v1069_v38  ;;  %v30514_v9 = vpack.c.bf16 %v1052_v60, %v1040_v48  ;;  %v30540_v5 = vpack.c.bf16 %v30376_v27, %v30371_v58  ;;  %v33831_v48 = vld [vmem:[#allocation32_spill] sm:$0xff] }
 0x1bd   : > { %25384 = vmatpush1.bf16.msra.mxu1 %v30476_v54  ;;  %970 = vmatprep.mubr.f32.mxu1 %v33818_v13  ;;  %v1076_v54 = vand.u32 4294901760, %v1075_v1  ;;  %v30547_v49 = vpack.c.bf16 %v30389_v16, %v30384_v3  ;;  %v30552_v60 = vpack.c.bf16 %v30403_v28, %v30395_v36  ;;  %33828 = vst [vmem:[#allocation88_spill] sm:$0xff] %v30558_v51  ;;  %v33833_v1 = vld [vmem:[#allocation34_spill] sm:$0xff] }
 0x1be   : > { %25386 = vmatprep.subr.bf16.mxu1 %v30481_v47  ;;  %33820 = vst [vmem:[#allocation80_spill] sm:$0xff] %v30511_v46  ;;  %33821 = vst [vmem:[#allocation81_spill] sm:$0xff] %v30514_v9  ;;  %v30518_v29 = vpack.c.bf16 %v1070_v39, %v1058_v17  ;;  %v30569_v38 = vpack.c.bf16 %v30470_v31, %v30465_v22  ;;  %v33835_v17 = vld [vmem:[#allocation36_spill] sm:$0xff]  ;;  %v33836_v39 = vld [vmem:[#allocation37_spill] sm:$0xff] }
 0x1bf   : > { %v30521_v10 = vpack.c.bf16 %v1076_v54, %v1064_v30  ;;  %v30535_v54 = vpack.c.bf16 %v30366_v12, %v30361_v33  ;;  %33825 = vst [vmem:[#allocation85_spill] sm:$0xff] %v30540_v5  ;;  %33826 = vst [vmem:[#allocation86_spill] sm:$0xff] %v30547_v49  ;;  %v33837_v30 = vld [vmem:[#allocation38_spill] sm:$0xff] }
 0x1c0   : > { %976 = vmatmul.mubr.f32.gmra.mrb[4].mxu1 %v975_v56  ;;  %33822 = vst [vmem:[#allocation82_spill] sm:$0xff] %v30518_v29  ;;  %33827 = vst [vmem:[#allocation87_spill] sm:$0xff] %v30552_v60  ;;  %v33834_v56 = vld [vmem:[#allocation35_spill] sm:$0xff] }
 0x1c1   : > { %25388 = vmatpush1.bf16.msra.mxu1 %v30500_v63  ;;  %1206 = vmatprep.mubr.f32.mxu1 %v33818_v13  ;;  %33823 = vst [vmem:[#allocation83_spill] sm:$0xff] %v30521_v10  ;;  %33824 = vst [vmem:[#allocation84_spill] sm:$0xff] %v30535_v54 }
 0x1c2   : > { %25390 = vmatprep.subr.bf16.mxu1 %v30511_v46  ;;  %33830 = vst [vmem:[#allocation90_spill] sm:$0xff] %v30569_v38 }
 0x1c5   : > { %25392 = vmatpush1.bf16.msra.mxu1 %v30514_v9 }
 0x1c6   : > { %25394 = vmatprep.subr.bf16.mxu1 %v30518_v29 }
 0x1c9   : > { %25396 = vmatpush1.bf16.msra.mxu1 %v30521_v10 }
 0x1ca   : > { %25398 = vmatprep.subr.bf16.mxu1 %v30233_v53  ;;  %v375_v53 = vld [vmem:[#allocation10 + $0x78] sm:$0xff] }
 0x1cb   : > { %v2347_v29 = vand.u32 4294901760, %v375_v53 }
 0x1cd   : > { %25400 = vmatpush1.bf16.msra.mxu1 %v30252_v61  ;;  %v374_v61 = vld [vmem:[#allocation10 + $0x70] sm:$0xff] }
 0x1ce   : > { %25402 = vmatprep.subr.bf16.mxu1 %v30270_v11  ;;  %v2344_v10 = vand.u32 4294901760, %v374_v61 }
 0x1d0   : > { %v30834_v63 = vpack.c.bf16 %v2347_v29, %v2344_v10 }
 0x1d1   : > { %25404 = vmatpush1.bf16.msra.mxu1 %v30283_v37 }
 0x1d2   : > { %25406 = vmatprep.subr.bf16.mxu1 %v30303_v59 }
 0x1d5   : > { %25408 = vmatpush1.bf16.msra.mxu1 %v30309_v14  ;;  %v373_v14 = vld [vmem:[#allocation10 + $0x68] sm:$0xff] }
 0x1d6   : > { %25410 = vmatprep.subr.bf16.mxu1 %v30318_v44  ;;  %v372_v44 = vld [vmem:[#allocation10 + $0x60] sm:$0xff]  ;;  %v2341_v37 = vand.u32 4294901760, %v373_v14 }
 0x1d7   : > { %v2338_v59 = vand.u32 4294901760, %v372_v44 }
 0x1d9   : > { %25412 = vmatpush1.bf16.msra.mxu1 %v30324_v7 }
 0x1da   : > { %25414 = vmatprep.subr.bf16.mxu1 %v30322_v2 }
 0x1dc   : > { %1208 = vmatmul.mubr.f32.vlgmr.msra.gmra.mrb[2].mxu1 %v30430_v6 }
 0x1dd   : > { %25416 = vmatpush1.bf16.msra.mxu1 %v30535_v54  ;;  %1213 = vmatprep.mubr.f32.mxu1 %v33818_v13 }
 0x1de   : > { %25418 = vmatprep.subr.bf16.mxu1 %v30540_v5 }
 0x1e0   : > { %1215 = vmatmul.mubr.f32.gmra.mrb[4].mxu1 %v30422_v21 }
 0x1e1   : > { %25420 = vmatpush1.bf16.msra.mxu1 %v30547_v49  ;;  %1349 = vmatprep.mubr.f32.mxu1 %v33818_v13 }
 0x1e2   : > { %25422 = vmatprep.subr.bf16.mxu1 %v30552_v60 }
 0x1e5   : > { %25424 = vmatpush1.bf16.msra.mxu1 %v30558_v51  ;;  %v33848_v51 = vand.u32 4294901760, %v30376_v27  ;;  %v33855_v27 = vand.u32 4294901760, %v30403_v28 }
 0x1e6   : > { %25426 = vmatprep.subr.bf16.mxu1 %v30564_v41  ;;  %v33847_v41 = vand.u32 4294901760, %v30371_v58  ;;  %v33854_v58 = vand.u32 4294901760, %v30395_v36  ;;  %v33861_v36 = vand.u32 4294901760, %v30435_v20  ;;  %v33872_v20 = vld [vmem:[#allocation46_spill] sm:$0xff] }
 0x1e8   : > { %v30618_v60 = vpack.c.bf16 %v33848_v51, %v33847_v41  ;;  %v33869_v41 = vld [vmem:[#allocation45_spill] sm:$0xff] }
 0x1e9   : > { %25428 = vmatpush1.bf16.msra.mxu1 %v30569_v38 }
 0x1ea   : > { %25430 = vmatprep.subr.bf16.mxu1 %v30328_v4  ;;  %v33845_v4 = vand.u32 4294901760, %v30366_v12  ;;  %33849 = vst [vmem:[#allocation92_spill] sm:$0xff] %v30618_v60  ;;  %v33852_v12 = vand.u32 4294901760, %v30389_v16  ;;  %v33862_v16 = vand.u32 4294901760, %v30440_v62  ;;  %v33873_v62 = vand.u32 4294901760, %v33872_v20 }
 0x1ec   : > { %v30652_v28 = vpack.c.bf16 %v33862_v16, %v33861_v36  ;;  %v33882_v36 = vld [vmem:[#allocation50_spill] sm:$0xff] }
 0x1ed   : > { %25432 = vmatpush1.bf16.msra.mxu1 %v30332_v26  ;;  %v33844_v26 = vand.u32 4294901760, %v30361_v33  ;;  %v33851_v33 = vand.u32 4294901760, %v30384_v3  ;;  %v33883_v16 = vand.u32 4294901760, %v33882_v36 }
 0x1ee   : > { %25434 = vmatprep.subr.bf16.mxu1 %v30336_v34  ;;  %v33843_v34 = vld [vmem:[#allocation42_spill] sm:$0xff]  ;;  %33863 = vst [vmem:[#allocation96_spill] sm:$0xff] %v30652_v28 }
 0x1ef   : > { %v30611_v38 = vpack.c.bf16 %v33845_v4, %v33844_v26  ;;  %v30628_v4 = vpack.c.bf16 %v33852_v12, %v33851_v33  ;;  %v30635_v26 = vpack.c.bf16 %v33855_v27, %v33854_v58  ;;  %v33874_v12 = vld [vmem:[#allocation47_spill] sm:$0xff] }
 0x1f0   : > { %v33875_v58 = vand.u32 4294901760, %v33874_v12  ;;  %v33892_v12 = vld [vmem:[#allocation55_spill] sm:$0xff] }
 0x1f1   : > { %25436 = vmatpush1.bf16.msra.mxu1 %v30340_v8  ;;  %33846 = vst [vmem:[#allocation91_spill] sm:$0xff] %v30611_v38  ;;  %33853 = vst [vmem:[#allocation93_spill] sm:$0xff] %v30628_v4 }
 0x1f2   : > { %25438 = vmatprep.subr.bf16.mxu1 %v30344_v18  ;;  %33856 = vst [vmem:[#allocation94_spill] sm:$0xff] %v30635_v26  ;;  %v30673_v27 = vpack.c.bf16 %v33875_v58, %v33873_v62  ;;  %v33893_v58 = vand.u32 4294901760, %v33892_v12  ;;  %v33907_v12 = vld [vmem:[#allocation24_spill] sm:$0xff] }
 0x1f4   : > { %33876 = vst [vmem:[#allocation45_spill] sm:$0xff] %v30673_v27 }
 0x1f5   : > { %25440 = vmatpush1.bf16.msra.mxu1 %v30348_v15  ;;  %v33840_v15 = vld [vmem:[#allocation39_spill] sm:$0xff] }
 0x1f6   : > { %25442 = vmatprep.subr.bf16.mxu1 %v30352_v52  ;;  %v33839_v52 = vand.u32 4294901760, %v30151_v24  ;;  %v33841_v18 = vand.u32 4294901760, %v33840_v15  ;;  %v33850_v24 = vand.u32 4294901760, %v30452_v40  ;;  %v33858_v15 = vand.u32 4294901760, %v30420_v0 }
 0x1f7   : > { %v33865_v0 = vand.u32 4294901760, %v30470_v31 }
 0x1f8   : > { %v30604_v8 = vpack.c.bf16 %v33841_v18, %v33839_v52  ;;  %v33857_v18 = vand.u32 4294901760, %v30443_v55  ;;  %v33859_v52 = vand.u32 4294901760, %v30428_v57  ;;  %v33867_v57 = vld [vmem:[#allocation44_spill] sm:$0xff] }
 0x1f9   : > { %25444 = vmatpush1.bf16.msra.mxu1 %v30356_v43  ;;  %v33838_v43 = vld [vmem:[#allocation40_spill] sm:$0xff]  ;;  %v33868_v51 = vand.u32 4294901760, %v33867_v57 }
 0x1fa   : > { %25446 = vmatprep.subr.bf16.mxu1 %v30024_v19  ;;  %33842 = vst [vmem:[#allocation39_spill] sm:$0xff] %v30604_v8  ;;  %v30644_v3 = vpack.c.bf16 %v33859_v52, %v33858_v15 }
 0x1fc   : > { %1352 = vmatmul.mubr.f32.vlgmr.msra.gmra.mrb[2].mxu1 %v30452_v40  ;;  %33860 = vst [vmem:[#allocation95_spill] sm:$0xff] %v30644_v3 }
 0x1fd   : > { %25448 = vmatpush1.bf16.msra.mxu1 %v30055_v32  ;;  %1357 = vmatprep.mubr.f32.mxu1 %v33818_v13 }
 0x1fe   : > { %25450 = vmatprep.subr.bf16.mxu1 %v30064_v35 }
 0x200   : > { %1360 = vmatmul.mubr.f32.gmra.mrb[4].mxu1 %v30443_v55  ;;  %v33864_v55 = vand.u32 4294901760, %v30465_v22  ;;  %v33877_v22 = vld [vmem:[#allocation48_spill] sm:$0xff] }
 0x201   : > { %25452 = vmatpush1.bf16.msra.mxu1 %v30082_v42  ;;  %1462 = vmatprep.mubr.f32.mxu1 %v33818_v13  ;;  %v33878_v31 = vand.u32 4294901760, %v33877_v22  ;;  %v33894_v22 = vld [vmem:[#allocation57_spill] sm:$0xff] }
 0x202   : > { %25454 = vmatprep.subr.bf16.mxu1 %v30092_v45  ;;  %v30659_v40 = vpack.c.bf16 %v33865_v0, %v33864_v55  ;;  %v33884_v55 = vld [vmem:[#allocation51_spill] sm:$0xff] }
 0x203   : > { %v33885_v0 = vand.u32 4294901760, %v33884_v55 }
 0x204   : > { %33866 = vst [vmem:[#allocation97_spill] sm:$0xff] %v30659_v40 }
 0x205   : > { %25456 = vmatpush1.bf16.msra.mxu1 %v30105_v50  ;;  %v30687_v57 = vpack.c.bf16 %v33885_v0, %v33883_v16  ;;  %v33899_v16 = vld [vmem:[#allocation60_spill] sm:$0xff] }
 0x206   : > { %25458 = vmatprep.subr.bf16.mxu1 %v33831_v48  ;;  %v33900_v55 = vand.u32 4294901760, %v33899_v16 }
 0x207   : > { %33886 = vst [vmem:[#allocation47_spill] sm:$0xff] %v30687_v57 }
 0x209   : > { %25460 = vmatpush1.bf16.msra.mxu1 %v33832_v23 }
 0x20a   : > { %25462 = vmatprep.subr.bf16.mxu1 %v33833_v1 }
 0x20d   : > { %25464 = vmatpush1.bf16.msra.mxu1 %v33834_v56 }
 0x20e   : > { %25466 = vmatprep.subr.bf16.mxu1 %v33835_v17 }
 0x211   : > { %25468 = vmatpush1.bf16.msra.mxu1 %v33836_v39 }
 0x212   : > { %25470 = vmatprep.subr.bf16.mxu1 %v33837_v30 }
 0x215   : > { %25472 = vmatpush1.bf16.msra.mxu1 %v33838_v43 }
 0x216   : > { %25474 = vmatprep.subr.bf16.mxu1 %v30178_v25 }
 0x219   : > { %25476 = vmatpush1.bf16.msra.mxu1 %v33843_v34 }
 0x21a   : > { %25478 = vmatprep.subr.bf16.mxu1 %v30604_v8  ;;  %v30797_v8 = vld [vmem:[#allocation10 + $0x48] sm:$0xff] }
 0x21c   : > { %1466 = vmatmul.mubr.f32.vlgmr.msra.gmra.mrb[2].mxu1 %v33850_v24  ;;  %v33870_v24 = vand.u32 4294901760, %v33869_v41 }
 0x21d   : > { %25480 = vmatpush1.bf16.msra.mxu1 %v30611_v38  ;;  %1471 = vmatprep.mubr.f32.mxu1 %v33818_v13  ;;  %v30795_v38 = vld [vmem:[#allocation10 + $0x40] sm:$0xff] }
 0x21e   : > { %25482 = vmatprep.subr.bf16.mxu1 %v30618_v60  ;;  %v30666_v33 = vpack.c.bf16 %v33870_v24, %v33868_v51  ;;  %v33887_v51 = vld [vmem:[#allocation53_spill] sm:$0xff]  ;;  %v33889_v24 = vld [vmem:[#allocation54_spill] sm:$0xff] }
 0x21f   : > { %v33888_v41 = vand.u32 4294901760, %v33887_v51  ;;  %v33890_v20 = vand.u32 4294901760, %v33889_v24  ;;  %v33902_v51 = vld [vmem:[#allocation62_spill] sm:$0xff]  ;;  %v33904_v24 = vld [vmem:[#allocation63_spill] sm:$0xff] }
 0x220   : > { %1475 = vmatmul.mubr.f32.gmra.mrb[4].mxu1 %v33857_v18  ;;  %33871 = vst [vmem:[#allocation44_spill] sm:$0xff] %v30666_v33  ;;  %v33879_v18 = vld [vmem:[#allocation49_spill] sm:$0xff] }
 0x221   : > { %25484 = vmatpush1.bf16.msra.mxu1 %v30628_v4  ;;  %1641 = vmatprep.mubr.f32.mxu1 %v33818_v13  ;;  %v33880_v15 = vand.u32 4294901760, %v33879_v18  ;;  %v30694_v62 = vpack.c.bf16 %v33890_v20, %v33888_v41  ;;  %v33903_v41 = vand.u32 4294901760, %v33902_v51  ;;  %v33905_v20 = vand.u32 4294901760, %v33904_v24  ;;  %v30782_v4 = vld [vmem:[#allocation10 + $0x38] sm:$0xff] }
 0x222   : > { %25486 = vmatprep.subr.bf16.mxu1 %v30635_v26  ;;  %v30780_v26 = vld [vmem:[#allocation10 + $0x30] sm:$0xff]  ;;  %v33513_v60 = vand.u32 4294901760, %v30782_v4 }
 0x223   : > { %v30680_v52 = vpack.c.bf16 %v33880_v15, %v33878_v31  ;;  %33891 = vst [vmem:[#allocation48_spill] sm:$0xff] %v30694_v62  ;;  %v33895_v31 = vand.u32 4294901760, %v33894_v22  ;;  %v33897_v15 = vld [vmem:[#allocation58_spill] sm:$0xff] }
 0x224   : > { %v33898_v36 = vand.u32 4294901760, %v33897_v15 }
 0x225   : > { %25488 = vmatpush1.bf16.msra.mxu1 %v30644_v3  ;;  %33881 = vst [vmem:[#allocation46_spill] sm:$0xff] %v30680_v52  ;;  %v30701_v18 = vpack.c.bf16 %v33895_v31, %v33893_v58  ;;  %v859_v58 = vld [vmem:[%s29947_s11] sm:$0xff] }
 0x226   : > { %25490 = vmatprep.subr.bf16.mxu1 %v30652_v28  ;;  %v30708_v0 = vpack.c.bf16 %v33900_v55, %v33898_v36  ;;  %v861_v36 = vld [vmem:[%s29947_s11 + $0x10] sm:$0xff] }
 0x227   : > { %33896 = vst [vmem:[#allocation49_spill] sm:$0xff] %v30701_v18 }
 0x228   : > { %33901 = vst [vmem:[#allocation50_spill] sm:$0xff] %v30708_v0 }
 0x229   : > { %25492 = vmatpush1.bf16.msra.mxu1 %v30659_v40 }
 0x22a   : > { %25494 = vmatprep.subr.bf16.mxu1 %v30666_v33  ;;  %v33908_v33 = vld [vmem:[#allocation25_spill] sm:$0xff] }
 0x22d   : > { %25496 = vmatpush1.bf16.msra.mxu1 %v30673_v27 }
 0x22e   : > { %25498 = vmatprep.subr.bf16.mxu1 %v30680_v52 }
 0x231   : > { %25500 = vmatpush1.bf16.msra.mxu1 %v30687_v57  ;;  %v30715_v57 = vpack.c.bf16 %v33905_v20, %v33903_v41 }
 0x232   : > { %25502 = vmatprep.subr.bf16.mxu1 %v30694_v62 }
 0x233   : > { %33906 = vst [vmem:[#allocation51_spill] sm:$0xff] %v30715_v57 }
 0x235   : > { %25504 = vmatpush1.bf16.msra.mxu1 %v30701_v18 }
 0x236   : > { %25506 = vmatprep.subr.bf16.mxu1 %v30708_v0 }
 0x239   : > { %25508 = vmatpush1.bf16.msra.mxu1 %v30715_v57 }
 0x23a   : > { %25510 = vmatprep.subr.bf16.mxu1 %v30024_v19 }
 0x23c   : > { %1643 = vmatmul.mubr.f32.vlgmr.msra.gmra.mrb[2].mxu1 %v30430_v6 }
 0x23d   : > { %25512 = vmatpush1.bf16.msra.mxu1 %v30055_v32  ;;  %1648 = vmatprep.mubr.f32.mxu1 %v33818_v13 }
 0x23e   : > { %25514 = vmatprep.subr.bf16.mxu1 %v30064_v35 }
 0x240   : > { %1650 = vmatmul.mubr.f32.gmra.mrb[4].mxu1 %v30422_v21 }
 0x241   : > { %25516 = vmatpush1.bf16.msra.mxu1 %v30082_v42  ;;  %1752 = vmatprep.mubr.f32.mxu1 %v33818_v13 }
 0x242   : > { %25518 = vmatprep.subr.bf16.mxu1 %v30092_v45 }
 0x245   : > { %25520 = vmatpush1.bf16.msra.mxu1 %v30105_v50  ;;  %v33927_v50 = vand.u32 4294901760, %v30797_v8 }
 0x246   : > { %25522 = vmatprep.subr.bf16.mxu1 %v33831_v48 }
 0x249   : > { %25524 = vmatpush1.bf16.msra.mxu1 %v33832_v23 }
 0x24a   : > { %25526 = vmatprep.subr.bf16.mxu1 %v33833_v1 }
 0x24d   : > { %25528 = vmatpush1.bf16.msra.mxu1 %v33834_v56 }
 0x24e   : > { %25530 = vmatprep.subr.bf16.mxu1 %v33835_v17 }
 0x251   : > { %25532 = vmatpush1.bf16.msra.mxu1 %v33836_v39 }
 0x252   : > { %25534 = vmatprep.subr.bf16.mxu1 %v33837_v30 }
 0x255   : > { %25536 = vmatpush1.bf16.msra.mxu1 %v33838_v43 }
 0x256   : > { %25538 = vmatprep.subr.bf16.mxu1 %v30178_v25 }
 0x259   : > { %25540 = vmatpush1.bf16.msra.mxu1 %v33843_v34 }
 0x25c   : > { %1754 = vmatmul.mubr.f32.vlgmr.msra.gmra.mrb[2].mxu1 %v30430_v6 }
 0x25d   : > { %1759 = vmatprep.mubr.f32.mxu1 %v33818_v13 }
 0x260   : > { %1761 = vmatmul.mubr.f32.gmra.mrb[4].mxu1 %v30422_v21 }
 0x261   : > { %23295 = vmatprep.mubr.f32.mxu1 %v33907_v12 }
 0x32f   : > { %v1755_v22 = vpop.f32.mrb[2].mxu1 }
 0x330   : > { %v1767_v31 = vadd.f32 %v1755_v22, %v859_v58  ;;  %v30744_v15 = vpop.f32.mrb[3].mxu1 }
 0x332   : > { %v21671_v16 = vmul.f32 -1.442695, %v1767_v31 }
 0x333   : > { %v1762_v55 = vpop.f32.mrb[4].mxu1 }
 0x334   : > { %29270 = vpow2.f32 %v21671_v16  ;;  %v1769_v51 = vadd.f32 %v1762_v55, %v861_v36  ;;  %v30747_v41 = vpop.f32.mrb[5].mxu1 }
 0x336   : > { %v21673_v24 = vmul.f32 -1.442695, %v1769_v51 }
 0x338   : > { %29272 = vpow2.f32 %v21673_v24 }
 0x33e   : > { %v29271_v6 = vpop.eup %29270 }
 0x33f   : > { %v1783_v20 = vadd.f32 1.0, %v29271_v6 }
 0x341   : > { %29274 = vrcp.f32 %v1783_v20 }
 0x342   : > { %v29273_v21 = vpop.eup %29272 }
 0x343   : > { %v1785_v57 = vadd.f32 1.0, %v29273_v21 }
 0x345   : > { %29276 = vrcp.f32 %v1785_v57 }
 0x34b   : > { %v29275_v0 = vpop.eup %29274 }
 0x34c   : > { %v1795_v18 = vmul.f32 0.0, %v29275_v0  ;;  %v33909_v0 = vld [vmem:[#allocation18_spill] sm:$0xff] }
 0x34e   : > { %v1798_v58 = vand.u32 4294901760, %v1795_v18 }
 0x34f   : > { %v29277_v22 = vpop.eup %29276 }
 0x350   : > { %v1886_v62 = vsub.f32 %v1795_v18, %v1798_v58  ;;  %v1796_v52 = vmul.f32 0.0, %v29277_v22  ;;  %v33910_v18 = vld [vmem:[#allocation19_spill] sm:$0xff] }
 0x351   : > { %v361_v22 = vld [vmem:[#allocation10 + $0x8] sm:$0xff] }
 0x352   : > { %v1801_v31 = vand.u32 4294901760, %v1796_v52  ;;  %v1887_v27 = vand.u32 4294901760, %v1886_v62 }
 0x354   : > { %v25541_v16 = vpack.c.bf16 %v1801_v31, %v1798_v58  ;;  %v1893_v36 = vsub.f32 %v1796_v52, %v1801_v31  ;;  %v1888_v55 = vsub.f32 %v1886_v62, %v1887_v27  ;;  %v33911_v52 = vld [vmem:[#allocation20_spill] sm:$0xff]  ;;  %v360_v58 = vld [vmem:[#allocation10] sm:$0xff]  ;;  %v33914_v31 = vld [vmem:[#allocation23_spill] sm:$0xff] }
 0x356   : > { %25542 = vmatprep.subr.bf16.mxu0 %v25541_v16  ;;  %v1894_v51 = vand.u32 4294901760, %v1893_v36  ;;  %v25549_v24 = vpack.c.bf16 %v1893_v36, %v1886_v62  ;;  %v1889_v57 = vand.u32 4294901760, %v1888_v55  ;;  %v33912_v62 = vld [vmem:[#allocation21_spill] sm:$0xff] }
 0x357   : > { %25544 = vmatpush3.bf16.msra.mxu0 %v25541_v16 }
 0x358   : > { %v1895_v6 = vsub.f32 %v1893_v36, %v1894_v51  ;;  %v25557_v20 = vpack.c.bf16 %v1894_v51, %v1887_v27  ;;  %v33913_v27 = vld [vmem:[#allocation22_spill] sm:$0xff]  ;;  %v2305_v36 = vand.u32 4294901760, %v361_v22  ;;  %v30759_v51 = vld [vmem:[#allocation10 + $0x10] sm:$0xff] }
 0x35a   : > { %23044 = vmatmul.mubr.f32.vlgmr.msra.gmra.mrb[2].mxu0 %v33908_v33  ;;  %v1896_v21 = vand.u32 4294901760, %v1895_v6  ;;  %v33500_v6 = vand.u32 4294901760, %v30759_v51  ;;  %v30828_v11 = vsub.f32 %v361_v22, %v2305_v36 }
 0x35b   : > { %23050 = vmatprep.mubr.f32.mxu0 %v33909_v0 }
 0x35c   : > { %v25545_v40 = vpack.c.bf16 %v1896_v21, %v1889_v57  ;;  %v30768_v57 = vld [vmem:[#allocation10 + $0x20] sm:$0xff]  ;;  %v30770_v21 = vld [vmem:[#allocation10 + $0x28] sm:$0xff]  ;;  %v33554_v46 = vand.u32 4294901760, %v30828_v11 }
 0x35d   : > { %v33509_v3 = vand.u32 4294901760, %v30770_v21  ;;  %v33921_v30 = vand.u32 4294901760, %v30770_v21 }
 0x35e   : > { %25546 = vmatprep.subr.bf16.mxu0 %v25545_v40  ;;  %v2413_v22 = vsub.f32 %v30828_v11, %v33554_v46 }
 0x35f   : > { %25548 = vmatpush3.bf16.msra.mxu0 %v25545_v40  ;;  %v2302_v40 = vand.u32 4294901760, %v360_v58  ;;  %v30925_v39 = vsub.f32 %v30770_v21, %v33921_v30  ;;  %v33922_v30 = vand.u32 4294901760, %v30780_v26 }
 0x360   : > { %25550 = vmatprep.subr.bf16.mxu0 %v25549_v24 }
 0x361   : > { %v30757_v55 = vpack.c.bf16 %v2305_v36, %v2302_v40  ;;  %v2414_v36 = vand.u32 4294901760, %v2413_v22  ;;  %v30859_v22 = vsub.f32 %v372_v44, %v2338_v59  ;;  %v30942_v21 = vsub.f32 %v30780_v26, %v33922_v30 }
 0x362   : > { %23051 = vmatmul.mubr.f32.vlgmr.msra.gmra.mrb[2].mxu0 %v33910_v18 }
 0x363   : > { %25552 = vmatpush3.bf16.msra.mxu0 %v25549_v24  ;;  %23057 = vmatprep.mubr.f32.mxu0 %v33911_v52  ;;  %v30761_v24 = vld [vmem:[#allocation10 + $0x18] sm:$0xff] }
 0x364   : > { %25554 = vmatprep.subr.bf16.mxu0 %v25541_v16 }
 0x36a   : > { %23058 = vmatmul.mubr.f32.vlgmr.msra.gmra.mrb[2].mxu0 %v33912_v62 }
 0x36b   : > { %25556 = vmatpush3.bf16.msra.mxu0 %v25541_v16  ;;  %23064 = vmatprep.mubr.f32.mxu0 %v33913_v27 }
 0x36c   : > { %25558 = vmatprep.subr.bf16.mxu0 %v25557_v20 }
 0x372   : > { %23065 = vmatmul.mubr.f32.vlgmr.msra.gmra.mrb[2].mxu0 %v33914_v31 }
 0x373   : > { %25560 = vmatpush3.bf16.msra.mxu0 %v25557_v20  ;;  %23071 = vmatprep.mubr.f32.mxu0 %v33909_v0  ;;  %v33499_v20 = vand.u32 4294901760, %v30761_v24 }
 0x374   : > { %25562 = vmatprep.subr.bf16.mxu0 %v25541_v16 }
 0x375   : > { %v30776_v28 = vpack.c.bf16 %v33499_v20, %v33500_v6  ;;  %v33514_v6 = vand.u32 4294901760, %v30780_v26 }
 0x377   : > { %v30805_v49 = vpack.c.bf16 %v33513_v60, %v33514_v6  ;;  %v370_v60 = vld [vmem:[#allocation10 + $0x50] sm:$0xff]  ;;  %v371_v6 = vld [vmem:[#allocation10 + $0x58] sm:$0xff] }
 0x378   : > { %v2332_v54 = vand.u32 4294901760, %v370_v60  ;;  %v2335_v2 = vand.u32 4294901760, %v371_v6 }
 0x37a   : > { %23072 = vmatmul.mubr.f32.vlgmr.msra.gmra.mrb[2].mxu0 %v33910_v18  ;;  %v30820_v7 = vpack.c.bf16 %v2335_v2, %v2332_v54  ;;  %v30847_v34 = vsub.f32 %v370_v60, %v2332_v54  ;;  %v30849_v25 = vsub.f32 %v371_v6, %v2335_v2  ;;  %v33560_v2 = vand.u32 4294901760, %v30859_v22 }
 0x37b   : > { %25564 = vmatpush3.bf16.msra.mxu0 %v25541_v16  ;;  %23078 = vmatprep.mubr.f32.mxu0 %v33909_v0  ;;  %v33510_v16 = vand.u32 4294901760, %v30768_v57 }
 0x37c   : > { %25566 = vmatprep.subr.bf16.mxu0 %v30757_v55  ;;  %v33556_v43 = vand.u32 4294901760, %v30849_v25 }
 0x37d   : > { %v30791_v20 = vpack.c.bf16 %v33509_v3, %v33510_v16  ;;  %v33530_v3 = vand.u32 4294901760, %v30795_v38  ;;  %v33529_v16 = vand.u32 4294901760, %v30797_v8 }
 0x37f   : > { %v30815_v5 = vpack.c.bf16 %v33529_v16, %v33530_v3  ;;  %v30824_v16 = vpack.c.bf16 %v2341_v37, %v2338_v59  ;;  %v30826_v3 = vsub.f32 %v360_v58, %v2302_v40  ;;  %v30873_v59 = vsub.f32 %v374_v61, %v2344_v10 }
 0x381   : > { %v33552_v9 = vand.u32 4294901760, %v30826_v3 }
 0x382   : > { %23079 = vmatmul.mubr.f32.vlgmr.msra.gmra.mrb[2].mxu0 %v33910_v18 }
 0x383   : > { %25568 = vmatpush3.bf16.msra.mxu0 %v30757_v55  ;;  %v2406_v58 = vsub.f32 %v30826_v3, %v33552_v9  ;;  %v33555_v9 = vand.u32 4294901760, %v30847_v34 }
 0x384   : > { %25570 = vmatprep.subr.bf16.mxu0 %v30776_v28 }
 0x385   : > { %v2407_v40 = vand.u32 4294901760, %v2406_v58  ;;  %v2476_v46 = vsub.f32 %v30847_v34, %v33555_v9  ;;  %v2483_v58 = vsub.f32 %v30849_v25, %v33556_v43  ;;  %v2490_v9 = vsub.f32 %v30859_v22, %v33560_v2 }
 0x387   : > { %25572 = vmatpush3.bf16.msra.mxu0 %v30776_v28  ;;  %v30844_v47 = vpack.c.bf16 %v2414_v36, %v2407_v40  ;;  %v30861_v40 = vsub.f32 %v373_v14, %v2341_v37  ;;  %v2477_v54 = vand.u32 4294901760, %v2476_v46  ;;  %v2484_v60 = vand.u32 4294901760, %v2483_v58 }
 0x388   : > { %25574 = vmatprep.subr.bf16.mxu0 %v30791_v20  ;;  %v30875_v37 = vsub.f32 %v375_v53, %v2347_v29  ;;  %v2491_v14 = vand.u32 4294901760, %v2490_v9  ;;  %v33559_v46 = vand.u32 4294901760, %v30873_v59  ;;  %v30895_v29 = vpack.c.bf16 %v30849_v25, %v30847_v34 }
 0x389   : > { %v33557_v6 = vand.u32 4294901760, %v30861_v40  ;;  %v30865_v36 = vpack.c.bf16 %v2484_v60, %v2477_v54  ;;  %v30899_v9 = vpack.c.bf16 %v30861_v40, %v30859_v22 }
 0x38a   : > { %v33558_v58 = vand.u32 4294901760, %v30875_v37  ;;  %v2504_v60 = vsub.f32 %v30873_v59, %v33559_v46  ;;  %33915 = vst [vmem:[#allocation53_spill] sm:$0xff] %v30895_v29  ;;  %v33920_v46 = vand.u32 4294901760, %v30768_v57 }
 0x38b   : > { %25576 = vmatpush3.bf16.msra.mxu0 %v30791_v20  ;;  %v2497_v43 = vsub.f32 %v30861_v40, %v33557_v6  ;;  %33916 = vst [vmem:[#allocation54_spill] sm:$0xff] %v30899_v9 }
 0x38c   : > { %25578 = vmatprep.subr.bf16.mxu0 %v30805_v49  ;;  %v2511_v6 = vsub.f32 %v30875_v37, %v33558_v58  ;;  %v2505_v61 = vand.u32 4294901760, %v2504_v60  ;;  %v33919_v60 = vand.u32 4294901760, %v30761_v24  ;;  %v30920_v2 = vsub.f32 %v30768_v57, %v33920_v46 }
 0x38d   : > { %v2498_v44 = vand.u32 4294901760, %v2497_v43  ;;  %v30891_v43 = vpack.c.bf16 %v30828_v11, %v30826_v3 }
 0x38e   : > { %v2512_v10 = vand.u32 4294901760, %v2511_v6  ;;  %v33918_v6 = vand.u32 4294901760, %v30759_v51  ;;  %v33924_v26 = vand.u32 4294901760, %v30920_v2 }
 0x38f   : > { %25580 = vmatpush3.bf16.msra.mxu0 %v30805_v49  ;;  %v30879_v54 = vpack.c.bf16 %v2498_v44, %v2491_v14  ;;  %v30903_v14 = vpack.c.bf16 %v30875_v37, %v30873_v59 }
 0x390   : > { %25582 = vmatprep.subr.bf16.mxu0 %v30815_v5  ;;  %v30887_v53 = vpack.c.bf16 %v2512_v10, %v2505_v61  ;;  %v30908_v44 = vsub.f32 %v30759_v51, %v33918_v6  ;;  %v30913_v61 = vsub.f32 %v30761_v24, %v33919_v60  ;;  %v2434_v30 = vsub.f32 %v30920_v2, %v33924_v26 }
 0x391   : > { %33917 = vst [vmem:[#allocation55_spill] sm:$0xff] %v30903_v14  ;;  %v30976_v26 = vsub.f32 %v30797_v8, %v33927_v50 }
 0x392   : > { %v33566_v10 = vand.u32 4294901760, %v30908_v44  ;;  %v33568_v58 = vand.u32 4294901760, %v30913_v61 }
 0x393   : > { %25584 = vmatpush3.bf16.msra.mxu0 %v30815_v5  ;;  %v2468_v8 = vand.u32 4294901760, %v30976_v26 }
 0x394   : > { %25586 = vmatprep.subr.bf16.mxu0 %v30820_v7  ;;  %v2420_v24 = vsub.f32 %v30908_v44, %v33566_v10  ;;  %v2427_v60 = vsub.f32 %v30913_v61, %v33568_v58  ;;  %v33923_v10 = vand.u32 4294901760, %v30782_v4 }
 0x396   : > { %v30950_v23 = vsub.f32 %v30782_v4, %v33923_v10  ;;  %v2421_v48 = vand.u32 4294901760, %v2420_v24  ;;  %v2428_v46 = vand.u32 4294901760, %v2427_v60  ;;  %v33926_v24 = vand.u32 4294901760, %v30795_v38 }
 0x397   : > { %25588 = vmatpush3.bf16.msra.mxu0 %v30820_v7  ;;  %v33929_v10 = vand.u32 4294901760, %v30942_v21 }
 0x398   : > { %25590 = vmatprep.subr.bf16.mxu0 %v30824_v16  ;;  %v30971_v60 = vsub.f32 %v30795_v38, %v33926_v24  ;;  %v30981_v42 = vpack.c.bf16 %v2428_v46, %v2421_v48  ;;  %v33930_v24 = vand.u32 4294901760, %v30950_v23 }
 0x399   : > { %v2448_v32 = vsub.f32 %v30942_v21, %v33929_v10  ;;  %v31036_v10 = vpack.c.bf16 %v30950_v23, %v30942_v21 }
 0x39a   : > { %v2455_v19 = vsub.f32 %v30950_v23, %v33930_v24  ;;  %v2461_v50 = vand.u32 4294901760, %v30971_v60  ;;  %v33933_v24 = vand.u32 4294901760, %v30828_v11  ;;  %v33939_v11 = vand.u32 4294901760, %v30920_v2 }
 0x39b   : > { %25592 = vmatpush3.bf16.msra.mxu0 %v30824_v16  ;;  %v2449_v48 = vand.u32 4294901760, %v2448_v32  ;;  %v31022_v32 = vpack.c.bf16 %v30913_v61, %v30908_v44 }
 0x39c   : > { %25594 = vmatprep.subr.bf16.mxu0 %v30834_v63  ;;  %v2456_v46 = vand.u32 4294901760, %v2455_v19 }
 0x39f   : > { %25596 = vmatpush3.bf16.msra.mxu0 %v30834_v63 }
 0x3a0   : > { %25598 = vmatprep.subr.bf16.mxu0 %v30844_v47 }
 0x455   : > { %v23080_v51 = vpop.f32.mrb[2].mxu0 }
 0x456   : > { %v30927_v6 = vand.u32 4294901760, %v23080_v51  ;;  %v2289_v17 = vpop.f32.mrb[3].mxu0 }
 0x457   : > { %v30935_v56 = vand.u32 4294901760, %v2289_v17 }
 0x458   : > { %v30945_v1 = vsub.f32 %v23080_v51, %v30927_v6  ;;  %v33925_v51 = vand.u32 4294901760, %v30925_v39 }
 0x459   : > { %v30953_v58 = vsub.f32 %v2289_v17, %v30935_v56 }
 0x45a   : > { %v33578_v57 = vand.u32 4294901760, %v30945_v1  ;;  %v2441_v45 = vsub.f32 %v30925_v39, %v33925_v51 }
 0x45b   : > { %v33928_v51 = vand.u32 4294901760, %v30953_v58 }
 0x45c   : > { %v2395_v17 = vsub.f32 %v30945_v1, %v33578_v57  ;;  %v2435_v57 = vand.u32 4294901760, %v2434_v30  ;;  %v2442_v13 = vand.u32 4294901760, %v2441_v45  ;;  %v2462_v30 = vsub.f32 %v30971_v60, %v2461_v50 }
 0x45d   : > { %v2385_v4 = vsub.f32 %v30953_v58, %v33928_v51  ;;  %v31042_v51 = vpack.c.bf16 %v30976_v26, %v30971_v60  ;;  %v33949_v60 = vand.u32 4294901760, %v30859_v22  ;;  %v860_v22 = vld [vmem:[%s29947_s11 + $0x8] sm:$0xff] }
 0x45e   : > { %v2396_v38 = vand.u32 4294901760, %v2395_v17  ;;  %v30993_v45 = vpack.c.bf16 %v2442_v13, %v2435_v57  ;;  %v2463_v13 = vand.u32 4294901760, %v2462_v30  ;;  %v31030_v17 = vpack.c.bf16 %v30925_v39, %v30920_v2 }
 0x45f   : > { %v2386_v35 = vand.u32 4294901760, %v2385_v4  ;;  %v2469_v4 = vsub.f32 %v30976_v26, %v2468_v8  ;;  %v33936_v30 = vand.u32 4294901760, %v30913_v61  ;;  %v33946_v2 = vand.u32 4294901760, %v30847_v34 }
 0x460   : > { %v33950_v26 = vand.u32 4294901760, %v30861_v40  ;;  %v33952_v34 = vand.u32 4294901760, %v30873_v59  ;;  %v1768_v59 = vadd.f32 %v30744_v15, %v860_v22 }
 0x461   : > { %23113 = vmatprep.mubr.f32.mxu0 %v2386_v35  ;;  %v31004_v35 = vpack.c.bf16 %v2456_v46, %v2449_v48  ;;  %v2470_v57 = vand.u32 4294901760, %v2469_v4  ;;  %v33935_v46 = vand.u32 4294901760, %v30908_v44  ;;  %v33942_v44 = vand.u32 4294901760, %v30942_v21 }
 0x462   : > { %23114 = vmatmul.mubr.f32.vlgmr.msra.gmra.mrb[4].mxu0 %v2396_v38  ;;  %v33931_v38 = vand.u32 4294901760, %v30953_v58 }
 0x463   : > { %25600 = vmatpush3.bf16.msra.mxu0 %v30844_v47  ;;  %23148 = vmatprep.mubr.f32.mxu0 %v30935_v56  ;;  %v31008_v19 = vpack.c.bf16 %v2470_v57, %v2463_v13  ;;  %v31083_v4 = vpack.c.bf16 %v33936_v30, %v33935_v46  ;;  %v33938_v13 = vand.u32 4294901760, %v30945_v1 }
 0x464   : > { %25602 = vmatprep.subr.bf16.mxu0 %v30981_v42 }
 0x465   : > { %33937 = vst [vmem:[#allocation58_spill] sm:$0xff] %v31083_v4 }
 0x467   : > { %25604 = vmatpush3.bf16.msra.mxu0 %v30981_v42 }
 0x468   : > { %25606 = vmatprep.subr.bf16.mxu0 %v30993_v45 }
 0x46b   : > { %25608 = vmatpush3.bf16.msra.mxu0 %v30993_v45 }
 0x46c   : > { %25610 = vmatprep.subr.bf16.mxu0 %v31004_v35 }
 0x46f   : > { %25612 = vmatpush3.bf16.msra.mxu0 %v31004_v35 }
 0x470   : > { %25614 = vmatprep.subr.bf16.mxu0 %v31008_v19 }
 0x473   : > { %25616 = vmatpush3.bf16.msra.mxu0 %v31008_v19 }
 0x474   : > { %25618 = vmatprep.subr.bf16.mxu0 %v30865_v36 }
 0x477   : > { %25620 = vmatpush3.bf16.msra.mxu0 %v30865_v36 }
 0x478   : > { %25622 = vmatprep.subr.bf16.mxu0 %v30879_v54 }
 0x47b   : > { %25624 = vmatpush3.bf16.msra.mxu0 %v30879_v54 }
 0x47c   : > { %25626 = vmatprep.subr.bf16.mxu0 %v30887_v53 }
 0x47f   : > { %25628 = vmatpush3.bf16.msra.mxu0 %v30887_v53 }
 0x480   : > { %25630 = vmatprep.subr.bf16.mxu0 %v30891_v43 }
 0x482   : > { %23149 = vmatmul.mubr.f32.vlgmr.msra.gmra.mrb[4].mxu0 %v30927_v6 }
 0x483   : > { %25632 = vmatpush3.bf16.msra.mxu0 %v30891_v43  ;;  %23183 = vmatprep.mubr.f32.mxu0 %v30953_v58  ;;  %v33932_v58 = vand.u32 4294901760, %v30826_v3  ;;  %v33940_v3 = vand.u32 4294901760, %v30925_v39  ;;  %v31110_v39 = vpack.c.bf16 %v2468_v8, %v2461_v50  ;;  %v31126_v50 = vpack.c.bf16 %v33950_v26, %v33949_v60 }
 0x484   : > { %25634 = vmatprep.subr.bf16.mxu0 %v31022_v32 }
 0x485   : > { %v31075_v48 = vpack.c.bf16 %v33933_v24, %v33932_v58  ;;  %v31094_v57 = vpack.c.bf16 %v33940_v3, %v33939_v11  ;;  %33945 = vst [vmem:[#allocation63_spill] sm:$0xff] %v31110_v39  ;;  %33951 = vst [vmem:[#allocation18_spill] sm:$0xff] %v31126_v50 }
 0x487   : > { %25636 = vmatpush3.bf16.msra.mxu0 %v31022_v32  ;;  %33934 = vst [vmem:[#allocation57_spill] sm:$0xff] %v31075_v48  ;;  %33941 = vst [vmem:[#allocation60_spill] sm:$0xff] %v31094_v57 }
 0x488   : > { %25638 = vmatprep.subr.bf16.mxu0 %v31030_v17 }
 0x48b   : > { %25640 = vmatpush3.bf16.msra.mxu0 %v31030_v17 }
 0x48c   : > { %25642 = vmatprep.subr.bf16.mxu0 %v31036_v10 }
 0x48f   : > { %25644 = vmatpush3.bf16.msra.mxu0 %v31036_v10 }
 0x490   : > { %25646 = vmatprep.subr.bf16.mxu0 %v31042_v51 }
 0x493   : > { %25648 = vmatpush3.bf16.msra.mxu0 %v31042_v51 }
 0x494   : > { %25650 = vmatprep.subr.bf16.mxu0 %v30895_v29 }
 0x497   : > { %25652 = vmatpush3.bf16.msra.mxu0 %v30895_v29 }
 0x498   : > { %25654 = vmatprep.subr.bf16.mxu0 %v30899_v9 }
 0x49b   : > { %25656 = vmatpush3.bf16.msra.mxu0 %v30899_v9  ;;  %v33982_v9 = vld [vmem:[#allocation59_spill] sm:$0xff] }
 0x49c   : > { %25658 = vmatprep.subr.bf16.mxu0 %v30903_v14 }
 0x49f   : > { %25660 = vmatpush3.bf16.msra.mxu0 %v30903_v14  ;;  %v33976_v14 = vld [vmem:[#allocation80_spill] sm:$0xff] }
 0x4a0   : > { %25662 = vmatprep.subr.bf16.mxu0 %v30757_v55 }
 0x4a2   : > { %23184 = vmatmul.mubr.f32.vlgmr.msra.gmra.mrb[4].mxu0 %v30945_v1  ;;  %v33943_v1 = vand.u32 4294901760, %v30950_v23  ;;  %v33947_v23 = vand.u32 4294901760, %v30849_v25  ;;  %v33953_v25 = vand.u32 4294901760, %v30875_v37 }
 0x4a3   : > { %25664 = vmatpush3.bf16.msra.mxu0 %v30757_v55  ;;  %23218 = vmatprep.mubr.f32.mxu0 %v33931_v38  ;;  %v21672_v38 = vmul.f32 -1.442695, %v1768_v59 }
 0x4a4   : > { %25666 = vmatprep.subr.bf16.mxu0 %v30776_v28  ;;  %v31102_v61 = vpack.c.bf16 %v33943_v1, %v33942_v44  ;;  %v31118_v21 = vpack.c.bf16 %v33947_v23, %v33946_v2  ;;  %v31134_v8 = vpack.c.bf16 %v33953_v25, %v33952_v34 }
 0x4a6   : > { %33944 = vst [vmem:[#allocation62_spill] sm:$0xff] %v31102_v61  ;;  %33948 = vst [vmem:[#allocation25_spill] sm:$0xff] %v31118_v21 }
 0x4a7   : > { %25668 = vmatpush3.bf16.msra.mxu0 %v30776_v28  ;;  %33954 = vst [vmem:[#allocation19_spill] sm:$0xff] %v31134_v8 }
 0x4a8   : > { %25670 = vmatprep.subr.bf16.mxu0 %v30791_v20 }
 0x4ab   : > { %25672 = vmatpush3.bf16.msra.mxu0 %v30791_v20 }
 0x4ac   : > { %25674 = vmatprep.subr.bf16.mxu0 %v30805_v49 }
 0x4af   : > { %25676 = vmatpush3.bf16.msra.mxu0 %v30805_v49 }
 0x4b0   : > { %25678 = vmatprep.subr.bf16.mxu0 %v30815_v5 }
 0x4b3   : > { %25680 = vmatpush3.bf16.msra.mxu0 %v30815_v5 }
 0x4b4   : > { %25682 = vmatprep.subr.bf16.mxu0 %v30820_v7 }
 0x4b7   : > { %25684 = vmatpush3.bf16.msra.mxu0 %v30820_v7 }
 0x4b8   : > { %25686 = vmatprep.subr.bf16.mxu0 %v30824_v16 }
 0x4bb   : > { %25688 = vmatpush3.bf16.msra.mxu0 %v30824_v16 }
 0x4bc   : > { %25690 = vmatprep.subr.bf16.mxu0 %v30834_v63 }
 0x4bf   : > { %25692 = vmatpush3.bf16.msra.mxu0 %v30834_v63 }
 0x4c0   : > { %25694 = vmatprep.subr.bf16.mxu0 %v31075_v48 }
 0x4c2   : > { %23219 = vmatmul.mubr.f32.vlgmr.msra.gmra.mrb[4].mxu0 %v33938_v13  ;;  %v2300_v13 = vld [vmem:[%s29957_s23 + $0x8] sm:$0xff] }
 0x4c3   : > { %25696 = vmatpush3.bf16.msra.mxu0 %v31075_v48  ;;  %23253 = vmatprep.mubr.f32.mxu0 %v30935_v56  ;;  %v33975_v48 = vld [vmem:[#allocation79_spill] sm:$0xff] }
 0x4c4   : > { %25698 = vmatprep.subr.bf16.mxu0 %v31083_v4 }
 0x4c7   : > { %25700 = vmatpush3.bf16.msra.mxu0 %v31083_v4  ;;  %v33973_v4 = vld [vmem:[#allocation77_spill] sm:$0xff] }
 0x4c8   : > { %25702 = vmatprep.subr.bf16.mxu0 %v31094_v57 }
 0x4cb   : > { %25704 = vmatpush3.bf16.msra.mxu0 %v31094_v57 }
 0x4cc   : > { %25706 = vmatprep.subr.bf16.mxu0 %v31102_v61 }
 0x4cf   : > { %25708 = vmatpush3.bf16.msra.mxu0 %v31102_v61 }
 0x4d0   : > { %25710 = vmatprep.subr.bf16.mxu0 %v31110_v39 }
 0x4d3   : > { %25712 = vmatpush3.bf16.msra.mxu0 %v31110_v39 }
 0x4d4   : > { %25714 = vmatprep.subr.bf16.mxu0 %v31118_v21 }
 0x4d7   : > { %25716 = vmatpush3.bf16.msra.mxu0 %v31118_v21 }
 0x4d8   : > { %25718 = vmatprep.subr.bf16.mxu0 %v31126_v50 }
 0x4db   : > { %25720 = vmatpush3.bf16.msra.mxu0 %v31126_v50 }
 0x4dc   : > { %25722 = vmatprep.subr.bf16.mxu0 %v31134_v8 }
 0x4df   : > { %25724 = vmatpush3.bf16.msra.mxu0 %v31134_v8 }
 0x4e0   : > { %25726 = vmatprep.subr.bf16.mxu0 %v30757_v55 }
 0x4e2   : > { %23254 = vmatmul.mubr.f32.vlgmr.msra.gmra.mrb[4].mxu0 %v30927_v6 }
 0x4e3   : > { %25728 = vmatpush3.bf16.msra.mxu0 %v30757_v55  ;;  %23288 = vmatprep.mubr.f32.mxu0 %v30935_v56  ;;  %v862_v56 = vld [vmem:[%s29947_s11 + $0x18] sm:$0xff] }
 0x4e4   : > { %25730 = vmatprep.subr.bf16.mxu0 %v30776_v28  ;;  %v1770_v40 = vadd.f32 %v30747_v41, %v862_v56 }
 0x4e6   : > { %v21674_v37 = vmul.f32 -1.442695, %v1770_v40 }
 0x4e7   : > { %25732 = vmatpush3.bf16.msra.mxu0 %v30776_v28 }
 0x4e8   : > { %25734 = vmatprep.subr.bf16.mxu0 %v30791_v20  ;;  %29278 = vpow2.f32 %v21674_v37 }
 0x4e9   : > { %29280 = vpow2.f32 %v21672_v38 }
 0x4eb   : > { %25736 = vmatpush3.bf16.msra.mxu0 %v30791_v20 }
 0x4ec   : > { %25738 = vmatprep.subr.bf16.mxu0 %v30805_v49 }
 0x4ef   : > { %25740 = vmatpush3.bf16.msra.mxu0 %v30805_v49 }
 0x4f0   : > { %25742 = vmatprep.subr.bf16.mxu0 %v30815_v5 }
 0x4f2   : > { %v29279_v58 = vpop.eup %29278 }
 0x4f3   : > { %25744 = vmatpush3.bf16.msra.mxu0 %v30815_v5  ;;  %v29281_v24 = vpop.eup %29280  ;;  %v1786_v46 = vadd.f32 1.0, %v29279_v58 }
 0x4f4   : > { %25746 = vmatprep.subr.bf16.mxu0 %v30820_v7  ;;  %v1784_v30 = vadd.f32 1.0, %v29281_v24 }
 0x4f5   : > { %29282 = vrcp.f32 %v1786_v46 }
 0x4f6   : > { %29284 = vrcp.f32 %v1784_v30 }
 0x4f7   : > { %25748 = vmatpush3.bf16.msra.mxu0 %v30820_v7 }
 0x4f8   : > { %25750 = vmatprep.subr.bf16.mxu0 %v30824_v16 }
 0x4fb   : > { %25752 = vmatpush3.bf16.msra.mxu0 %v30824_v16 }
 0x4fc   : > { %25754 = vmatprep.subr.bf16.mxu0 %v30834_v63 }
 0x4ff   : > { %25756 = vmatpush3.bf16.msra.mxu0 %v30834_v63  ;;  %v29283_v15 = vpop.eup %29282 }
 0x500   : > { %v29285_v41 = vpop.eup %29284  ;;  %v2992_v2 = vsub.f32 1.0, %v29283_v15  ;;  %v2990_v34 = vmul.f32 0.0, %v29283_v15 }
 0x501   : > { %v2991_v60 = vsub.f32 1.0, %v29285_v41  ;;  %v2989_v56 = vmul.f32 0.0, %v29285_v41 }
 0x502   : > { %23289 = vmatmul.mubr.f32.vlgmr.msra.gmra.mrb[4].mxu0 %v30927_v6  ;;  %v2299_v6 = vld [vmem:[%s29957_s23] sm:$0xff] }
 0x503   : > { %23337 = vmatprep.mubr.f32.mxu0 %v33907_v12 }
 0x5d5   : > { %v23290_v11 = vpop.f32.mrb[4].mxu0 }
 0x5d6   : > { %v2986_v3 = vadd.f32 %v23290_v11, %v2300_v13  ;;  %v2975_v44 = vpop.f32.mrb[5].mxu0 }
 0x5d7   : > { %v2985_v1 = vadd.f32 %v2975_v44, %v2299_v6 }
 0x5d8   : > { %29286 = vtanh.f32 %v2986_v3 }
 0x5d9   : > { %29288 = vtanh.f32 %v2985_v1 }
 0x5e2   : > { %v29287_v23 = vpop.eup %29286 }
 0x5e3   : > { %v29289_v26 = vpop.eup %29288  ;;  %v2994_v25 = vmul.f32 %v29287_v23, %v2992_v2  ;;  %v33955_v2 = vld [vmem:[#allocation26_spill] sm:$0xff]  ;;  %v33956_v23 = vld [vmem:[#allocation27_spill] sm:$0xff] }
 0x5e4   : > { %v2993_v22 = vmul.f32 %v29289_v26, %v2991_v60  ;;  %v33957_v60 = vmov 0.0   ;;  %v33958_v26 = vld [vmem:[#allocation28_spill] sm:$0xff] }
 0x5e5   : > { %v31165_v40 = vadd.f32 %v2994_v25, %v2990_v34  ;;  %v33959_v34 = vld [vmem:[#allocation29_spill] sm:$0xff]  ;;  %v33960_v25 = vld [vmem:[#allocation30_spill] sm:$0xff] }
 0x5e6   : > { %v31167_v59 = vadd.f32 %v2993_v22, %v2989_v56  ;;  %v33961_v56 = vld [vmem:[#allocation31_spill] sm:$0xff]  ;;  %v33962_v22 = vld [vmem:[#allocation32_spill] sm:$0xff] }
 0x5e7   : > { %2998 = vst [vmem:[%s31171_s24 + $0x8] sm:$0xff] %v31165_v40  ;;  %v3003_v37 = vand.u32 4294901760, %v31165_v40 }
 0x5e8   : > { %2997 = vst [vmem:[%s31171_s24] sm:$0xff] %v31167_v59  ;;  %v3000_v38 = vand.u32 4294901760, %v31167_v59 }
 0x5e9   : > { %v3095_v58 = vsub.f32 %v31165_v40, %v3003_v37 }
 0x5ea   : > { %v25757_v24 = vpack.c.bf16 %v3003_v37, %v3000_v38  ;;  %v3088_v46 = vsub.f32 %v31167_v59, %v3000_v38  ;;  %v33963_v37 = vld [vmem:[#allocation33_spill] sm:$0xff]  ;;  %v33964_v38 = vld [vmem:[#allocation34_spill] sm:$0xff] }
 0x5eb   : > { %v3096_v30 = vand.u32 4294901760, %v3095_v58 }
 0x5ec   : > { %25758 = vmatprep.subr.bf16.mxu1 %v25757_v24  ;;  %v3089_v13 = vand.u32 4294901760, %v3088_v46  ;;  %v25765_v15 = vpack.c.bf16 %v3095_v58, %v3088_v46 }
 0x5ed   : > { %25760 = vmatpush3.bf16.msra.mxu1 %v25757_v24  ;;  %v3097_v6 = vsub.f32 %v3095_v58, %v3096_v30  ;;  %v33965_v58 = vld [vmem:[#allocation35_spill] sm:$0xff] }
 0x5ee   : > { %v3090_v11 = vsub.f32 %v3088_v46, %v3089_v13  ;;  %v25773_v41 = vpack.c.bf16 %v3096_v30, %v3089_v13  ;;  %v33967_v46 = vld [vmem:[#allocation37_spill] sm:$0xff]  ;;  %v33968_v30 = vld [vmem:[#allocation38_spill] sm:$0xff]  ;;  %v33969_v13 = vld [vmem:[#allocation40_spill] sm:$0xff] }
 0x5ef   : > { %v3098_v3 = vand.u32 4294901760, %v3097_v6  ;;  %v33970_v6 = vld [vmem:[#allocation41_spill] sm:$0xff] }
 0x5f0   : > { %23296 = vmatmul.mubr.f32.vlgmr.msra.gmra.mrb[6].mxu1 %v33908_v33  ;;  %v3091_v44 = vand.u32 4294901760, %v3090_v11  ;;  %v33971_v11 = vld [vmem:[#allocation42_spill] sm:$0xff] }
 0x5f1   : > { %23302 = vmatprep.mubr.f32.mxu1 %v33909_v0 }
 0x5f2   : > { %v25761_v1 = vpack.c.bf16 %v3098_v3, %v3091_v44  ;;  %v33972_v3 = vld [vmem:[#allocation43_spill] sm:$0xff] }
 0x5f4   : > { %25762 = vmatprep.subr.bf16.mxu1 %v25761_v1 }
 0x5f5   : > { %25764 = vmatpush3.bf16.msra.mxu1 %v25761_v1 }
 0x5f6   : > { %25766 = vmatprep.subr.bf16.mxu1 %v25765_v15 }
 0x5f8   : > { %23303 = vmatmul.mubr.f32.vlgmr.msra.gmra.mrb[6].mxu1 %v33910_v18 }
 0x5f9   : > { %25768 = vmatpush3.bf16.msra.mxu1 %v25765_v15  ;;  %23309 = vmatprep.mubr.f32.mxu1 %v33911_v52 }
 0x5fa   : > { %25770 = vmatprep.subr.bf16.mxu1 %v25757_v24 }
 0x600   : > { %23310 = vmatmul.mubr.f32.vlgmr.msra.gmra.mrb[6].mxu1 %v33912_v62 }
 0x601   : > { %25772 = vmatpush3.bf16.msra.mxu1 %v25757_v24  ;;  %23316 = vmatprep.mubr.f32.mxu1 %v33913_v27 }
 0x602   : > { %25774 = vmatprep.subr.bf16.mxu1 %v25773_v41 }
 0x608   : > { %23317 = vmatmul.mubr.f32.vlgmr.msra.gmra.mrb[6].mxu1 %v33914_v31 }
 0x609   : > { %25776 = vmatpush3.bf16.msra.mxu1 %v25773_v41  ;;  %23323 = vmatprep.mubr.f32.mxu1 %v33909_v0 }
 0x60a   : > { %25778 = vmatprep.subr.bf16.mxu1 %v25757_v24 }
 0x610   : > { %23324 = vmatmul.mubr.f32.vlgmr.msra.gmra.mrb[6].mxu1 %v33910_v18 }
 0x611   : > { %25780 = vmatpush3.bf16.msra.mxu1 %v25757_v24  ;;  %23330 = vmatprep.mubr.f32.mxu1 %v33909_v0  ;;  %v33966_v24 = vld [vmem:[#allocation36_spill] sm:$0xff] }
 0x612   : > { %25782 = vmatprep.subr.bf16.mxu1 %v33955_v2 }
 0x618   : > { %23331 = vmatmul.mubr.f32.vlgmr.msra.gmra.mrb[6].mxu1 %v33910_v18 }
 0x619   : > { %25784 = vmatpush1.bf16.msra.mxu1 %v33956_v23  ;;  %3602 = vmatprep.mubr.f32.mxu1 %v33957_v60 }
 0x61a   : > { %25786 = vmatprep.subr.bf16.mxu1 %v33958_v26 }
 0x61d   : > { %25788 = vmatpush1.bf16.msra.mxu1 %v33959_v34 }
 0x61e   : > { %25790 = vmatprep.subr.bf16.mxu1 %v33960_v25 }
 0x621   : > { %25792 = vmatpush1.bf16.msra.mxu1 %v33961_v56 }
 0x622   : > { %25794 = vmatprep.subr.bf16.mxu1 %v33962_v22 }
 0x625   : > { %25796 = vmatpush1.bf16.msra.mxu1 %v33963_v37 }
 0x626   : > { %25798 = vmatprep.subr.bf16.mxu1 %v33964_v38 }
 0x629   : > { %25800 = vmatpush1.bf16.msra.mxu1 %v33965_v58 }
 0x62a   : > { %25802 = vmatprep.subr.bf16.mxu1 %v33966_v24 }
 0x62d   : > { %25804 = vmatpush1.bf16.msra.mxu1 %v33967_v46 }
 0x62e   : > { %25806 = vmatprep.subr.bf16.mxu1 %v33968_v30 }
 0x631   : > { %25808 = vmatpush1.bf16.msra.mxu1 %v33969_v13 }
 0x632   : > { %25810 = vmatprep.subr.bf16.mxu1 %v33970_v6 }
 0x635   : > { %25812 = vmatpush1.bf16.msra.mxu1 %v33971_v11 }
 0x636   : > { %25814 = vmatprep.subr.bf16.mxu1 %v33972_v3 }
 0x6eb   : > { %v23332_v44 = vpop.f32.mrb[6].mxu1 }
 0x6ec   : > { %v31210_v1 = vand.u32 4294901760, %v23332_v44  ;;  %v3491_v15 = vpop.f32.mrb[7].mxu1 }
 0x6ed   : > { %v31212_v41 = vand.u32 4294901760, %v3491_v15 }
 0x6ee   : > { %v31215_v8 = vsub.f32 %v23332_v44, %v31210_v1  ;;  %v33974_v44 = vld [vmem:[#allocation78_spill] sm:$0xff] }
 0x6ef   : > { %v31218_v50 = vsub.f32 %v3491_v15, %v31212_v41 }
 0x6f0   : > { %v33603_v21 = vand.u32 4294901760, %v31215_v8 }
 0x6f1   : > { %v33602_v39 = vand.u32 4294901760, %v31218_v50 }
 0x6f2   : > { %v3617_v57 = vsub.f32 %v31215_v8, %v33603_v21  ;;  %v33979_v21 = vld [vmem:[#allocation83_spill] sm:$0xff] }
 0x6f3   : > { %v3606_v3 = vsub.f32 %v31218_v50, %v33602_v39  ;;  %v33978_v39 = vld [vmem:[#allocation82_spill] sm:$0xff] }
 0x6f4   : > { %v3618_v15 = vand.u32 4294901760, %v3617_v57  ;;  %v33983_v57 = vld [vmem:[#allocation61_spill] sm:$0xff] }
 0x6f5   : > { %v3607_v61 = vand.u32 4294901760, %v3606_v3  ;;  %v33977_v3 = vld [vmem:[#allocation81_spill] sm:$0xff] }
 0x6f7   : > { %3608 = vmatmul.mubr.f32.vlgmr.msra.gmra.mrb[8].mxu1 %v3607_v61  ;;  %v33980_v61 = vld [vmem:[#allocation52_spill] sm:$0xff] }
 0x6f8   : > { %25816 = vmatpush1.bf16.msra.mxu1 %v33973_v4  ;;  %3613 = vmatprep.mubr.f32.mxu1 %v33957_v60  ;;  %v33981_v4 = vld [vmem:[#allocation56_spill] sm:$0xff] }
 0x6f9   : > { %25818 = vmatprep.subr.bf16.mxu1 %v33974_v44  ;;  %v33986_v44 = vld [vmem:[#allocation66_spill] sm:$0xff] }
 0x6fb   : > { %3619 = vmatmul.mubr.f32.gmra.mrb[10].mxu1 %v3618_v15  ;;  %v33984_v15 = vld [vmem:[#allocation64_spill] sm:$0xff] }
 0x6fc   : > { %25820 = vmatpush1.bf16.msra.mxu1 %v33975_v48  ;;  %3849 = vmatprep.mubr.f32.mxu1 %v33957_v60  ;;  %v33985_v48 = vld [vmem:[#allocation65_spill] sm:$0xff] }
 0x6fd   : > { %25822 = vmatprep.subr.bf16.mxu1 %v33976_v14  ;;  %v33987_v14 = vld [vmem:[#allocation68_spill] sm:$0xff] }
 0x700   : > { %25824 = vmatpush1.bf16.msra.mxu1 %v33977_v3  ;;  %v33988_v3 = vld [vmem:[#allocation67_spill] sm:$0xff] }
 0x701   : > { %25826 = vmatprep.subr.bf16.mxu1 %v33978_v39  ;;  %v34002_v39 = vld [vmem:[#allocation75_spill] sm:$0xff] }
 0x704   : > { %25828 = vmatpush1.bf16.msra.mxu1 %v33979_v21  ;;  %v33989_v21 = vld [vmem:[#allocation84_spill] sm:$0xff] }
 0x705   : > { %25830 = vmatprep.subr.bf16.mxu1 %v33980_v61  ;;  %v34000_v61 = vld [vmem:[#allocation73_spill] sm:$0xff] }
 0x708   : > { %25832 = vmatpush1.bf16.msra.mxu1 %v33981_v4  ;;  %v33990_v4 = vld [vmem:[#allocation85_spill] sm:$0xff] }
 0x709   : > { %25834 = vmatprep.subr.bf16.mxu1 %v33982_v9  ;;  %v33998_v9 = vld [vmem:[#allocation71_spill] sm:$0xff] }
 0x70c   : > { %25836 = vmatpush1.bf16.msra.mxu1 %v33983_v57  ;;  %v33991_v57 = vld [vmem:[#allocation86_spill] sm:$0xff] }
 0x70d   : > { %25838 = vmatprep.subr.bf16.mxu1 %v33984_v15  ;;  %v33996_v15 = vld [vmem:[#allocation69_spill] sm:$0xff] }
 0x710   : > { %25840 = vmatpush1.bf16.msra.mxu1 %v33985_v48  ;;  %v33992_v48 = vld [vmem:[#allocation87_spill] sm:$0xff] }
 0x711   : > { %25842 = vmatprep.subr.bf16.mxu1 %v33986_v44  ;;  %v33993_v44 = vld [vmem:[#allocation88_spill] sm:$0xff] }
 0x714   : > { %25844 = vmatpush1.bf16.msra.mxu1 %v33987_v14  ;;  %v33994_v14 = vld [vmem:[#allocation89_spill] sm:$0xff] }
 0x715   : > { %25846 = vmatprep.subr.bf16.mxu1 %v33988_v3  ;;  %v33995_v3 = vld [vmem:[#allocation90_spill] sm:$0xff] }
 0x717   : > { %3851 = vmatmul.mubr.f32.vlgmr.msra.gmra.mrb[8].mxu1 %v31212_v41 }
 0x718   : > { %25848 = vmatpush1.bf16.msra.mxu1 %v33989_v21  ;;  %3856 = vmatprep.mubr.f32.mxu1 %v33957_v60  ;;  %v33997_v21 = vld [vmem:[#allocation70_spill] sm:$0xff] }
 0x719   : > { %25850 = vmatprep.subr.bf16.mxu1 %v33990_v4  ;;  %v33999_v4 = vld [vmem:[#allocation72_spill] sm:$0xff] }
 0x71b   : > { %3858 = vmatmul.mubr.f32.gmra.mrb[10].mxu1 %v31210_v1 }
 0x71c   : > { %25852 = vmatpush1.bf16.msra.mxu1 %v33991_v57  ;;  %3992 = vmatprep.mubr.f32.mxu1 %v33957_v60  ;;  %v34001_v57 = vld [vmem:[#allocation74_spill] sm:$0xff] }
 0x71d   : > { %25854 = vmatprep.subr.bf16.mxu1 %v33992_v48  ;;  %v34003_v48 = vld [vmem:[#allocation76_spill] sm:$0xff] }
 0x720   : > { %25856 = vmatpush1.bf16.msra.mxu1 %v33993_v44 }
 0x721   : > { %25858 = vmatprep.subr.bf16.mxu1 %v33994_v14 }
 0x724   : > { %25860 = vmatpush1.bf16.msra.mxu1 %v33995_v3  ;;  %v34020_v3 = vld [vmem:[#allocation50_spill] sm:$0xff] }
 0x725   : > { %25862 = vmatprep.subr.bf16.mxu1 %v33996_v15  ;;  %v34011_v15 = vld [vmem:[#allocation95_spill] sm:$0xff] }
 0x728   : > { %25864 = vmatpush1.bf16.msra.mxu1 %v33997_v21  ;;  %v34010_v21 = vld [vmem:[#allocation94_spill] sm:$0xff] }
 0x729   : > { %25866 = vmatprep.subr.bf16.mxu1 %v33998_v9  ;;  %v34009_v9 = vld [vmem:[#allocation93_spill] sm:$0xff] }
 0x72c   : > { %25868 = vmatpush1.bf16.msra.mxu1 %v33999_v4  ;;  %v34008_v4 = vand.u32 4294901760, %v31215_v8 }
 0x72d   : > { %25870 = vmatprep.subr.bf16.mxu1 %v34000_v61  ;;  %v34007_v61 = vld [vmem:[#allocation92_spill] sm:$0xff] }
 0x730   : > { %25872 = vmatpush1.bf16.msra.mxu1 %v34001_v57  ;;  %v34006_v57 = vld [vmem:[#allocation91_spill] sm:$0xff] }
 0x731   : > { %25874 = vmatprep.subr.bf16.mxu1 %v34002_v39  ;;  %v34005_v39 = vand.u32 4294901760, %v31218_v50 }
 0x734   : > { %25876 = vmatpush1.bf16.msra.mxu1 %v34003_v48  ;;  %v34004_v48 = vld [vmem:[#allocation39_spill] sm:$0xff] }
 0x735   : > { %25878 = vmatprep.subr.bf16.mxu1 %v33955_v2 }
 0x737   : > { %3995 = vmatmul.mubr.f32.vlgmr.msra.gmra.mrb[8].mxu1 %v31218_v50  ;;  %v34014_v50 = vld [vmem:[#allocation44_spill] sm:$0xff] }
 0x738   : > { %25880 = vmatpush1.bf16.msra.mxu1 %v33956_v23  ;;  %4000 = vmatprep.mubr.f32.mxu1 %v33957_v60 }
 0x739   : > { %25882 = vmatprep.subr.bf16.mxu1 %v33958_v26 }
 0x73b   : > { %4003 = vmatmul.mubr.f32.gmra.mrb[10].mxu1 %v31215_v8  ;;  %v34017_v8 = vld [vmem:[#allocation47_spill] sm:$0xff] }
 0x73c   : > { %25884 = vmatpush1.bf16.msra.mxu1 %v33959_v34  ;;  %4105 = vmatprep.mubr.f32.mxu1 %v33957_v60 }
 0x73d   : > { %25886 = vmatprep.subr.bf16.mxu1 %v33960_v25 }
 0x740   : > { %25888 = vmatpush1.bf16.msra.mxu1 %v33961_v56 }
 0x741   : > { %25890 = vmatprep.subr.bf16.mxu1 %v33962_v22 }
 0x744   : > { %25892 = vmatpush1.bf16.msra.mxu1 %v33963_v37 }
 0x745   : > { %25894 = vmatprep.subr.bf16.mxu1 %v33964_v38 }
 0x748   : > { %25896 = vmatpush1.bf16.msra.mxu1 %v33965_v58 }
 0x749   : > { %25898 = vmatprep.subr.bf16.mxu1 %v33966_v24 }
 0x74c   : > { %25900 = vmatpush1.bf16.msra.mxu1 %v33967_v46 }
 0x74d   : > { %25902 = vmatprep.subr.bf16.mxu1 %v33968_v30 }
 0x750   : > { %25904 = vmatpush1.bf16.msra.mxu1 %v33969_v13 }
 0x751   : > { %25906 = vmatprep.subr.bf16.mxu1 %v33970_v6 }
 0x754   : > { %25908 = vmatpush1.bf16.msra.mxu1 %v33971_v11 }
 0x755   : > { %25910 = vmatprep.subr.bf16.mxu1 %v34004_v48  ;;  %v34012_v48 = vld [vmem:[#allocation96_spill] sm:$0xff] }
 0x757   : > { %4109 = vmatmul.mubr.f32.vlgmr.msra.gmra.mrb[8].mxu1 %v34005_v39  ;;  %v34013_v39 = vld [vmem:[#allocation97_spill] sm:$0xff] }
 0x758   : > { %25912 = vmatpush1.bf16.msra.mxu1 %v34006_v57  ;;  %4114 = vmatprep.mubr.f32.mxu1 %v33957_v60  ;;  %v34015_v57 = vld [vmem:[#allocation45_spill] sm:$0xff] }
 0x759   : > { %25914 = vmatprep.subr.bf16.mxu1 %v34007_v61  ;;  %v34016_v61 = vld [vmem:[#allocation46_spill] sm:$0xff] }
 0x75b   : > { %4118 = vmatmul.mubr.f32.gmra.mrb[10].mxu1 %v34008_v4  ;;  %v34018_v4 = vld [vmem:[#allocation48_spill] sm:$0xff] }
 0x75c   : > { %25916 = vmatpush1.bf16.msra.mxu1 %v34009_v9  ;;  %4284 = vmatprep.mubr.f32.mxu1 %v33957_v60  ;;  %v34019_v9 = vld [vmem:[#allocation49_spill] sm:$0xff] }
 0x75d   : > { %25918 = vmatprep.subr.bf16.mxu1 %v34010_v21  ;;  %v34021_v21 = vld [vmem:[#allocation51_spill] sm:$0xff] }
 0x760   : > { %25920 = vmatpush1.bf16.msra.mxu1 %v34011_v15 }
 0x761   : > { %25922 = vmatprep.subr.bf16.mxu1 %v34012_v48 }
 0x764   : > { %25924 = vmatpush1.bf16.msra.mxu1 %v34013_v39 }
 0x765   : > { %25926 = vmatprep.subr.bf16.mxu1 %v34014_v50 }
 0x768   : > { %25928 = vmatpush1.bf16.msra.mxu1 %v34015_v57 }
 0x769   : > { %25930 = vmatprep.subr.bf16.mxu1 %v34016_v61 }
 0x76c   : > { %25932 = vmatpush1.bf16.msra.mxu1 %v34017_v8  ;;  %v21677_v8 = vld [vmem:[%s29947_s11 + $0x30] sm:$0xff] }
 0x76d   : > { %25934 = vmatprep.subr.bf16.mxu1 %v34018_v4 }
 0x770   : > { %25936 = vmatpush1.bf16.msra.mxu1 %v34019_v9 }
 0x771   : > { %25938 = vmatprep.subr.bf16.mxu1 %v34020_v3 }
 0x774   : > { %25940 = vmatpush1.bf16.msra.mxu1 %v34021_v21  ;;  %v21675_v21 = vld [vmem:[%s29947_s11 + $0x20] sm:$0xff] }
 0x775   : > { %25942 = vmatprep.subr.bf16.mxu1 %v33955_v2 }
 0x777   : > { %4286 = vmatmul.mubr.f32.vlgmr.msra.gmra.mrb[8].mxu1 %v31212_v41 }
 0x778   : > { %25944 = vmatpush1.bf16.msra.mxu1 %v33956_v23  ;;  %4291 = vmatprep.mubr.f32.mxu1 %v33957_v60 }
 0x779   : > { %25946 = vmatprep.subr.bf16.mxu1 %v33958_v26 }
 0x77b   : > { %4293 = vmatmul.mubr.f32.gmra.mrb[10].mxu1 %v31210_v1 }
 0x77c   : > { %25948 = vmatpush1.bf16.msra.mxu1 %v33959_v34  ;;  %4395 = vmatprep.mubr.f32.mxu1 %v33957_v60 }
 0x77d   : > { %25950 = vmatprep.subr.bf16.mxu1 %v33960_v25 }
 0x780   : > { %25952 = vmatpush1.bf16.msra.mxu1 %v33961_v56 }
 0x781   : > { %25954 = vmatprep.subr.bf16.mxu1 %v33962_v22 }
 0x784   : > { %25956 = vmatpush1.bf16.msra.mxu1 %v33963_v37 }
 0x785   : > { %25958 = vmatprep.subr.bf16.mxu1 %v33964_v38 }
 0x788   : > { %25960 = vmatpush1.bf16.msra.mxu1 %v33965_v58 }
 0x789   : > { %25962 = vmatprep.subr.bf16.mxu1 %v33966_v24 }
 0x78c   : > { %25964 = vmatpush1.bf16.msra.mxu1 %v33967_v46 }
 0x78d   : > { %25966 = vmatprep.subr.bf16.mxu1 %v33968_v30 }
 0x790   : > { %25968 = vmatpush1.bf16.msra.mxu1 %v33969_v13 }
 0x791   : > { %25970 = vmatprep.subr.bf16.mxu1 %v33970_v6 }
 0x794   : > { %25972 = vmatpush1.bf16.msra.mxu1 %v33971_v11 }
 0x797   : > { %4397 = vmatmul.mubr.f32.vlgmr.msra.gmra.mrb[8].mxu1 %v31212_v41 }
 0x798   : > { %4402 = vmatprep.mubr.f32.mxu1 %v33957_v60 }
 0x79b   : > { %4404 = vmatmul.mubr.f32.gmra.mrb[10].mxu1 %v31210_v1 }
 0x79c   : > { %23589 = vmatprep.mubr.f32.mxu1 %v33907_v12 }
 0x86a   : > { %v4398_v3 = vpop.f32.mrb[8].mxu1 }
 0x86b   : > { %v4410_v9 = vadd.f32 %v21675_v21, %v4398_v3  ;;  %v31332_v4 = vpop.f32.mrb[9].mxu1 }
 0x86d   : > { %v21679_v61 = vmul.f32 -1.442695, %v4410_v9 }
 0x86e   : > { %v4405_v57 = vpop.f32.mrb[10].mxu1 }
 0x86f   : > { %29290 = vpow2.f32 %v21679_v61  ;;  %v4412_v50 = vadd.f32 %v21677_v8, %v4405_v57  ;;  %v31335_v39 = vpop.f32.mrb[11].mxu1 }
 0x871   : > { %v21681_v48 = vmul.f32 -1.442695, %v4412_v50 }
 0x873   : > { %29292 = vpow2.f32 %v21681_v48 }
 0x879   : > { %v29291_v41 = vpop.eup %29290 }
 0x87a   : > { %v4426_v15 = vadd.f32 1.0, %v29291_v41 }
 0x87c   : > { %29294 = vrcp.f32 %v4426_v15 }
 0x87d   : > { %v29293_v1 = vpop.eup %29292 }
 0x87e   : > { %v4428_v14 = vadd.f32 1.0, %v29293_v1 }
 0x880   : > { %29296 = vrcp.f32 %v4428_v14 }
 0x886   : > { %v29295_v44 = vpop.eup %29294 }
 0x887   : > { %v4438_v21 = vmul.f32 %v29295_v44, %v31167_v59 }
 0x889   : > { %v4441_v3 = vand.u32 4294901760, %v4438_v21 }
 0x88a   : > { %v29297_v11 = vpop.eup %29296 }
 0x88b   : > { %v4439_v9 = vmul.f32 %v29297_v11, %v31165_v40  ;;  %v4529_v6 = vsub.f32 %v4438_v21, %v4441_v3 }
 0x88d   : > { %v4444_v61 = vand.u32 4294901760, %v4439_v9  ;;  %v4530_v57 = vand.u32 4294901760, %v4529_v6 }
 0x88f   : > { %v25973_v8 = vpack.c.bf16 %v4444_v61, %v4441_v3  ;;  %v4536_v13 = vsub.f32 %v4439_v9, %v4444_v61  ;;  %v4531_v48 = vsub.f32 %v4529_v6, %v4530_v57 }
 0x891   : > { %25974 = vmatprep.subr.bf16.mxu0 %v25973_v8  ;;  %v4537_v50 = vand.u32 4294901760, %v4536_v13  ;;  %v25981_v41 = vpack.c.bf16 %v4536_v13, %v4529_v6  ;;  %v4532_v14 = vand.u32 4294901760, %v4531_v48 }
 0x892   : > { %25976 = vmatpush3.bf16.msra.mxu0 %v25973_v8 }
 0x893   : > { %v4538_v15 = vsub.f32 %v4536_v13, %v4537_v50  ;;  %v25989_v1 = vpack.c.bf16 %v4537_v50, %v4530_v57 }
 0x895   : > { %23338 = vmatmul.mubr.f32.vlgmr.msra.gmra.mrb[6].mxu0 %v33908_v33  ;;  %v4539_v44 = vand.u32 4294901760, %v4538_v15  ;;  %v34023_v15 = vld [vmem:[#allocation55_spill] sm:$0xff] }
 0x896   : > { %23344 = vmatprep.mubr.f32.mxu0 %v33909_v0 }
 0x897   : > { %v25977_v30 = vpack.c.bf16 %v4539_v44, %v4532_v14  ;;  %v34025_v14 = vld [vmem:[#allocation58_spill] sm:$0xff]  ;;  %v34026_v44 = vld [vmem:[#allocation60_spill] sm:$0xff] }
 0x899   : > { %25978 = vmatprep.subr.bf16.mxu0 %v25977_v30 }
 0x89a   : > { %25980 = vmatpush3.bf16.msra.mxu0 %v25977_v30 }
 0x89b   : > { %25982 = vmatprep.subr.bf16.mxu0 %v25981_v41 }
 0x89d   : > { %23345 = vmatmul.mubr.f32.vlgmr.msra.gmra.mrb[6].mxu0 %v33910_v18 }
 0x89e   : > { %25984 = vmatpush3.bf16.msra.mxu0 %v25981_v41  ;;  %23351 = vmatprep.mubr.f32.mxu0 %v33911_v52  ;;  %v34022_v41 = vld [vmem:[#allocation54_spill] sm:$0xff] }
 0x89f   : > { %25986 = vmatprep.subr.bf16.mxu0 %v25973_v8 }
 0x8a5   : > { %23352 = vmatmul.mubr.f32.vlgmr.msra.gmra.mrb[6].mxu0 %v33912_v62 }
 0x8a6   : > { %25988 = vmatpush3.bf16.msra.mxu0 %v25973_v8  ;;  %23358 = vmatprep.mubr.f32.mxu0 %v33913_v27 }
 0x8a7   : > { %25990 = vmatprep.subr.bf16.mxu0 %v25989_v1 }
 0x8ad   : > { %23359 = vmatmul.mubr.f32.vlgmr.msra.gmra.mrb[6].mxu0 %v33914_v31 }
 0x8ae   : > { %25992 = vmatpush3.bf16.msra.mxu0 %v25989_v1  ;;  %23365 = vmatprep.mubr.f32.mxu0 %v33909_v0  ;;  %v34024_v1 = vld [vmem:[#allocation57_spill] sm:$0xff] }
 0x8af   : > { %25994 = vmatprep.subr.bf16.mxu0 %v25973_v8 }
 0x8b5   : > { %23366 = vmatmul.mubr.f32.vlgmr.msra.gmra.mrb[6].mxu0 %v33910_v18 }
 0x8b6   : > { %25996 = vmatpush3.bf16.msra.mxu0 %v25973_v8  ;;  %23372 = vmatprep.mubr.f32.mxu0 %v33909_v0 }
 0x8b7   : > { %25998 = vmatprep.subr.bf16.mxu0 %v30757_v55 }
 0x8bd   : > { %23373 = vmatmul.mubr.f32.vlgmr.msra.gmra.mrb[6].mxu0 %v33910_v18 }
 0x8be   : > { %26000 = vmatpush3.bf16.msra.mxu0 %v30757_v55 }
 0x8bf   : > { %26002 = vmatprep.subr.bf16.mxu0 %v30776_v28 }
 0x8c2   : > { %26004 = vmatpush3.bf16.msra.mxu0 %v30776_v28 }
 0x8c3   : > { %26006 = vmatprep.subr.bf16.mxu0 %v30791_v20 }
 0x8c6   : > { %26008 = vmatpush3.bf16.msra.mxu0 %v30791_v20 }
 0x8c7   : > { %26010 = vmatprep.subr.bf16.mxu0 %v30805_v49 }
 0x8ca   : > { %26012 = vmatpush3.bf16.msra.mxu0 %v30805_v49 }
 0x8cb   : > { %26014 = vmatprep.subr.bf16.mxu0 %v30815_v5 }
 0x8ce   : > { %26016 = vmatpush3.bf16.msra.mxu0 %v30815_v5 }
 0x8cf   : > { %26018 = vmatprep.subr.bf16.mxu0 %v30820_v7 }
 0x8d2   : > { %26020 = vmatpush3.bf16.msra.mxu0 %v30820_v7 }
 0x8d3   : > { %26022 = vmatprep.subr.bf16.mxu0 %v30824_v16 }
 0x8d6   : > { %26024 = vmatpush3.bf16.msra.mxu0 %v30824_v16 }
 0x8d7   : > { %26026 = vmatprep.subr.bf16.mxu0 %v30834_v63 }
 0x8da   : > { %26028 = vmatpush3.bf16.msra.mxu0 %v30834_v63 }
 0x8db   : > { %26030 = vmatprep.subr.bf16.mxu0 %v30844_v47 }
 0x990   : > { %v23374_v30 = vpop.f32.mrb[6].mxu0 }
 0x991   : > { %v31367_v13 = vand.u32 4294901760, %v23374_v30  ;;  %v4932_v6 = vpop.f32.mrb[7].mxu0 }
 0x992   : > { %v31369_v11 = vand.u32 4294901760, %v4932_v6 }
 0x993   : > { %v31372_v21 = vsub.f32 %v23374_v30, %v31367_v13  ;;  %v34027_v30 = vld [vmem:[#allocation62_spill] sm:$0xff] }
 0x994   : > { %v5027_v3 = vsub.f32 %v4932_v6, %v31369_v11  ;;  %v34028_v6 = vld [vmem:[#allocation63_spill] sm:$0xff] }
 0x995   : > { %v5038_v9 = vand.u32 4294901760, %v31372_v21 }
 0x996   : > { %v5028_v61 = vand.u32 4294901760, %v5027_v3 }
 0x997   : > { %v5039_v57 = vsub.f32 %v31372_v21, %v5038_v9 }
 0x998   : > { %v5029_v8 = vsub.f32 %v5027_v3, %v5028_v61 }
 0x999   : > { %v5040_v50 = vand.u32 4294901760, %v5039_v57 }
 0x99a   : > { %v5030_v48 = vand.u32 4294901760, %v5029_v8 }
 0x99c   : > { %23407 = vmatprep.mubr.f32.mxu0 %v5030_v48 }
 0x99d   : > { %23408 = vmatmul.mubr.f32.vlgmr.msra.gmra.mrb[8].mxu0 %v5040_v50 }
 0x99e   : > { %26032 = vmatpush3.bf16.msra.mxu0 %v30844_v47  ;;  %23442 = vmatprep.mubr.f32.mxu0 %v31369_v11 }
 0x99f   : > { %26034 = vmatprep.subr.bf16.mxu0 %v30981_v42 }
 0x9a2   : > { %26036 = vmatpush3.bf16.msra.mxu0 %v30981_v42 }
 0x9a3   : > { %26038 = vmatprep.subr.bf16.mxu0 %v30993_v45 }
 0x9a6   : > { %26040 = vmatpush3.bf16.msra.mxu0 %v30993_v45 }
 0x9a7   : > { %26042 = vmatprep.subr.bf16.mxu0 %v31004_v35 }
 0x9aa   : > { %26044 = vmatpush3.bf16.msra.mxu0 %v31004_v35 }
 0x9ab   : > { %26046 = vmatprep.subr.bf16.mxu0 %v31008_v19 }
 0x9ae   : > { %26048 = vmatpush3.bf16.msra.mxu0 %v31008_v19 }
 0x9af   : > { %26050 = vmatprep.subr.bf16.mxu0 %v30865_v36 }
 0x9b2   : > { %26052 = vmatpush3.bf16.msra.mxu0 %v30865_v36 }
 0x9b3   : > { %26054 = vmatprep.subr.bf16.mxu0 %v30879_v54 }
 0x9b6   : > { %26056 = vmatpush3.bf16.msra.mxu0 %v30879_v54 }
 0x9b7   : > { %26058 = vmatprep.subr.bf16.mxu0 %v30887_v53 }
 0x9ba   : > { %26060 = vmatpush3.bf16.msra.mxu0 %v30887_v53 }
 0x9bb   : > { %26062 = vmatprep.subr.bf16.mxu0 %v30891_v43 }
 0x9bd   : > { %23443 = vmatmul.mubr.f32.vlgmr.msra.gmra.mrb[8].mxu0 %v31367_v13 }
 0x9be   : > { %26064 = vmatpush3.bf16.msra.mxu0 %v30891_v43  ;;  %23477 = vmatprep.mubr.f32.mxu0 %v5027_v3  ;;  %v34030_v3 = vld [vmem:[#allocation18_spill] sm:$0xff] }
 0x9bf   : > { %26066 = vmatprep.subr.bf16.mxu0 %v31022_v32 }
 0x9c2   : > { %26068 = vmatpush3.bf16.msra.mxu0 %v31022_v32 }
 0x9c3   : > { %26070 = vmatprep.subr.bf16.mxu0 %v31030_v17 }
 0x9c6   : > { %26072 = vmatpush3.bf16.msra.mxu0 %v31030_v17 }
 0x9c7   : > { %26074 = vmatprep.subr.bf16.mxu0 %v31036_v10 }
 0x9ca   : > { %26076 = vmatpush3.bf16.msra.mxu0 %v31036_v10 }
 0x9cb   : > { %26078 = vmatprep.subr.bf16.mxu0 %v31042_v51 }
 0x9ce   : > { %26080 = vmatpush3.bf16.msra.mxu0 %v31042_v51 }
 0x9cf   : > { %26082 = vmatprep.subr.bf16.mxu0 %v30895_v29 }
 0x9d2   : > { %26084 = vmatpush3.bf16.msra.mxu0 %v30895_v29 }
 0x9d3   : > { %26086 = vmatprep.subr.bf16.mxu0 %v34022_v41 }
 0x9d6   : > { %26088 = vmatpush3.bf16.msra.mxu0 %v34022_v41  ;;  %v34046_v41 = vld [vmem:[#allocation59_spill] sm:$0xff] }
 0x9d7   : > { %26090 = vmatprep.subr.bf16.mxu0 %v34023_v15 }
 0x9da   : > { %26092 = vmatpush3.bf16.msra.mxu0 %v34023_v15 }
 0x9db   : > { %26094 = vmatprep.subr.bf16.mxu0 %v30757_v55 }
 0x9dd   : > { %23478 = vmatmul.mubr.f32.vlgmr.msra.gmra.mrb[8].mxu0 %v31372_v21  ;;  %v34029_v21 = vld [vmem:[#allocation25_spill] sm:$0xff] }
 0x9de   : > { %26096 = vmatpush3.bf16.msra.mxu0 %v30757_v55  ;;  %23512 = vmatprep.mubr.f32.mxu0 %v5028_v61  ;;  %v21676_v61 = vld [vmem:[%s29947_s11 + $0x28] sm:$0xff] }
 0x9df   : > { %26098 = vmatprep.subr.bf16.mxu0 %v30776_v28  ;;  %v4411_v8 = vadd.f32 %v21676_v61, %v31332_v4 }
 0x9e1   : > { %v21680_v50 = vmul.f32 -1.442695, %v4411_v8 }
 0x9e2   : > { %26100 = vmatpush3.bf16.msra.mxu0 %v30776_v28 }
 0x9e3   : > { %26102 = vmatprep.subr.bf16.mxu0 %v30791_v20 }
 0x9e6   : > { %26104 = vmatpush3.bf16.msra.mxu0 %v30791_v20 }
 0x9e7   : > { %26106 = vmatprep.subr.bf16.mxu0 %v30805_v49 }
 0x9ea   : > { %26108 = vmatpush3.bf16.msra.mxu0 %v30805_v49 }
 0x9eb   : > { %26110 = vmatprep.subr.bf16.mxu0 %v30815_v5 }
 0x9ee   : > { %26112 = vmatpush3.bf16.msra.mxu0 %v30815_v5 }
 0x9ef   : > { %26114 = vmatprep.subr.bf16.mxu0 %v30820_v7 }
 0x9f2   : > { %26116 = vmatpush3.bf16.msra.mxu0 %v30820_v7 }
 0x9f3   : > { %26118 = vmatprep.subr.bf16.mxu0 %v30824_v16 }
 0x9f6   : > { %26120 = vmatpush3.bf16.msra.mxu0 %v30824_v16 }
 0x9f7   : > { %26122 = vmatprep.subr.bf16.mxu0 %v30834_v63 }
 0x9fa   : > { %26124 = vmatpush3.bf16.msra.mxu0 %v30834_v63 }
 0x9fb   : > { %26126 = vmatprep.subr.bf16.mxu0 %v34024_v1 }
 0x9fd   : > { %23513 = vmatmul.mubr.f32.vlgmr.msra.gmra.mrb[8].mxu0 %v5038_v9  ;;  %v34031_v9 = vld [vmem:[#allocation19_spill] sm:$0xff] }
 0x9fe   : > { %26128 = vmatpush3.bf16.msra.mxu0 %v34024_v1  ;;  %23547 = vmatprep.mubr.f32.mxu0 %v31369_v11 }
 0x9ff   : > { %26130 = vmatprep.subr.bf16.mxu0 %v34025_v14 }
 0xa02   : > { %26132 = vmatpush3.bf16.msra.mxu0 %v34025_v14 }
 0xa03   : > { %26134 = vmatprep.subr.bf16.mxu0 %v34026_v44 }
 0xa06   : > { %26136 = vmatpush3.bf16.msra.mxu0 %v34026_v44 }
 0xa07   : > { %26138 = vmatprep.subr.bf16.mxu0 %v34027_v30 }
 0xa0a   : > { %26140 = vmatpush3.bf16.msra.mxu0 %v34027_v30  ;;  %v21684_v30 = vld [vmem:[%s29957_s23 + $0x18] sm:$0xff] }
 0xa0b   : > { %26142 = vmatprep.subr.bf16.mxu0 %v34028_v6 }
 0xa0e   : > { %26144 = vmatpush3.bf16.msra.mxu0 %v34028_v6 }
 0xa0f   : > { %26146 = vmatprep.subr.bf16.mxu0 %v34029_v21 }
 0xa12   : > { %26148 = vmatpush3.bf16.msra.mxu0 %v34029_v21 }
 0xa13   : > { %26150 = vmatprep.subr.bf16.mxu0 %v34030_v3 }
 0xa16   : > { %26152 = vmatpush3.bf16.msra.mxu0 %v34030_v3 }
 0xa17   : > { %26154 = vmatprep.subr.bf16.mxu0 %v34031_v9 }
 0xa1a   : > { %26156 = vmatpush3.bf16.msra.mxu0 %v34031_v9 }
 0xa1b   : > { %26158 = vmatprep.subr.bf16.mxu0 %v30757_v55 }
 0xa1d   : > { %23548 = vmatmul.mubr.f32.vlgmr.msra.gmra.mrb[8].mxu0 %v31367_v13 }
 0xa1e   : > { %26160 = vmatpush3.bf16.msra.mxu0 %v30757_v55  ;;  %23582 = vmatprep.mubr.f32.mxu0 %v31369_v11  ;;  %v21678_v11 = vld [vmem:[%s29947_s11 + $0x38] sm:$0xff] }
 0xa1f   : > { %26162 = vmatprep.subr.bf16.mxu0 %v30776_v28  ;;  %v4413_v57 = vadd.f32 %v21678_v11, %v31335_v39 }
 0xa21   : > { %v21682_v48 = vmul.f32 -1.442695, %v4413_v57 }
 0xa22   : > { %26164 = vmatpush3.bf16.msra.mxu0 %v30776_v28 }
 0xa23   : > { %26166 = vmatprep.subr.bf16.mxu0 %v30791_v20  ;;  %29298 = vpow2.f32 %v21682_v48 }
 0xa24   : > { %29300 = vpow2.f32 %v21680_v50 }
 0xa26   : > { %26168 = vmatpush3.bf16.msra.mxu0 %v30791_v20 }
 0xa27   : > { %26170 = vmatprep.subr.bf16.mxu0 %v30805_v49 }
 0xa2a   : > { %26172 = vmatpush3.bf16.msra.mxu0 %v30805_v49 }
 0xa2b   : > { %26174 = vmatprep.subr.bf16.mxu0 %v30815_v5 }
 0xa2d   : > { %v29299_v9 = vpop.eup %29298 }
 0xa2e   : > { %26176 = vmatpush3.bf16.msra.mxu0 %v30815_v5  ;;  %v29301_v3 = vpop.eup %29300  ;;  %v4429_v21 = vadd.f32 1.0, %v29299_v9 }
 0xa2f   : > { %26178 = vmatprep.subr.bf16.mxu0 %v30820_v7  ;;  %v4427_v6 = vadd.f32 1.0, %v29301_v3 }
 0xa30   : > { %29302 = vrcp.f32 %v4429_v21 }
 0xa31   : > { %29304 = vrcp.f32 %v4427_v6 }
 0xa32   : > { %26180 = vmatpush3.bf16.msra.mxu0 %v30820_v7 }
 0xa33   : > { %26182 = vmatprep.subr.bf16.mxu0 %v30824_v16 }
 0xa36   : > { %26184 = vmatpush3.bf16.msra.mxu0 %v30824_v16 }
 0xa37   : > { %26186 = vmatprep.subr.bf16.mxu0 %v30834_v63 }
 0xa3a   : > { %26188 = vmatpush3.bf16.msra.mxu0 %v30834_v63  ;;  %v29303_v39 = vpop.eup %29302 }
 0xa3b   : > { %v29305_v4 = vpop.eup %29304  ;;  %v5636_v11 = vsub.f32 1.0, %v29303_v39  ;;  %v5634_v3 = vmul.f32 %v29303_v39, %v31165_v40 }
 0xa3c   : > { %v5635_v57 = vsub.f32 1.0, %v29305_v4  ;;  %v5633_v21 = vmul.f32 %v29305_v4, %v31167_v59 }
 0xa3d   : > { %23583 = vmatmul.mubr.f32.vlgmr.msra.gmra.mrb[8].mxu0 %v31367_v13  ;;  %v21683_v13 = vld [vmem:[%s29957_s23 + $0x10] sm:$0xff] }
 0xa3e   : > { %23631 = vmatprep.mubr.f32.mxu0 %v33907_v12 }
 0xb10   : > { %v23584_v44 = vpop.f32.mrb[8].mxu0 }
 0xb11   : > { %v5630_v14 = vadd.f32 %v23584_v44, %v21684_v30  ;;  %v5619_v1 = vpop.f32.mrb[9].mxu0 }
 0xb12   : > { %v5629_v15 = vadd.f32 %v21683_v13, %v5619_v1 }
 0xb13   : > { %29306 = vtanh.f32 %v5630_v14 }
 0xb14   : > { %29308 = vtanh.f32 %v5629_v15 }
 0xb1d   : > { %v29307_v61 = vpop.eup %29306 }
 0xb1e   : > { %v29309_v8 = vpop.eup %29308  ;;  %v5638_v9 = vmul.f32 %v29307_v61, %v5636_v11 }
 0xb1f   : > { %v5637_v6 = vmul.f32 %v29309_v8, %v5635_v57 }
 0xb20   : > { %v31472_v48 = vadd.f32 %v5638_v9, %v5634_v3  ;;  %v34032_v3 = vld [vmem:[#allocation38_spill] sm:$0xff]  ;;  %v34033_v9 = vld [vmem:[#allocation40_spill] sm:$0xff] }
 0xb21   : > { %v31474_v44 = vadd.f32 %v5637_v6, %v5633_v21  ;;  %v34034_v21 = vld [vmem:[#allocation41_spill] sm:$0xff]  ;;  %v34035_v6 = vld [vmem:[#allocation42_spill] sm:$0xff] }
 0xb22   : > { %21686 = vst [vmem:[%s31171_s24 + $0x18] sm:$0xff] %v31472_v48  ;;  %v5648_v15 = vand.u32 4294901760, %v31472_v48 }
 0xb23   : > { %21685 = vst [vmem:[%s31171_s24 + $0x10] sm:$0xff] %v31474_v44  ;;  %v5645_v1 = vand.u32 4294901760, %v31474_v44 }
 0xb24   : > { %v5740_v14 = vsub.f32 %v31472_v48, %v5648_v15 }
 0xb25   : > { %v26189_v30 = vpack.c.bf16 %v5648_v15, %v5645_v1  ;;  %v5733_v40 = vsub.f32 %v31474_v44, %v5645_v1  ;;  %v34036_v15 = vld [vmem:[#allocation43_spill] sm:$0xff] }
 0xb26   : > { %v5741_v50 = vand.u32 4294901760, %v5740_v14 }
 0xb27   : > { %26190 = vmatprep.subr.bf16.mxu1 %v26189_v30  ;;  %v5734_v59 = vand.u32 4294901760, %v5733_v40  ;;  %v26197_v57 = vpack.c.bf16 %v5740_v14, %v5733_v40 }
 0xb28   : > { %26192 = vmatpush3.bf16.msra.mxu1 %v26189_v30  ;;  %v5742_v13 = vsub.f32 %v5740_v14, %v5741_v50 }
 0xb29   : > { %v5735_v39 = vsub.f32 %v5733_v40, %v5734_v59  ;;  %v26205_v8 = vpack.c.bf16 %v5741_v50, %v5734_v59 }
 0xb2a   : > { %v5743_v4 = vand.u32 4294901760, %v5742_v13 }
 0xb2b   : > { %23590 = vmatmul.mubr.f32.vlgmr.msra.gmra.mrb[12].mxu1 %v33908_v33  ;;  %v5736_v11 = vand.u32 4294901760, %v5735_v39 }
 0xb2c   : > { %23596 = vmatprep.mubr.f32.mxu1 %v33909_v0 }
 0xb2d   : > { %v26193_v61 = vpack.c.bf16 %v5743_v4, %v5736_v11 }
 0xb2f   : > { %26194 = vmatprep.subr.bf16.mxu1 %v26193_v61 }
 0xb30   : > { %26196 = vmatpush3.bf16.msra.mxu1 %v26193_v61 }
 0xb31   : > { %26198 = vmatprep.subr.bf16.mxu1 %v26197_v57 }
 0xb33   : > { %23597 = vmatmul.mubr.f32.vlgmr.msra.gmra.mrb[12].mxu1 %v33910_v18 }
 0xb34   : > { %26200 = vmatpush3.bf16.msra.mxu1 %v26197_v57  ;;  %23603 = vmatprep.mubr.f32.mxu1 %v33911_v52  ;;  %v34037_v57 = vld [vmem:[#allocation77_spill] sm:$0xff] }
 0xb35   : > { %26202 = vmatprep.subr.bf16.mxu1 %v26189_v30 }
 0xb3b   : > { %23604 = vmatmul.mubr.f32.vlgmr.msra.gmra.mrb[12].mxu1 %v33912_v62 }
 0xb3c   : > { %26204 = vmatpush3.bf16.msra.mxu1 %v26189_v30  ;;  %23610 = vmatprep.mubr.f32.mxu1 %v33913_v27 }
 0xb3d   : > { %26206 = vmatprep.subr.bf16.mxu1 %v26205_v8 }
 0xb43   : > { %23611 = vmatmul.mubr.f32.vlgmr.msra.gmra.mrb[12].mxu1 %v33914_v31 }
 0xb44   : > { %26208 = vmatpush3.bf16.msra.mxu1 %v26205_v8  ;;  %23617 = vmatprep.mubr.f32.mxu1 %v33909_v0  ;;  %v34038_v8 = vld [vmem:[#allocation78_spill] sm:$0xff] }
 0xb45   : > { %26210 = vmatprep.subr.bf16.mxu1 %v26189_v30 }
 0xb4b   : > { %23618 = vmatmul.mubr.f32.vlgmr.msra.gmra.mrb[12].mxu1 %v33910_v18 }
 0xb4c   : > { %26212 = vmatpush3.bf16.msra.mxu1 %v26189_v30  ;;  %23624 = vmatprep.mubr.f32.mxu1 %v33909_v0 }
 0xb4d   : > { %26214 = vmatprep.subr.bf16.mxu1 %v33955_v2 }
 0xb53   : > { %23625 = vmatmul.mubr.f32.vlgmr.msra.gmra.mrb[12].mxu1 %v33910_v18 }
 0xb54   : > { %26216 = vmatpush1.bf16.msra.mxu1 %v33956_v23  ;;  %6247 = vmatprep.mubr.f32.mxu1 %v33957_v60 }
 0xb55   : > { %26218 = vmatprep.subr.bf16.mxu1 %v33958_v26 }
 0xb58   : > { %26220 = vmatpush1.bf16.msra.mxu1 %v33959_v34 }
 0xb59   : > { %26222 = vmatprep.subr.bf16.mxu1 %v33960_v25 }
 0xb5c   : > { %26224 = vmatpush1.bf16.msra.mxu1 %v33961_v56 }
 0xb5d   : > { %26226 = vmatprep.subr.bf16.mxu1 %v33962_v22 }
 0xb60   : > { %26228 = vmatpush1.bf16.msra.mxu1 %v33963_v37 }
 0xb61   : > { %26230 = vmatprep.subr.bf16.mxu1 %v33964_v38 }
 0xb64   : > { %26232 = vmatpush1.bf16.msra.mxu1 %v33965_v58 }
 0xb65   : > { %26234 = vmatprep.subr.bf16.mxu1 %v33966_v24 }
 0xb68   : > { %26236 = vmatpush1.bf16.msra.mxu1 %v33967_v46 }
 0xb69   : > { %26238 = vmatprep.subr.bf16.mxu1 %v34032_v3 }
 0xb6c   : > { %26240 = vmatpush1.bf16.msra.mxu1 %v34033_v9 }
 0xb6d   : > { %26242 = vmatprep.subr.bf16.mxu1 %v34034_v21 }
 0xb70   : > { %26244 = vmatpush1.bf16.msra.mxu1 %v34035_v6 }
 0xb71   : > { %26246 = vmatprep.subr.bf16.mxu1 %v34036_v15  ;;  %v34040_v15 = vld [vmem:[#allocation80_spill] sm:$0xff] }
 0xc26   : > { %v23626_v1 = vpop.f32.mrb[12].mxu1 }
 0xc27   : > { %v31513_v14 = vand.u32 4294901760, %v23626_v1  ;;  %v6136_v30 = vpop.f32.mrb[13].mxu1 }
 0xc28   : > { %v31515_v40 = vand.u32 4294901760, %v6136_v30 }
 0xc29   : > { %v31518_v50 = vsub.f32 %v23626_v1, %v31513_v14 }
 0xc2a   : > { %v31521_v59 = vsub.f32 %v6136_v30, %v31515_v40  ;;  %v34039_v30 = vld [vmem:[#allocation79_spill] sm:$0xff] }
 0xc2b   : > { %v33620_v13 = vand.u32 4294901760, %v31518_v50 }
 0xc2c   : > { %v33619_v39 = vand.u32 4294901760, %v31521_v59 }
 0xc2d   : > { %v6262_v61 = vsub.f32 %v31518_v50, %v33620_v13  ;;  %v34043_v13 = vld [vmem:[#allocation83_spill] sm:$0xff] }
 0xc2e   : > { %v6251_v4 = vsub.f32 %v31521_v59, %v33619_v39  ;;  %v34042_v39 = vld [vmem:[#allocation82_spill] sm:$0xff] }
 0xc2f   : > { %v6263_v1 = vand.u32 4294901760, %v6262_v61  ;;  %v34047_v61 = vld [vmem:[#allocation61_spill] sm:$0xff] }
 0xc30   : > { %v6252_v11 = vand.u32 4294901760, %v6251_v4  ;;  %v34041_v4 = vld [vmem:[#allocation81_spill] sm:$0xff] }
 0xc32   : > { %6253 = vmatmul.mubr.f32.vlgmr.msra.gmra.mrb[14].mxu1 %v6252_v11  ;;  %v34044_v11 = vld [vmem:[#allocation52_spill] sm:$0xff] }
 0xc33   : > { %26248 = vmatpush1.bf16.msra.mxu1 %v34037_v57  ;;  %6258 = vmatprep.mubr.f32.mxu1 %v33957_v60  ;;  %v34045_v57 = vld [vmem:[#allocation56_spill] sm:$0xff] }
 0xc34   : > { %26250 = vmatprep.subr.bf16.mxu1 %v34038_v8  ;;  %v34050_v8 = vld [vmem:[#allocation66_spill] sm:$0xff] }
 0xc36   : > { %6264 = vmatmul.mubr.f32.gmra.mrb[16].mxu1 %v6263_v1  ;;  %v34048_v1 = vld [vmem:[#allocation64_spill] sm:$0xff] }
 0xc37   : > { %26252 = vmatpush1.bf16.msra.mxu1 %v34039_v30  ;;  %6494 = vmatprep.mubr.f32.mxu1 %v33957_v60  ;;  %v34049_v30 = vld [vmem:[#allocation65_spill] sm:$0xff] }
 0xc38   : > { %26254 = vmatprep.subr.bf16.mxu1 %v34040_v15  ;;  %v34051_v15 = vld [vmem:[#allocation68_spill] sm:$0xff] }
 0xc3b   : > { %26256 = vmatpush1.bf16.msra.mxu1 %v34041_v4  ;;  %v34052_v4 = vld [vmem:[#allocation67_spill] sm:$0xff] }
 0xc3c   : > { %26258 = vmatprep.subr.bf16.mxu1 %v34042_v39  ;;  %v34066_v39 = vld [vmem:[#allocation75_spill] sm:$0xff] }
 0xc3f   : > { %26260 = vmatpush1.bf16.msra.mxu1 %v34043_v13  ;;  %v34053_v13 = vld [vmem:[#allocation84_spill] sm:$0xff] }
 0xc40   : > { %26262 = vmatprep.subr.bf16.mxu1 %v34044_v11  ;;  %v34064_v11 = vld [vmem:[#allocation73_spill] sm:$0xff] }
 0xc43   : > { %26264 = vmatpush1.bf16.msra.mxu1 %v34045_v57  ;;  %v34054_v57 = vld [vmem:[#allocation85_spill] sm:$0xff] }
 0xc44   : > { %26266 = vmatprep.subr.bf16.mxu1 %v34046_v41  ;;  %v34062_v41 = vld [vmem:[#allocation71_spill] sm:$0xff] }
 0xc47   : > { %26268 = vmatpush1.bf16.msra.mxu1 %v34047_v61  ;;  %v34055_v61 = vld [vmem:[#allocation86_spill] sm:$0xff] }
 0xc48   : > { %26270 = vmatprep.subr.bf16.mxu1 %v34048_v1  ;;  %v34060_v1 = vld [vmem:[#allocation69_spill] sm:$0xff] }
 0xc4b   : > { %26272 = vmatpush1.bf16.msra.mxu1 %v34049_v30  ;;  %v34056_v30 = vld [vmem:[#allocation87_spill] sm:$0xff] }
 0xc4c   : > { %26274 = vmatprep.subr.bf16.mxu1 %v34050_v8  ;;  %v34057_v8 = vld [vmem:[#allocation88_spill] sm:$0xff] }
 0xc4f   : > { %26276 = vmatpush1.bf16.msra.mxu1 %v34051_v15  ;;  %v34058_v15 = vld [vmem:[#allocation89_spill] sm:$0xff] }
 0xc50   : > { %26278 = vmatprep.subr.bf16.mxu1 %v34052_v4  ;;  %v34059_v4 = vld [vmem:[#allocation90_spill] sm:$0xff] }
 0xc52   : > { %6496 = vmatmul.mubr.f32.vlgmr.msra.gmra.mrb[14].mxu1 %v31515_v40 }
 0xc53   : > { %26280 = vmatpush1.bf16.msra.mxu1 %v34053_v13  ;;  %6501 = vmatprep.mubr.f32.mxu1 %v33957_v60  ;;  %v34061_v13 = vld [vmem:[#allocation70_spill] sm:$0xff] }
 0xc54   : > { %26282 = vmatprep.subr.bf16.mxu1 %v34054_v57  ;;  %v34063_v57 = vld [vmem:[#allocation72_spill] sm:$0xff] }
 0xc56   : > { %6503 = vmatmul.mubr.f32.gmra.mrb[16].mxu1 %v31513_v14 }
 0xc57   : > { %26284 = vmatpush1.bf16.msra.mxu1 %v34055_v61  ;;  %6637 = vmatprep.mubr.f32.mxu1 %v33957_v60  ;;  %v34065_v61 = vld [vmem:[#allocation74_spill] sm:$0xff] }
 0xc58   : > { %26286 = vmatprep.subr.bf16.mxu1 %v34056_v30  ;;  %v34067_v30 = vld [vmem:[#allocation76_spill] sm:$0xff] }
 0xc5b   : > { %26288 = vmatpush1.bf16.msra.mxu1 %v34057_v8 }
 0xc5c   : > { %26290 = vmatprep.subr.bf16.mxu1 %v34058_v15 }
 0xc5f   : > { %26292 = vmatpush1.bf16.msra.mxu1 %v34059_v4  ;;  %v34084_v4 = vld [vmem:[#allocation50_spill] sm:$0xff] }
 0xc60   : > { %26294 = vmatprep.subr.bf16.mxu1 %v34060_v1  ;;  %v34075_v1 = vld [vmem:[#allocation95_spill] sm:$0xff] }
 0xc63   : > { %26296 = vmatpush1.bf16.msra.mxu1 %v34061_v13  ;;  %v34074_v13 = vld [vmem:[#allocation94_spill] sm:$0xff] }
 0xc64   : > { %26298 = vmatprep.subr.bf16.mxu1 %v34062_v41  ;;  %v34073_v41 = vld [vmem:[#allocation93_spill] sm:$0xff] }
 0xc67   : > { %26300 = vmatpush1.bf16.msra.mxu1 %v34063_v57  ;;  %v34072_v57 = vand.u32 4294901760, %v31518_v50 }
 0xc68   : > { %26302 = vmatprep.subr.bf16.mxu1 %v34064_v11  ;;  %v34071_v11 = vld [vmem:[#allocation92_spill] sm:$0xff] }
 0xc6b   : > { %26304 = vmatpush1.bf16.msra.mxu1 %v34065_v61  ;;  %v34070_v61 = vld [vmem:[#allocation91_spill] sm:$0xff] }
 0xc6c   : > { %26306 = vmatprep.subr.bf16.mxu1 %v34066_v39  ;;  %v34069_v39 = vand.u32 4294901760, %v31521_v59 }
 0xc6f   : > { %26308 = vmatpush1.bf16.msra.mxu1 %v34067_v30  ;;  %v34068_v30 = vld [vmem:[#allocation39_spill] sm:$0xff] }
 0xc70   : > { %26310 = vmatprep.subr.bf16.mxu1 %v33955_v2 }
 0xc72   : > { %6640 = vmatmul.mubr.f32.vlgmr.msra.gmra.mrb[14].mxu1 %v31521_v59  ;;  %v34077_v59 = vld [vmem:[#allocation97_spill] sm:$0xff] }
 0xc73   : > { %26312 = vmatpush1.bf16.msra.mxu1 %v33956_v23  ;;  %6645 = vmatprep.mubr.f32.mxu1 %v33957_v60 }
 0xc74   : > { %26314 = vmatprep.subr.bf16.mxu1 %v33958_v26 }
 0xc76   : > { %6648 = vmatmul.mubr.f32.gmra.mrb[16].mxu1 %v31518_v50  ;;  %v34081_v50 = vld [vmem:[#allocation47_spill] sm:$0xff] }
 0xc77   : > { %26316 = vmatpush1.bf16.msra.mxu1 %v33959_v34  ;;  %6750 = vmatprep.mubr.f32.mxu1 %v33957_v60 }
 0xc78   : > { %26318 = vmatprep.subr.bf16.mxu1 %v33960_v25 }
 0xc7b   : > { %26320 = vmatpush1.bf16.msra.mxu1 %v33961_v56 }
 0xc7c   : > { %26322 = vmatprep.subr.bf16.mxu1 %v33962_v22 }
 0xc7f   : > { %26324 = vmatpush1.bf16.msra.mxu1 %v33963_v37 }
 0xc80   : > { %26326 = vmatprep.subr.bf16.mxu1 %v33964_v38 }
 0xc83   : > { %26328 = vmatpush1.bf16.msra.mxu1 %v33965_v58 }
 0xc84   : > { %26330 = vmatprep.subr.bf16.mxu1 %v33966_v24 }
 0xc87   : > { %26332 = vmatpush1.bf16.msra.mxu1 %v33967_v46 }
 0xc88   : > { %26334 = vmatprep.subr.bf16.mxu1 %v34032_v3 }
 0xc8b   : > { %26336 = vmatpush1.bf16.msra.mxu1 %v34033_v9 }
 0xc8c   : > { %26338 = vmatprep.subr.bf16.mxu1 %v34034_v21 }
 0xc8f   : > { %26340 = vmatpush1.bf16.msra.mxu1 %v34035_v6 }
 0xc90   : > { %26342 = vmatprep.subr.bf16.mxu1 %v34068_v30  ;;  %v34076_v30 = vld [vmem:[#allocation96_spill] sm:$0xff] }
 0xc92   : > { %6754 = vmatmul.mubr.f32.vlgmr.msra.gmra.mrb[14].mxu1 %v34069_v39  ;;  %v34078_v39 = vld [vmem:[#allocation44_spill] sm:$0xff] }
 0xc93   : > { %26344 = vmatpush1.bf16.msra.mxu1 %v34070_v61  ;;  %6759 = vmatprep.mubr.f32.mxu1 %v33957_v60  ;;  %v34079_v61 = vld [vmem:[#allocation45_spill] sm:$0xff] }
 0xc94   : > { %26346 = vmatprep.subr.bf16.mxu1 %v34071_v11  ;;  %v34080_v11 = vld [vmem:[#allocation46_spill] sm:$0xff] }
 0xc96   : > { %6763 = vmatmul.mubr.f32.gmra.mrb[16].mxu1 %v34072_v57  ;;  %v34082_v57 = vld [vmem:[#allocation48_spill] sm:$0xff] }
 0xc97   : > { %26348 = vmatpush1.bf16.msra.mxu1 %v34073_v41  ;;  %6929 = vmatprep.mubr.f32.mxu1 %v33957_v60  ;;  %v34083_v41 = vld [vmem:[#allocation49_spill] sm:$0xff] }
 0xc98   : > { %26350 = vmatprep.subr.bf16.mxu1 %v34074_v13  ;;  %v34085_v13 = vld [vmem:[#allocation51_spill] sm:$0xff] }
 0xc9b   : > { %26352 = vmatpush1.bf16.msra.mxu1 %v34075_v1 }
 0xc9c   : > { %26354 = vmatprep.subr.bf16.mxu1 %v34076_v30 }
 0xc9f   : > { %26356 = vmatpush1.bf16.msra.mxu1 %v34077_v59 }
 0xca0   : > { %26358 = vmatprep.subr.bf16.mxu1 %v34078_v39 }
 0xca3   : > { %26360 = vmatpush1.bf16.msra.mxu1 %v34079_v61 }
 0xca4   : > { %26362 = vmatprep.subr.bf16.mxu1 %v34080_v11 }
 0xca7   : > { %26364 = vmatpush1.bf16.msra.mxu1 %v34081_v50  ;;  %v21689_v50 = vld [vmem:[%s29947_s11 + $0x50] sm:$0xff] }
 0xca8   : > { %26366 = vmatprep.subr.bf16.mxu1 %v34082_v57 }
 0xcab   : > { %26368 = vmatpush1.bf16.msra.mxu1 %v34083_v41 }
 0xcac   : > { %26370 = vmatprep.subr.bf16.mxu1 %v34084_v4 }
 0xcaf   : > { %26372 = vmatpush1.bf16.msra.mxu1 %v34085_v13  ;;  %v21687_v13 = vld [vmem:[%s29947_s11 + $0x40] sm:$0xff] }
 0xcb0   : > { %26374 = vmatprep.subr.bf16.mxu1 %v33955_v2 }
 0xcb2   : > { %6931 = vmatmul.mubr.f32.vlgmr.msra.gmra.mrb[14].mxu1 %v31515_v40 }
 0xcb3   : > { %26376 = vmatpush1.bf16.msra.mxu1 %v33956_v23  ;;  %6936 = vmatprep.mubr.f32.mxu1 %v33957_v60 }
 0xcb4   : > { %26378 = vmatprep.subr.bf16.mxu1 %v33958_v26 }
 0xcb6   : > { %6938 = vmatmul.mubr.f32.gmra.mrb[16].mxu1 %v31513_v14 }
 0xcb7   : > { %26380 = vmatpush1.bf16.msra.mxu1 %v33959_v34  ;;  %7040 = vmatprep.mubr.f32.mxu1 %v33957_v60 }
 0xcb8   : > { %26382 = vmatprep.subr.bf16.mxu1 %v33960_v25 }
 0xcbb   : > { %26384 = vmatpush1.bf16.msra.mxu1 %v33961_v56 }
 0xcbc   : > { %26386 = vmatprep.subr.bf16.mxu1 %v33962_v22 }
 0xcbf   : > { %26388 = vmatpush1.bf16.msra.mxu1 %v33963_v37 }
 0xcc0   : > { %26390 = vmatprep.subr.bf16.mxu1 %v33964_v38 }
 0xcc3   : > { %26392 = vmatpush1.bf16.msra.mxu1 %v33965_v58 }
 0xcc4   : > { %26394 = vmatprep.subr.bf16.mxu1 %v33966_v24 }
 0xcc7   : > { %26396 = vmatpush1.bf16.msra.mxu1 %v33967_v46 }
 0xcc8   : > { %26398 = vmatprep.subr.bf16.mxu1 %v34032_v3 }
 0xccb   : > { %26400 = vmatpush1.bf16.msra.mxu1 %v34033_v9 }
 0xccc   : > { %26402 = vmatprep.subr.bf16.mxu1 %v34034_v21 }
 0xccf   : > { %26404 = vmatpush1.bf16.msra.mxu1 %v34035_v6 }
 0xcd2   : > { %7042 = vmatmul.mubr.f32.vlgmr.msra.gmra.mrb[14].mxu1 %v31515_v40 }
 0xcd3   : > { %7047 = vmatprep.mubr.f32.mxu1 %v33957_v60 }
 0xcd6   : > { %7049 = vmatmul.mubr.f32.gmra.mrb[16].mxu1 %v31513_v14 }
 0xcd7   : > { %23883 = vmatprep.mubr.f32.mxu1 %v33907_v12 }
 0xda5   : > { %v7043_v4 = vpop.f32.mrb[14].mxu1 }
 0xda6   : > { %v7055_v41 = vadd.f32 %v21687_v13, %v7043_v4  ;;  %v31635_v57 = vpop.f32.mrb[15].mxu1 }
 0xda8   : > { %v21691_v11 = vmul.f32 -1.442695, %v7055_v41 }
 0xda9   : > { %v7050_v61 = vpop.f32.mrb[16].mxu1 }
 0xdaa   : > { %29310 = vpow2.f32 %v21691_v11  ;;  %v7057_v39 = vadd.f32 %v21689_v50, %v7050_v61  ;;  %v31638_v59 = vpop.f32.mrb[17].mxu1 }
 0xdac   : > { %v21693_v30 = vmul.f32 -1.442695, %v7057_v39 }
 0xdae   : > { %29312 = vpow2.f32 %v21693_v30 }
 0xdb4   : > { %v29311_v40 = vpop.eup %29310 }
 0xdb5   : > { %v7071_v1 = vadd.f32 1.0, %v29311_v40 }
 0xdb7   : > { %29314 = vrcp.f32 %v7071_v1 }
 0xdb8   : > { %v29313_v14 = vpop.eup %29312 }
 0xdb9   : > { %v7073_v15 = vadd.f32 1.0, %v29313_v14 }
 0xdbb   : > { %29316 = vrcp.f32 %v7073_v15 }
 0xdc1   : > { %v29315_v8 = vpop.eup %29314 }
 0xdc2   : > { %v7083_v13 = vmul.f32 %v29315_v8, %v31474_v44 }
 0xdc4   : > { %v7086_v4 = vand.u32 4294901760, %v7083_v13 }
 0xdc5   : > { %v29317_v6 = vpop.eup %29316 }
 0xdc6   : > { %v7084_v41 = vmul.f32 %v29317_v6, %v31472_v48  ;;  %v7174_v21 = vsub.f32 %v7083_v13, %v7086_v4 }
 0xdc8   : > { %v7089_v11 = vand.u32 4294901760, %v7084_v41  ;;  %v7175_v61 = vand.u32 4294901760, %v7174_v21 }
 0xdca   : > { %v26405_v50 = vpack.c.bf16 %v7089_v11, %v7086_v4  ;;  %v7181_v9 = vsub.f32 %v7084_v41, %v7089_v11  ;;  %v7176_v30 = vsub.f32 %v7174_v21, %v7175_v61 }
 0xdcc   : > { %26406 = vmatprep.subr.bf16.mxu0 %v26405_v50  ;;  %v7182_v39 = vand.u32 4294901760, %v7181_v9  ;;  %v26413_v40 = vpack.c.bf16 %v7181_v9, %v7174_v21  ;;  %v7177_v15 = vand.u32 4294901760, %v7176_v30 }
 0xdcd   : > { %26408 = vmatpush3.bf16.msra.mxu0 %v26405_v50 }
 0xdce   : > { %v7183_v1 = vsub.f32 %v7181_v9, %v7182_v39  ;;  %v26421_v14 = vpack.c.bf16 %v7182_v39, %v7175_v61 }
 0xdd0   : > { %23632 = vmatmul.mubr.f32.vlgmr.msra.gmra.mrb[10].mxu0 %v33908_v33  ;;  %v7184_v8 = vand.u32 4294901760, %v7183_v1  ;;  %v34087_v1 = vld [vmem:[#allocation55_spill] sm:$0xff] }
 0xdd1   : > { %23638 = vmatprep.mubr.f32.mxu0 %v33909_v0 }
 0xdd2   : > { %v26409_v3 = vpack.c.bf16 %v7184_v8, %v7177_v15  ;;  %v34089_v15 = vld [vmem:[#allocation58_spill] sm:$0xff]  ;;  %v34090_v8 = vld [vmem:[#allocation60_spill] sm:$0xff] }
 0xdd4   : > { %26410 = vmatprep.subr.bf16.mxu0 %v26409_v3 }
 0xdd5   : > { %26412 = vmatpush3.bf16.msra.mxu0 %v26409_v3 }
 0xdd6   : > { %26414 = vmatprep.subr.bf16.mxu0 %v26413_v40 }
 0xdd8   : > { %23639 = vmatmul.mubr.f32.vlgmr.msra.gmra.mrb[10].mxu0 %v33910_v18 }
 0xdd9   : > { %26416 = vmatpush3.bf16.msra.mxu0 %v26413_v40  ;;  %23645 = vmatprep.mubr.f32.mxu0 %v33911_v52  ;;  %v34086_v40 = vld [vmem:[#allocation54_spill] sm:$0xff] }
 0xdda   : > { %26418 = vmatprep.subr.bf16.mxu0 %v26405_v50 }
 0xde0   : > { %23646 = vmatmul.mubr.f32.vlgmr.msra.gmra.mrb[10].mxu0 %v33912_v62 }
 0xde1   : > { %26420 = vmatpush3.bf16.msra.mxu0 %v26405_v50  ;;  %23652 = vmatprep.mubr.f32.mxu0 %v33913_v27 }
 0xde2   : > { %26422 = vmatprep.subr.bf16.mxu0 %v26421_v14 }
 0xde8   : > { %23653 = vmatmul.mubr.f32.vlgmr.msra.gmra.mrb[10].mxu0 %v33914_v31 }
 0xde9   : > { %26424 = vmatpush3.bf16.msra.mxu0 %v26421_v14  ;;  %23659 = vmatprep.mubr.f32.mxu0 %v33909_v0  ;;  %v34088_v14 = vld [vmem:[#allocation57_spill] sm:$0xff] }
 0xdea   : > { %26426 = vmatprep.subr.bf16.mxu0 %v26405_v50 }
 0xdf0   : > { %23660 = vmatmul.mubr.f32.vlgmr.msra.gmra.mrb[10].mxu0 %v33910_v18 }
 0xdf1   : > { %26428 = vmatpush3.bf16.msra.mxu0 %v26405_v50  ;;  %23666 = vmatprep.mubr.f32.mxu0 %v33909_v0 }
 0xdf2   : > { %26430 = vmatprep.subr.bf16.mxu0 %v30757_v55 }
 0xdf8   : > { %23667 = vmatmul.mubr.f32.vlgmr.msra.gmra.mrb[10].mxu0 %v33910_v18 }
 0xdf9   : > { %26432 = vmatpush3.bf16.msra.mxu0 %v30757_v55 }
 0xdfa   : > { %26434 = vmatprep.subr.bf16.mxu0 %v30776_v28 }
 0xdfd   : > { %26436 = vmatpush3.bf16.msra.mxu0 %v30776_v28 }
 0xdfe   : > { %26438 = vmatprep.subr.bf16.mxu0 %v30791_v20 }
 0xe01   : > { %26440 = vmatpush3.bf16.msra.mxu0 %v30791_v20 }
 0xe02   : > { %26442 = vmatprep.subr.bf16.mxu0 %v30805_v49 }
 0xe05   : > { %26444 = vmatpush3.bf16.msra.mxu0 %v30805_v49 }
 0xe06   : > { %26446 = vmatprep.subr.bf16.mxu0 %v30815_v5 }
 0xe09   : > { %26448 = vmatpush3.bf16.msra.mxu0 %v30815_v5 }
 0xe0a   : > { %26450 = vmatprep.subr.bf16.mxu0 %v30820_v7 }
 0xe0d   : > { %26452 = vmatpush3.bf16.msra.mxu0 %v30820_v7 }
 0xe0e   : > { %26454 = vmatprep.subr.bf16.mxu0 %v30824_v16 }
 0xe11   : > { %26456 = vmatpush3.bf16.msra.mxu0 %v30824_v16 }
 0xe12   : > { %26458 = vmatprep.subr.bf16.mxu0 %v30834_v63 }
 0xe15   : > { %26460 = vmatpush3.bf16.msra.mxu0 %v30834_v63 }
 0xe16   : > { %26462 = vmatprep.subr.bf16.mxu0 %v30844_v47 }
 0xecb   : > { %v23668_v3 = vpop.f32.mrb[10].mxu0 }
 0xecc   : > { %v31670_v9 = vand.u32 4294901760, %v23668_v3  ;;  %v7577_v21 = vpop.f32.mrb[11].mxu0 }
 0xecd   : > { %v31672_v6 = vand.u32 4294901760, %v7577_v21 }
 0xece   : > { %v31675_v13 = vsub.f32 %v23668_v3, %v31670_v9  ;;  %v34091_v3 = vld [vmem:[#allocation62_spill] sm:$0xff] }
 0xecf   : > { %v7672_v4 = vsub.f32 %v7577_v21, %v31672_v6  ;;  %v34092_v21 = vld [vmem:[#allocation63_spill] sm:$0xff] }
 0xed0   : > { %v7683_v41 = vand.u32 4294901760, %v31675_v13 }
 0xed1   : > { %v7673_v11 = vand.u32 4294901760, %v7672_v4 }
 0xed2   : > { %v7684_v61 = vsub.f32 %v31675_v13, %v7683_v41 }
 0xed3   : > { %v7674_v50 = vsub.f32 %v7672_v4, %v7673_v11 }
 0xed4   : > { %v7685_v39 = vand.u32 4294901760, %v7684_v61 }
 0xed5   : > { %v7675_v30 = vand.u32 4294901760, %v7674_v50 }
 0xed7   : > { %23701 = vmatprep.mubr.f32.mxu0 %v7675_v30 }
 0xed8   : > { %23702 = vmatmul.mubr.f32.vlgmr.msra.gmra.mrb[12].mxu0 %v7685_v39 }
 0xed9   : > { %26464 = vmatpush3.bf16.msra.mxu0 %v30844_v47  ;;  %23736 = vmatprep.mubr.f32.mxu0 %v31672_v6 }
 0xeda   : > { %26466 = vmatprep.subr.bf16.mxu0 %v30981_v42 }
 0xedd   : > { %26468 = vmatpush3.bf16.msra.mxu0 %v30981_v42 }
 0xede   : > { %26470 = vmatprep.subr.bf16.mxu0 %v30993_v45 }
 0xee1   : > { %26472 = vmatpush3.bf16.msra.mxu0 %v30993_v45 }
 0xee2   : > { %26474 = vmatprep.subr.bf16.mxu0 %v31004_v35 }
 0xee5   : > { %26476 = vmatpush3.bf16.msra.mxu0 %v31004_v35 }
 0xee6   : > { %26478 = vmatprep.subr.bf16.mxu0 %v31008_v19 }
 0xee9   : > { %26480 = vmatpush3.bf16.msra.mxu0 %v31008_v19 }
 0xeea   : > { %26482 = vmatprep.subr.bf16.mxu0 %v30865_v36 }
 0xeed   : > { %26484 = vmatpush3.bf16.msra.mxu0 %v30865_v36 }
 0xeee   : > { %26486 = vmatprep.subr.bf16.mxu0 %v30879_v54 }
 0xef1   : > { %26488 = vmatpush3.bf16.msra.mxu0 %v30879_v54 }
 0xef2   : > { %26490 = vmatprep.subr.bf16.mxu0 %v30887_v53 }
 0xef5   : > { %26492 = vmatpush3.bf16.msra.mxu0 %v30887_v53 }
 0xef6   : > { %26494 = vmatprep.subr.bf16.mxu0 %v30891_v43 }
 0xef8   : > { %23737 = vmatmul.mubr.f32.vlgmr.msra.gmra.mrb[12].mxu0 %v31670_v9 }
 0xef9   : > { %26496 = vmatpush3.bf16.msra.mxu0 %v30891_v43  ;;  %23771 = vmatprep.mubr.f32.mxu0 %v7672_v4  ;;  %v34094_v4 = vld [vmem:[#allocation18_spill] sm:$0xff] }
 0xefa   : > { %26498 = vmatprep.subr.bf16.mxu0 %v31022_v32 }
 0xefd   : > { %26500 = vmatpush3.bf16.msra.mxu0 %v31022_v32 }
 0xefe   : > { %26502 = vmatprep.subr.bf16.mxu0 %v31030_v17 }
 0xf01   : > { %26504 = vmatpush3.bf16.msra.mxu0 %v31030_v17 }
 0xf02   : > { %26506 = vmatprep.subr.bf16.mxu0 %v31036_v10 }
 0xf05   : > { %26508 = vmatpush3.bf16.msra.mxu0 %v31036_v10 }
 0xf06   : > { %26510 = vmatprep.subr.bf16.mxu0 %v31042_v51 }
 0xf09   : > { %26512 = vmatpush3.bf16.msra.mxu0 %v31042_v51 }
 0xf0a   : > { %26514 = vmatprep.subr.bf16.mxu0 %v30895_v29 }
 0xf0d   : > { %26516 = vmatpush3.bf16.msra.mxu0 %v30895_v29 }
 0xf0e   : > { %26518 = vmatprep.subr.bf16.mxu0 %v34086_v40 }
 0xf11   : > { %26520 = vmatpush3.bf16.msra.mxu0 %v34086_v40  ;;  %v34110_v40 = vld [vmem:[#allocation59_spill] sm:$0xff] }
 0xf12   : > { %26522 = vmatprep.subr.bf16.mxu0 %v34087_v1 }
 0xf15   : > { %26524 = vmatpush3.bf16.msra.mxu0 %v34087_v1 }
 0xf16   : > { %26526 = vmatprep.subr.bf16.mxu0 %v30757_v55 }
 0xf18   : > { %23772 = vmatmul.mubr.f32.vlgmr.msra.gmra.mrb[12].mxu0 %v31675_v13  ;;  %v34093_v13 = vld [vmem:[#allocation25_spill] sm:$0xff] }
 0xf19   : > { %26528 = vmatpush3.bf16.msra.mxu0 %v30757_v55  ;;  %23806 = vmatprep.mubr.f32.mxu0 %v7673_v11  ;;  %v21688_v11 = vld [vmem:[%s29947_s11 + $0x48] sm:$0xff] }
 0xf1a   : > { %26530 = vmatprep.subr.bf16.mxu0 %v30776_v28  ;;  %v7056_v50 = vadd.f32 %v21688_v11, %v31635_v57 }
 0xf1c   : > { %v21692_v39 = vmul.f32 -1.442695, %v7056_v50 }
 0xf1d   : > { %26532 = vmatpush3.bf16.msra.mxu0 %v30776_v28 }
 0xf1e   : > { %26534 = vmatprep.subr.bf16.mxu0 %v30791_v20 }
 0xf21   : > { %26536 = vmatpush3.bf16.msra.mxu0 %v30791_v20 }
 0xf22   : > { %26538 = vmatprep.subr.bf16.mxu0 %v30805_v49 }
 0xf25   : > { %26540 = vmatpush3.bf16.msra.mxu0 %v30805_v49 }
 0xf26   : > { %26542 = vmatprep.subr.bf16.mxu0 %v30815_v5 }
 0xf29   : > { %26544 = vmatpush3.bf16.msra.mxu0 %v30815_v5 }
 0xf2a   : > { %26546 = vmatprep.subr.bf16.mxu0 %v30820_v7 }
 0xf2d   : > { %26548 = vmatpush3.bf16.msra.mxu0 %v30820_v7 }
 0xf2e   : > { %26550 = vmatprep.subr.bf16.mxu0 %v30824_v16 }
 0xf31   : > { %26552 = vmatpush3.bf16.msra.mxu0 %v30824_v16 }
 0xf32   : > { %26554 = vmatprep.subr.bf16.mxu0 %v30834_v63 }
 0xf35   : > { %26556 = vmatpush3.bf16.msra.mxu0 %v30834_v63 }
 0xf36   : > { %26558 = vmatprep.subr.bf16.mxu0 %v34088_v14 }
 0xf38   : > { %23807 = vmatmul.mubr.f32.vlgmr.msra.gmra.mrb[12].mxu0 %v7683_v41  ;;  %v34095_v41 = vld [vmem:[#allocation19_spill] sm:$0xff] }
 0xf39   : > { %26560 = vmatpush3.bf16.msra.mxu0 %v34088_v14  ;;  %23841 = vmatprep.mubr.f32.mxu0 %v31672_v6 }
 0xf3a   : > { %26562 = vmatprep.subr.bf16.mxu0 %v34089_v15 }
 0xf3d   : > { %26564 = vmatpush3.bf16.msra.mxu0 %v34089_v15 }
 0xf3e   : > { %26566 = vmatprep.subr.bf16.mxu0 %v34090_v8 }
 0xf41   : > { %26568 = vmatpush3.bf16.msra.mxu0 %v34090_v8 }
 0xf42   : > { %26570 = vmatprep.subr.bf16.mxu0 %v34091_v3 }
 0xf45   : > { %26572 = vmatpush3.bf16.msra.mxu0 %v34091_v3  ;;  %v21696_v3 = vld [vmem:[%s29957_s23 + $0x28] sm:$0xff] }
 0xf46   : > { %26574 = vmatprep.subr.bf16.mxu0 %v34092_v21 }
 0xf49   : > { %26576 = vmatpush3.bf16.msra.mxu0 %v34092_v21 }
 0xf4a   : > { %26578 = vmatprep.subr.bf16.mxu0 %v34093_v13 }
 0xf4d   : > { %26580 = vmatpush3.bf16.msra.mxu0 %v34093_v13 }
 0xf4e   : > { %26582 = vmatprep.subr.bf16.mxu0 %v34094_v4 }
 0xf51   : > { %26584 = vmatpush3.bf16.msra.mxu0 %v34094_v4 }
 0xf52   : > { %26586 = vmatprep.subr.bf16.mxu0 %v34095_v41 }
 0xf55   : > { %26588 = vmatpush3.bf16.msra.mxu0 %v34095_v41 }
 0xf56   : > { %26590 = vmatprep.subr.bf16.mxu0 %v30757_v55 }
 0xf58   : > { %23842 = vmatmul.mubr.f32.vlgmr.msra.gmra.mrb[12].mxu0 %v31670_v9 }
 0xf59   : > { %26592 = vmatpush3.bf16.msra.mxu0 %v30757_v55  ;;  %23876 = vmatprep.mubr.f32.mxu0 %v31672_v6  ;;  %v21690_v6 = vld [vmem:[%s29947_s11 + $0x58] sm:$0xff] }
 0xf5a   : > { %26594 = vmatprep.subr.bf16.mxu0 %v30776_v28  ;;  %v7058_v61 = vadd.f32 %v21690_v6, %v31638_v59 }
 0xf5c   : > { %v21694_v30 = vmul.f32 -1.442695, %v7058_v61 }
 0xf5d   : > { %26596 = vmatpush3.bf16.msra.mxu0 %v30776_v28 }
 0xf5e   : > { %26598 = vmatprep.subr.bf16.mxu0 %v30791_v20  ;;  %29318 = vpow2.f32 %v21694_v30 }
 0xf5f   : > { %29320 = vpow2.f32 %v21692_v39 }
 0xf61   : > { %26600 = vmatpush3.bf16.msra.mxu0 %v30791_v20 }
 0xf62   : > { %26602 = vmatprep.subr.bf16.mxu0 %v30805_v49 }
 0xf65   : > { %26604 = vmatpush3.bf16.msra.mxu0 %v30805_v49 }
 0xf66   : > { %26606 = vmatprep.subr.bf16.mxu0 %v30815_v5 }
 0xf68   : > { %v29319_v41 = vpop.eup %29318 }
 0xf69   : > { %26608 = vmatpush3.bf16.msra.mxu0 %v30815_v5  ;;  %v29321_v4 = vpop.eup %29320  ;;  %v7074_v13 = vadd.f32 1.0, %v29319_v41 }
 0xf6a   : > { %26610 = vmatprep.subr.bf16.mxu0 %v30820_v7  ;;  %v7072_v21 = vadd.f32 1.0, %v29321_v4 }
 0xf6b   : > { %29322 = vrcp.f32 %v7074_v13 }
 0xf6c   : > { %29324 = vrcp.f32 %v7072_v21 }
 0xf6d   : > { %26612 = vmatpush3.bf16.msra.mxu0 %v30820_v7 }
 0xf6e   : > { %26614 = vmatprep.subr.bf16.mxu0 %v30824_v16 }
 0xf71   : > { %26616 = vmatpush3.bf16.msra.mxu0 %v30824_v16 }
 0xf72   : > { %26618 = vmatprep.subr.bf16.mxu0 %v30834_v63 }
 0xf75   : > { %26620 = vmatpush3.bf16.msra.mxu0 %v30834_v63  ;;  %v29323_v59 = vpop.eup %29322 }
 0xf76   : > { %v29325_v57 = vpop.eup %29324  ;;  %v8281_v6 = vsub.f32 1.0, %v29323_v59  ;;  %v8279_v4 = vmul.f32 %v29323_v59, %v31472_v48 }
 0xf77   : > { %v8280_v61 = vsub.f32 1.0, %v29325_v57  ;;  %v8278_v13 = vmul.f32 %v29325_v57, %v31474_v44 }
 0xf78   : > { %23877 = vmatmul.mubr.f32.vlgmr.msra.gmra.mrb[12].mxu0 %v31670_v9  ;;  %v21695_v9 = vld [vmem:[%s29957_s23 + $0x20] sm:$0xff] }
 0xf79   : > { %23925 = vmatprep.mubr.f32.mxu0 %v33907_v12 }
0x104b   : > { %v23878_v8 = vpop.f32.mrb[12].mxu0 }
0x104c   : > { %v8275_v15 = vadd.f32 %v23878_v8, %v21696_v3  ;;  %v8264_v14 = vpop.f32.mrb[13].mxu0 }
0x104d   : > { %v8274_v1 = vadd.f32 %v21695_v9, %v8264_v14 }
0x104e   : > { %29326 = vtanh.f32 %v8275_v15 }
0x104f   : > { %29328 = vtanh.f32 %v8274_v1 }
0x1058   : > { %v29327_v11 = vpop.eup %29326 }
0x1059   : > { %v29329_v50 = vpop.eup %29328  ;;  %v8283_v41 = vmul.f32 %v29327_v11, %v8281_v6 }
0x105a   : > { %v8282_v21 = vmul.f32 %v29329_v50, %v8280_v61 }
0x105b   : > { %v31775_v30 = vadd.f32 %v8283_v41, %v8279_v4  ;;  %v34096_v4 = vld [vmem:[#allocation38_spill] sm:$0xff]  ;;  %v34097_v41 = vld [vmem:[#allocation40_spill] sm:$0xff] }
0x105c   : > { %v31777_v8 = vadd.f32 %v8282_v21, %v8278_v13  ;;  %v34098_v13 = vld [vmem:[#allocation41_spill] sm:$0xff]  ;;  %v34099_v21 = vld [vmem:[#allocation42_spill] sm:$0xff] }
0x105d   : > { %21698 = vst [vmem:[%s31171_s24 + $0x28] sm:$0xff] %v31775_v30  ;;  %v8293_v1 = vand.u32 4294901760, %v31775_v30 }
0x105e   : > { %21697 = vst [vmem:[%s31171_s24 + $0x20] sm:$0xff] %v31777_v8  ;;  %v8290_v14 = vand.u32 4294901760, %v31777_v8 }
0x105f   : > { %v8385_v15 = vsub.f32 %v31775_v30, %v8293_v1 }
0x1060   : > { %v26621_v3 = vpack.c.bf16 %v8293_v1, %v8290_v14  ;;  %v8378_v48 = vsub.f32 %v31777_v8, %v8290_v14  ;;  %v34100_v1 = vld [vmem:[#allocation43_spill] sm:$0xff] }
0x1061   : > { %v8386_v39 = vand.u32 4294901760, %v8385_v15 }
0x1062   : > { %26622 = vmatprep.subr.bf16.mxu1 %v26621_v3  ;;  %v8379_v44 = vand.u32 4294901760, %v8378_v48  ;;  %v26629_v61 = vpack.c.bf16 %v8385_v15, %v8378_v48 }
0x1063   : > { %26624 = vmatpush3.bf16.msra.mxu1 %v26621_v3  ;;  %v8387_v9 = vsub.f32 %v8385_v15, %v8386_v39 }
0x1064   : > { %v8380_v59 = vsub.f32 %v8378_v48, %v8379_v44  ;;  %v26637_v50 = vpack.c.bf16 %v8386_v39, %v8379_v44 }
0x1065   : > { %v8388_v57 = vand.u32 4294901760, %v8387_v9 }
0x1066   : > { %23884 = vmatmul.mubr.f32.vlgmr.msra.gmra.mrb[18].mxu1 %v33908_v33  ;;  %v8381_v6 = vand.u32 4294901760, %v8380_v59 }
0x1067   : > { %23890 = vmatprep.mubr.f32.mxu1 %v33909_v0 }
0x1068   : > { %v26625_v11 = vpack.c.bf16 %v8388_v57, %v8381_v6 }
0x106a   : > { %26626 = vmatprep.subr.bf16.mxu1 %v26625_v11 }
0x106b   : > { %26628 = vmatpush3.bf16.msra.mxu1 %v26625_v11 }
0x106c   : > { %26630 = vmatprep.subr.bf16.mxu1 %v26629_v61 }
0x106e   : > { %23891 = vmatmul.mubr.f32.vlgmr.msra.gmra.mrb[18].mxu1 %v33910_v18 }
0x106f   : > { %26632 = vmatpush3.bf16.msra.mxu1 %v26629_v61  ;;  %23897 = vmatprep.mubr.f32.mxu1 %v33911_v52  ;;  %v34101_v61 = vld [vmem:[#allocation77_spill] sm:$0xff] }
0x1070   : > { %26634 = vmatprep.subr.bf16.mxu1 %v26621_v3 }
0x1076   : > { %23898 = vmatmul.mubr.f32.vlgmr.msra.gmra.mrb[18].mxu1 %v33912_v62 }
0x1077   : > { %26636 = vmatpush3.bf16.msra.mxu1 %v26621_v3  ;;  %23904 = vmatprep.mubr.f32.mxu1 %v33913_v27 }
0x1078   : > { %26638 = vmatprep.subr.bf16.mxu1 %v26637_v50 }
0x107e   : > { %23905 = vmatmul.mubr.f32.vlgmr.msra.gmra.mrb[18].mxu1 %v33914_v31 }
0x107f   : > { %26640 = vmatpush3.bf16.msra.mxu1 %v26637_v50  ;;  %23911 = vmatprep.mubr.f32.mxu1 %v33909_v0  ;;  %v34102_v50 = vld [vmem:[#allocation78_spill] sm:$0xff] }
0x1080   : > { %26642 = vmatprep.subr.bf16.mxu1 %v26621_v3 }
0x1086   : > { %23912 = vmatmul.mubr.f32.vlgmr.msra.gmra.mrb[18].mxu1 %v33910_v18 }
0x1087   : > { %26644 = vmatpush3.bf16.msra.mxu1 %v26621_v3  ;;  %23918 = vmatprep.mubr.f32.mxu1 %v33909_v0 }
0x1088   : > { %26646 = vmatprep.subr.bf16.mxu1 %v33955_v2 }
0x108e   : > { %23919 = vmatmul.mubr.f32.vlgmr.msra.gmra.mrb[18].mxu1 %v33910_v18 }
0x108f   : > { %26648 = vmatpush1.bf16.msra.mxu1 %v33956_v23  ;;  %8892 = vmatprep.mubr.f32.mxu1 %v33957_v60 }
0x1090   : > { %26650 = vmatprep.subr.bf16.mxu1 %v33958_v26 }
0x1093   : > { %26652 = vmatpush1.bf16.msra.mxu1 %v33959_v34 }
0x1094   : > { %26654 = vmatprep.subr.bf16.mxu1 %v33960_v25 }
0x1097   : > { %26656 = vmatpush1.bf16.msra.mxu1 %v33961_v56 }
0x1098   : > { %26658 = vmatprep.subr.bf16.mxu1 %v33962_v22 }
0x109b   : > { %26660 = vmatpush1.bf16.msra.mxu1 %v33963_v37 }
0x109c   : > { %26662 = vmatprep.subr.bf16.mxu1 %v33964_v38 }
0x109f   : > { %26664 = vmatpush1.bf16.msra.mxu1 %v33965_v58 }
0x10a0   : > { %26666 = vmatprep.subr.bf16.mxu1 %v33966_v24 }
0x10a3   : > { %26668 = vmatpush1.bf16.msra.mxu1 %v33967_v46 }
0x10a4   : > { %26670 = vmatprep.subr.bf16.mxu1 %v34096_v4 }
0x10a7   : > { %26672 = vmatpush1.bf16.msra.mxu1 %v34097_v41 }
0x10a8   : > { %26674 = vmatprep.subr.bf16.mxu1 %v34098_v13 }
0x10ab   : > { %26676 = vmatpush1.bf16.msra.mxu1 %v34099_v21 }
0x10ac   : > { %26678 = vmatprep.subr.bf16.mxu1 %v34100_v1  ;;  %v34104_v1 = vld [vmem:[#allocation80_spill] sm:$0xff] }
0x1161   : > { %v23920_v14 = vpop.f32.mrb[18].mxu1 }
0x1162   : > { %v31816_v15 = vand.u32 4294901760, %v23920_v14  ;;  %v8781_v3 = vpop.f32.mrb[19].mxu1 }
0x1163   : > { %v31818_v48 = vand.u32 4294901760, %v8781_v3 }
0x1164   : > { %v31821_v39 = vsub.f32 %v23920_v14, %v31816_v15 }
0x1165   : > { %v31824_v44 = vsub.f32 %v8781_v3, %v31818_v48  ;;  %v34103_v3 = vld [vmem:[#allocation79_spill] sm:$0xff] }
0x1166   : > { %v33636_v9 = vand.u32 4294901760, %v31821_v39 }
0x1167   : > { %v33635_v59 = vand.u32 4294901760, %v31824_v44 }
0x1168   : > { %v8907_v11 = vsub.f32 %v31821_v39, %v33636_v9  ;;  %v34107_v9 = vld [vmem:[#allocation83_spill] sm:$0xff] }
0x1169   : > { %v8896_v57 = vsub.f32 %v31824_v44, %v33635_v59  ;;  %v34106_v59 = vld [vmem:[#allocation82_spill] sm:$0xff] }
0x116a   : > { %v8908_v14 = vand.u32 4294901760, %v8907_v11  ;;  %v34111_v11 = vld [vmem:[#allocation61_spill] sm:$0xff] }
0x116b   : > { %v8897_v6 = vand.u32 4294901760, %v8896_v57  ;;  %v34105_v57 = vld [vmem:[#allocation81_spill] sm:$0xff] }
0x116d   : > { %8898 = vmatmul.mubr.f32.vlgmr.msra.gmra.mrb[20].mxu1 %v8897_v6  ;;  %v34108_v6 = vld [vmem:[#allocation52_spill] sm:$0xff] }
0x116e   : > { %26680 = vmatpush1.bf16.msra.mxu1 %v34101_v61  ;;  %8903 = vmatprep.mubr.f32.mxu1 %v33957_v60  ;;  %v34109_v61 = vld [vmem:[#allocation56_spill] sm:$0xff] }
0x116f   : > { %26682 = vmatprep.subr.bf16.mxu1 %v34102_v50  ;;  %v34114_v50 = vld [vmem:[#allocation66_spill] sm:$0xff] }
0x1171   : > { %8909 = vmatmul.mubr.f32.gmra.mrb[22].mxu1 %v8908_v14  ;;  %v34112_v14 = vld [vmem:[#allocation64_spill] sm:$0xff] }
0x1172   : > { %26684 = vmatpush1.bf16.msra.mxu1 %v34103_v3  ;;  %9139 = vmatprep.mubr.f32.mxu1 %v33957_v60  ;;  %v34113_v3 = vld [vmem:[#allocation65_spill] sm:$0xff] }
0x1173   : > { %26686 = vmatprep.subr.bf16.mxu1 %v34104_v1  ;;  %v34115_v1 = vld [vmem:[#allocation68_spill] sm:$0xff] }
0x1176   : > { %26688 = vmatpush1.bf16.msra.mxu1 %v34105_v57  ;;  %v34116_v57 = vld [vmem:[#allocation67_spill] sm:$0xff] }
0x1177   : > { %26690 = vmatprep.subr.bf16.mxu1 %v34106_v59  ;;  %v34130_v59 = vld [vmem:[#allocation75_spill] sm:$0xff] }
0x117a   : > { %26692 = vmatpush1.bf16.msra.mxu1 %v34107_v9  ;;  %v34117_v9 = vld [vmem:[#allocation84_spill] sm:$0xff] }
0x117b   : > { %26694 = vmatprep.subr.bf16.mxu1 %v34108_v6  ;;  %v34128_v6 = vld [vmem:[#allocation73_spill] sm:$0xff] }
0x117e   : > { %26696 = vmatpush1.bf16.msra.mxu1 %v34109_v61  ;;  %v34118_v61 = vld [vmem:[#allocation85_spill] sm:$0xff] }
0x117f   : > { %26698 = vmatprep.subr.bf16.mxu1 %v34110_v40  ;;  %v34126_v40 = vld [vmem:[#allocation71_spill] sm:$0xff] }
0x1182   : > { %26700 = vmatpush1.bf16.msra.mxu1 %v34111_v11  ;;  %v34119_v11 = vld [vmem:[#allocation86_spill] sm:$0xff] }
0x1183   : > { %26702 = vmatprep.subr.bf16.mxu1 %v34112_v14  ;;  %v34124_v14 = vld [vmem:[#allocation69_spill] sm:$0xff] }
0x1186   : > { %26704 = vmatpush1.bf16.msra.mxu1 %v34113_v3  ;;  %v34120_v3 = vld [vmem:[#allocation87_spill] sm:$0xff] }
0x1187   : > { %26706 = vmatprep.subr.bf16.mxu1 %v34114_v50  ;;  %v34121_v50 = vld [vmem:[#allocation88_spill] sm:$0xff] }
0x118a   : > { %26708 = vmatpush1.bf16.msra.mxu1 %v34115_v1  ;;  %v34122_v1 = vld [vmem:[#allocation89_spill] sm:$0xff] }
0x118b   : > { %26710 = vmatprep.subr.bf16.mxu1 %v34116_v57  ;;  %v34123_v57 = vld [vmem:[#allocation90_spill] sm:$0xff] }
0x118d   : > { %9141 = vmatmul.mubr.f32.vlgmr.msra.gmra.mrb[20].mxu1 %v31818_v48 }
0x118e   : > { %26712 = vmatpush1.bf16.msra.mxu1 %v34117_v9  ;;  %9146 = vmatprep.mubr.f32.mxu1 %v33957_v60  ;;  %v34125_v9 = vld [vmem:[#allocation70_spill] sm:$0xff] }
0x118f   : > { %26714 = vmatprep.subr.bf16.mxu1 %v34118_v61  ;;  %v34127_v61 = vld [vmem:[#allocation72_spill] sm:$0xff] }
0x1191   : > { %9148 = vmatmul.mubr.f32.gmra.mrb[22].mxu1 %v31816_v15 }
0x1192   : > { %26716 = vmatpush1.bf16.msra.mxu1 %v34119_v11  ;;  %9282 = vmatprep.mubr.f32.mxu1 %v33957_v60  ;;  %v34129_v11 = vld [vmem:[#allocation74_spill] sm:$0xff] }
0x1193   : > { %26718 = vmatprep.subr.bf16.mxu1 %v34120_v3  ;;  %v34131_v3 = vld [vmem:[#allocation76_spill] sm:$0xff] }
0x1196   : > { %26720 = vmatpush1.bf16.msra.mxu1 %v34121_v50 }
0x1197   : > { %26722 = vmatprep.subr.bf16.mxu1 %v34122_v1 }
0x119a   : > { %26724 = vmatpush1.bf16.msra.mxu1 %v34123_v57  ;;  %v34148_v57 = vld [vmem:[#allocation50_spill] sm:$0xff] }
0x119b   : > { %26726 = vmatprep.subr.bf16.mxu1 %v34124_v14  ;;  %v34139_v14 = vld [vmem:[#allocation95_spill] sm:$0xff] }
0x119e   : > { %26728 = vmatpush1.bf16.msra.mxu1 %v34125_v9  ;;  %v34138_v9 = vld [vmem:[#allocation94_spill] sm:$0xff] }
0x119f   : > { %26730 = vmatprep.subr.bf16.mxu1 %v34126_v40  ;;  %v34137_v40 = vld [vmem:[#allocation93_spill] sm:$0xff] }
0x11a2   : > { %26732 = vmatpush1.bf16.msra.mxu1 %v34127_v61  ;;  %v34136_v61 = vand.u32 4294901760, %v31821_v39 }
0x11a3   : > { %26734 = vmatprep.subr.bf16.mxu1 %v34128_v6  ;;  %v34135_v6 = vld [vmem:[#allocation92_spill] sm:$0xff] }
0x11a6   : > { %26736 = vmatpush1.bf16.msra.mxu1 %v34129_v11  ;;  %v34134_v11 = vld [vmem:[#allocation91_spill] sm:$0xff] }
0x11a7   : > { %26738 = vmatprep.subr.bf16.mxu1 %v34130_v59  ;;  %v34133_v59 = vand.u32 4294901760, %v31824_v44 }
0x11aa   : > { %26740 = vmatpush1.bf16.msra.mxu1 %v34131_v3  ;;  %v34132_v3 = vld [vmem:[#allocation39_spill] sm:$0xff] }
0x11ab   : > { %26742 = vmatprep.subr.bf16.mxu1 %v33955_v2 }
0x11ad   : > { %9285 = vmatmul.mubr.f32.vlgmr.msra.gmra.mrb[20].mxu1 %v31824_v44  ;;  %v34141_v44 = vld [vmem:[#allocation97_spill] sm:$0xff] }
0x11ae   : > { %26744 = vmatpush1.bf16.msra.mxu1 %v33956_v23  ;;  %9290 = vmatprep.mubr.f32.mxu1 %v33957_v60 }
0x11af   : > { %26746 = vmatprep.subr.bf16.mxu1 %v33958_v26 }
0x11b1   : > { %9293 = vmatmul.mubr.f32.gmra.mrb[22].mxu1 %v31821_v39  ;;  %v34145_v39 = vld [vmem:[#allocation47_spill] sm:$0xff] }
0x11b2   : > { %26748 = vmatpush1.bf16.msra.mxu1 %v33959_v34  ;;  %9395 = vmatprep.mubr.f32.mxu1 %v33957_v60 }
0x11b3   : > { %26750 = vmatprep.subr.bf16.mxu1 %v33960_v25 }
0x11b6   : > { %26752 = vmatpush1.bf16.msra.mxu1 %v33961_v56 }
0x11b7   : > { %26754 = vmatprep.subr.bf16.mxu1 %v33962_v22 }
0x11ba   : > { %26756 = vmatpush1.bf16.msra.mxu1 %v33963_v37 }
0x11bb   : > { %26758 = vmatprep.subr.bf16.mxu1 %v33964_v38 }
0x11be   : > { %26760 = vmatpush1.bf16.msra.mxu1 %v33965_v58 }
0x11bf   : > { %26762 = vmatprep.subr.bf16.mxu1 %v33966_v24 }
0x11c2   : > { %26764 = vmatpush1.bf16.msra.mxu1 %v33967_v46 }
0x11c3   : > { %26766 = vmatprep.subr.bf16.mxu1 %v34096_v4 }
0x11c6   : > { %26768 = vmatpush1.bf16.msra.mxu1 %v34097_v41 }
0x11c7   : > { %26770 = vmatprep.subr.bf16.mxu1 %v34098_v13 }
0x11ca   : > { %26772 = vmatpush1.bf16.msra.mxu1 %v34099_v21 }
0x11cb   : > { %26774 = vmatprep.subr.bf16.mxu1 %v34132_v3  ;;  %v34140_v3 = vld [vmem:[#allocation96_spill] sm:$0xff] }
0x11cd   : > { %9399 = vmatmul.mubr.f32.vlgmr.msra.gmra.mrb[20].mxu1 %v34133_v59  ;;  %v34142_v59 = vld [vmem:[#allocation44_spill] sm:$0xff] }
0x11ce   : > { %26776 = vmatpush1.bf16.msra.mxu1 %v34134_v11  ;;  %9404 = vmatprep.mubr.f32.mxu1 %v33957_v60  ;;  %v34143_v11 = vld [vmem:[#allocation45_spill] sm:$0xff] }
0x11cf   : > { %26778 = vmatprep.subr.bf16.mxu1 %v34135_v6  ;;  %v34144_v6 = vld [vmem:[#allocation46_spill] sm:$0xff] }
0x11d1   : > { %9408 = vmatmul.mubr.f32.gmra.mrb[22].mxu1 %v34136_v61  ;;  %v34146_v61 = vld [vmem:[#allocation48_spill] sm:$0xff] }
0x11d2   : > { %26780 = vmatpush1.bf16.msra.mxu1 %v34137_v40  ;;  %9574 = vmatprep.mubr.f32.mxu1 %v33957_v60  ;;  %v34147_v40 = vld [vmem:[#allocation49_spill] sm:$0xff] }
0x11d3   : > { %26782 = vmatprep.subr.bf16.mxu1 %v34138_v9  ;;  %v34149_v9 = vld [vmem:[#allocation51_spill] sm:$0xff] }
0x11d6   : > { %26784 = vmatpush1.bf16.msra.mxu1 %v34139_v14 }
0x11d7   : > { %26786 = vmatprep.subr.bf16.mxu1 %v34140_v3 }
0x11da   : > { %26788 = vmatpush1.bf16.msra.mxu1 %v34141_v44 }
0x11db   : > { %26790 = vmatprep.subr.bf16.mxu1 %v34142_v59 }
0x11de   : > { %26792 = vmatpush1.bf16.msra.mxu1 %v34143_v11 }
0x11df   : > { %26794 = vmatprep.subr.bf16.mxu1 %v34144_v6 }
0x11e2   : > { %26796 = vmatpush1.bf16.msra.mxu1 %v34145_v39  ;;  %v21701_v39 = vld [vmem:[%s29947_s11 + $0x70] sm:$0xff] }
0x11e3   : > { %26798 = vmatprep.subr.bf16.mxu1 %v34146_v61 }
0x11e6   : > { %26800 = vmatpush1.bf16.msra.mxu1 %v34147_v40 }
0x11e7   : > { %26802 = vmatprep.subr.bf16.mxu1 %v34148_v57 }
0x11ea   : > { %26804 = vmatpush1.bf16.msra.mxu1 %v34149_v9  ;;  %v21699_v9 = vld [vmem:[%s29947_s11 + $0x60] sm:$0xff] }
0x11eb   : > { %26806 = vmatprep.subr.bf16.mxu1 %v33955_v2 }
0x11ed   : > { %9576 = vmatmul.mubr.f32.vlgmr.msra.gmra.mrb[20].mxu1 %v31818_v48 }
0x11ee   : > { %26808 = vmatpush1.bf16.msra.mxu1 %v33956_v23  ;;  %9581 = vmatprep.mubr.f32.mxu1 %v33957_v60 }
0x11ef   : > { %26810 = vmatprep.subr.bf16.mxu1 %v33958_v26 }
0x11f1   : > { %9583 = vmatmul.mubr.f32.gmra.mrb[22].mxu1 %v31816_v15 }
0x11f2   : > { %26812 = vmatpush1.bf16.msra.mxu1 %v33959_v34  ;;  %9685 = vmatprep.mubr.f32.mxu1 %v33957_v60 }
0x11f3   : > { %26814 = vmatprep.subr.bf16.mxu1 %v33960_v25 }
0x11f6   : > { %26816 = vmatpush1.bf16.msra.mxu1 %v33961_v56 }
0x11f7   : > { %26818 = vmatprep.subr.bf16.mxu1 %v33962_v22 }
0x11fa   : > { %26820 = vmatpush1.bf16.msra.mxu1 %v33963_v37 }
0x11fb   : > { %26822 = vmatprep.subr.bf16.mxu1 %v33964_v38 }
0x11fe   : > { %26824 = vmatpush1.bf16.msra.mxu1 %v33965_v58 }
0x11ff   : > { %26826 = vmatprep.subr.bf16.mxu1 %v33966_v24 }
0x1202   : > { %26828 = vmatpush1.bf16.msra.mxu1 %v33967_v46 }
0x1203   : > { %26830 = vmatprep.subr.bf16.mxu1 %v34096_v4 }
0x1206   : > { %26832 = vmatpush1.bf16.msra.mxu1 %v34097_v41 }
0x1207   : > { %26834 = vmatprep.subr.bf16.mxu1 %v34098_v13 }
0x120a   : > { %26836 = vmatpush1.bf16.msra.mxu1 %v34099_v21 }
0x120d   : > { %9687 = vmatmul.mubr.f32.vlgmr.msra.gmra.mrb[20].mxu1 %v31818_v48 }
0x120e   : > { %9692 = vmatprep.mubr.f32.mxu1 %v33957_v60 }
0x1211   : > { %9694 = vmatmul.mubr.f32.gmra.mrb[22].mxu1 %v31816_v15 }
0x1212   : > { %24177 = vmatprep.mubr.f32.mxu1 %v33907_v12 }
0x12e0   : > { %v9688_v57 = vpop.f32.mrb[20].mxu1 }
0x12e1   : > { %v9700_v40 = vadd.f32 %v21699_v9, %v9688_v57  ;;  %v31938_v61 = vpop.f32.mrb[21].mxu1 }
0x12e3   : > { %v21703_v6 = vmul.f32 -1.442695, %v9700_v40 }
0x12e4   : > { %v9695_v11 = vpop.f32.mrb[22].mxu1 }
0x12e5   : > { %29330 = vpow2.f32 %v21703_v6  ;;  %v9702_v59 = vadd.f32 %v21701_v39, %v9695_v11  ;;  %v31941_v44 = vpop.f32.mrb[23].mxu1 }
0x12e7   : > { %v21705_v3 = vmul.f32 -1.442695, %v9702_v59 }
0x12e9   : > { %29332 = vpow2.f32 %v21705_v3 }
0x12ef   : > { %v29331_v48 = vpop.eup %29330 }
0x12f0   : > { %v9716_v14 = vadd.f32 1.0, %v29331_v48 }
0x12f2   : > { %29334 = vrcp.f32 %v9716_v14 }
0x12f3   : > { %v29333_v15 = vpop.eup %29332 }
0x12f4   : > { %v9718_v1 = vadd.f32 1.0, %v29333_v15 }
0x12f6   : > { %29336 = vrcp.f32 %v9718_v1 }
0x12fc   : > { %v29335_v50 = vpop.eup %29334 }
0x12fd   : > { %v9728_v9 = vmul.f32 %v29335_v50, %v31777_v8 }
0x12ff   : > { %v9731_v57 = vand.u32 4294901760, %v9728_v9 }
0x1300   : > { %v29337_v21 = vpop.eup %29336 }
0x1301   : > { %v9729_v40 = vmul.f32 %v29337_v21, %v31775_v30  ;;  %v9819_v13 = vsub.f32 %v9728_v9, %v9731_v57 }
0x1303   : > { %v9734_v6 = vand.u32 4294901760, %v9729_v40  ;;  %v9820_v11 = vand.u32 4294901760, %v9819_v13 }
0x1305   : > { %v26837_v39 = vpack.c.bf16 %v9734_v6, %v9731_v57  ;;  %v9826_v41 = vsub.f32 %v9729_v40, %v9734_v6  ;;  %v9821_v3 = vsub.f32 %v9819_v13, %v9820_v11 }
0x1307   : > { %26838 = vmatprep.subr.bf16.mxu0 %v26837_v39  ;;  %v9827_v59 = vand.u32 4294901760, %v9826_v41  ;;  %v26845_v48 = vpack.c.bf16 %v9826_v41, %v9819_v13  ;;  %v9822_v1 = vand.u32 4294901760, %v9821_v3 }
0x1308   : > { %26840 = vmatpush3.bf16.msra.mxu0 %v26837_v39 }
0x1309   : > { %v9828_v14 = vsub.f32 %v9826_v41, %v9827_v59  ;;  %v26853_v15 = vpack.c.bf16 %v9827_v59, %v9820_v11 }
0x130b   : > { %23926 = vmatmul.mubr.f32.vlgmr.msra.gmra.mrb[14].mxu0 %v33908_v33  ;;  %v9829_v50 = vand.u32 4294901760, %v9828_v14  ;;  %v34151_v14 = vld [vmem:[#allocation55_spill] sm:$0xff] }
0x130c   : > { %23932 = vmatprep.mubr.f32.mxu0 %v33909_v0 }
0x130d   : > { %v26841_v4 = vpack.c.bf16 %v9829_v50, %v9822_v1  ;;  %v34153_v1 = vld [vmem:[#allocation58_spill] sm:$0xff]  ;;  %v34154_v50 = vld [vmem:[#allocation60_spill] sm:$0xff] }
0x130f   : > { %26842 = vmatprep.subr.bf16.mxu0 %v26841_v4 }
0x1310   : > { %26844 = vmatpush3.bf16.msra.mxu0 %v26841_v4 }
0x1311   : > { %26846 = vmatprep.subr.bf16.mxu0 %v26845_v48 }
0x1313   : > { %23933 = vmatmul.mubr.f32.vlgmr.msra.gmra.mrb[14].mxu0 %v33910_v18 }
0x1314   : > { %26848 = vmatpush3.bf16.msra.mxu0 %v26845_v48  ;;  %23939 = vmatprep.mubr.f32.mxu0 %v33911_v52  ;;  %v34150_v48 = vld [vmem:[#allocation54_spill] sm:$0xff] }
0x1315   : > { %26850 = vmatprep.subr.bf16.mxu0 %v26837_v39 }
0x131b   : > { %23940 = vmatmul.mubr.f32.vlgmr.msra.gmra.mrb[14].mxu0 %v33912_v62 }
0x131c   : > { %26852 = vmatpush3.bf16.msra.mxu0 %v26837_v39  ;;  %23946 = vmatprep.mubr.f32.mxu0 %v33913_v27 }
0x131d   : > { %26854 = vmatprep.subr.bf16.mxu0 %v26853_v15 }
0x1323   : > { %23947 = vmatmul.mubr.f32.vlgmr.msra.gmra.mrb[14].mxu0 %v33914_v31 }
0x1324   : > { %26856 = vmatpush3.bf16.msra.mxu0 %v26853_v15  ;;  %23953 = vmatprep.mubr.f32.mxu0 %v33909_v0  ;;  %v34152_v15 = vld [vmem:[#allocation57_spill] sm:$0xff] }
0x1325   : > { %26858 = vmatprep.subr.bf16.mxu0 %v26837_v39 }
0x132b   : > { %23954 = vmatmul.mubr.f32.vlgmr.msra.gmra.mrb[14].mxu0 %v33910_v18 }
0x132c   : > { %26860 = vmatpush3.bf16.msra.mxu0 %v26837_v39  ;;  %23960 = vmatprep.mubr.f32.mxu0 %v33909_v0 }
0x132d   : > { %26862 = vmatprep.subr.bf16.mxu0 %v30757_v55 }
0x1333   : > { %23961 = vmatmul.mubr.f32.vlgmr.msra.gmra.mrb[14].mxu0 %v33910_v18 }
0x1334   : > { %26864 = vmatpush3.bf16.msra.mxu0 %v30757_v55 }
0x1335   : > { %26866 = vmatprep.subr.bf16.mxu0 %v30776_v28 }
0x1338   : > { %26868 = vmatpush3.bf16.msra.mxu0 %v30776_v28 }
0x1339   : > { %26870 = vmatprep.subr.bf16.mxu0 %v30791_v20 }
0x133c   : > { %26872 = vmatpush3.bf16.msra.mxu0 %v30791_v20 }
0x133d   : > { %26874 = vmatprep.subr.bf16.mxu0 %v30805_v49 }
0x1340   : > { %26876 = vmatpush3.bf16.msra.mxu0 %v30805_v49 }
0x1341   : > { %26878 = vmatprep.subr.bf16.mxu0 %v30815_v5 }
0x1344   : > { %26880 = vmatpush3.bf16.msra.mxu0 %v30815_v5 }
0x1345   : > { %26882 = vmatprep.subr.bf16.mxu0 %v30820_v7 }
0x1348   : > { %26884 = vmatpush3.bf16.msra.mxu0 %v30820_v7 }
0x1349   : > { %26886 = vmatprep.subr.bf16.mxu0 %v30824_v16 }
0x134c   : > { %26888 = vmatpush3.bf16.msra.mxu0 %v30824_v16 }
0x134d   : > { %26890 = vmatprep.subr.bf16.mxu0 %v30834_v63 }
0x1350   : > { %26892 = vmatpush3.bf16.msra.mxu0 %v30834_v63 }
0x1351   : > { %26894 = vmatprep.subr.bf16.mxu0 %v30844_v47 }
0x1406   : > { %v23962_v4 = vpop.f32.mrb[14].mxu0 }
0x1407   : > { %v31973_v41 = vand.u32 4294901760, %v23962_v4  ;;  %v10222_v13 = vpop.f32.mrb[15].mxu0 }
0x1408   : > { %v31975_v21 = vand.u32 4294901760, %v10222_v13 }
0x1409   : > { %v31978_v9 = vsub.f32 %v23962_v4, %v31973_v41  ;;  %v34155_v4 = vld [vmem:[#allocation62_spill] sm:$0xff] }
0x140a   : > { %v10317_v57 = vsub.f32 %v10222_v13, %v31975_v21  ;;  %v34156_v13 = vld [vmem:[#allocation63_spill] sm:$0xff] }
0x140b   : > { %v10328_v40 = vand.u32 4294901760, %v31978_v9 }
0x140c   : > { %v10318_v6 = vand.u32 4294901760, %v10317_v57 }
0x140d   : > { %v10329_v11 = vsub.f32 %v31978_v9, %v10328_v40 }
0x140e   : > { %v10319_v39 = vsub.f32 %v10317_v57, %v10318_v6 }
0x140f   : > { %v10330_v59 = vand.u32 4294901760, %v10329_v11 }
0x1410   : > { %v10320_v3 = vand.u32 4294901760, %v10319_v39 }
0x1412   : > { %23995 = vmatprep.mubr.f32.mxu0 %v10320_v3 }
0x1413   : > { %23996 = vmatmul.mubr.f32.vlgmr.msra.gmra.mrb[16].mxu0 %v10330_v59 }
0x1414   : > { %26896 = vmatpush3.bf16.msra.mxu0 %v30844_v47  ;;  %24030 = vmatprep.mubr.f32.mxu0 %v31975_v21 }
0x1415   : > { %26898 = vmatprep.subr.bf16.mxu0 %v30981_v42 }
0x1418   : > { %26900 = vmatpush3.bf16.msra.mxu0 %v30981_v42 }
0x1419   : > { %26902 = vmatprep.subr.bf16.mxu0 %v30993_v45 }
0x141c   : > { %26904 = vmatpush3.bf16.msra.mxu0 %v30993_v45 }
0x141d   : > { %26906 = vmatprep.subr.bf16.mxu0 %v31004_v35 }
0x1420   : > { %26908 = vmatpush3.bf16.msra.mxu0 %v31004_v35 }
0x1421   : > { %26910 = vmatprep.subr.bf16.mxu0 %v31008_v19 }
0x1424   : > { %26912 = vmatpush3.bf16.msra.mxu0 %v31008_v19 }
0x1425   : > { %26914 = vmatprep.subr.bf16.mxu0 %v30865_v36 }
0x1428   : > { %26916 = vmatpush3.bf16.msra.mxu0 %v30865_v36 }
0x1429   : > { %26918 = vmatprep.subr.bf16.mxu0 %v30879_v54 }
0x142c   : > { %26920 = vmatpush3.bf16.msra.mxu0 %v30879_v54 }
0x142d   : > { %26922 = vmatprep.subr.bf16.mxu0 %v30887_v53 }
0x1430   : > { %26924 = vmatpush3.bf16.msra.mxu0 %v30887_v53 }
0x1431   : > { %26926 = vmatprep.subr.bf16.mxu0 %v30891_v43 }
0x1433   : > { %24031 = vmatmul.mubr.f32.vlgmr.msra.gmra.mrb[16].mxu0 %v31973_v41 }
0x1434   : > { %26928 = vmatpush3.bf16.msra.mxu0 %v30891_v43  ;;  %24065 = vmatprep.mubr.f32.mxu0 %v10317_v57  ;;  %v34158_v57 = vld [vmem:[#allocation18_spill] sm:$0xff] }
0x1435   : > { %26930 = vmatprep.subr.bf16.mxu0 %v31022_v32 }
0x1438   : > { %26932 = vmatpush3.bf16.msra.mxu0 %v31022_v32 }
0x1439   : > { %26934 = vmatprep.subr.bf16.mxu0 %v31030_v17 }
0x143c   : > { %26936 = vmatpush3.bf16.msra.mxu0 %v31030_v17 }
0x143d   : > { %26938 = vmatprep.subr.bf16.mxu0 %v31036_v10 }
0x1440   : > { %26940 = vmatpush3.bf16.msra.mxu0 %v31036_v10 }
0x1441   : > { %26942 = vmatprep.subr.bf16.mxu0 %v31042_v51 }
0x1444   : > { %26944 = vmatpush3.bf16.msra.mxu0 %v31042_v51 }
0x1445   : > { %26946 = vmatprep.subr.bf16.mxu0 %v30895_v29 }
0x1448   : > { %26948 = vmatpush3.bf16.msra.mxu0 %v30895_v29 }
0x1449   : > { %26950 = vmatprep.subr.bf16.mxu0 %v34150_v48 }
0x144c   : > { %26952 = vmatpush3.bf16.msra.mxu0 %v34150_v48  ;;  %v34174_v48 = vld [vmem:[#allocation59_spill] sm:$0xff] }
0x144d   : > { %26954 = vmatprep.subr.bf16.mxu0 %v34151_v14 }
0x1450   : > { %26956 = vmatpush3.bf16.msra.mxu0 %v34151_v14 }
0x1451   : > { %26958 = vmatprep.subr.bf16.mxu0 %v30757_v55 }
0x1453   : > { %24066 = vmatmul.mubr.f32.vlgmr.msra.gmra.mrb[16].mxu0 %v31978_v9  ;;  %v34157_v9 = vld [vmem:[#allocation25_spill] sm:$0xff] }
0x1454   : > { %26960 = vmatpush3.bf16.msra.mxu0 %v30757_v55  ;;  %24100 = vmatprep.mubr.f32.mxu0 %v10318_v6  ;;  %v21700_v6 = vld [vmem:[%s29947_s11 + $0x68] sm:$0xff] }
0x1455   : > { %26962 = vmatprep.subr.bf16.mxu0 %v30776_v28  ;;  %v9701_v39 = vadd.f32 %v21700_v6, %v31938_v61 }
0x1457   : > { %v21704_v59 = vmul.f32 -1.442695, %v9701_v39 }
0x1458   : > { %26964 = vmatpush3.bf16.msra.mxu0 %v30776_v28 }
0x1459   : > { %26966 = vmatprep.subr.bf16.mxu0 %v30791_v20 }
0x145c   : > { %26968 = vmatpush3.bf16.msra.mxu0 %v30791_v20 }
0x145d   : > { %26970 = vmatprep.subr.bf16.mxu0 %v30805_v49 }
0x1460   : > { %26972 = vmatpush3.bf16.msra.mxu0 %v30805_v49 }
0x1461   : > { %26974 = vmatprep.subr.bf16.mxu0 %v30815_v5 }
0x1464   : > { %26976 = vmatpush3.bf16.msra.mxu0 %v30815_v5 }
0x1465   : > { %26978 = vmatprep.subr.bf16.mxu0 %v30820_v7 }
0x1468   : > { %26980 = vmatpush3.bf16.msra.mxu0 %v30820_v7 }
0x1469   : > { %26982 = vmatprep.subr.bf16.mxu0 %v30824_v16 }
0x146c   : > { %26984 = vmatpush3.bf16.msra.mxu0 %v30824_v16 }
0x146d   : > { %26986 = vmatprep.subr.bf16.mxu0 %v30834_v63 }
0x1470   : > { %26988 = vmatpush3.bf16.msra.mxu0 %v30834_v63 }
0x1471   : > { %26990 = vmatprep.subr.bf16.mxu0 %v34152_v15 }
0x1473   : > { %24101 = vmatmul.mubr.f32.vlgmr.msra.gmra.mrb[16].mxu0 %v10328_v40  ;;  %v34159_v40 = vld [vmem:[#allocation19_spill] sm:$0xff] }
0x1474   : > { %26992 = vmatpush3.bf16.msra.mxu0 %v34152_v15  ;;  %24135 = vmatprep.mubr.f32.mxu0 %v31975_v21 }
0x1475   : > { %26994 = vmatprep.subr.bf16.mxu0 %v34153_v1 }
0x1478   : > { %26996 = vmatpush3.bf16.msra.mxu0 %v34153_v1 }
0x1479   : > { %26998 = vmatprep.subr.bf16.mxu0 %v34154_v50 }
0x147c   : > { %27000 = vmatpush3.bf16.msra.mxu0 %v34154_v50 }
0x147d   : > { %27002 = vmatprep.subr.bf16.mxu0 %v34155_v4 }
0x1480   : > { %27004 = vmatpush3.bf16.msra.mxu0 %v34155_v4  ;;  %v21708_v4 = vld [vmem:[%s29957_s23 + $0x38] sm:$0xff] }
0x1481   : > { %27006 = vmatprep.subr.bf16.mxu0 %v34156_v13 }
0x1484   : > { %27008 = vmatpush3.bf16.msra.mxu0 %v34156_v13 }
0x1485   : > { %27010 = vmatprep.subr.bf16.mxu0 %v34157_v9 }
0x1488   : > { %27012 = vmatpush3.bf16.msra.mxu0 %v34157_v9 }
0x1489   : > { %27014 = vmatprep.subr.bf16.mxu0 %v34158_v57 }
0x148c   : > { %27016 = vmatpush3.bf16.msra.mxu0 %v34158_v57 }
0x148d   : > { %27018 = vmatprep.subr.bf16.mxu0 %v34159_v40 }
0x1490   : > { %27020 = vmatpush3.bf16.msra.mxu0 %v34159_v40 }
0x1491   : > { %27022 = vmatprep.subr.bf16.mxu0 %v30757_v55 }
0x1493   : > { %24136 = vmatmul.mubr.f32.vlgmr.msra.gmra.mrb[16].mxu0 %v31973_v41 }
0x1494   : > { %27024 = vmatpush3.bf16.msra.mxu0 %v30757_v55  ;;  %24170 = vmatprep.mubr.f32.mxu0 %v31975_v21  ;;  %v21702_v21 = vld [vmem:[%s29947_s11 + $0x78] sm:$0xff] }
0x1495   : > { %27026 = vmatprep.subr.bf16.mxu0 %v30776_v28  ;;  %v9703_v11 = vadd.f32 %v21702_v21, %v31941_v44 }
0x1497   : > { %v21706_v3 = vmul.f32 -1.442695, %v9703_v11 }
0x1498   : > { %27028 = vmatpush3.bf16.msra.mxu0 %v30776_v28 }
0x1499   : > { %27030 = vmatprep.subr.bf16.mxu0 %v30791_v20  ;;  %29338 = vpow2.f32 %v21706_v3 }
0x149a   : > { %29340 = vpow2.f32 %v21704_v59 }
0x149c   : > { %27032 = vmatpush3.bf16.msra.mxu0 %v30791_v20 }
0x149d   : > { %27034 = vmatprep.subr.bf16.mxu0 %v30805_v49 }
0x14a0   : > { %27036 = vmatpush3.bf16.msra.mxu0 %v30805_v49 }
0x14a1   : > { %27038 = vmatprep.subr.bf16.mxu0 %v30815_v5 }
0x14a3   : > { %v29339_v40 = vpop.eup %29338 }
0x14a4   : > { %27040 = vmatpush3.bf16.msra.mxu0 %v30815_v5  ;;  %v29341_v57 = vpop.eup %29340  ;;  %v9719_v9 = vadd.f32 1.0, %v29339_v40 }
0x14a5   : > { %27042 = vmatprep.subr.bf16.mxu0 %v30820_v7  ;;  %v9717_v13 = vadd.f32 1.0, %v29341_v57 }
0x14a6   : > { %29342 = vrcp.f32 %v9719_v9 }
0x14a7   : > { %29344 = vrcp.f32 %v9717_v13 }
0x14a8   : > { %27044 = vmatpush3.bf16.msra.mxu0 %v30820_v7 }
0x14a9   : > { %27046 = vmatprep.subr.bf16.mxu0 %v30824_v16 }
0x14ac   : > { %27048 = vmatpush3.bf16.msra.mxu0 %v30824_v16 }
0x14ad   : > { %27050 = vmatprep.subr.bf16.mxu0 %v30834_v63 }
0x14b0   : > { %27052 = vmatpush3.bf16.msra.mxu0 %v30834_v63  ;;  %v29343_v44 = vpop.eup %29342 }
0x14b1   : > { %v29345_v61 = vpop.eup %29344  ;;  %v10926_v21 = vsub.f32 1.0, %v29343_v44  ;;  %v10924_v57 = vmul.f32 %v29343_v44, %v31775_v30 }
0x14b2   : > { %v10925_v11 = vsub.f32 1.0, %v29345_v61  ;;  %v10923_v9 = vmul.f32 %v29345_v61, %v31777_v8 }
0x14b3   : > { %24171 = vmatmul.mubr.f32.vlgmr.msra.gmra.mrb[16].mxu0 %v31973_v41  ;;  %v21707_v41 = vld [vmem:[%s29957_s23 + $0x30] sm:$0xff] }
0x14b4   : > { %24219 = vmatprep.mubr.f32.mxu0 %v33907_v12 }
0x1586   : > { %v24172_v50 = vpop.f32.mrb[16].mxu0 }
0x1587   : > { %v10920_v1 = vadd.f32 %v24172_v50, %v21708_v4  ;;  %v10909_v15 = vpop.f32.mrb[17].mxu0 }
0x1588   : > { %v10919_v14 = vadd.f32 %v21707_v41, %v10909_v15 }
0x1589   : > { %29346 = vtanh.f32 %v10920_v1 }
0x158a   : > { %29348 = vtanh.f32 %v10919_v14 }
0x1593   : > { %v29347_v6 = vpop.eup %29346 }
0x1594   : > { %v29349_v39 = vpop.eup %29348  ;;  %v10928_v40 = vmul.f32 %v29347_v6, %v10926_v21 }
0x1595   : > { %v10927_v13 = vmul.f32 %v29349_v39, %v10925_v11 }
0x1596   : > { %v32078_v3 = vadd.f32 %v10928_v40, %v10924_v57  ;;  %v34160_v57 = vld [vmem:[#allocation38_spill] sm:$0xff]  ;;  %v34161_v40 = vld [vmem:[#allocation40_spill] sm:$0xff] }
0x1597   : > { %v32080_v50 = vadd.f32 %v10927_v13, %v10923_v9  ;;  %v34162_v9 = vld [vmem:[#allocation41_spill] sm:$0xff]  ;;  %v34163_v13 = vld [vmem:[#allocation42_spill] sm:$0xff] }
0x1598   : > { %21710 = vst [vmem:[%s31171_s24 + $0x38] sm:$0xff] %v32078_v3  ;;  %v10938_v14 = vand.u32 4294901760, %v32078_v3 }
0x1599   : > { %21709 = vst [vmem:[%s31171_s24 + $0x30] sm:$0xff] %v32080_v50  ;;  %v10935_v15 = vand.u32 4294901760, %v32080_v50 }
0x159a   : > { %v11030_v1 = vsub.f32 %v32078_v3, %v10938_v14 }
0x159b   : > { %v27053_v4 = vpack.c.bf16 %v10938_v14, %v10935_v15  ;;  %v11023_v30 = vsub.f32 %v32080_v50, %v10935_v15  ;;  %v34164_v14 = vld [vmem:[#allocation43_spill] sm:$0xff] }
0x159c   : > { %v11031_v59 = vand.u32 4294901760, %v11030_v1 }
0x159d   : > { %27054 = vmatprep.subr.bf16.mxu1 %v27053_v4  ;;  %v11024_v8 = vand.u32 4294901760, %v11023_v30  ;;  %v27061_v11 = vpack.c.bf16 %v11030_v1, %v11023_v30 }
0x159e   : > { %27056 = vmatpush3.bf16.msra.mxu1 %v27053_v4  ;;  %v11032_v41 = vsub.f32 %v11030_v1, %v11031_v59 }
0x159f   : > { %v11025_v44 = vsub.f32 %v11023_v30, %v11024_v8  ;;  %v27069_v39 = vpack.c.bf16 %v11031_v59, %v11024_v8 }
0x15a0   : > { %v11033_v61 = vand.u32 4294901760, %v11032_v41 }
0x15a1   : > { %24178 = vmatmul.mubr.f32.vlgmr.msra.gmra.mrb[24].mxu1 %v33908_v33  ;;  %v11026_v21 = vand.u32 4294901760, %v11025_v44 }
0x15a2   : > { %24184 = vmatprep.mubr.f32.mxu1 %v33909_v0 }
0x15a3   : > { %v27057_v6 = vpack.c.bf16 %v11033_v61, %v11026_v21 }
0x15a5   : > { %27058 = vmatprep.subr.bf16.mxu1 %v27057_v6 }
0x15a6   : > { %27060 = vmatpush3.bf16.msra.mxu1 %v27057_v6 }
0x15a7   : > { %27062 = vmatprep.subr.bf16.mxu1 %v27061_v11 }
0x15a9   : > { %24185 = vmatmul.mubr.f32.vlgmr.msra.gmra.mrb[24].mxu1 %v33910_v18 }
0x15aa   : > { %27064 = vmatpush3.bf16.msra.mxu1 %v27061_v11  ;;  %24191 = vmatprep.mubr.f32.mxu1 %v33911_v52  ;;  %v34165_v11 = vld [vmem:[#allocation77_spill] sm:$0xff] }
0x15ab   : > { %27066 = vmatprep.subr.bf16.mxu1 %v27053_v4 }
0x15b1   : > { %24192 = vmatmul.mubr.f32.vlgmr.msra.gmra.mrb[24].mxu1 %v33912_v62 }
0x15b2   : > { %27068 = vmatpush3.bf16.msra.mxu1 %v27053_v4  ;;  %24198 = vmatprep.mubr.f32.mxu1 %v33913_v27 }
0x15b3   : > { %27070 = vmatprep.subr.bf16.mxu1 %v27069_v39 }
0x15b9   : > { %24199 = vmatmul.mubr.f32.vlgmr.msra.gmra.mrb[24].mxu1 %v33914_v31 }
0x15ba   : > { %27072 = vmatpush3.bf16.msra.mxu1 %v27069_v39  ;;  %24205 = vmatprep.mubr.f32.mxu1 %v33909_v0  ;;  %v34166_v39 = vld [vmem:[#allocation78_spill] sm:$0xff] }
0x15bb   : > { %27074 = vmatprep.subr.bf16.mxu1 %v27053_v4 }
0x15c1   : > { %24206 = vmatmul.mubr.f32.vlgmr.msra.gmra.mrb[24].mxu1 %v33910_v18 }
0x15c2   : > { %27076 = vmatpush3.bf16.msra.mxu1 %v27053_v4  ;;  %24212 = vmatprep.mubr.f32.mxu1 %v33909_v0 }
0x15c3   : > { %27078 = vmatprep.subr.bf16.mxu1 %v33955_v2 }
0x15c9   : > { %24213 = vmatmul.mubr.f32.vlgmr.msra.gmra.mrb[24].mxu1 %v33910_v18 }
0x15ca   : > { %27080 = vmatpush1.bf16.msra.mxu1 %v33956_v23  ;;  %11537 = vmatprep.mubr.f32.mxu1 %v33957_v60 }
0x15cb   : > { %27082 = vmatprep.subr.bf16.mxu1 %v33958_v26 }
0x15ce   : > { %27084 = vmatpush1.bf16.msra.mxu1 %v33959_v34 }
0x15cf   : > { %27086 = vmatprep.subr.bf16.mxu1 %v33960_v25 }
0x15d2   : > { %27088 = vmatpush1.bf16.msra.mxu1 %v33961_v56 }
0x15d3   : > { %27090 = vmatprep.subr.bf16.mxu1 %v33962_v22 }
0x15d6   : > { %27092 = vmatpush1.bf16.msra.mxu1 %v33963_v37 }
0x15d7   : > { %27094 = vmatprep.subr.bf16.mxu1 %v33964_v38 }
0x15da   : > { %27096 = vmatpush1.bf16.msra.mxu1 %v33965_v58 }
0x15db   : > { %27098 = vmatprep.subr.bf16.mxu1 %v33966_v24 }
0x15de   : > { %27100 = vmatpush1.bf16.msra.mxu1 %v33967_v46 }
0x15df   : > { %27102 = vmatprep.subr.bf16.mxu1 %v34160_v57 }
0x15e2   : > { %27104 = vmatpush1.bf16.msra.mxu1 %v34161_v40 }
0x15e3   : > { %27106 = vmatprep.subr.bf16.mxu1 %v34162_v9 }
0x15e6   : > { %27108 = vmatpush1.bf16.msra.mxu1 %v34163_v13 }
0x15e7   : > { %27110 = vmatprep.subr.bf16.mxu1 %v34164_v14  ;;  %v34168_v14 = vld [vmem:[#allocation80_spill] sm:$0xff] }
0x169c   : > { %v24214_v15 = vpop.f32.mrb[24].mxu1 }
0x169d   : > { %v32119_v1 = vand.u32 4294901760, %v24214_v15  ;;  %v11426_v4 = vpop.f32.mrb[25].mxu1 }
0x169e   : > { %v32121_v30 = vand.u32 4294901760, %v11426_v4 }
0x169f   : > { %v32124_v59 = vsub.f32 %v24214_v15, %v32119_v1 }
0x16a0   : > { %v32127_v8 = vsub.f32 %v11426_v4, %v32121_v30  ;;  %v34167_v4 = vld [vmem:[#allocation79_spill] sm:$0xff] }
0x16a1   : > { %v33652_v41 = vand.u32 4294901760, %v32124_v59 }
0x16a2   : > { %v33651_v44 = vand.u32 4294901760, %v32127_v8 }
0x16a3   : > { %v11552_v6 = vsub.f32 %v32124_v59, %v33652_v41  ;;  %v34171_v41 = vld [vmem:[#allocation83_spill] sm:$0xff] }
0x16a4   : > { %v11541_v61 = vsub.f32 %v32127_v8, %v33651_v44  ;;  %v34170_v44 = vld [vmem:[#allocation82_spill] sm:$0xff] }
0x16a5   : > { %v11553_v15 = vand.u32 4294901760, %v11552_v6  ;;  %v34175_v6 = vld [vmem:[#allocation61_spill] sm:$0xff] }
0x16a6   : > { %v11542_v21 = vand.u32 4294901760, %v11541_v61  ;;  %v34169_v61 = vld [vmem:[#allocation81_spill] sm:$0xff] }
0x16a8   : > { %11543 = vmatmul.mubr.f32.vlgmr.msra.gmra.mrb[26].mxu1 %v11542_v21  ;;  %v34172_v21 = vld [vmem:[#allocation52_spill] sm:$0xff] }
0x16a9   : > { %27112 = vmatpush1.bf16.msra.mxu1 %v34165_v11  ;;  %11548 = vmatprep.mubr.f32.mxu1 %v33957_v60  ;;  %v34173_v11 = vld [vmem:[#allocation56_spill] sm:$0xff] }
0x16aa   : > { %27114 = vmatprep.subr.bf16.mxu1 %v34166_v39  ;;  %v34178_v39 = vld [vmem:[#allocation66_spill] sm:$0xff] }
0x16ac   : > { %11554 = vmatmul.mubr.f32.gmra.mrb[28].mxu1 %v11553_v15  ;;  %v34176_v15 = vld [vmem:[#allocation64_spill] sm:$0xff] }
0x16ad   : > { %27116 = vmatpush1.bf16.msra.mxu1 %v34167_v4  ;;  %11784 = vmatprep.mubr.f32.mxu1 %v33957_v60  ;;  %v34177_v4 = vld [vmem:[#allocation65_spill] sm:$0xff] }
0x16ae   : > { %27118 = vmatprep.subr.bf16.mxu1 %v34168_v14  ;;  %v34179_v14 = vld [vmem:[#allocation68_spill] sm:$0xff] }
0x16b1   : > { %27120 = vmatpush1.bf16.msra.mxu1 %v34169_v61  ;;  %v34180_v61 = vld [vmem:[#allocation67_spill] sm:$0xff] }
0x16b2   : > { %27122 = vmatprep.subr.bf16.mxu1 %v34170_v44  ;;  %v34194_v44 = vld [vmem:[#allocation75_spill] sm:$0xff] }
0x16b5   : > { %27124 = vmatpush1.bf16.msra.mxu1 %v34171_v41  ;;  %v34181_v41 = vld [vmem:[#allocation84_spill] sm:$0xff] }
0x16b6   : > { %27126 = vmatprep.subr.bf16.mxu1 %v34172_v21  ;;  %v34192_v21 = vld [vmem:[#allocation73_spill] sm:$0xff] }
0x16b9   : > { %27128 = vmatpush1.bf16.msra.mxu1 %v34173_v11  ;;  %v34182_v11 = vld [vmem:[#allocation85_spill] sm:$0xff] }
0x16ba   : > { %27130 = vmatprep.subr.bf16.mxu1 %v34174_v48  ;;  %v34190_v48 = vld [vmem:[#allocation71_spill] sm:$0xff] }
0x16bd   : > { %27132 = vmatpush1.bf16.msra.mxu1 %v34175_v6  ;;  %v34183_v6 = vld [vmem:[#allocation86_spill] sm:$0xff] }
0x16be   : > { %27134 = vmatprep.subr.bf16.mxu1 %v34176_v15  ;;  %v34188_v15 = vld [vmem:[#allocation69_spill] sm:$0xff] }
0x16c1   : > { %27136 = vmatpush1.bf16.msra.mxu1 %v34177_v4  ;;  %v34184_v4 = vld [vmem:[#allocation87_spill] sm:$0xff] }
0x16c2   : > { %27138 = vmatprep.subr.bf16.mxu1 %v34178_v39  ;;  %v34185_v39 = vld [vmem:[#allocation88_spill] sm:$0xff] }
0x16c5   : > { %27140 = vmatpush1.bf16.msra.mxu1 %v34179_v14  ;;  %v34186_v14 = vld [vmem:[#allocation89_spill] sm:$0xff] }
0x16c6   : > { %27142 = vmatprep.subr.bf16.mxu1 %v34180_v61  ;;  %v34187_v61 = vld [vmem:[#allocation90_spill] sm:$0xff] }
0x16c8   : > { %11786 = vmatmul.mubr.f32.vlgmr.msra.gmra.mrb[26].mxu1 %v32121_v30 }
0x16c9   : > { %27144 = vmatpush1.bf16.msra.mxu1 %v34181_v41  ;;  %11791 = vmatprep.mubr.f32.mxu1 %v33957_v60  ;;  %v34189_v41 = vld [vmem:[#allocation70_spill] sm:$0xff] }
0x16ca   : > { %27146 = vmatprep.subr.bf16.mxu1 %v34182_v11  ;;  %v34191_v11 = vld [vmem:[#allocation72_spill] sm:$0xff] }
0x16cc   : > { %11793 = vmatmul.mubr.f32.gmra.mrb[28].mxu1 %v32119_v1 }
0x16cd   : > { %27148 = vmatpush1.bf16.msra.mxu1 %v34183_v6  ;;  %11927 = vmatprep.mubr.f32.mxu1 %v33957_v60  ;;  %v34193_v6 = vld [vmem:[#allocation74_spill] sm:$0xff] }
0x16ce   : > { %27150 = vmatprep.subr.bf16.mxu1 %v34184_v4  ;;  %v34195_v4 = vld [vmem:[#allocation76_spill] sm:$0xff] }
0x16d1   : > { %27152 = vmatpush1.bf16.msra.mxu1 %v34185_v39 }
0x16d2   : > { %27154 = vmatprep.subr.bf16.mxu1 %v34186_v14 }
0x16d5   : > { %27156 = vmatpush1.bf16.msra.mxu1 %v34187_v61  ;;  %v34212_v61 = vld [vmem:[#allocation50_spill] sm:$0xff] }
0x16d6   : > { %27158 = vmatprep.subr.bf16.mxu1 %v34188_v15  ;;  %v34203_v15 = vld [vmem:[#allocation95_spill] sm:$0xff] }
0x16d9   : > { %27160 = vmatpush1.bf16.msra.mxu1 %v34189_v41  ;;  %v34202_v41 = vld [vmem:[#allocation94_spill] sm:$0xff] }
0x16da   : > { %27162 = vmatprep.subr.bf16.mxu1 %v34190_v48  ;;  %v34201_v48 = vld [vmem:[#allocation93_spill] sm:$0xff] }
0x16dd   : > { %27164 = vmatpush1.bf16.msra.mxu1 %v34191_v11  ;;  %v34200_v11 = vand.u32 4294901760, %v32124_v59 }
0x16de   : > { %27166 = vmatprep.subr.bf16.mxu1 %v34192_v21  ;;  %v34199_v21 = vld [vmem:[#allocation92_spill] sm:$0xff] }
0x16e1   : > { %27168 = vmatpush1.bf16.msra.mxu1 %v34193_v6  ;;  %v34198_v6 = vld [vmem:[#allocation91_spill] sm:$0xff] }
0x16e2   : > { %27170 = vmatprep.subr.bf16.mxu1 %v34194_v44  ;;  %v34197_v44 = vand.u32 4294901760, %v32127_v8 }
0x16e5   : > { %27172 = vmatpush1.bf16.msra.mxu1 %v34195_v4  ;;  %v34196_v4 = vld [vmem:[#allocation39_spill] sm:$0xff] }
0x16e6   : > { %27174 = vmatprep.subr.bf16.mxu1 %v33955_v2 }
0x16e8   : > { %11930 = vmatmul.mubr.f32.vlgmr.msra.gmra.mrb[26].mxu1 %v32127_v8  ;;  %v34205_v8 = vld [vmem:[#allocation97_spill] sm:$0xff] }
0x16e9   : > { %27176 = vmatpush1.bf16.msra.mxu1 %v33956_v23  ;;  %11935 = vmatprep.mubr.f32.mxu1 %v33957_v60 }
0x16ea   : > { %27178 = vmatprep.subr.bf16.mxu1 %v33958_v26 }
0x16ec   : > { %11938 = vmatmul.mubr.f32.gmra.mrb[28].mxu1 %v32124_v59  ;;  %v34209_v59 = vld [vmem:[#allocation47_spill] sm:$0xff] }
0x16ed   : > { %27180 = vmatpush1.bf16.msra.mxu1 %v33959_v34  ;;  %12040 = vmatprep.mubr.f32.mxu1 %v33957_v60 }
0x16ee   : > { %27182 = vmatprep.subr.bf16.mxu1 %v33960_v25 }
0x16f1   : > { %27184 = vmatpush1.bf16.msra.mxu1 %v33961_v56 }
0x16f2   : > { %27186 = vmatprep.subr.bf16.mxu1 %v33962_v22 }
0x16f5   : > { %27188 = vmatpush1.bf16.msra.mxu1 %v33963_v37 }
0x16f6   : > { %27190 = vmatprep.subr.bf16.mxu1 %v33964_v38 }
0x16f9   : > { %27192 = vmatpush1.bf16.msra.mxu1 %v33965_v58 }
0x16fa   : > { %27194 = vmatprep.subr.bf16.mxu1 %v33966_v24 }
0x16fd   : > { %27196 = vmatpush1.bf16.msra.mxu1 %v33967_v46 }
0x16fe   : > { %27198 = vmatprep.subr.bf16.mxu1 %v34160_v57 }
0x1701   : > { %27200 = vmatpush1.bf16.msra.mxu1 %v34161_v40 }
0x1702   : > { %27202 = vmatprep.subr.bf16.mxu1 %v34162_v9 }
0x1705   : > { %27204 = vmatpush1.bf16.msra.mxu1 %v34163_v13 }
0x1706   : > { %27206 = vmatprep.subr.bf16.mxu1 %v34196_v4  ;;  %v34204_v4 = vld [vmem:[#allocation96_spill] sm:$0xff] }
0x1708   : > { %12044 = vmatmul.mubr.f32.vlgmr.msra.gmra.mrb[26].mxu1 %v34197_v44  ;;  %v34206_v44 = vld [vmem:[#allocation44_spill] sm:$0xff] }
0x1709   : > { %27208 = vmatpush1.bf16.msra.mxu1 %v34198_v6  ;;  %12049 = vmatprep.mubr.f32.mxu1 %v33957_v60  ;;  %v34207_v6 = vld [vmem:[#allocation45_spill] sm:$0xff] }
0x170a   : > { %27210 = vmatprep.subr.bf16.mxu1 %v34199_v21  ;;  %v34208_v21 = vld [vmem:[#allocation46_spill] sm:$0xff] }
0x170c   : > { %12053 = vmatmul.mubr.f32.gmra.mrb[28].mxu1 %v34200_v11  ;;  %v34210_v11 = vld [vmem:[#allocation48_spill] sm:$0xff] }
0x170d   : > { %27212 = vmatpush1.bf16.msra.mxu1 %v34201_v48  ;;  %12219 = vmatprep.mubr.f32.mxu1 %v33957_v60  ;;  %v34211_v48 = vld [vmem:[#allocation49_spill] sm:$0xff] }
0x170e   : > { %27214 = vmatprep.subr.bf16.mxu1 %v34202_v41  ;;  %v34213_v41 = vld [vmem:[#allocation51_spill] sm:$0xff] }
0x1711   : > { %27216 = vmatpush1.bf16.msra.mxu1 %v34203_v15 }
0x1712   : > { %27218 = vmatprep.subr.bf16.mxu1 %v34204_v4 }
0x1715   : > { %27220 = vmatpush1.bf16.msra.mxu1 %v34205_v8 }
0x1716   : > { %27222 = vmatprep.subr.bf16.mxu1 %v34206_v44 }
0x1719   : > { %27224 = vmatpush1.bf16.msra.mxu1 %v34207_v6 }
0x171a   : > { %27226 = vmatprep.subr.bf16.mxu1 %v34208_v21 }
0x171d   : > { %27228 = vmatpush1.bf16.msra.mxu1 %v34209_v59  ;;  %v21713_v59 = vld [vmem:[%s29947_s11 + $0x90] sm:$0xff] }
0x171e   : > { %27230 = vmatprep.subr.bf16.mxu1 %v34210_v11 }
0x1721   : > { %27232 = vmatpush1.bf16.msra.mxu1 %v34211_v48 }
0x1722   : > { %27234 = vmatprep.subr.bf16.mxu1 %v34212_v61 }
0x1725   : > { %27236 = vmatpush1.bf16.msra.mxu1 %v34213_v41  ;;  %v21711_v41 = vld [vmem:[%s29947_s11 + $0x80] sm:$0xff] }
0x1726   : > { %27238 = vmatprep.subr.bf16.mxu1 %v33955_v2 }
0x1728   : > { %12221 = vmatmul.mubr.f32.vlgmr.msra.gmra.mrb[26].mxu1 %v32121_v30 }
0x1729   : > { %27240 = vmatpush1.bf16.msra.mxu1 %v33956_v23  ;;  %12226 = vmatprep.mubr.f32.mxu1 %v33957_v60 }
0x172a   : > { %27242 = vmatprep.subr.bf16.mxu1 %v33958_v26 }
0x172c   : > { %12228 = vmatmul.mubr.f32.gmra.mrb[28].mxu1 %v32119_v1 }
0x172d   : > { %27244 = vmatpush1.bf16.msra.mxu1 %v33959_v34  ;;  %12330 = vmatprep.mubr.f32.mxu1 %v33957_v60 }
0x172e   : > { %27246 = vmatprep.subr.bf16.mxu1 %v33960_v25 }
0x1731   : > { %27248 = vmatpush1.bf16.msra.mxu1 %v33961_v56 }
0x1732   : > { %27250 = vmatprep.subr.bf16.mxu1 %v33962_v22 }
0x1735   : > { %27252 = vmatpush1.bf16.msra.mxu1 %v33963_v37 }
0x1736   : > { %27254 = vmatprep.subr.bf16.mxu1 %v33964_v38 }
0x1739   : > { %27256 = vmatpush1.bf16.msra.mxu1 %v33965_v58 }
0x173a   : > { %27258 = vmatprep.subr.bf16.mxu1 %v33966_v24 }
0x173d   : > { %27260 = vmatpush1.bf16.msra.mxu1 %v33967_v46 }
0x173e   : > { %27262 = vmatprep.subr.bf16.mxu1 %v34160_v57 }
0x1741   : > { %27264 = vmatpush1.bf16.msra.mxu1 %v34161_v40 }
0x1742   : > { %27266 = vmatprep.subr.bf16.mxu1 %v34162_v9 }
0x1745   : > { %27268 = vmatpush1.bf16.msra.mxu1 %v34163_v13 }
0x1748   : > { %12332 = vmatmul.mubr.f32.vlgmr.msra.gmra.mrb[26].mxu1 %v32121_v30 }
0x1749   : > { %12337 = vmatprep.mubr.f32.mxu1 %v33957_v60 }
0x174c   : > { %12339 = vmatmul.mubr.f32.gmra.mrb[28].mxu1 %v32119_v1 }
0x174d   : > { %24471 = vmatprep.mubr.f32.mxu1 %v33907_v12 }
0x181b   : > { %v12333_v61 = vpop.f32.mrb[26].mxu1 }
0x181c   : > { %v12345_v48 = vadd.f32 %v21711_v41, %v12333_v61  ;;  %v32241_v11 = vpop.f32.mrb[27].mxu1 }
0x181e   : > { %v21715_v21 = vmul.f32 -1.442695, %v12345_v48 }
0x181f   : > { %v12340_v6 = vpop.f32.mrb[28].mxu1 }
0x1820   : > { %29350 = vpow2.f32 %v21715_v21  ;;  %v12347_v44 = vadd.f32 %v21713_v59, %v12340_v6  ;;  %v32244_v8 = vpop.f32.mrb[29].mxu1 }
0x1822   : > { %v21717_v4 = vmul.f32 -1.442695, %v12347_v44 }
0x1824   : > { %29352 = vpow2.f32 %v21717_v4 }
0x182a   : > { %v29351_v30 = vpop.eup %29350 }
0x182b   : > { %v12361_v15 = vadd.f32 1.0, %v29351_v30 }
0x182d   : > { %29354 = vrcp.f32 %v12361_v15 }
0x182e   : > { %v29353_v1 = vpop.eup %29352 }
0x182f   : > { %v12363_v14 = vadd.f32 1.0, %v29353_v1 }
0x1831   : > { %29356 = vrcp.f32 %v12363_v14 }
0x1837   : > { %v29355_v39 = vpop.eup %29354 }
0x1838   : > { %v12373_v41 = vmul.f32 %v29355_v39, %v32080_v50 }
0x183a   : > { %v12376_v61 = vand.u32 4294901760, %v12373_v41 }
0x183b   : > { %v29357_v13 = vpop.eup %29356 }
0x183c   : > { %v12374_v48 = vmul.f32 %v29357_v13, %v32078_v3  ;;  %v12464_v9 = vsub.f32 %v12373_v41, %v12376_v61 }
0x183e   : > { %v12379_v21 = vand.u32 4294901760, %v12374_v48  ;;  %v12465_v6 = vand.u32 4294901760, %v12464_v9 }
0x1840   : > { %v27269_v59 = vpack.c.bf16 %v12379_v21, %v12376_v61  ;;  %v12471_v40 = vsub.f32 %v12374_v48, %v12379_v21  ;;  %v12466_v4 = vsub.f32 %v12464_v9, %v12465_v6 }
0x1842   : > { %27270 = vmatprep.subr.bf16.mxu0 %v27269_v59  ;;  %v12472_v44 = vand.u32 4294901760, %v12471_v40  ;;  %v27277_v30 = vpack.c.bf16 %v12471_v40, %v12464_v9  ;;  %v12467_v14 = vand.u32 4294901760, %v12466_v4 }
0x1843   : > { %27272 = vmatpush3.bf16.msra.mxu0 %v27269_v59 }
0x1844   : > { %v12473_v15 = vsub.f32 %v12471_v40, %v12472_v44  ;;  %v27285_v1 = vpack.c.bf16 %v12472_v44, %v12465_v6 }
0x1846   : > { %24220 = vmatmul.mubr.f32.vlgmr.msra.gmra.mrb[18].mxu0 %v33908_v33  ;;  %v12474_v39 = vand.u32 4294901760, %v12473_v15  ;;  %v34215_v15 = vld [vmem:[#allocation55_spill] sm:$0xff] }
0x1847   : > { %24226 = vmatprep.mubr.f32.mxu0 %v33909_v0 }
0x1848   : > { %v27273_v57 = vpack.c.bf16 %v12474_v39, %v12467_v14  ;;  %v34217_v14 = vld [vmem:[#allocation58_spill] sm:$0xff]  ;;  %v34218_v39 = vld [vmem:[#allocation60_spill] sm:$0xff] }
0x184a   : > { %27274 = vmatprep.subr.bf16.mxu0 %v27273_v57 }
0x184b   : > { %27276 = vmatpush3.bf16.msra.mxu0 %v27273_v57 }
0x184c   : > { %27278 = vmatprep.subr.bf16.mxu0 %v27277_v30 }
0x184e   : > { %24227 = vmatmul.mubr.f32.vlgmr.msra.gmra.mrb[18].mxu0 %v33910_v18 }
0x184f   : > { %27280 = vmatpush3.bf16.msra.mxu0 %v27277_v30  ;;  %24233 = vmatprep.mubr.f32.mxu0 %v33911_v52  ;;  %v34214_v30 = vld [vmem:[#allocation54_spill] sm:$0xff] }
0x1850   : > { %27282 = vmatprep.subr.bf16.mxu0 %v27269_v59 }
0x1856   : > { %24234 = vmatmul.mubr.f32.vlgmr.msra.gmra.mrb[18].mxu0 %v33912_v62 }
0x1857   : > { %27284 = vmatpush3.bf16.msra.mxu0 %v27269_v59  ;;  %24240 = vmatprep.mubr.f32.mxu0 %v33913_v27 }
0x1858   : > { %27286 = vmatprep.subr.bf16.mxu0 %v27285_v1 }
0x185e   : > { %24241 = vmatmul.mubr.f32.vlgmr.msra.gmra.mrb[18].mxu0 %v33914_v31 }
0x185f   : > { %27288 = vmatpush3.bf16.msra.mxu0 %v27285_v1  ;;  %24247 = vmatprep.mubr.f32.mxu0 %v33909_v0  ;;  %v34216_v1 = vld [vmem:[#allocation57_spill] sm:$0xff] }
0x1860   : > { %27290 = vmatprep.subr.bf16.mxu0 %v27269_v59 }
0x1866   : > { %24248 = vmatmul.mubr.f32.vlgmr.msra.gmra.mrb[18].mxu0 %v33910_v18 }
0x1867   : > { %27292 = vmatpush3.bf16.msra.mxu0 %v27269_v59  ;;  %24254 = vmatprep.mubr.f32.mxu0 %v33909_v0 }
0x1868   : > { %27294 = vmatprep.subr.bf16.mxu0 %v30757_v55 }
0x186e   : > { %24255 = vmatmul.mubr.f32.vlgmr.msra.gmra.mrb[18].mxu0 %v33910_v18 }
0x186f   : > { %27296 = vmatpush3.bf16.msra.mxu0 %v30757_v55 }
0x1870   : > { %27298 = vmatprep.subr.bf16.mxu0 %v30776_v28 }
0x1873   : > { %27300 = vmatpush3.bf16.msra.mxu0 %v30776_v28 }
0x1874   : > { %27302 = vmatprep.subr.bf16.mxu0 %v30791_v20 }
0x1877   : > { %27304 = vmatpush3.bf16.msra.mxu0 %v30791_v20 }
0x1878   : > { %27306 = vmatprep.subr.bf16.mxu0 %v30805_v49 }
0x187b   : > { %27308 = vmatpush3.bf16.msra.mxu0 %v30805_v49 }
0x187c   : > { %27310 = vmatprep.subr.bf16.mxu0 %v30815_v5 }
0x187f   : > { %27312 = vmatpush3.bf16.msra.mxu0 %v30815_v5 }
0x1880   : > { %27314 = vmatprep.subr.bf16.mxu0 %v30820_v7 }
0x1883   : > { %27316 = vmatpush3.bf16.msra.mxu0 %v30820_v7 }
0x1884   : > { %27318 = vmatprep.subr.bf16.mxu0 %v30824_v16 }
0x1887   : > { %27320 = vmatpush3.bf16.msra.mxu0 %v30824_v16 }
0x1888   : > { %27322 = vmatprep.subr.bf16.mxu0 %v30834_v63 }
0x188b   : > { %27324 = vmatpush3.bf16.msra.mxu0 %v30834_v63 }
0x188c   : > { %27326 = vmatprep.subr.bf16.mxu0 %v30844_v47 }
0x1941   : > { %v24256_v57 = vpop.f32.mrb[18].mxu0 }
0x1942   : > { %v32276_v40 = vand.u32 4294901760, %v24256_v57  ;;  %v12867_v9 = vpop.f32.mrb[19].mxu0 }
0x1943   : > { %v32278_v13 = vand.u32 4294901760, %v12867_v9 }
0x1944   : > { %v32281_v41 = vsub.f32 %v24256_v57, %v32276_v40  ;;  %v34219_v57 = vld [vmem:[#allocation62_spill] sm:$0xff] }
0x1945   : > { %v12962_v61 = vsub.f32 %v12867_v9, %v32278_v13  ;;  %v34220_v9 = vld [vmem:[#allocation63_spill] sm:$0xff] }
0x1946   : > { %v12973_v48 = vand.u32 4294901760, %v32281_v41 }
0x1947   : > { %v12963_v21 = vand.u32 4294901760, %v12962_v61 }
0x1948   : > { %v12974_v6 = vsub.f32 %v32281_v41, %v12973_v48 }
0x1949   : > { %v12964_v59 = vsub.f32 %v12962_v61, %v12963_v21 }
0x194a   : > { %v12975_v44 = vand.u32 4294901760, %v12974_v6 }
0x194b   : > { %v12965_v4 = vand.u32 4294901760, %v12964_v59 }
0x194d   : > { %24289 = vmatprep.mubr.f32.mxu0 %v12965_v4 }
0x194e   : > { %24290 = vmatmul.mubr.f32.vlgmr.msra.gmra.mrb[20].mxu0 %v12975_v44 }
0x194f   : > { %27328 = vmatpush3.bf16.msra.mxu0 %v30844_v47  ;;  %24324 = vmatprep.mubr.f32.mxu0 %v32278_v13 }
0x1950   : > { %27330 = vmatprep.subr.bf16.mxu0 %v30981_v42 }
0x1953   : > { %27332 = vmatpush3.bf16.msra.mxu0 %v30981_v42 }
0x1954   : > { %27334 = vmatprep.subr.bf16.mxu0 %v30993_v45 }
0x1957   : > { %27336 = vmatpush3.bf16.msra.mxu0 %v30993_v45 }
0x1958   : > { %27338 = vmatprep.subr.bf16.mxu0 %v31004_v35 }
0x195b   : > { %27340 = vmatpush3.bf16.msra.mxu0 %v31004_v35 }
0x195c   : > { %27342 = vmatprep.subr.bf16.mxu0 %v31008_v19 }
0x195f   : > { %27344 = vmatpush3.bf16.msra.mxu0 %v31008_v19 }
0x1960   : > { %27346 = vmatprep.subr.bf16.mxu0 %v30865_v36 }
0x1963   : > { %27348 = vmatpush3.bf16.msra.mxu0 %v30865_v36 }
0x1964   : > { %27350 = vmatprep.subr.bf16.mxu0 %v30879_v54 }
0x1967   : > { %27352 = vmatpush3.bf16.msra.mxu0 %v30879_v54 }
0x1968   : > { %27354 = vmatprep.subr.bf16.mxu0 %v30887_v53 }
0x196b   : > { %27356 = vmatpush3.bf16.msra.mxu0 %v30887_v53 }
0x196c   : > { %27358 = vmatprep.subr.bf16.mxu0 %v30891_v43 }
0x196e   : > { %24325 = vmatmul.mubr.f32.vlgmr.msra.gmra.mrb[20].mxu0 %v32276_v40 }
0x196f   : > { %27360 = vmatpush3.bf16.msra.mxu0 %v30891_v43  ;;  %24359 = vmatprep.mubr.f32.mxu0 %v12962_v61  ;;  %v34222_v61 = vld [vmem:[#allocation18_spill] sm:$0xff] }
0x1970   : > { %27362 = vmatprep.subr.bf16.mxu0 %v31022_v32 }
0x1973   : > { %27364 = vmatpush3.bf16.msra.mxu0 %v31022_v32 }
0x1974   : > { %27366 = vmatprep.subr.bf16.mxu0 %v31030_v17 }
0x1977   : > { %27368 = vmatpush3.bf16.msra.mxu0 %v31030_v17 }
0x1978   : > { %27370 = vmatprep.subr.bf16.mxu0 %v31036_v10 }
0x197b   : > { %27372 = vmatpush3.bf16.msra.mxu0 %v31036_v10 }
0x197c   : > { %27374 = vmatprep.subr.bf16.mxu0 %v31042_v51 }
0x197f   : > { %27376 = vmatpush3.bf16.msra.mxu0 %v31042_v51 }
0x1980   : > { %27378 = vmatprep.subr.bf16.mxu0 %v30895_v29 }
0x1983   : > { %27380 = vmatpush3.bf16.msra.mxu0 %v30895_v29 }
0x1984   : > { %27382 = vmatprep.subr.bf16.mxu0 %v34214_v30 }
0x1987   : > { %27384 = vmatpush3.bf16.msra.mxu0 %v34214_v30  ;;  %v34239_v30 = vld [vmem:[#allocation59_spill] sm:$0xff] }
0x1988   : > { %27386 = vmatprep.subr.bf16.mxu0 %v34215_v15 }
0x198b   : > { %27388 = vmatpush3.bf16.msra.mxu0 %v34215_v15 }
0x198c   : > { %27390 = vmatprep.subr.bf16.mxu0 %v30757_v55 }
0x198e   : > { %24360 = vmatmul.mubr.f32.vlgmr.msra.gmra.mrb[20].mxu0 %v32281_v41  ;;  %v34221_v41 = vld [vmem:[#allocation25_spill] sm:$0xff] }
0x198f   : > { %27392 = vmatpush3.bf16.msra.mxu0 %v30757_v55  ;;  %24394 = vmatprep.mubr.f32.mxu0 %v12963_v21  ;;  %v21712_v21 = vld [vmem:[%s29947_s11 + $0x88] sm:$0xff] }
0x1990   : > { %27394 = vmatprep.subr.bf16.mxu0 %v30776_v28  ;;  %v12346_v59 = vadd.f32 %v21712_v21, %v32241_v11 }
0x1992   : > { %v21716_v44 = vmul.f32 -1.442695, %v12346_v59 }
0x1993   : > { %27396 = vmatpush3.bf16.msra.mxu0 %v30776_v28 }
0x1994   : > { %27398 = vmatprep.subr.bf16.mxu0 %v30791_v20 }
0x1997   : > { %27400 = vmatpush3.bf16.msra.mxu0 %v30791_v20 }
0x1998   : > { %27402 = vmatprep.subr.bf16.mxu0 %v30805_v49 }
0x199b   : > { %27404 = vmatpush3.bf16.msra.mxu0 %v30805_v49 }
0x199c   : > { %27406 = vmatprep.subr.bf16.mxu0 %v30815_v5 }
0x199f   : > { %27408 = vmatpush3.bf16.msra.mxu0 %v30815_v5 }
0x19a0   : > { %27410 = vmatprep.subr.bf16.mxu0 %v30820_v7 }
0x19a3   : > { %27412 = vmatpush3.bf16.msra.mxu0 %v30820_v7 }
0x19a4   : > { %27414 = vmatprep.subr.bf16.mxu0 %v30824_v16 }
0x19a7   : > { %27416 = vmatpush3.bf16.msra.mxu0 %v30824_v16 }
0x19a8   : > { %27418 = vmatprep.subr.bf16.mxu0 %v30834_v63 }
0x19ab   : > { %27420 = vmatpush3.bf16.msra.mxu0 %v30834_v63 }
0x19ac   : > { %27422 = vmatprep.subr.bf16.mxu0 %v34216_v1 }
0x19ae   : > { %24395 = vmatmul.mubr.f32.vlgmr.msra.gmra.mrb[20].mxu0 %v12973_v48  ;;  %v34223_v48 = vld [vmem:[#allocation19_spill] sm:$0xff] }
0x19af   : > { %27424 = vmatpush3.bf16.msra.mxu0 %v34216_v1  ;;  %24429 = vmatprep.mubr.f32.mxu0 %v32278_v13 }
0x19b0   : > { %27426 = vmatprep.subr.bf16.mxu0 %v34217_v14 }
0x19b3   : > { %27428 = vmatpush3.bf16.msra.mxu0 %v34217_v14 }
0x19b4   : > { %27430 = vmatprep.subr.bf16.mxu0 %v34218_v39 }
0x19b7   : > { %27432 = vmatpush3.bf16.msra.mxu0 %v34218_v39 }
0x19b8   : > { %27434 = vmatprep.subr.bf16.mxu0 %v34219_v57 }
0x19bb   : > { %27436 = vmatpush3.bf16.msra.mxu0 %v34219_v57  ;;  %v21720_v57 = vld [vmem:[%s29957_s23 + $0x48] sm:$0xff] }
0x19bc   : > { %27438 = vmatprep.subr.bf16.mxu0 %v34220_v9 }
0x19bf   : > { %27440 = vmatpush3.bf16.msra.mxu0 %v34220_v9 }
0x19c0   : > { %27442 = vmatprep.subr.bf16.mxu0 %v34221_v41 }
0x19c3   : > { %27444 = vmatpush3.bf16.msra.mxu0 %v34221_v41 }
0x19c4   : > { %27446 = vmatprep.subr.bf16.mxu0 %v34222_v61 }
0x19c7   : > { %27448 = vmatpush3.bf16.msra.mxu0 %v34222_v61 }
0x19c8   : > { %27450 = vmatprep.subr.bf16.mxu0 %v34223_v48 }
0x19cb   : > { %27452 = vmatpush3.bf16.msra.mxu0 %v34223_v48 }
0x19cc   : > { %27454 = vmatprep.subr.bf16.mxu0 %v30757_v55 }
0x19ce   : > { %24430 = vmatmul.mubr.f32.vlgmr.msra.gmra.mrb[20].mxu0 %v32276_v40 }
0x19cf   : > { %27456 = vmatpush3.bf16.msra.mxu0 %v30757_v55  ;;  %24464 = vmatprep.mubr.f32.mxu0 %v32278_v13  ;;  %v21714_v13 = vld [vmem:[%s29947_s11 + $0x98] sm:$0xff] }
0x19d0   : > { %27458 = vmatprep.subr.bf16.mxu0 %v30776_v28  ;;  %v12348_v6 = vadd.f32 %v21714_v13, %v32244_v8 }
0x19d2   : > { %v21718_v4 = vmul.f32 -1.442695, %v12348_v6 }
0x19d3   : > { %27460 = vmatpush3.bf16.msra.mxu0 %v30776_v28 }
0x19d4   : > { %27462 = vmatprep.subr.bf16.mxu0 %v30791_v20  ;;  %29358 = vpow2.f32 %v21718_v4 }
0x19d5   : > { %29360 = vpow2.f32 %v21716_v44 }
0x19d7   : > { %27464 = vmatpush3.bf16.msra.mxu0 %v30791_v20 }
0x19d8   : > { %27466 = vmatprep.subr.bf16.mxu0 %v30805_v49 }
0x19db   : > { %27468 = vmatpush3.bf16.msra.mxu0 %v30805_v49 }
0x19dc   : > { %27470 = vmatprep.subr.bf16.mxu0 %v30815_v5 }
0x19de   : > { %v29359_v48 = vpop.eup %29358 }
0x19df   : > { %27472 = vmatpush3.bf16.msra.mxu0 %v30815_v5  ;;  %v29361_v61 = vpop.eup %29360  ;;  %v12364_v41 = vadd.f32 1.0, %v29359_v48 }
0x19e0   : > { %27474 = vmatprep.subr.bf16.mxu0 %v30820_v7  ;;  %v12362_v9 = vadd.f32 1.0, %v29361_v61 }
0x19e1   : > { %29362 = vrcp.f32 %v12364_v41 }
0x19e2   : > { %29364 = vrcp.f32 %v12362_v9 }
0x19e3   : > { %27476 = vmatpush3.bf16.msra.mxu0 %v30820_v7 }
0x19e4   : > { %27478 = vmatprep.subr.bf16.mxu0 %v30824_v16 }
0x19e7   : > { %27480 = vmatpush3.bf16.msra.mxu0 %v30824_v16 }
0x19e8   : > { %27482 = vmatprep.subr.bf16.mxu0 %v30834_v63 }
0x19eb   : > { %27484 = vmatpush3.bf16.msra.mxu0 %v30834_v63  ;;  %v29363_v8 = vpop.eup %29362 }
0x19ec   : > { %v29365_v11 = vpop.eup %29364  ;;  %v13571_v13 = vsub.f32 1.0, %v29363_v8  ;;  %v13569_v61 = vmul.f32 %v29363_v8, %v32078_v3 }
0x19ed   : > { %v13570_v6 = vsub.f32 1.0, %v29365_v11  ;;  %v13568_v41 = vmul.f32 %v29365_v11, %v32080_v50 }
0x19ee   : > { %24465 = vmatmul.mubr.f32.vlgmr.msra.gmra.mrb[20].mxu0 %v32276_v40  ;;  %v21719_v40 = vld [vmem:[%s29957_s23 + $0x40] sm:$0xff] }
0x19ef   : > { %24513 = vmatprep.mubr.f32.mxu0 %v33907_v12 }
0x1ac1   : > { %v24466_v39 = vpop.f32.mrb[20].mxu0 }
0x1ac2   : > { %v13565_v14 = vadd.f32 %v24466_v39, %v21720_v57  ;;  %v13554_v1 = vpop.f32.mrb[21].mxu0 }
0x1ac3   : > { %v13564_v15 = vadd.f32 %v21719_v40, %v13554_v1 }
0x1ac4   : > { %29366 = vtanh.f32 %v13565_v14 }
0x1ac5   : > { %29368 = vtanh.f32 %v13564_v15 }
0x1ace   : > { %v29367_v21 = vpop.eup %29366 }
0x1acf   : > { %v29369_v59 = vpop.eup %29368  ;;  %v13573_v48 = vmul.f32 %v29367_v21, %v13571_v13 }
0x1ad0   : > { %v13572_v9 = vmul.f32 %v29369_v59, %v13570_v6 }
0x1ad1   : > { %v32381_v4 = vadd.f32 %v13573_v48, %v13569_v61  ;;  %v34225_v61 = vld [vmem:[#allocation38_spill] sm:$0xff]  ;;  %v34226_v48 = vld [vmem:[#allocation40_spill] sm:$0xff] }
0x1ad2   : > { %v32383_v39 = vadd.f32 %v13572_v9, %v13568_v41  ;;  %v34227_v41 = vld [vmem:[#allocation41_spill] sm:$0xff]  ;;  %v34228_v9 = vld [vmem:[#allocation42_spill] sm:$0xff] }
0x1ad3   : > { %21722 = vst [vmem:[%s31171_s24 + $0x48] sm:$0xff] %v32381_v4  ;;  %v13583_v15 = vand.u32 4294901760, %v32381_v4 }
0x1ad4   : > { %34224 = vst [vmem:[#allocation20_spill] sm:$0xff] %v32383_v39  ;;  %21721 = vst [vmem:[%s31171_s24 + $0x40] sm:$0xff] %v32383_v39  ;;  %v13580_v1 = vand.u32 4294901760, %v32383_v39 }
0x1ad5   : > { %v13675_v14 = vsub.f32 %v32381_v4, %v13583_v15 }
0x1ad6   : > { %v27485_v57 = vpack.c.bf16 %v13583_v15, %v13580_v1  ;;  %v13668_v3 = vsub.f32 %v32383_v39, %v13580_v1  ;;  %v34229_v15 = vld [vmem:[#allocation43_spill] sm:$0xff] }
0x1ad7   : > { %v13676_v44 = vand.u32 4294901760, %v13675_v14 }
0x1ad8   : > { %27486 = vmatprep.subr.bf16.mxu1 %v27485_v57  ;;  %v13669_v50 = vand.u32 4294901760, %v13668_v3  ;;  %v27493_v6 = vpack.c.bf16 %v13675_v14, %v13668_v3 }
0x1ad9   : > { %27488 = vmatpush3.bf16.msra.mxu1 %v27485_v57  ;;  %v13677_v40 = vsub.f32 %v13675_v14, %v13676_v44 }
0x1ada   : > { %v13670_v8 = vsub.f32 %v13668_v3, %v13669_v50  ;;  %v27501_v59 = vpack.c.bf16 %v13676_v44, %v13669_v50 }
0x1adb   : > { %v13678_v11 = vand.u32 4294901760, %v13677_v40 }
0x1adc   : > { %24472 = vmatmul.mubr.f32.vlgmr.msra.gmra.mrb[30].mxu1 %v33908_v33  ;;  %v13671_v13 = vand.u32 4294901760, %v13670_v8 }
0x1add   : > { %24478 = vmatprep.mubr.f32.mxu1 %v33909_v0 }
0x1ade   : > { %v27489_v21 = vpack.c.bf16 %v13678_v11, %v13671_v13 }
0x1ae0   : > { %27490 = vmatprep.subr.bf16.mxu1 %v27489_v21 }
0x1ae1   : > { %27492 = vmatpush3.bf16.msra.mxu1 %v27489_v21 }
0x1ae2   : > { %27494 = vmatprep.subr.bf16.mxu1 %v27493_v6 }
0x1ae4   : > { %24479 = vmatmul.mubr.f32.vlgmr.msra.gmra.mrb[30].mxu1 %v33910_v18 }
0x1ae5   : > { %27496 = vmatpush3.bf16.msra.mxu1 %v27493_v6  ;;  %24485 = vmatprep.mubr.f32.mxu1 %v33911_v52  ;;  %v34230_v6 = vld [vmem:[#allocation77_spill] sm:$0xff] }
0x1ae6   : > { %27498 = vmatprep.subr.bf16.mxu1 %v27485_v57 }
0x1aec   : > { %24486 = vmatmul.mubr.f32.vlgmr.msra.gmra.mrb[30].mxu1 %v33912_v62 }
0x1aed   : > { %27500 = vmatpush3.bf16.msra.mxu1 %v27485_v57  ;;  %24492 = vmatprep.mubr.f32.mxu1 %v33913_v27 }
0x1aee   : > { %27502 = vmatprep.subr.bf16.mxu1 %v27501_v59 }
0x1af4   : > { %24493 = vmatmul.mubr.f32.vlgmr.msra.gmra.mrb[30].mxu1 %v33914_v31 }
0x1af5   : > { %27504 = vmatpush3.bf16.msra.mxu1 %v27501_v59  ;;  %24499 = vmatprep.mubr.f32.mxu1 %v33909_v0  ;;  %v34231_v59 = vld [vmem:[#allocation78_spill] sm:$0xff] }
0x1af6   : > { %27506 = vmatprep.subr.bf16.mxu1 %v27485_v57 }
0x1afc   : > { %24500 = vmatmul.mubr.f32.vlgmr.msra.gmra.mrb[30].mxu1 %v33910_v18 }
0x1afd   : > { %27508 = vmatpush3.bf16.msra.mxu1 %v27485_v57  ;;  %24506 = vmatprep.mubr.f32.mxu1 %v33909_v0 }
0x1afe   : > { %27510 = vmatprep.subr.bf16.mxu1 %v33955_v2 }
0x1b04   : > { %24507 = vmatmul.mubr.f32.vlgmr.msra.gmra.mrb[30].mxu1 %v33910_v18 }
0x1b05   : > { %27512 = vmatpush1.bf16.msra.mxu1 %v33956_v23  ;;  %14182 = vmatprep.mubr.f32.mxu1 %v33957_v60 }
0x1b06   : > { %27514 = vmatprep.subr.bf16.mxu1 %v33958_v26 }
0x1b09   : > { %27516 = vmatpush1.bf16.msra.mxu1 %v33959_v34 }
0x1b0a   : > { %27518 = vmatprep.subr.bf16.mxu1 %v33960_v25 }
0x1b0d   : > { %27520 = vmatpush1.bf16.msra.mxu1 %v33961_v56 }
0x1b0e   : > { %27522 = vmatprep.subr.bf16.mxu1 %v33962_v22 }
0x1b11   : > { %27524 = vmatpush1.bf16.msra.mxu1 %v33963_v37 }
0x1b12   : > { %27526 = vmatprep.subr.bf16.mxu1 %v33964_v38 }
0x1b15   : > { %27528 = vmatpush1.bf16.msra.mxu1 %v33965_v58 }
0x1b16   : > { %27530 = vmatprep.subr.bf16.mxu1 %v33966_v24 }
0x1b19   : > { %27532 = vmatpush1.bf16.msra.mxu1 %v33967_v46 }
0x1b1a   : > { %27534 = vmatprep.subr.bf16.mxu1 %v34225_v61 }
0x1b1d   : > { %27536 = vmatpush1.bf16.msra.mxu1 %v34226_v48 }
0x1b1e   : > { %27538 = vmatprep.subr.bf16.mxu1 %v34227_v41 }
0x1b21   : > { %27540 = vmatpush1.bf16.msra.mxu1 %v34228_v9 }
0x1b22   : > { %27542 = vmatprep.subr.bf16.mxu1 %v34229_v15  ;;  %v34233_v15 = vld [vmem:[#allocation80_spill] sm:$0xff] }
0x1bd7   : > { %v24508_v1 = vpop.f32.mrb[30].mxu1 }
0x1bd8   : > { %v32422_v14 = vand.u32 4294901760, %v24508_v1  ;;  %v14071_v57 = vpop.f32.mrb[31].mxu1 }
0x1bd9   : > { %v32424_v3 = vand.u32 4294901760, %v14071_v57 }
0x1bda   : > { %v32427_v44 = vsub.f32 %v24508_v1, %v32422_v14 }
0x1bdb   : > { %v32430_v50 = vsub.f32 %v14071_v57, %v32424_v3  ;;  %v34232_v57 = vld [vmem:[#allocation79_spill] sm:$0xff] }
0x1bdc   : > { %v33668_v40 = vand.u32 4294901760, %v32427_v44 }
0x1bdd   : > { %v33667_v8 = vand.u32 4294901760, %v32430_v50 }
0x1bde   : > { %v14197_v21 = vsub.f32 %v32427_v44, %v33668_v40  ;;  %v34236_v40 = vld [vmem:[#allocation83_spill] sm:$0xff] }
0x1bdf   : > { %v14186_v11 = vsub.f32 %v32430_v50, %v33667_v8  ;;  %v34235_v8 = vld [vmem:[#allocation82_spill] sm:$0xff] }
0x1be0   : > { %v14198_v1 = vand.u32 4294901760, %v14197_v21  ;;  %v34240_v21 = vld [vmem:[#allocation61_spill] sm:$0xff] }
0x1be1   : > { %v14187_v13 = vand.u32 4294901760, %v14186_v11  ;;  %v34234_v11 = vld [vmem:[#allocation81_spill] sm:$0xff] }
0x1be3   : > { %14188 = vmatmul.mubr.f32.vlgmr.msra.gmra.mrb[32].mxu1 %v14187_v13  ;;  %v34237_v13 = vld [vmem:[#allocation52_spill] sm:$0xff] }
0x1be4   : > { %27544 = vmatpush1.bf16.msra.mxu1 %v34230_v6  ;;  %14193 = vmatprep.mubr.f32.mxu1 %v33957_v60  ;;  %v34238_v6 = vld [vmem:[#allocation56_spill] sm:$0xff] }
0x1be5   : > { %27546 = vmatprep.subr.bf16.mxu1 %v34231_v59  ;;  %v34243_v59 = vld [vmem:[#allocation66_spill] sm:$0xff] }
0x1be7   : > { %14199 = vmatmul.mubr.f32.gmra.mrb[34].mxu1 %v14198_v1  ;;  %v34241_v1 = vld [vmem:[#allocation64_spill] sm:$0xff] }
0x1be8   : > { %27548 = vmatpush1.bf16.msra.mxu1 %v34232_v57  ;;  %14429 = vmatprep.mubr.f32.mxu1 %v33957_v60  ;;  %v34242_v57 = vld [vmem:[#allocation65_spill] sm:$0xff] }
0x1be9   : > { %27550 = vmatprep.subr.bf16.mxu1 %v34233_v15  ;;  %v34244_v15 = vld [vmem:[#allocation68_spill] sm:$0xff] }
0x1bec   : > { %27552 = vmatpush1.bf16.msra.mxu1 %v34234_v11  ;;  %v34245_v11 = vld [vmem:[#allocation67_spill] sm:$0xff] }
0x1bed   : > { %27554 = vmatprep.subr.bf16.mxu1 %v34235_v8  ;;  %v34259_v8 = vld [vmem:[#allocation75_spill] sm:$0xff] }
0x1bf0   : > { %27556 = vmatpush1.bf16.msra.mxu1 %v34236_v40  ;;  %v34246_v40 = vld [vmem:[#allocation84_spill] sm:$0xff] }
0x1bf1   : > { %27558 = vmatprep.subr.bf16.mxu1 %v34237_v13  ;;  %v34257_v13 = vld [vmem:[#allocation73_spill] sm:$0xff] }
0x1bf4   : > { %27560 = vmatpush1.bf16.msra.mxu1 %v34238_v6  ;;  %v34247_v6 = vld [vmem:[#allocation85_spill] sm:$0xff] }
0x1bf5   : > { %27562 = vmatprep.subr.bf16.mxu1 %v34239_v30  ;;  %v34255_v30 = vld [vmem:[#allocation71_spill] sm:$0xff] }
0x1bf8   : > { %27564 = vmatpush1.bf16.msra.mxu1 %v34240_v21  ;;  %v34248_v21 = vld [vmem:[#allocation86_spill] sm:$0xff] }
0x1bf9   : > { %27566 = vmatprep.subr.bf16.mxu1 %v34241_v1  ;;  %v34253_v1 = vld [vmem:[#allocation69_spill] sm:$0xff] }
0x1bfc   : > { %27568 = vmatpush1.bf16.msra.mxu1 %v34242_v57  ;;  %v34249_v57 = vld [vmem:[#allocation87_spill] sm:$0xff] }
0x1bfd   : > { %27570 = vmatprep.subr.bf16.mxu1 %v34243_v59  ;;  %v34250_v59 = vld [vmem:[#allocation88_spill] sm:$0xff] }
0x1c00   : > { %27572 = vmatpush1.bf16.msra.mxu1 %v34244_v15  ;;  %v34251_v15 = vld [vmem:[#allocation89_spill] sm:$0xff] }
0x1c01   : > { %27574 = vmatprep.subr.bf16.mxu1 %v34245_v11  ;;  %v34252_v11 = vld [vmem:[#allocation90_spill] sm:$0xff] }
0x1c03   : > { %14431 = vmatmul.mubr.f32.vlgmr.msra.gmra.mrb[32].mxu1 %v32424_v3 }
0x1c04   : > { %27576 = vmatpush1.bf16.msra.mxu1 %v34246_v40  ;;  %14436 = vmatprep.mubr.f32.mxu1 %v33957_v60  ;;  %v34254_v40 = vld [vmem:[#allocation70_spill] sm:$0xff] }
0x1c05   : > { %27578 = vmatprep.subr.bf16.mxu1 %v34247_v6  ;;  %v34256_v6 = vld [vmem:[#allocation72_spill] sm:$0xff] }
0x1c07   : > { %14438 = vmatmul.mubr.f32.gmra.mrb[34].mxu1 %v32422_v14 }
0x1c08   : > { %27580 = vmatpush1.bf16.msra.mxu1 %v34248_v21  ;;  %14572 = vmatprep.mubr.f32.mxu1 %v33957_v60  ;;  %v34258_v21 = vld [vmem:[#allocation74_spill] sm:$0xff] }
0x1c09   : > { %27582 = vmatprep.subr.bf16.mxu1 %v34249_v57  ;;  %v34260_v57 = vld [vmem:[#allocation76_spill] sm:$0xff] }
0x1c0c   : > { %27584 = vmatpush1.bf16.msra.mxu1 %v34250_v59 }
0x1c0d   : > { %27586 = vmatprep.subr.bf16.mxu1 %v34251_v15 }
0x1c10   : > { %27588 = vmatpush1.bf16.msra.mxu1 %v34252_v11  ;;  %v34277_v11 = vld [vmem:[#allocation50_spill] sm:$0xff] }
0x1c11   : > { %27590 = vmatprep.subr.bf16.mxu1 %v34253_v1  ;;  %v34268_v1 = vld [vmem:[#allocation95_spill] sm:$0xff] }
0x1c14   : > { %27592 = vmatpush1.bf16.msra.mxu1 %v34254_v40  ;;  %v34267_v40 = vld [vmem:[#allocation94_spill] sm:$0xff] }
0x1c15   : > { %27594 = vmatprep.subr.bf16.mxu1 %v34255_v30  ;;  %v34266_v30 = vld [vmem:[#allocation93_spill] sm:$0xff] }
0x1c18   : > { %27596 = vmatpush1.bf16.msra.mxu1 %v34256_v6  ;;  %v34265_v6 = vand.u32 4294901760, %v32427_v44 }
0x1c19   : > { %27598 = vmatprep.subr.bf16.mxu1 %v34257_v13  ;;  %v34264_v13 = vld [vmem:[#allocation92_spill] sm:$0xff] }
0x1c1c   : > { %27600 = vmatpush1.bf16.msra.mxu1 %v34258_v21  ;;  %v34263_v21 = vld [vmem:[#allocation91_spill] sm:$0xff] }
0x1c1d   : > { %27602 = vmatprep.subr.bf16.mxu1 %v34259_v8  ;;  %v34262_v8 = vand.u32 4294901760, %v32430_v50 }
0x1c20   : > { %27604 = vmatpush1.bf16.msra.mxu1 %v34260_v57  ;;  %v34261_v57 = vld [vmem:[#allocation39_spill] sm:$0xff] }
0x1c21   : > { %27606 = vmatprep.subr.bf16.mxu1 %v33955_v2 }
0x1c23   : > { %14575 = vmatmul.mubr.f32.vlgmr.msra.gmra.mrb[32].mxu1 %v32430_v50  ;;  %v34270_v50 = vld [vmem:[#allocation97_spill] sm:$0xff] }
0x1c24   : > { %27608 = vmatpush1.bf16.msra.mxu1 %v33956_v23  ;;  %14580 = vmatprep.mubr.f32.mxu1 %v33957_v60 }
0x1c25   : > { %27610 = vmatprep.subr.bf16.mxu1 %v33958_v26 }
0x1c27   : > { %14583 = vmatmul.mubr.f32.gmra.mrb[34].mxu1 %v32427_v44  ;;  %v34274_v44 = vld [vmem:[#allocation47_spill] sm:$0xff] }
0x1c28   : > { %27612 = vmatpush1.bf16.msra.mxu1 %v33959_v34  ;;  %14685 = vmatprep.mubr.f32.mxu1 %v33957_v60 }
0x1c29   : > { %27614 = vmatprep.subr.bf16.mxu1 %v33960_v25 }
0x1c2c   : > { %27616 = vmatpush1.bf16.msra.mxu1 %v33961_v56 }
0x1c2d   : > { %27618 = vmatprep.subr.bf16.mxu1 %v33962_v22 }
0x1c30   : > { %27620 = vmatpush1.bf16.msra.mxu1 %v33963_v37 }
0x1c31   : > { %27622 = vmatprep.subr.bf16.mxu1 %v33964_v38 }
0x1c34   : > { %27624 = vmatpush1.bf16.msra.mxu1 %v33965_v58 }
0x1c35   : > { %27626 = vmatprep.subr.bf16.mxu1 %v33966_v24 }
0x1c38   : > { %27628 = vmatpush1.bf16.msra.mxu1 %v33967_v46 }
0x1c39   : > { %27630 = vmatprep.subr.bf16.mxu1 %v34225_v61 }
0x1c3c   : > { %27632 = vmatpush1.bf16.msra.mxu1 %v34226_v48 }
0x1c3d   : > { %27634 = vmatprep.subr.bf16.mxu1 %v34227_v41 }
0x1c40   : > { %27636 = vmatpush1.bf16.msra.mxu1 %v34228_v9 }
0x1c41   : > { %27638 = vmatprep.subr.bf16.mxu1 %v34261_v57  ;;  %v34269_v57 = vld [vmem:[#allocation96_spill] sm:$0xff] }
0x1c43   : > { %14689 = vmatmul.mubr.f32.vlgmr.msra.gmra.mrb[32].mxu1 %v34262_v8  ;;  %v34271_v8 = vld [vmem:[#allocation44_spill] sm:$0xff] }
0x1c44   : > { %27640 = vmatpush1.bf16.msra.mxu1 %v34263_v21  ;;  %14694 = vmatprep.mubr.f32.mxu1 %v33957_v60  ;;  %v34272_v21 = vld [vmem:[#allocation45_spill] sm:$0xff] }
0x1c45   : > { %27642 = vmatprep.subr.bf16.mxu1 %v34264_v13  ;;  %v34273_v13 = vld [vmem:[#allocation46_spill] sm:$0xff] }
0x1c47   : > { %14698 = vmatmul.mubr.f32.gmra.mrb[34].mxu1 %v34265_v6  ;;  %v34275_v6 = vld [vmem:[#allocation48_spill] sm:$0xff] }
0x1c48   : > { %27644 = vmatpush1.bf16.msra.mxu1 %v34266_v30  ;;  %14864 = vmatprep.mubr.f32.mxu1 %v33957_v60  ;;  %v34276_v30 = vld [vmem:[#allocation49_spill] sm:$0xff] }
0x1c49   : > { %27646 = vmatprep.subr.bf16.mxu1 %v34267_v40  ;;  %v34278_v40 = vld [vmem:[#allocation51_spill] sm:$0xff] }
0x1c4c   : > { %27648 = vmatpush1.bf16.msra.mxu1 %v34268_v1 }
0x1c4d   : > { %27650 = vmatprep.subr.bf16.mxu1 %v34269_v57 }
0x1c50   : > { %27652 = vmatpush1.bf16.msra.mxu1 %v34270_v50 }
0x1c51   : > { %27654 = vmatprep.subr.bf16.mxu1 %v34271_v8 }
0x1c54   : > { %27656 = vmatpush1.bf16.msra.mxu1 %v34272_v21 }
0x1c55   : > { %27658 = vmatprep.subr.bf16.mxu1 %v34273_v13 }
0x1c58   : > { %27660 = vmatpush1.bf16.msra.mxu1 %v34274_v44  ;;  %v21725_v44 = vld [vmem:[%s29947_s11 + $0xb0] sm:$0xff] }
0x1c59   : > { %27662 = vmatprep.subr.bf16.mxu1 %v34275_v6 }
0x1c5c   : > { %27664 = vmatpush1.bf16.msra.mxu1 %v34276_v30 }
0x1c5d   : > { %27666 = vmatprep.subr.bf16.mxu1 %v34277_v11 }
0x1c60   : > { %27668 = vmatpush1.bf16.msra.mxu1 %v34278_v40  ;;  %v21723_v40 = vld [vmem:[%s29947_s11 + $0xa0] sm:$0xff] }
0x1c61   : > { %27670 = vmatprep.subr.bf16.mxu1 %v33955_v2 }
0x1c63   : > { %14866 = vmatmul.mubr.f32.vlgmr.msra.gmra.mrb[32].mxu1 %v32424_v3 }
0x1c64   : > { %27672 = vmatpush1.bf16.msra.mxu1 %v33956_v23  ;;  %14871 = vmatprep.mubr.f32.mxu1 %v33957_v60 }
0x1c65   : > { %27674 = vmatprep.subr.bf16.mxu1 %v33958_v26 }
0x1c67   : > { %14873 = vmatmul.mubr.f32.gmra.mrb[34].mxu1 %v32422_v14 }
0x1c68   : > { %27676 = vmatpush1.bf16.msra.mxu1 %v33959_v34  ;;  %14975 = vmatprep.mubr.f32.mxu1 %v33957_v60 }
0x1c69   : > { %27678 = vmatprep.subr.bf16.mxu1 %v33960_v25 }
0x1c6c   : > { %27680 = vmatpush1.bf16.msra.mxu1 %v33961_v56 }
0x1c6d   : > { %27682 = vmatprep.subr.bf16.mxu1 %v33962_v22 }
0x1c70   : > { %27684 = vmatpush1.bf16.msra.mxu1 %v33963_v37 }
0x1c71   : > { %27686 = vmatprep.subr.bf16.mxu1 %v33964_v38 }
0x1c74   : > { %27688 = vmatpush1.bf16.msra.mxu1 %v33965_v58 }
0x1c75   : > { %27690 = vmatprep.subr.bf16.mxu1 %v33966_v24 }
0x1c78   : > { %27692 = vmatpush1.bf16.msra.mxu1 %v33967_v46 }
0x1c79   : > { %27694 = vmatprep.subr.bf16.mxu1 %v34225_v61 }
0x1c7c   : > { %27696 = vmatpush1.bf16.msra.mxu1 %v34226_v48 }
0x1c7d   : > { %27698 = vmatprep.subr.bf16.mxu1 %v34227_v41 }
0x1c80   : > { %27700 = vmatpush1.bf16.msra.mxu1 %v34228_v9 }
0x1c83   : > { %14977 = vmatmul.mubr.f32.vlgmr.msra.gmra.mrb[32].mxu1 %v32424_v3 }
0x1c84   : > { %14982 = vmatprep.mubr.f32.mxu1 %v33957_v60 }
0x1c87   : > { %14984 = vmatmul.mubr.f32.gmra.mrb[34].mxu1 %v32422_v14 }
0x1c88   : > { %24765 = vmatprep.mubr.f32.mxu1 %v33907_v12 }
0x1d56   : > { %v14978_v11 = vpop.f32.mrb[32].mxu1 }
0x1d57   : > { %v14990_v30 = vadd.f32 %v21723_v40, %v14978_v11  ;;  %v32544_v6 = vpop.f32.mrb[33].mxu1 }
0x1d58   : > { %34279 = vst [vmem:[#allocation21_spill] sm:$0xff] %v32544_v6 }
0x1d59   : > { %v21727_v13 = vmul.f32 -1.442695, %v14990_v30 }
0x1d5a   : > { %v14985_v21 = vpop.f32.mrb[34].mxu1 }
0x1d5b   : > { %29370 = vpow2.f32 %v21727_v13  ;;  %v14992_v8 = vadd.f32 %v21725_v44, %v14985_v21  ;;  %v32547_v50 = vpop.f32.mrb[35].mxu1 }
0x1d5c   : > { %34280 = vst [vmem:[#allocation22_spill] sm:$0xff] %v32547_v50 }
0x1d5d   : > { %v21729_v57 = vmul.f32 -1.442695, %v14992_v8 }
0x1d5f   : > { %29372 = vpow2.f32 %v21729_v57 }
0x1d65   : > { %v29371_v3 = vpop.eup %29370 }
0x1d66   : > { %v15006_v1 = vadd.f32 1.0, %v29371_v3 }
0x1d68   : > { %29374 = vrcp.f32 %v15006_v1 }
0x1d69   : > { %v29373_v14 = vpop.eup %29372 }
0x1d6a   : > { %v15008_v15 = vadd.f32 1.0, %v29373_v14 }
0x1d6c   : > { %29376 = vrcp.f32 %v15008_v15 }
0x1d72   : > { %v29375_v59 = vpop.eup %29374 }
0x1d73   : > { %v15018_v40 = vmul.f32 %v29375_v59, %v32383_v39 }
0x1d75   : > { %v15021_v11 = vand.u32 4294901760, %v15018_v40 }
0x1d76   : > { %v29377_v12 = vpop.eup %29376 }
0x1d77   : > { %v15019_v30 = vmul.f32 %v29377_v12, %v32381_v4  ;;  %v15109_v6 = vsub.f32 %v15018_v40, %v15021_v11 }
0x1d79   : > { %v15024_v13 = vand.u32 4294901760, %v15019_v30  ;;  %v15110_v21 = vand.u32 4294901760, %v15109_v6 }
0x1d7b   : > { %v27701_v44 = vpack.c.bf16 %v15024_v13, %v15021_v11  ;;  %v15116_v50 = vsub.f32 %v15019_v30, %v15024_v13  ;;  %v15111_v57 = vsub.f32 %v15109_v6, %v15110_v21 }
0x1d7d   : > { %27702 = vmatprep.subr.bf16.mxu0 %v27701_v44  ;;  %v15117_v8 = vand.u32 4294901760, %v15116_v50  ;;  %v27709_v3 = vpack.c.bf16 %v15116_v50, %v15109_v6  ;;  %v15112_v15 = vand.u32 4294901760, %v15111_v57 }
0x1d7e   : > { %27704 = vmatpush3.bf16.msra.mxu0 %v27701_v44 }
0x1d7f   : > { %v15118_v1 = vsub.f32 %v15116_v50, %v15117_v8  ;;  %v27717_v14 = vpack.c.bf16 %v15117_v8, %v15110_v21 }
0x1d81   : > { %24514 = vmatmul.mubr.f32.vlgmr.msra.gmra.mrb[22].mxu0 %v33908_v33  ;;  %v15119_v59 = vand.u32 4294901760, %v15118_v1  ;;  %v34282_v1 = vld [vmem:[#allocation55_spill] sm:$0xff] }
0x1d82   : > { %24520 = vmatprep.mubr.f32.mxu0 %v33909_v0 }
0x1d83   : > { %v27705_v39 = vpack.c.bf16 %v15119_v59, %v15112_v15  ;;  %v34284_v15 = vld [vmem:[#allocation58_spill] sm:$0xff]  ;;  %v34285_v59 = vld [vmem:[#allocation60_spill] sm:$0xff] }
0x1d85   : > { %27706 = vmatprep.subr.bf16.mxu0 %v27705_v39 }
0x1d86   : > { %27708 = vmatpush3.bf16.msra.mxu0 %v27705_v39 }
0x1d87   : > { %27710 = vmatprep.subr.bf16.mxu0 %v27709_v3 }
0x1d89   : > { %24521 = vmatmul.mubr.f32.vlgmr.msra.gmra.mrb[22].mxu0 %v33910_v18 }
0x1d8a   : > { %27712 = vmatpush3.bf16.msra.mxu0 %v27709_v3  ;;  %24527 = vmatprep.mubr.f32.mxu0 %v33911_v52  ;;  %v34281_v3 = vld [vmem:[#allocation54_spill] sm:$0xff] }
0x1d8b   : > { %27714 = vmatprep.subr.bf16.mxu0 %v27701_v44 }
0x1d91   : > { %24528 = vmatmul.mubr.f32.vlgmr.msra.gmra.mrb[22].mxu0 %v33912_v62 }
0x1d92   : > { %27716 = vmatpush3.bf16.msra.mxu0 %v27701_v44  ;;  %24534 = vmatprep.mubr.f32.mxu0 %v33913_v27 }
0x1d93   : > { %27718 = vmatprep.subr.bf16.mxu0 %v27717_v14 }
0x1d99   : > { %24535 = vmatmul.mubr.f32.vlgmr.msra.gmra.mrb[22].mxu0 %v33914_v31 }
0x1d9a   : > { %27720 = vmatpush3.bf16.msra.mxu0 %v27717_v14  ;;  %24541 = vmatprep.mubr.f32.mxu0 %v33909_v0  ;;  %v34283_v14 = vld [vmem:[#allocation57_spill] sm:$0xff] }
0x1d9b   : > { %27722 = vmatprep.subr.bf16.mxu0 %v27701_v44 }
0x1da1   : > { %24542 = vmatmul.mubr.f32.vlgmr.msra.gmra.mrb[22].mxu0 %v33910_v18 }
0x1da2   : > { %27724 = vmatpush3.bf16.msra.mxu0 %v27701_v44  ;;  %24548 = vmatprep.mubr.f32.mxu0 %v33909_v0 }
0x1da3   : > { %27726 = vmatprep.subr.bf16.mxu0 %v30757_v55 }
0x1da9   : > { %24549 = vmatmul.mubr.f32.vlgmr.msra.gmra.mrb[22].mxu0 %v33910_v18 }
0x1daa   : > { %27728 = vmatpush3.bf16.msra.mxu0 %v30757_v55 }
0x1dab   : > { %27730 = vmatprep.subr.bf16.mxu0 %v30776_v28 }
0x1dae   : > { %27732 = vmatpush3.bf16.msra.mxu0 %v30776_v28 }
0x1daf   : > { %27734 = vmatprep.subr.bf16.mxu0 %v30791_v20 }
0x1db2   : > { %27736 = vmatpush3.bf16.msra.mxu0 %v30791_v20 }
0x1db3   : > { %27738 = vmatprep.subr.bf16.mxu0 %v30805_v49 }
0x1db6   : > { %27740 = vmatpush3.bf16.msra.mxu0 %v30805_v49 }
0x1db7   : > { %27742 = vmatprep.subr.bf16.mxu0 %v30815_v5 }
0x1dba   : > { %27744 = vmatpush3.bf16.msra.mxu0 %v30815_v5 }
0x1dbb   : > { %27746 = vmatprep.subr.bf16.mxu0 %v30820_v7 }
0x1dbe   : > { %27748 = vmatpush3.bf16.msra.mxu0 %v30820_v7 }
0x1dbf   : > { %27750 = vmatprep.subr.bf16.mxu0 %v30824_v16 }
0x1dc2   : > { %27752 = vmatpush3.bf16.msra.mxu0 %v30824_v16 }
0x1dc3   : > { %27754 = vmatprep.subr.bf16.mxu0 %v30834_v63 }
0x1dc6   : > { %27756 = vmatpush3.bf16.msra.mxu0 %v30834_v63 }
0x1dc7   : > { %27758 = vmatprep.subr.bf16.mxu0 %v30844_v47 }
0x1e7c   : > { %v24550_v12 = vpop.f32.mrb[22].mxu0 }
0x1e7d   : > { %v32579_v39 = vand.u32 4294901760, %v24550_v12  ;;  %v15512_v50 = vpop.f32.mrb[23].mxu0 }
0x1e7e   : > { %v32581_v6 = vand.u32 4294901760, %v15512_v50 }
0x1e7f   : > { %v32584_v40 = vsub.f32 %v24550_v12, %v32579_v39  ;;  %v34286_v12 = vld [vmem:[#allocation62_spill] sm:$0xff] }
0x1e80   : > { %v15607_v11 = vsub.f32 %v15512_v50, %v32581_v6  ;;  %v34287_v50 = vld [vmem:[#allocation63_spill] sm:$0xff] }
0x1e81   : > { %v15618_v30 = vand.u32 4294901760, %v32584_v40 }
0x1e82   : > { %v15608_v13 = vand.u32 4294901760, %v15607_v11 }
0x1e83   : > { %v15619_v21 = vsub.f32 %v32584_v40, %v15618_v30 }
0x1e84   : > { %v15609_v44 = vsub.f32 %v15607_v11, %v15608_v13 }
0x1e85   : > { %v15620_v8 = vand.u32 4294901760, %v15619_v21  ;;  %v34292_v21 = vld [vmem:[#allocation22_spill] sm:$0xff] }
0x1e86   : > { %v15610_v57 = vand.u32 4294901760, %v15609_v44 }
0x1e88   : > { %24583 = vmatprep.mubr.f32.mxu0 %v15610_v57  ;;  %v34293_v57 = vld [vmem:[#allocation21_spill] sm:$0xff] }
0x1e89   : > { %24584 = vmatmul.mubr.f32.vlgmr.msra.gmra.mrb[24].mxu0 %v15620_v8 }
0x1e8a   : > { %27760 = vmatpush3.bf16.msra.mxu0 %v30844_v47  ;;  %24618 = vmatprep.mubr.f32.mxu0 %v32581_v6 }
0x1e8b   : > { %27762 = vmatprep.subr.bf16.mxu0 %v30981_v42 }
0x1e8e   : > { %27764 = vmatpush3.bf16.msra.mxu0 %v30981_v42 }
0x1e8f   : > { %27766 = vmatprep.subr.bf16.mxu0 %v30993_v45 }
0x1e92   : > { %27768 = vmatpush3.bf16.msra.mxu0 %v30993_v45 }
0x1e93   : > { %27770 = vmatprep.subr.bf16.mxu0 %v31004_v35 }
0x1e96   : > { %27772 = vmatpush3.bf16.msra.mxu0 %v31004_v35 }
0x1e97   : > { %27774 = vmatprep.subr.bf16.mxu0 %v31008_v19 }
0x1e9a   : > { %27776 = vmatpush3.bf16.msra.mxu0 %v31008_v19 }
0x1e9b   : > { %27778 = vmatprep.subr.bf16.mxu0 %v30865_v36 }
0x1e9e   : > { %27780 = vmatpush3.bf16.msra.mxu0 %v30865_v36 }
0x1e9f   : > { %27782 = vmatprep.subr.bf16.mxu0 %v30879_v54 }
0x1ea2   : > { %27784 = vmatpush3.bf16.msra.mxu0 %v30879_v54 }
0x1ea3   : > { %27786 = vmatprep.subr.bf16.mxu0 %v30887_v53 }
0x1ea6   : > { %27788 = vmatpush3.bf16.msra.mxu0 %v30887_v53 }
0x1ea7   : > { %27790 = vmatprep.subr.bf16.mxu0 %v30891_v43 }
0x1ea9   : > { %24619 = vmatmul.mubr.f32.vlgmr.msra.gmra.mrb[24].mxu0 %v32579_v39 }
0x1eaa   : > { %27792 = vmatpush3.bf16.msra.mxu0 %v30891_v43  ;;  %24653 = vmatprep.mubr.f32.mxu0 %v15607_v11  ;;  %v34289_v11 = vld [vmem:[#allocation18_spill] sm:$0xff] }
0x1eab   : > { %27794 = vmatprep.subr.bf16.mxu0 %v31022_v32 }
0x1eae   : > { %27796 = vmatpush3.bf16.msra.mxu0 %v31022_v32 }
0x1eaf   : > { %27798 = vmatprep.subr.bf16.mxu0 %v31030_v17 }
0x1eb2   : > { %27800 = vmatpush3.bf16.msra.mxu0 %v31030_v17 }
0x1eb3   : > { %27802 = vmatprep.subr.bf16.mxu0 %v31036_v10 }
0x1eb6   : > { %27804 = vmatpush3.bf16.msra.mxu0 %v31036_v10 }
0x1eb7   : > { %27806 = vmatprep.subr.bf16.mxu0 %v31042_v51 }
0x1eba   : > { %27808 = vmatpush3.bf16.msra.mxu0 %v31042_v51 }
0x1ebb   : > { %27810 = vmatprep.subr.bf16.mxu0 %v30895_v29 }
0x1ebe   : > { %27812 = vmatpush3.bf16.msra.mxu0 %v30895_v29 }
0x1ebf   : > { %27814 = vmatprep.subr.bf16.mxu0 %v34281_v3 }
0x1ec2   : > { %27816 = vmatpush3.bf16.msra.mxu0 %v34281_v3 }
0x1ec3   : > { %27818 = vmatprep.subr.bf16.mxu0 %v34282_v1 }
0x1ec6   : > { %27820 = vmatpush3.bf16.msra.mxu0 %v34282_v1 }
0x1ec7   : > { %27822 = vmatprep.subr.bf16.mxu0 %v30757_v55 }
0x1ec9   : > { %24654 = vmatmul.mubr.f32.vlgmr.msra.gmra.mrb[24].mxu0 %v32584_v40  ;;  %v34288_v40 = vld [vmem:[#allocation25_spill] sm:$0xff] }
0x1eca   : > { %27824 = vmatpush3.bf16.msra.mxu0 %v30757_v55  ;;  %24688 = vmatprep.mubr.f32.mxu0 %v15608_v13  ;;  %v21724_v13 = vld [vmem:[%s29947_s11 + $0xa8] sm:$0xff] }
0x1ecb   : > { %27826 = vmatprep.subr.bf16.mxu0 %v30776_v28  ;;  %v14991_v8 = vadd.f32 %v21724_v13, %v34293_v57 }
0x1ece   : > { %27828 = vmatpush3.bf16.msra.mxu0 %v30776_v28 }
0x1ecf   : > { %27830 = vmatprep.subr.bf16.mxu0 %v30791_v20 }
0x1ed2   : > { %27832 = vmatpush3.bf16.msra.mxu0 %v30791_v20 }
0x1ed3   : > { %27834 = vmatprep.subr.bf16.mxu0 %v30805_v49 }
0x1ed6   : > { %27836 = vmatpush3.bf16.msra.mxu0 %v30805_v49 }
0x1ed7   : > { %27838 = vmatprep.subr.bf16.mxu0 %v30815_v5 }
0x1eda   : > { %27840 = vmatpush3.bf16.msra.mxu0 %v30815_v5 }
0x1edb   : > { %27842 = vmatprep.subr.bf16.mxu0 %v30820_v7 }
0x1ede   : > { %27844 = vmatpush3.bf16.msra.mxu0 %v30820_v7 }
0x1edf   : > { %27846 = vmatprep.subr.bf16.mxu0 %v30824_v16 }
0x1ee2   : > { %27848 = vmatpush3.bf16.msra.mxu0 %v30824_v16 }
0x1ee3   : > { %27850 = vmatprep.subr.bf16.mxu0 %v30834_v63 }
0x1ee6   : > { %27852 = vmatpush3.bf16.msra.mxu0 %v30834_v63 }
0x1ee7   : > { %27854 = vmatprep.subr.bf16.mxu0 %v34283_v14 }
0x1ee9   : > { %24689 = vmatmul.mubr.f32.vlgmr.msra.gmra.mrb[24].mxu0 %v15618_v30  ;;  %v34290_v30 = vld [vmem:[#allocation19_spill] sm:$0xff] }
0x1eea   : > { %27856 = vmatpush3.bf16.msra.mxu0 %v34283_v14  ;;  %24723 = vmatprep.mubr.f32.mxu0 %v32581_v6  ;;  %v21731_v14 = vld [vmem:[%s29957_s23 + $0x50] sm:$0xff] }
0x1eeb   : > { %27858 = vmatprep.subr.bf16.mxu0 %v34284_v15 }
0x1eee   : > { %27860 = vmatpush3.bf16.msra.mxu0 %v34284_v15  ;;  %v21732_v15 = vld [vmem:[%s29957_s23 + $0x58] sm:$0xff] }
0x1eef   : > { %27862 = vmatprep.subr.bf16.mxu0 %v34285_v59 }
0x1ef2   : > { %27864 = vmatpush3.bf16.msra.mxu0 %v34285_v59 }
0x1ef3   : > { %27866 = vmatprep.subr.bf16.mxu0 %v34286_v12 }
0x1ef6   : > { %27868 = vmatpush3.bf16.msra.mxu0 %v34286_v12 }
0x1ef7   : > { %27870 = vmatprep.subr.bf16.mxu0 %v34287_v50 }
0x1efa   : > { %27872 = vmatpush3.bf16.msra.mxu0 %v34287_v50 }
0x1efb   : > { %27874 = vmatprep.subr.bf16.mxu0 %v34288_v40 }
0x1efe   : > { %27876 = vmatpush3.bf16.msra.mxu0 %v34288_v40 }
0x1eff   : > { %27878 = vmatprep.subr.bf16.mxu0 %v34289_v11 }
0x1f02   : > { %27880 = vmatpush3.bf16.msra.mxu0 %v34289_v11  ;;  %v21728_v11 = vmul.f32 -1.442695, %v14991_v8 }
0x1f03   : > { %27882 = vmatprep.subr.bf16.mxu0 %v34290_v30 }
0x1f06   : > { %27884 = vmatpush3.bf16.msra.mxu0 %v34290_v30 }
0x1f07   : > { %27886 = vmatprep.subr.bf16.mxu0 %v30757_v55 }
0x1f09   : > { %24724 = vmatmul.mubr.f32.vlgmr.msra.gmra.mrb[24].mxu0 %v32579_v39 }
0x1f0a   : > { %27888 = vmatpush3.bf16.msra.mxu0 %v30757_v55  ;;  %24758 = vmatprep.mubr.f32.mxu0 %v32581_v6  ;;  %v21726_v6 = vld [vmem:[%s29947_s11 + $0xb8] sm:$0xff] }
0x1f0b   : > { %27890 = vmatprep.subr.bf16.mxu0 %v30776_v28  ;;  %v14993_v44 = vadd.f32 %v21726_v6, %v34292_v21 }
0x1f0d   : > { %v21730_v30 = vmul.f32 -1.442695, %v14993_v44 }
0x1f0e   : > { %27892 = vmatpush3.bf16.msra.mxu0 %v30776_v28 }
0x1f0f   : > { %27894 = vmatprep.subr.bf16.mxu0 %v30791_v20  ;;  %29378 = vpow2.f32 %v21730_v30 }
0x1f10   : > { %29380 = vpow2.f32 %v21728_v11 }
0x1f12   : > { %27896 = vmatpush3.bf16.msra.mxu0 %v30791_v20 }
0x1f13   : > { %27898 = vmatprep.subr.bf16.mxu0 %v30805_v49 }
0x1f16   : > { %27900 = vmatpush3.bf16.msra.mxu0 %v30805_v49 }
0x1f17   : > { %27902 = vmatprep.subr.bf16.mxu0 %v30815_v5 }
0x1f19   : > { %v29379_v40 = vpop.eup %29378 }
0x1f1a   : > { %27904 = vmatpush3.bf16.msra.mxu0 %v30815_v5  ;;  %v29381_v50 = vpop.eup %29380  ;;  %v15009_v12 = vadd.f32 1.0, %v29379_v40 }
0x1f1b   : > { %27906 = vmatprep.subr.bf16.mxu0 %v30820_v7  ;;  %v15007_v59 = vadd.f32 1.0, %v29381_v50 }
0x1f1c   : > { %29382 = vrcp.f32 %v15009_v12  ;;  %v34294_v12 = vld [vmem:[#allocation20_spill] sm:$0xff] }
0x1f1d   : > { %29384 = vrcp.f32 %v15007_v59 }
0x1f1e   : > { %27908 = vmatpush3.bf16.msra.mxu0 %v30820_v7 }
0x1f1f   : > { %27910 = vmatprep.subr.bf16.mxu0 %v30824_v16 }
0x1f22   : > { %27912 = vmatpush3.bf16.msra.mxu0 %v30824_v16 }
0x1f23   : > { %27914 = vmatprep.subr.bf16.mxu0 %v30834_v63 }
0x1f26   : > { %27916 = vmatpush3.bf16.msra.mxu0 %v30834_v63  ;;  %v29383_v6 = vpop.eup %29382 }
0x1f27   : > { %27942 = vmatprep.subr.bf16.mxu0 %v33955_v2  ;;  %v29385_v13 = vpop.eup %29384  ;;  %v16216_v30 = vsub.f32 1.0, %v29383_v6  ;;  %v16214_v50 = vmul.f32 %v29383_v6, %v32381_v4 }
0x1f28   : > { %v16215_v21 = vsub.f32 1.0, %v29385_v13  ;;  %v16213_v57 = vmul.f32 %v29385_v13, %v34294_v12  ;;  %v34296_v12 = vld [vmem:[#allocation24_spill] sm:$0xff] }
0x1f29   : > { %24759 = vmatmul.mubr.f32.vlgmr.msra.gmra.mrb[24].mxu0 %v32579_v39  ;;  %v34291_v39 = vld [vmem:[#allocation43_spill] sm:$0xff] }
0x1f2a   : > { %27944 = vmatpush1.bf16.msra.mxu0 %v33956_v23  ;;  %16827 = vmatprep.mubr.f32.mxu0 %v33957_v60 }
0x1f2b   : > { %27946 = vmatprep.subr.bf16.mxu0 %v33958_v26 }
0x1f2e   : > { %27948 = vmatpush1.bf16.msra.mxu0 %v33959_v34 }
0x1f2f   : > { %27950 = vmatprep.subr.bf16.mxu0 %v33960_v25 }
0x1f32   : > { %27952 = vmatpush1.bf16.msra.mxu0 %v33961_v56 }
0x1f33   : > { %27954 = vmatprep.subr.bf16.mxu0 %v33962_v22 }
0x1f36   : > { %27956 = vmatpush1.bf16.msra.mxu0 %v33963_v37 }
0x1f37   : > { %27958 = vmatprep.subr.bf16.mxu0 %v33964_v38 }
0x1f3a   : > { %27960 = vmatpush1.bf16.msra.mxu0 %v33965_v58 }
0x1f3b   : > { %27962 = vmatprep.subr.bf16.mxu0 %v33966_v24 }
0x1f3e   : > { %27964 = vmatpush1.bf16.msra.mxu0 %v33967_v46 }
0x1f3f   : > { %27966 = vmatprep.subr.bf16.mxu0 %v34225_v61 }
0x1f42   : > { %27968 = vmatpush1.bf16.msra.mxu0 %v34226_v48 }
0x1f43   : > { %27970 = vmatprep.subr.bf16.mxu0 %v34227_v41 }
0x1f46   : > { %27972 = vmatpush1.bf16.msra.mxu0 %v34228_v9 }
0x1f47   : > { %27974 = vmatprep.subr.bf16.mxu0 %v34291_v39 }
0x1ffc   : > { %v24760_v1 = vpop.f32.mrb[24].mxu0 }
0x1ffd   : > { %v16210_v39 = vadd.f32 %v24760_v1, %v21732_v15  ;;  %v16199_v3 = vpop.f32.mrb[25].mxu0 }
0x1ffe   : > { %v16209_v29 = vadd.f32 %v21731_v14, %v16199_v3 }
0x1fff   : > { %29386 = vtanh.f32 %v16210_v39 }
0x2000   : > { %29388 = vtanh.f32 %v16209_v29 }
0x2009   : > { %v29387_v11 = vpop.eup %29386 }
0x200a   : > { %v29389_v44 = vpop.eup %29388  ;;  %v16218_v40 = vmul.f32 %v29387_v11, %v16216_v30 }
0x200b   : > { %v16217_v59 = vmul.f32 %v29389_v44, %v16215_v21 }
0x200c   : > { %v32701_v8 = vadd.f32 %v16218_v40, %v16214_v50 }
0x200d   : > { %v32703_v1 = vadd.f32 %v16217_v59, %v16213_v57 }
0x200e   : > { %21734 = vst [vmem:[%s31171_s24 + $0x58] sm:$0xff] %v32701_v8  ;;  %v16228_v29 = vand.u32 4294901760, %v32701_v8 }
0x200f   : > { %34295 = vst [vmem:[#allocation23_spill] sm:$0xff] %v32703_v1  ;;  %21733 = vst [vmem:[%s31171_s24 + $0x50] sm:$0xff] %v32703_v1  ;;  %v16225_v3 = vand.u32 4294901760, %v32703_v1 }
0x2010   : > { %v16320_v14 = vsub.f32 %v32701_v8, %v16228_v29 }
0x2011   : > { %v27917_v15 = vpack.c.bf16 %v16228_v29, %v16225_v3  ;;  %v16313_v4 = vsub.f32 %v32703_v1, %v16225_v3 }
0x2012   : > { %v16321_v39 = vand.u32 4294901760, %v16320_v14 }
0x2013   : > { %27918 = vmatprep.subr.bf16.mxu1 %v27917_v15  ;;  %v16314_v6 = vand.u32 4294901760, %v16313_v4  ;;  %v27925_v50 = vpack.c.bf16 %v16320_v14, %v16313_v4 }
0x2014   : > { %27920 = vmatpush3.bf16.msra.mxu1 %v27917_v15  ;;  %v16322_v13 = vsub.f32 %v16320_v14, %v16321_v39 }
0x2015   : > { %v16315_v30 = vsub.f32 %v16313_v4, %v16314_v6  ;;  %v27933_v40 = vpack.c.bf16 %v16321_v39, %v16314_v6 }
0x2016   : > { %v16323_v11 = vand.u32 4294901760, %v16322_v13 }
0x2017   : > { %24766 = vmatmul.mubr.f32.vlgmr.msra.gmra.mrb[36].mxu1 %v33908_v33  ;;  %v16316_v21 = vand.u32 4294901760, %v16315_v30 }
0x2018   : > { %24772 = vmatprep.mubr.f32.mxu1 %v33909_v0 }
0x2019   : > { %v27921_v44 = vpack.c.bf16 %v16323_v11, %v16316_v21  ;;  %v34297_v11 = vld [vmem:[#allocation77_spill] sm:$0xff]  ;;  %v34298_v21 = vld [vmem:[#allocation78_spill] sm:$0xff] }
0x201b   : > { %27922 = vmatprep.subr.bf16.mxu1 %v27921_v44 }
0x201c   : > { %27924 = vmatpush3.bf16.msra.mxu1 %v27921_v44 }
0x201d   : > { %27926 = vmatprep.subr.bf16.mxu1 %v27925_v50 }
0x201f   : > { %24773 = vmatmul.mubr.f32.vlgmr.msra.gmra.mrb[36].mxu1 %v33910_v18 }
0x2020   : > { %27928 = vmatpush3.bf16.msra.mxu1 %v27925_v50  ;;  %24779 = vmatprep.mubr.f32.mxu1 %v33911_v52  ;;  %v34299_v50 = vld [vmem:[#allocation79_spill] sm:$0xff] }
0x2021   : > { %27930 = vmatprep.subr.bf16.mxu1 %v27917_v15 }
0x2027   : > { %24780 = vmatmul.mubr.f32.vlgmr.msra.gmra.mrb[36].mxu1 %v33912_v62 }
0x2028   : > { %27932 = vmatpush3.bf16.msra.mxu1 %v27917_v15  ;;  %24786 = vmatprep.mubr.f32.mxu1 %v33913_v27 }
0x2029   : > { %27934 = vmatprep.subr.bf16.mxu1 %v27933_v40 }
0x202f   : > { %24787 = vmatmul.mubr.f32.vlgmr.msra.gmra.mrb[36].mxu1 %v33914_v31 }
0x2030   : > { %27936 = vmatpush3.bf16.msra.mxu1 %v27933_v40  ;;  %24793 = vmatprep.mubr.f32.mxu1 %v33909_v0  ;;  %v34300_v40 = vld [vmem:[#allocation80_spill] sm:$0xff] }
0x2031   : > { %27938 = vmatprep.subr.bf16.mxu1 %v27917_v15 }
0x2037   : > { %24794 = vmatmul.mubr.f32.vlgmr.msra.gmra.mrb[36].mxu1 %v33910_v18 }
0x2038   : > { %27940 = vmatpush3.bf16.msra.mxu1 %v27917_v15  ;;  %24800 = vmatprep.mubr.f32.mxu1 %v33909_v0 }
0x203f   : > { %24801 = vmatmul.mubr.f32.vlgmr.msra.gmra.mrb[36].mxu1 %v33910_v18 }
0x2040   : > { %24807 = vmatprep.mubr.f32.mxu1 %v34296_v12 }
0x2112   : > { %v24802_v57 = vpop.f32.mrb[36].mxu1 }
0x2113   : > { %v32725_v59 = vand.u32 4294901760, %v24802_v57  ;;  %v16716_v29 = vpop.f32.mrb[37].mxu1 }
0x2114   : > { %v32727_v3 = vand.u32 4294901760, %v16716_v29 }
0x2115   : > { %v32730_v14 = vsub.f32 %v24802_v57, %v32725_v59  ;;  %v34301_v57 = vld [vmem:[#allocation81_spill] sm:$0xff] }
0x2116   : > { %v32733_v4 = vsub.f32 %v16716_v29, %v32727_v3  ;;  %v34302_v29 = vld [vmem:[#allocation82_spill] sm:$0xff] }
0x2117   : > { %v33684_v15 = vand.u32 4294901760, %v32730_v14 }
0x2118   : > { %v33685_v39 = vand.u32 4294901760, %v32733_v4 }
0x2119   : > { %v16842_v30 = vsub.f32 %v32730_v14, %v33684_v15  ;;  %v34305_v15 = vld [vmem:[#allocation56_spill] sm:$0xff] }
0x211a   : > { %v16831_v6 = vsub.f32 %v32733_v4, %v33685_v39  ;;  %v34306_v39 = vld [vmem:[#allocation59_spill] sm:$0xff] }
0x211b   : > { %v16843_v44 = vand.u32 4294901760, %v16842_v30  ;;  %v34307_v30 = vld [vmem:[#allocation61_spill] sm:$0xff] }
0x211c   : > { %v16832_v13 = vand.u32 4294901760, %v16831_v6  ;;  %v34303_v6 = vld [vmem:[#allocation83_spill] sm:$0xff] }
0x211e   : > { %16833 = vmatmul.mubr.f32.vlgmr.msra.gmra.mrb[26].mxu0 %v16832_v13  ;;  %v34304_v13 = vld [vmem:[#allocation52_spill] sm:$0xff] }
0x211f   : > { %27976 = vmatpush1.bf16.msra.mxu0 %v34297_v11  ;;  %16838 = vmatprep.mubr.f32.mxu0 %v33957_v60 }
0x2120   : > { %27978 = vmatprep.subr.bf16.mxu0 %v34298_v21  ;;  %v34310_v21 = vld [vmem:[#allocation66_spill] sm:$0xff] }
0x2122   : > { %16844 = vmatmul.mubr.f32.gmra.mrb[28].mxu0 %v16843_v44  ;;  %v34308_v44 = vld [vmem:[#allocation64_spill] sm:$0xff] }
0x2123   : > { %27980 = vmatpush1.bf16.msra.mxu0 %v34299_v50  ;;  %17074 = vmatprep.mubr.f32.mxu0 %v33957_v60  ;;  %v34309_v50 = vld [vmem:[#allocation65_spill] sm:$0xff] }
0x2124   : > { %27982 = vmatprep.subr.bf16.mxu0 %v34300_v40  ;;  %v34311_v40 = vld [vmem:[#allocation68_spill] sm:$0xff] }
0x2127   : > { %27984 = vmatpush1.bf16.msra.mxu0 %v34301_v57  ;;  %v34312_v57 = vld [vmem:[#allocation67_spill] sm:$0xff] }
0x2128   : > { %27986 = vmatprep.subr.bf16.mxu0 %v34302_v29  ;;  %v34326_v29 = vld [vmem:[#allocation75_spill] sm:$0xff] }
0x212b   : > { %27988 = vmatpush1.bf16.msra.mxu0 %v34303_v6  ;;  %v34313_v6 = vld [vmem:[#allocation84_spill] sm:$0xff] }
0x212c   : > { %27990 = vmatprep.subr.bf16.mxu0 %v34304_v13  ;;  %v34324_v13 = vld [vmem:[#allocation73_spill] sm:$0xff] }
0x212f   : > { %27992 = vmatpush1.bf16.msra.mxu0 %v34305_v15  ;;  %v34314_v15 = vld [vmem:[#allocation85_spill] sm:$0xff] }
0x2130   : > { %27994 = vmatprep.subr.bf16.mxu0 %v34306_v39  ;;  %v34322_v39 = vld [vmem:[#allocation71_spill] sm:$0xff] }
0x2133   : > { %27996 = vmatpush1.bf16.msra.mxu0 %v34307_v30  ;;  %v34315_v30 = vld [vmem:[#allocation86_spill] sm:$0xff] }
0x2134   : > { %27998 = vmatprep.subr.bf16.mxu0 %v34308_v44  ;;  %v34320_v44 = vld [vmem:[#allocation69_spill] sm:$0xff] }
0x2137   : > { %28000 = vmatpush1.bf16.msra.mxu0 %v34309_v50  ;;  %v34316_v50 = vld [vmem:[#allocation87_spill] sm:$0xff] }
0x2138   : > { %28002 = vmatprep.subr.bf16.mxu0 %v34310_v21  ;;  %v34317_v21 = vld [vmem:[#allocation88_spill] sm:$0xff] }
0x213b   : > { %28004 = vmatpush1.bf16.msra.mxu0 %v34311_v40  ;;  %v34318_v40 = vld [vmem:[#allocation89_spill] sm:$0xff] }
0x213c   : > { %28006 = vmatprep.subr.bf16.mxu0 %v34312_v57  ;;  %v34319_v57 = vld [vmem:[#allocation90_spill] sm:$0xff] }
0x213e   : > { %17076 = vmatmul.mubr.f32.vlgmr.msra.gmra.mrb[26].mxu0 %v32727_v3 }
0x213f   : > { %28008 = vmatpush1.bf16.msra.mxu0 %v34313_v6  ;;  %17081 = vmatprep.mubr.f32.mxu0 %v33957_v60  ;;  %v34321_v6 = vld [vmem:[#allocation70_spill] sm:$0xff] }
0x2140   : > { %28010 = vmatprep.subr.bf16.mxu0 %v34314_v15  ;;  %v34323_v15 = vld [vmem:[#allocation72_spill] sm:$0xff] }
0x2142   : > { %17083 = vmatmul.mubr.f32.gmra.mrb[28].mxu0 %v32725_v59 }
0x2143   : > { %28012 = vmatpush1.bf16.msra.mxu0 %v34315_v30  ;;  %17217 = vmatprep.mubr.f32.mxu0 %v33957_v60  ;;  %v34325_v30 = vld [vmem:[#allocation74_spill] sm:$0xff] }
0x2144   : > { %28014 = vmatprep.subr.bf16.mxu0 %v34316_v50  ;;  %v34327_v50 = vld [vmem:[#allocation76_spill] sm:$0xff] }
0x2147   : > { %28016 = vmatpush1.bf16.msra.mxu0 %v34317_v21 }
0x2148   : > { %28018 = vmatprep.subr.bf16.mxu0 %v34318_v40 }
0x214b   : > { %28020 = vmatpush1.bf16.msra.mxu0 %v34319_v57  ;;  %v34344_v57 = vld [vmem:[#allocation50_spill] sm:$0xff] }
0x214c   : > { %28022 = vmatprep.subr.bf16.mxu0 %v34320_v44  ;;  %v34335_v44 = vld [vmem:[#allocation95_spill] sm:$0xff] }
0x214f   : > { %28024 = vmatpush1.bf16.msra.mxu0 %v34321_v6  ;;  %v34334_v6 = vld [vmem:[#allocation94_spill] sm:$0xff] }
0x2150   : > { %28026 = vmatprep.subr.bf16.mxu0 %v34322_v39  ;;  %v34333_v39 = vld [vmem:[#allocation93_spill] sm:$0xff] }
0x2153   : > { %28028 = vmatpush1.bf16.msra.mxu0 %v34323_v15  ;;  %v34332_v15 = vand.u32 4294901760, %v32730_v14 }
0x2154   : > { %28030 = vmatprep.subr.bf16.mxu0 %v34324_v13  ;;  %v34331_v13 = vld [vmem:[#allocation92_spill] sm:$0xff] }
0x2157   : > { %28032 = vmatpush1.bf16.msra.mxu0 %v34325_v30  ;;  %v34330_v30 = vld [vmem:[#allocation91_spill] sm:$0xff] }
0x2158   : > { %28034 = vmatprep.subr.bf16.mxu0 %v34326_v29  ;;  %v34329_v29 = vand.u32 4294901760, %v32733_v4 }
0x215b   : > { %28036 = vmatpush1.bf16.msra.mxu0 %v34327_v50  ;;  %v34328_v50 = vld [vmem:[#allocation39_spill] sm:$0xff] }
0x215c   : > { %28038 = vmatprep.subr.bf16.mxu0 %v33955_v2 }
0x215e   : > { %17220 = vmatmul.mubr.f32.vlgmr.msra.gmra.mrb[26].mxu0 %v32733_v4  ;;  %v34337_v4 = vld [vmem:[#allocation97_spill] sm:$0xff] }
0x215f   : > { %28040 = vmatpush1.bf16.msra.mxu0 %v33956_v23  ;;  %17225 = vmatprep.mubr.f32.mxu0 %v33957_v60 }
0x2160   : > { %28042 = vmatprep.subr.bf16.mxu0 %v33958_v26 }
0x2162   : > { %17228 = vmatmul.mubr.f32.gmra.mrb[28].mxu0 %v32730_v14  ;;  %v34341_v14 = vld [vmem:[#allocation47_spill] sm:$0xff] }
0x2163   : > { %28044 = vmatpush1.bf16.msra.mxu0 %v33959_v34  ;;  %17330 = vmatprep.mubr.f32.mxu0 %v33957_v60 }
0x2164   : > { %28046 = vmatprep.subr.bf16.mxu0 %v33960_v25 }
0x2167   : > { %28048 = vmatpush1.bf16.msra.mxu0 %v33961_v56 }
0x2168   : > { %28050 = vmatprep.subr.bf16.mxu0 %v33962_v22 }
0x216b   : > { %28052 = vmatpush1.bf16.msra.mxu0 %v33963_v37 }
0x216c   : > { %28054 = vmatprep.subr.bf16.mxu0 %v33964_v38 }
0x216f   : > { %28056 = vmatpush1.bf16.msra.mxu0 %v33965_v58 }
0x2170   : > { %28058 = vmatprep.subr.bf16.mxu0 %v33966_v24 }
0x2173   : > { %28060 = vmatpush1.bf16.msra.mxu0 %v33967_v46 }
0x2174   : > { %28062 = vmatprep.subr.bf16.mxu0 %v34225_v61 }
0x2177   : > { %28064 = vmatpush1.bf16.msra.mxu0 %v34226_v48 }
0x2178   : > { %28066 = vmatprep.subr.bf16.mxu0 %v34227_v41 }
0x217b   : > { %28068 = vmatpush1.bf16.msra.mxu0 %v34228_v9 }
0x217c   : > { %28070 = vmatprep.subr.bf16.mxu0 %v34328_v50  ;;  %v34336_v50 = vld [vmem:[#allocation96_spill] sm:$0xff] }
0x217e   : > { %17334 = vmatmul.mubr.f32.vlgmr.msra.gmra.mrb[26].mxu0 %v34329_v29  ;;  %v34338_v29 = vld [vmem:[#allocation44_spill] sm:$0xff] }
0x217f   : > { %28072 = vmatpush1.bf16.msra.mxu0 %v34330_v30  ;;  %17339 = vmatprep.mubr.f32.mxu0 %v33957_v60  ;;  %v34339_v30 = vld [vmem:[#allocation45_spill] sm:$0xff] }
0x2180   : > { %28074 = vmatprep.subr.bf16.mxu0 %v34331_v13  ;;  %v34340_v13 = vld [vmem:[#allocation46_spill] sm:$0xff] }
0x2182   : > { %17343 = vmatmul.mubr.f32.gmra.mrb[28].mxu0 %v34332_v15  ;;  %v34342_v15 = vld [vmem:[#allocation48_spill] sm:$0xff] }
0x2183   : > { %28076 = vmatpush1.bf16.msra.mxu0 %v34333_v39  ;;  %17509 = vmatprep.mubr.f32.mxu0 %v33957_v60  ;;  %v34343_v39 = vld [vmem:[#allocation49_spill] sm:$0xff] }
0x2184   : > { %28078 = vmatprep.subr.bf16.mxu0 %v34334_v6  ;;  %v34345_v6 = vld [vmem:[#allocation51_spill] sm:$0xff] }
0x2187   : > { %28080 = vmatpush1.bf16.msra.mxu0 %v34335_v44 }
0x2188   : > { %28082 = vmatprep.subr.bf16.mxu0 %v34336_v50 }
0x218b   : > { %28084 = vmatpush1.bf16.msra.mxu0 %v34337_v4 }
0x218c   : > { %28086 = vmatprep.subr.bf16.mxu0 %v34338_v29 }
0x218f   : > { %28088 = vmatpush1.bf16.msra.mxu0 %v34339_v30 }
0x2190   : > { %28090 = vmatprep.subr.bf16.mxu0 %v34340_v13 }
0x2193   : > { %28092 = vmatpush1.bf16.msra.mxu0 %v34341_v14  ;;  %v21737_v14 = vld [vmem:[%s29947_s11 + $0xd0] sm:$0xff] }
0x2194   : > { %28094 = vmatprep.subr.bf16.mxu0 %v34342_v15 }
0x2197   : > { %28096 = vmatpush1.bf16.msra.mxu0 %v34343_v39 }
0x2198   : > { %28098 = vmatprep.subr.bf16.mxu0 %v34344_v57 }
0x219b   : > { %28100 = vmatpush1.bf16.msra.mxu0 %v34345_v6  ;;  %v21735_v6 = vld [vmem:[%s29947_s11 + $0xc0] sm:$0xff] }
0x219c   : > { %28102 = vmatprep.subr.bf16.mxu0 %v33955_v2 }
0x219e   : > { %17511 = vmatmul.mubr.f32.vlgmr.msra.gmra.mrb[26].mxu0 %v32727_v3 }
0x219f   : > { %28104 = vmatpush1.bf16.msra.mxu0 %v33956_v23  ;;  %17516 = vmatprep.mubr.f32.mxu0 %v33957_v60 }
0x21a0   : > { %28106 = vmatprep.subr.bf16.mxu0 %v33958_v26 }
0x21a2   : > { %17518 = vmatmul.mubr.f32.gmra.mrb[28].mxu0 %v32725_v59 }
0x21a3   : > { %28108 = vmatpush1.bf16.msra.mxu0 %v33959_v34  ;;  %17620 = vmatprep.mubr.f32.mxu0 %v33957_v60 }
0x21a4   : > { %28110 = vmatprep.subr.bf16.mxu0 %v33960_v25 }
0x21a7   : > { %28112 = vmatpush1.bf16.msra.mxu0 %v33961_v56 }
0x21a8   : > { %28114 = vmatprep.subr.bf16.mxu0 %v33962_v22 }
0x21ab   : > { %28116 = vmatpush1.bf16.msra.mxu0 %v33963_v37 }
0x21ac   : > { %28118 = vmatprep.subr.bf16.mxu0 %v33964_v38 }
0x21af   : > { %28120 = vmatpush1.bf16.msra.mxu0 %v33965_v58 }
0x21b0   : > { %28122 = vmatprep.subr.bf16.mxu0 %v33966_v24 }
0x21b3   : > { %28124 = vmatpush1.bf16.msra.mxu0 %v33967_v46 }
0x21b4   : > { %28126 = vmatprep.subr.bf16.mxu0 %v34225_v61 }
0x21b7   : > { %28128 = vmatpush1.bf16.msra.mxu0 %v34226_v48 }
0x21b8   : > { %28130 = vmatprep.subr.bf16.mxu0 %v34227_v41 }
0x21bb   : > { %28132 = vmatpush1.bf16.msra.mxu0 %v34228_v9 }
0x21be   : > { %17622 = vmatmul.mubr.f32.vlgmr.msra.gmra.mrb[26].mxu0 %v32727_v3 }
0x21bf   : > { %17627 = vmatprep.mubr.f32.mxu0 %v33957_v60 }
0x21c2   : > { %17629 = vmatmul.mubr.f32.gmra.mrb[28].mxu0 %v32725_v59 }
0x21c3   : > { %25059 = vmatprep.mubr.f32.mxu0 %v34296_v12 }
0x2291   : > { %v17623_v57 = vpop.f32.mrb[26].mxu0 }
0x2292   : > { %v17635_v39 = vadd.f32 %v21735_v6, %v17623_v57  ;;  %v32847_v15 = vpop.f32.mrb[27].mxu0 }
0x2293   : > { %34346 = vst [vmem:[#allocation26_spill] sm:$0xff] %v32847_v15 }
0x2294   : > { %v21739_v13 = vmul.f32 -1.442695, %v17635_v39 }
0x2295   : > { %v17630_v30 = vpop.f32.mrb[28].mxu0 }
0x2296   : > { %29390 = vpow2.f32 %v21739_v13  ;;  %v17637_v29 = vadd.f32 %v21737_v14, %v17630_v30  ;;  %v32850_v4 = vpop.f32.mrb[29].mxu0 }
0x2298   : > { %v21741_v50 = vmul.f32 -1.442695, %v17637_v29 }
0x229a   : > { %29392 = vpow2.f32 %v21741_v50 }
0x22a0   : > { %v29391_v3 = vpop.eup %29390 }
0x22a1   : > { %v17651_v44 = vadd.f32 1.0, %v29391_v3 }
0x22a3   : > { %29394 = vrcp.f32 %v17651_v44 }
0x22a4   : > { %v29393_v59 = vpop.eup %29392 }
0x22a5   : > { %v17653_v40 = vadd.f32 1.0, %v29393_v59 }
0x22a7   : > { %29396 = vrcp.f32 %v17653_v40 }
0x22ad   : > { %v29395_v21 = vpop.eup %29394 }
0x22ae   : > { %v17663_v57 = vmul.f32 %v29395_v21, %v32703_v1 }
0x22b0   : > { %v17666_v6 = vand.u32 4294901760, %v17663_v57 }
0x22b1   : > { %v29397_v11 = vpop.eup %29396 }
0x22b2   : > { %v17664_v39 = vmul.f32 %v29397_v11, %v32701_v8  ;;  %v17754_v12 = vsub.f32 %v17663_v57, %v17666_v6 }
0x22b4   : > { %v17669_v13 = vand.u32 4294901760, %v17664_v39  ;;  %v17755_v30 = vand.u32 4294901760, %v17754_v12 }
0x22b6   : > { %v28133_v14 = vpack.c.bf16 %v17669_v13, %v17666_v6  ;;  %v17761_v15 = vsub.f32 %v17664_v39, %v17669_v13  ;;  %v17756_v50 = vsub.f32 %v17754_v12, %v17755_v30 }
0x22b8   : > { %28134 = vmatprep.subr.bf16.mxu1 %v28133_v14  ;;  %v17762_v29 = vand.u32 4294901760, %v17761_v15  ;;  %v28141_v3 = vpack.c.bf16 %v17761_v15, %v17754_v12  ;;  %v17757_v40 = vand.u32 4294901760, %v17756_v50 }
0x22b9   : > { %28136 = vmatpush3.bf16.msra.mxu1 %v28133_v14 }
0x22ba   : > { %v17763_v44 = vsub.f32 %v17761_v15, %v17762_v29  ;;  %v28149_v59 = vpack.c.bf16 %v17762_v29, %v17755_v30 }
0x22bc   : > { %24808 = vmatmul.mubr.f32.vlgmr.msra.gmra.mrb[38].mxu1 %v33908_v33  ;;  %v17764_v21 = vand.u32 4294901760, %v17763_v44  ;;  %v34348_v44 = vld [vmem:[#allocation54_spill] sm:$0xff] }
0x22bd   : > { %24814 = vmatprep.mubr.f32.mxu1 %v33909_v0 }
0x22be   : > { %v28137_v1 = vpack.c.bf16 %v17764_v21, %v17757_v40  ;;  %v34350_v40 = vld [vmem:[#allocation57_spill] sm:$0xff]  ;;  %v34351_v21 = vld [vmem:[#allocation58_spill] sm:$0xff] }
0x22c0   : > { %28138 = vmatprep.subr.bf16.mxu1 %v28137_v1 }
0x22c1   : > { %28140 = vmatpush3.bf16.msra.mxu1 %v28137_v1 }
0x22c2   : > { %28142 = vmatprep.subr.bf16.mxu1 %v28141_v3 }
0x22c4   : > { %24815 = vmatmul.mubr.f32.vlgmr.msra.gmra.mrb[38].mxu1 %v33910_v18 }
0x22c5   : > { %28144 = vmatpush3.bf16.msra.mxu1 %v28141_v3  ;;  %24821 = vmatprep.mubr.f32.mxu1 %v33911_v52  ;;  %v34347_v3 = vld [vmem:[#allocation53_spill] sm:$0xff] }
0x22c6   : > { %28146 = vmatprep.subr.bf16.mxu1 %v28133_v14 }
0x22cc   : > { %24822 = vmatmul.mubr.f32.vlgmr.msra.gmra.mrb[38].mxu1 %v33912_v62 }
0x22cd   : > { %28148 = vmatpush3.bf16.msra.mxu1 %v28133_v14  ;;  %24828 = vmatprep.mubr.f32.mxu1 %v33913_v27 }
0x22ce   : > { %28150 = vmatprep.subr.bf16.mxu1 %v28149_v59 }
0x22d4   : > { %24829 = vmatmul.mubr.f32.vlgmr.msra.gmra.mrb[38].mxu1 %v33914_v31 }
0x22d5   : > { %28152 = vmatpush3.bf16.msra.mxu1 %v28149_v59  ;;  %24835 = vmatprep.mubr.f32.mxu1 %v33909_v0  ;;  %v34349_v59 = vld [vmem:[#allocation55_spill] sm:$0xff] }
0x22d6   : > { %28154 = vmatprep.subr.bf16.mxu1 %v28133_v14 }
0x22dc   : > { %24836 = vmatmul.mubr.f32.vlgmr.msra.gmra.mrb[38].mxu1 %v33910_v18 }
0x22dd   : > { %28156 = vmatpush3.bf16.msra.mxu1 %v28133_v14  ;;  %24842 = vmatprep.mubr.f32.mxu1 %v33909_v0 }
0x22de   : > { %28158 = vmatprep.subr.bf16.mxu1 %v30757_v55 }
0x22e4   : > { %24843 = vmatmul.mubr.f32.vlgmr.msra.gmra.mrb[38].mxu1 %v33910_v18 }
0x22e5   : > { %28160 = vmatpush3.bf16.msra.mxu1 %v30757_v55 }
0x22e6   : > { %28162 = vmatprep.subr.bf16.mxu1 %v30776_v28 }
0x22e9   : > { %28164 = vmatpush3.bf16.msra.mxu1 %v30776_v28 }
0x22ea   : > { %28166 = vmatprep.subr.bf16.mxu1 %v30791_v20 }
0x22ed   : > { %28168 = vmatpush3.bf16.msra.mxu1 %v30791_v20 }
0x22ee   : > { %28170 = vmatprep.subr.bf16.mxu1 %v30805_v49 }
0x22f1   : > { %28172 = vmatpush3.bf16.msra.mxu1 %v30805_v49 }
0x22f2   : > { %28174 = vmatprep.subr.bf16.mxu1 %v30815_v5 }
0x22f5   : > { %28176 = vmatpush3.bf16.msra.mxu1 %v30815_v5 }
0x22f6   : > { %28178 = vmatprep.subr.bf16.mxu1 %v30820_v7 }
0x22f9   : > { %28180 = vmatpush3.bf16.msra.mxu1 %v30820_v7 }
0x22fa   : > { %28182 = vmatprep.subr.bf16.mxu1 %v30824_v16 }
0x22fd   : > { %28184 = vmatpush3.bf16.msra.mxu1 %v30824_v16 }
0x22fe   : > { %28186 = vmatprep.subr.bf16.mxu1 %v30834_v63 }
0x2301   : > { %28188 = vmatpush3.bf16.msra.mxu1 %v30834_v63 }
0x2302   : > { %28190 = vmatprep.subr.bf16.mxu1 %v30844_v47 }
0x23b7   : > { %v24844_v1 = vpop.f32.mrb[38].mxu1 }
0x23b8   : > { %v32882_v12 = vand.u32 4294901760, %v24844_v1  ;;  %v18157_v11 = vpop.f32.mrb[39].mxu1 }
0x23b9   : > { %v32884_v15 = vand.u32 4294901760, %v18157_v11 }
0x23ba   : > { %v32887_v57 = vsub.f32 %v24844_v1, %v32882_v12  ;;  %v34352_v1 = vld [vmem:[#allocation60_spill] sm:$0xff] }
0x23bb   : > { %v18252_v6 = vsub.f32 %v18157_v11, %v32884_v15  ;;  %v34353_v11 = vld [vmem:[#allocation62_spill] sm:$0xff] }
0x23bc   : > { %v18263_v39 = vand.u32 4294901760, %v32887_v57 }
0x23bd   : > { %v18253_v13 = vand.u32 4294901760, %v18252_v6 }
0x23be   : > { %v18264_v30 = vsub.f32 %v32887_v57, %v18263_v39 }
0x23bf   : > { %v18254_v14 = vsub.f32 %v18252_v6, %v18253_v13 }
0x23c0   : > { %v18265_v29 = vand.u32 4294901760, %v18264_v30  ;;  %v21736_v30 = vld [vmem:[%s29947_s11 + $0xc8] sm:$0xff] }
0x23c1   : > { %v18255_v50 = vand.u32 4294901760, %v18254_v14 }
0x23c3   : > { %24877 = vmatprep.mubr.f32.mxu1 %v18255_v50  ;;  %v34359_v50 = vld [vmem:[#allocation26_spill] sm:$0xff] }
0x23c4   : > { %24878 = vmatmul.mubr.f32.vlgmr.msra.gmra.mrb[40].mxu1 %v18265_v29  ;;  %v17636_v29 = vadd.f32 %v21736_v30, %v34359_v50 }
0x23c5   : > { %28192 = vmatpush3.bf16.msra.mxu1 %v30844_v47  ;;  %24912 = vmatprep.mubr.f32.mxu1 %v32884_v15 }
0x23c6   : > { %28194 = vmatprep.subr.bf16.mxu1 %v30981_v42 }
0x23c9   : > { %28196 = vmatpush3.bf16.msra.mxu1 %v30981_v42 }
0x23ca   : > { %28198 = vmatprep.subr.bf16.mxu1 %v30993_v45 }
0x23cd   : > { %28200 = vmatpush3.bf16.msra.mxu1 %v30993_v45 }
0x23ce   : > { %28202 = vmatprep.subr.bf16.mxu1 %v31004_v35 }
0x23d1   : > { %28204 = vmatpush3.bf16.msra.mxu1 %v31004_v35 }
0x23d2   : > { %28206 = vmatprep.subr.bf16.mxu1 %v31008_v19 }
0x23d5   : > { %28208 = vmatpush3.bf16.msra.mxu1 %v31008_v19 }
0x23d6   : > { %28210 = vmatprep.subr.bf16.mxu1 %v30865_v36 }
0x23d9   : > { %28212 = vmatpush3.bf16.msra.mxu1 %v30865_v36 }
0x23da   : > { %28214 = vmatprep.subr.bf16.mxu1 %v30879_v54 }
0x23dd   : > { %28216 = vmatpush3.bf16.msra.mxu1 %v30879_v54 }
0x23de   : > { %28218 = vmatprep.subr.bf16.mxu1 %v30887_v53 }
0x23e1   : > { %28220 = vmatpush3.bf16.msra.mxu1 %v30887_v53 }
0x23e2   : > { %28222 = vmatprep.subr.bf16.mxu1 %v30891_v43 }
0x23e4   : > { %24913 = vmatmul.mubr.f32.vlgmr.msra.gmra.mrb[40].mxu1 %v32882_v12 }
0x23e5   : > { %28224 = vmatpush3.bf16.msra.mxu1 %v30891_v43  ;;  %24947 = vmatprep.mubr.f32.mxu1 %v18252_v6  ;;  %v34355_v6 = vld [vmem:[#allocation25_spill] sm:$0xff] }
0x23e6   : > { %28226 = vmatprep.subr.bf16.mxu1 %v31022_v32 }
0x23e9   : > { %28228 = vmatpush3.bf16.msra.mxu1 %v31022_v32 }
0x23ea   : > { %28230 = vmatprep.subr.bf16.mxu1 %v31030_v17 }
0x23ed   : > { %28232 = vmatpush3.bf16.msra.mxu1 %v31030_v17 }
0x23ee   : > { %28234 = vmatprep.subr.bf16.mxu1 %v31036_v10 }
0x23f1   : > { %28236 = vmatpush3.bf16.msra.mxu1 %v31036_v10 }
0x23f2   : > { %28238 = vmatprep.subr.bf16.mxu1 %v31042_v51 }
0x23f5   : > { %28240 = vmatpush3.bf16.msra.mxu1 %v31042_v51 }
0x23f6   : > { %28242 = vmatprep.subr.bf16.mxu1 %v34347_v3 }
0x23f9   : > { %28244 = vmatpush3.bf16.msra.mxu1 %v34347_v3 }
0x23fa   : > { %28246 = vmatprep.subr.bf16.mxu1 %v34348_v44 }
0x23fd   : > { %28248 = vmatpush3.bf16.msra.mxu1 %v34348_v44 }
0x23fe   : > { %28250 = vmatprep.subr.bf16.mxu1 %v34349_v59 }
0x2401   : > { %28252 = vmatpush3.bf16.msra.mxu1 %v34349_v59 }
0x2402   : > { %28254 = vmatprep.subr.bf16.mxu1 %v30757_v55 }
0x2404   : > { %24948 = vmatmul.mubr.f32.vlgmr.msra.gmra.mrb[40].mxu1 %v32887_v57  ;;  %v34354_v57 = vld [vmem:[#allocation63_spill] sm:$0xff] }
0x2405   : > { %28256 = vmatpush3.bf16.msra.mxu1 %v30757_v55  ;;  %24982 = vmatprep.mubr.f32.mxu1 %v18253_v13  ;;  %v34357_v13 = vld [vmem:[#allocation19_spill] sm:$0xff] }
0x2406   : > { %28258 = vmatprep.subr.bf16.mxu1 %v30776_v28 }
0x2409   : > { %28260 = vmatpush3.bf16.msra.mxu1 %v30776_v28 }
0x240a   : > { %28262 = vmatprep.subr.bf16.mxu1 %v30791_v20 }
0x240d   : > { %28264 = vmatpush3.bf16.msra.mxu1 %v30791_v20 }
0x240e   : > { %28266 = vmatprep.subr.bf16.mxu1 %v30805_v49 }
0x2411   : > { %28268 = vmatpush3.bf16.msra.mxu1 %v30805_v49 }
0x2412   : > { %28270 = vmatprep.subr.bf16.mxu1 %v30815_v5 }
0x2415   : > { %28272 = vmatpush3.bf16.msra.mxu1 %v30815_v5 }
0x2416   : > { %28274 = vmatprep.subr.bf16.mxu1 %v30820_v7 }
0x2419   : > { %28276 = vmatpush3.bf16.msra.mxu1 %v30820_v7 }
0x241a   : > { %28278 = vmatprep.subr.bf16.mxu1 %v30824_v16 }
0x241d   : > { %28280 = vmatpush3.bf16.msra.mxu1 %v30824_v16 }
0x241e   : > { %28282 = vmatprep.subr.bf16.mxu1 %v30834_v63 }
0x2421   : > { %28284 = vmatpush3.bf16.msra.mxu1 %v30834_v63 }
0x2422   : > { %28286 = vmatprep.subr.bf16.mxu1 %v34350_v40 }
0x2424   : > { %24983 = vmatmul.mubr.f32.vlgmr.msra.gmra.mrb[40].mxu1 %v18263_v39  ;;  %v34356_v39 = vld [vmem:[#allocation18_spill] sm:$0xff] }
0x2425   : > { %28288 = vmatpush3.bf16.msra.mxu1 %v34350_v40  ;;  %25017 = vmatprep.mubr.f32.mxu1 %v32884_v15  ;;  %v21743_v40 = vld [vmem:[%s29957_s23 + $0x60] sm:$0xff] }
0x2426   : > { %28290 = vmatprep.subr.bf16.mxu1 %v34351_v21 }
0x2429   : > { %28292 = vmatpush3.bf16.msra.mxu1 %v34351_v21  ;;  %v21744_v21 = vld [vmem:[%s29957_s23 + $0x68] sm:$0xff] }
0x242a   : > { %28294 = vmatprep.subr.bf16.mxu1 %v34352_v1 }
0x242d   : > { %28296 = vmatpush3.bf16.msra.mxu1 %v34352_v1 }
0x242e   : > { %28298 = vmatprep.subr.bf16.mxu1 %v34353_v11 }
0x2431   : > { %28300 = vmatpush3.bf16.msra.mxu1 %v34353_v11 }
0x2432   : > { %28302 = vmatprep.subr.bf16.mxu1 %v34354_v57 }
0x2435   : > { %28304 = vmatpush3.bf16.msra.mxu1 %v34354_v57 }
0x2436   : > { %28306 = vmatprep.subr.bf16.mxu1 %v34355_v6 }
0x2439   : > { %28308 = vmatpush3.bf16.msra.mxu1 %v34355_v6 }
0x243a   : > { %28310 = vmatprep.subr.bf16.mxu1 %v34356_v39 }
0x243d   : > { %28312 = vmatpush3.bf16.msra.mxu1 %v34356_v39  ;;  %v21740_v39 = vmul.f32 -1.442695, %v17636_v29 }
0x243e   : > { %28314 = vmatprep.subr.bf16.mxu1 %v34357_v13 }
0x2441   : > { %28316 = vmatpush3.bf16.msra.mxu1 %v34357_v13 }
0x2442   : > { %28318 = vmatprep.subr.bf16.mxu1 %v30757_v55 }
0x2444   : > { %25018 = vmatmul.mubr.f32.vlgmr.msra.gmra.mrb[40].mxu1 %v32882_v12 }
0x2445   : > { %28320 = vmatpush3.bf16.msra.mxu1 %v30757_v55  ;;  %25052 = vmatprep.mubr.f32.mxu1 %v32884_v15  ;;  %v21738_v15 = vld [vmem:[%s29947_s11 + $0xd8] sm:$0xff] }
0x2446   : > { %28322 = vmatprep.subr.bf16.mxu1 %v30776_v28  ;;  %v17638_v14 = vadd.f32 %v21738_v15, %v32850_v4 }
0x2448   : > { %v21742_v13 = vmul.f32 -1.442695, %v17638_v14 }
0x2449   : > { %28324 = vmatpush3.bf16.msra.mxu1 %v30776_v28 }
0x244a   : > { %28326 = vmatprep.subr.bf16.mxu1 %v30791_v20  ;;  %29398 = vpow2.f32 %v21742_v13 }
0x244b   : > { %29400 = vpow2.f32 %v21740_v39 }
0x244d   : > { %28328 = vmatpush3.bf16.msra.mxu1 %v30791_v20 }
0x244e   : > { %28330 = vmatprep.subr.bf16.mxu1 %v30805_v49 }
0x2451   : > { %28332 = vmatpush3.bf16.msra.mxu1 %v30805_v49 }
0x2452   : > { %28334 = vmatprep.subr.bf16.mxu1 %v30815_v5 }
0x2454   : > { %v29399_v6 = vpop.eup %29398 }
0x2455   : > { %28336 = vmatpush3.bf16.msra.mxu1 %v30815_v5  ;;  %v29401_v57 = vpop.eup %29400  ;;  %v17654_v11 = vadd.f32 1.0, %v29399_v6 }
0x2456   : > { %28338 = vmatprep.subr.bf16.mxu1 %v30820_v7  ;;  %v17652_v1 = vadd.f32 1.0, %v29401_v57 }
0x2457   : > { %29402 = vrcp.f32 %v17654_v11  ;;  %v34360_v11 = vld [vmem:[#allocation23_spill] sm:$0xff] }
0x2458   : > { %29404 = vrcp.f32 %v17652_v1 }
0x2459   : > { %28340 = vmatpush3.bf16.msra.mxu1 %v30820_v7 }
0x245a   : > { %28342 = vmatprep.subr.bf16.mxu1 %v30824_v16 }
0x245d   : > { %28344 = vmatpush3.bf16.msra.mxu1 %v30824_v16 }
0x245e   : > { %28346 = vmatprep.subr.bf16.mxu1 %v30834_v63 }
0x2461   : > { %28348 = vmatpush3.bf16.msra.mxu1 %v30834_v63  ;;  %v29403_v4 = vpop.eup %29402 }
0x2462   : > { %28374 = vmatprep.subr.bf16.mxu1 %v33955_v2  ;;  %v29405_v15 = vpop.eup %29404  ;;  %v18861_v13 = vsub.f32 1.0, %v29403_v4  ;;  %v18859_v57 = vmul.f32 %v29403_v4, %v32701_v8 }
0x2463   : > { %v18860_v30 = vsub.f32 1.0, %v29405_v15  ;;  %v18858_v50 = vmul.f32 %v29405_v15, %v34360_v11  ;;  %v34361_v11 = vld [vmem:[#allocation24_spill] sm:$0xff] }
0x2464   : > { %25053 = vmatmul.mubr.f32.vlgmr.msra.gmra.mrb[40].mxu1 %v32882_v12  ;;  %v34358_v12 = vld [vmem:[#allocation43_spill] sm:$0xff] }
0x2465   : > { %28376 = vmatpush1.bf16.msra.mxu1 %v33956_v23  ;;  %19472 = vmatprep.mubr.f32.mxu1 %v33957_v60 }
0x2466   : > { %28378 = vmatprep.subr.bf16.mxu1 %v33958_v26 }
0x2469   : > { %28380 = vmatpush1.bf16.msra.mxu1 %v33959_v34 }
0x246a   : > { %28382 = vmatprep.subr.bf16.mxu1 %v33960_v25 }
0x246d   : > { %28384 = vmatpush1.bf16.msra.mxu1 %v33961_v56 }
0x246e   : > { %28386 = vmatprep.subr.bf16.mxu1 %v33962_v22 }
0x2471   : > { %28388 = vmatpush1.bf16.msra.mxu1 %v33963_v37 }
0x2472   : > { %28390 = vmatprep.subr.bf16.mxu1 %v33964_v38 }
0x2475   : > { %28392 = vmatpush1.bf16.msra.mxu1 %v33965_v58 }
0x2476   : > { %28394 = vmatprep.subr.bf16.mxu1 %v33966_v24 }
0x2479   : > { %28396 = vmatpush1.bf16.msra.mxu1 %v33967_v46 }
0x247a   : > { %28398 = vmatprep.subr.bf16.mxu1 %v34225_v61 }
0x247d   : > { %28400 = vmatpush1.bf16.msra.mxu1 %v34226_v48 }
0x247e   : > { %28402 = vmatprep.subr.bf16.mxu1 %v34227_v41 }
0x2481   : > { %28404 = vmatpush1.bf16.msra.mxu1 %v34228_v9 }
0x2482   : > { %28406 = vmatprep.subr.bf16.mxu1 %v34358_v12 }
0x2537   : > { %v25054_v59 = vpop.f32.mrb[40].mxu1 }
0x2538   : > { %v18855_v12 = vadd.f32 %v25054_v59, %v21744_v21  ;;  %v18844_v44 = vpop.f32.mrb[41].mxu1 }
0x2539   : > { %v18854_v3 = vadd.f32 %v21743_v40, %v18844_v44 }
0x253a   : > { %29406 = vtanh.f32 %v18855_v12 }
0x253b   : > { %29408 = vtanh.f32 %v18854_v3 }
0x2544   : > { %v29407_v39 = vpop.eup %29406 }
0x2545   : > { %v29409_v14 = vpop.eup %29408  ;;  %v18863_v6 = vmul.f32 %v29407_v39, %v18861_v13 }
0x2546   : > { %v18862_v1 = vmul.f32 %v29409_v14, %v18860_v30 }
0x2547   : > { %v33004_v29 = vadd.f32 %v18863_v6, %v18859_v57 }
0x2548   : > { %v33006_v59 = vadd.f32 %v18862_v1, %v18858_v50 }
0x2549   : > { %21746 = vst [vmem:[%s31171_s24 + $0x68] sm:$0xff] %v33004_v29  ;;  %v18873_v3 = vand.u32 4294901760, %v33004_v29 }
0x254a   : > { %21745 = vst [vmem:[%s31171_s24 + $0x60] sm:$0xff] %v33006_v59  ;;  %v18870_v44 = vand.u32 4294901760, %v33006_v59 }
0x254b   : > { %v18965_v40 = vsub.f32 %v33004_v29, %v18873_v3 }
0x254c   : > { %v28349_v21 = vpack.c.bf16 %v18873_v3, %v18870_v44  ;;  %v18958_v8 = vsub.f32 %v33006_v59, %v18870_v44 }
0x254d   : > { %v18966_v12 = vand.u32 4294901760, %v18965_v40 }
0x254e   : > { %28350 = vmatprep.subr.bf16.mxu0 %v28349_v21  ;;  %v18959_v4 = vand.u32 4294901760, %v18958_v8  ;;  %v28357_v57 = vpack.c.bf16 %v18965_v40, %v18958_v8 }
0x254f   : > { %28352 = vmatpush3.bf16.msra.mxu0 %v28349_v21  ;;  %v18967_v15 = vsub.f32 %v18965_v40, %v18966_v12 }
0x2550   : > { %v18960_v13 = vsub.f32 %v18958_v8, %v18959_v4  ;;  %v28365_v6 = vpack.c.bf16 %v18966_v12, %v18959_v4 }
0x2551   : > { %v18968_v39 = vand.u32 4294901760, %v18967_v15 }
0x2552   : > { %25060 = vmatmul.mubr.f32.vlgmr.msra.gmra.mrb[30].mxu0 %v33908_v33  ;;  %v18961_v30 = vand.u32 4294901760, %v18960_v13 }
0x2553   : > { %25066 = vmatprep.mubr.f32.mxu0 %v33909_v0 }
0x2554   : > { %v28353_v14 = vpack.c.bf16 %v18968_v39, %v18961_v30  ;;  %v34362_v39 = vld [vmem:[#allocation77_spill] sm:$0xff]  ;;  %v34363_v30 = vld [vmem:[#allocation78_spill] sm:$0xff] }
0x2556   : > { %28354 = vmatprep.subr.bf16.mxu0 %v28353_v14 }
0x2557   : > { %28356 = vmatpush3.bf16.msra.mxu0 %v28353_v14 }
0x2558   : > { %28358 = vmatprep.subr.bf16.mxu0 %v28357_v57 }
0x255a   : > { %25067 = vmatmul.mubr.f32.vlgmr.msra.gmra.mrb[30].mxu0 %v33910_v18 }
0x255b   : > { %28360 = vmatpush3.bf16.msra.mxu0 %v28357_v57  ;;  %25073 = vmatprep.mubr.f32.mxu0 %v33911_v52  ;;  %v34364_v57 = vld [vmem:[#allocation79_spill] sm:$0xff] }
0x255c   : > { %28362 = vmatprep.subr.bf16.mxu0 %v28349_v21 }
0x2562   : > { %25074 = vmatmul.mubr.f32.vlgmr.msra.gmra.mrb[30].mxu0 %v33912_v62 }
0x2563   : > { %28364 = vmatpush3.bf16.msra.mxu0 %v28349_v21  ;;  %25080 = vmatprep.mubr.f32.mxu0 %v33913_v27 }
0x2564   : > { %28366 = vmatprep.subr.bf16.mxu0 %v28365_v6 }
0x256a   : > { %25081 = vmatmul.mubr.f32.vlgmr.msra.gmra.mrb[30].mxu0 %v33914_v31 }
0x256b   : > { %28368 = vmatpush3.bf16.msra.mxu0 %v28365_v6  ;;  %25087 = vmatprep.mubr.f32.mxu0 %v33909_v0  ;;  %v34365_v6 = vld [vmem:[#allocation80_spill] sm:$0xff] }
0x256c   : > { %28370 = vmatprep.subr.bf16.mxu0 %v28349_v21 }
0x2572   : > { %25088 = vmatmul.mubr.f32.vlgmr.msra.gmra.mrb[30].mxu0 %v33910_v18 }
0x2573   : > { %28372 = vmatpush3.bf16.msra.mxu0 %v28349_v21  ;;  %25094 = vmatprep.mubr.f32.mxu0 %v33909_v0 }
0x257a   : > { %25095 = vmatmul.mubr.f32.vlgmr.msra.gmra.mrb[30].mxu0 %v33910_v18 }
0x257b   : > { %25101 = vmatprep.mubr.f32.mxu0 %v34361_v11  ;;  %v34366_v11 = vld [vmem:[#allocation81_spill] sm:$0xff] }
0x264d   : > { %v25096_v50 = vpop.f32.mrb[30].mxu0 }
0x264e   : > { %v33028_v1 = vand.u32 4294901760, %v25096_v50  ;;  %v19361_v3 = vpop.f32.mrb[31].mxu0 }
0x264f   : > { %v33030_v44 = vand.u32 4294901760, %v19361_v3 }
0x2650   : > { %v33033_v40 = vsub.f32 %v25096_v50, %v33028_v1  ;;  %v34367_v50 = vld [vmem:[#allocation82_spill] sm:$0xff] }
0x2651   : > { %v33036_v8 = vsub.f32 %v19361_v3, %v33030_v44  ;;  %v34368_v3 = vld [vmem:[#allocation83_spill] sm:$0xff] }
0x2652   : > { %v19486_v21 = vand.u32 4294901760, %v33033_v40 }
0x2653   : > { %v19475_v12 = vand.u32 4294901760, %v33036_v8 }
0x2654   : > { %v19487_v13 = vsub.f32 %v33033_v40, %v19486_v21 }
0x2655   : > { %v19476_v4 = vsub.f32 %v33036_v8, %v19475_v12 }
0x2656   : > { %v19488_v14 = vand.u32 4294901760, %v19487_v13  ;;  %v34372_v13 = vld [vmem:[#allocation61_spill] sm:$0xff] }
0x2657   : > { %v19477_v15 = vand.u32 4294901760, %v19476_v4  ;;  %v34369_v4 = vld [vmem:[#allocation52_spill] sm:$0xff] }
0x2659   : > { %19478 = vmatmul.mubr.f32.vlgmr.msra.gmra.mrb[42].mxu1 %v19477_v15  ;;  %v34370_v15 = vld [vmem:[#allocation56_spill] sm:$0xff] }
0x265a   : > { %28408 = vmatpush1.bf16.msra.mxu1 %v34362_v39  ;;  %19483 = vmatprep.mubr.f32.mxu1 %v33957_v60  ;;  %v34371_v39 = vld [vmem:[#allocation59_spill] sm:$0xff] }
0x265b   : > { %28410 = vmatprep.subr.bf16.mxu1 %v34363_v30  ;;  %v34373_v30 = vld [vmem:[#allocation64_spill] sm:$0xff] }
0x265d   : > { %19489 = vmatmul.mubr.f32.gmra.mrb[44].mxu1 %v19488_v14  ;;  %v34374_v14 = vld [vmem:[#allocation65_spill] sm:$0xff] }
0x265e   : > { %28412 = vmatpush1.bf16.msra.mxu1 %v34364_v57  ;;  %19719 = vmatprep.mubr.f32.mxu1 %v33957_v60  ;;  %v34375_v57 = vld [vmem:[#allocation66_spill] sm:$0xff] }
0x265f   : > { %28414 = vmatprep.subr.bf16.mxu1 %v34365_v6  ;;  %v34376_v6 = vld [vmem:[#allocation68_spill] sm:$0xff] }
0x2662   : > { %28416 = vmatpush1.bf16.msra.mxu1 %v34366_v11  ;;  %v34377_v11 = vld [vmem:[#allocation67_spill] sm:$0xff] }
0x2663   : > { %28418 = vmatprep.subr.bf16.mxu1 %v34367_v50  ;;  %v34378_v50 = vld [vmem:[#allocation84_spill] sm:$0xff] }
0x2666   : > { %28420 = vmatpush1.bf16.msra.mxu1 %v34368_v3  ;;  %v34379_v3 = vld [vmem:[#allocation85_spill] sm:$0xff] }
0x2667   : > { %28422 = vmatprep.subr.bf16.mxu1 %v34369_v4  ;;  %v34380_v4 = vld [vmem:[#allocation86_spill] sm:$0xff] }
0x266a   : > { %28424 = vmatpush1.bf16.msra.mxu1 %v34370_v15  ;;  %v34381_v15 = vld [vmem:[#allocation87_spill] sm:$0xff] }
0x266b   : > { %28426 = vmatprep.subr.bf16.mxu1 %v34371_v39  ;;  %v34382_v39 = vld [vmem:[#allocation88_spill] sm:$0xff] }
0x266e   : > { %28428 = vmatpush1.bf16.msra.mxu1 %v34372_v13  ;;  %v34383_v13 = vld [vmem:[#allocation89_spill] sm:$0xff] }
0x266f   : > { %28430 = vmatprep.subr.bf16.mxu1 %v34373_v30  ;;  %v34384_v30 = vld [vmem:[#allocation90_spill] sm:$0xff] }
0x2672   : > { %28432 = vmatpush1.bf16.msra.mxu1 %v34374_v14  ;;  %v34385_v14 = vld [vmem:[#allocation69_spill] sm:$0xff] }
0x2673   : > { %28434 = vmatprep.subr.bf16.mxu1 %v34375_v57  ;;  %v34386_v57 = vld [vmem:[#allocation70_spill] sm:$0xff] }
0x2676   : > { %28436 = vmatpush1.bf16.msra.mxu1 %v34376_v6  ;;  %v34387_v6 = vld [vmem:[#allocation71_spill] sm:$0xff] }
0x2677   : > { %28438 = vmatprep.subr.bf16.mxu1 %v34377_v11  ;;  %v34388_v11 = vld [vmem:[#allocation72_spill] sm:$0xff] }
0x2679   : > { %19721 = vmatmul.mubr.f32.vlgmr.msra.gmra.mrb[42].mxu1 %v33030_v44 }
0x267a   : > { %28440 = vmatpush1.bf16.msra.mxu1 %v34378_v50  ;;  %19726 = vmatprep.mubr.f32.mxu1 %v33957_v60  ;;  %v34389_v50 = vld [vmem:[#allocation73_spill] sm:$0xff] }
0x267b   : > { %28442 = vmatprep.subr.bf16.mxu1 %v34379_v3  ;;  %v34390_v3 = vld [vmem:[#allocation74_spill] sm:$0xff] }
0x267d   : > { %19728 = vmatmul.mubr.f32.gmra.mrb[44].mxu1 %v33028_v1 }
0x267e   : > { %28444 = vmatpush1.bf16.msra.mxu1 %v34380_v4  ;;  %19862 = vmatprep.mubr.f32.mxu1 %v33957_v60  ;;  %v34391_v4 = vld [vmem:[#allocation75_spill] sm:$0xff] }
0x267f   : > { %28446 = vmatprep.subr.bf16.mxu1 %v34381_v15  ;;  %v34392_v15 = vld [vmem:[#allocation76_spill] sm:$0xff] }
0x2682   : > { %28448 = vmatpush1.bf16.msra.mxu1 %v34382_v39  ;;  %v34393_v39 = vld [vmem:[#allocation39_spill] sm:$0xff] }
0x2683   : > { %28450 = vmatprep.subr.bf16.mxu1 %v34383_v13  ;;  %v34394_v13 = vld [vmem:[#allocation91_spill] sm:$0xff] }
0x2686   : > { %28452 = vmatpush1.bf16.msra.mxu1 %v34384_v30  ;;  %v34395_v30 = vld [vmem:[#allocation92_spill] sm:$0xff] }
0x2687   : > { %28454 = vmatprep.subr.bf16.mxu1 %v34385_v14  ;;  %v34396_v14 = vld [vmem:[#allocation93_spill] sm:$0xff] }
0x268a   : > { %28456 = vmatpush1.bf16.msra.mxu1 %v34386_v57  ;;  %v34397_v57 = vld [vmem:[#allocation94_spill] sm:$0xff] }
0x268b   : > { %28458 = vmatprep.subr.bf16.mxu1 %v34387_v6  ;;  %v34398_v6 = vld [vmem:[#allocation95_spill] sm:$0xff] }
0x268e   : > { %28460 = vmatpush1.bf16.msra.mxu1 %v34388_v11  ;;  %v34399_v11 = vld [vmem:[#allocation96_spill] sm:$0xff] }
0x268f   : > { %28462 = vmatprep.subr.bf16.mxu1 %v34389_v50  ;;  %v34402_v50 = vld [vmem:[#allocation45_spill] sm:$0xff] }
0x2692   : > { %28464 = vmatpush1.bf16.msra.mxu1 %v34390_v3  ;;  %v34403_v3 = vld [vmem:[#allocation46_spill] sm:$0xff] }
0x2693   : > { %28466 = vmatprep.subr.bf16.mxu1 %v34391_v4  ;;  %v34406_v4 = vld [vmem:[#allocation49_spill] sm:$0xff] }
0x2696   : > { %28468 = vmatpush1.bf16.msra.mxu1 %v34392_v15  ;;  %v34407_v15 = vld [vmem:[#allocation50_spill] sm:$0xff] }
0x2697   : > { %28470 = vmatprep.subr.bf16.mxu1 %v33955_v2 }
0x2699   : > { %19865 = vmatmul.mubr.f32.vlgmr.msra.gmra.mrb[42].mxu1 %v33036_v8  ;;  %v34400_v8 = vld [vmem:[#allocation97_spill] sm:$0xff] }
0x269a   : > { %28472 = vmatpush1.bf16.msra.mxu1 %v33956_v23  ;;  %19870 = vmatprep.mubr.f32.mxu1 %v33957_v60 }
0x269b   : > { %28474 = vmatprep.subr.bf16.mxu1 %v33958_v26 }
0x269d   : > { %19873 = vmatmul.mubr.f32.gmra.mrb[44].mxu1 %v33033_v40  ;;  %v34404_v40 = vld [vmem:[#allocation47_spill] sm:$0xff] }
0x269e   : > { %28476 = vmatpush1.bf16.msra.mxu1 %v33959_v34  ;;  %19975 = vmatprep.mubr.f32.mxu1 %v33957_v60 }
0x269f   : > { %28478 = vmatprep.subr.bf16.mxu1 %v33960_v25 }
0x26a2   : > { %28480 = vmatpush1.bf16.msra.mxu1 %v33961_v56 }
0x26a3   : > { %28482 = vmatprep.subr.bf16.mxu1 %v33962_v22 }
0x26a6   : > { %28484 = vmatpush1.bf16.msra.mxu1 %v33963_v37 }
0x26a7   : > { %28486 = vmatprep.subr.bf16.mxu1 %v33964_v38 }
0x26aa   : > { %28488 = vmatpush1.bf16.msra.mxu1 %v33965_v58 }
0x26ab   : > { %28490 = vmatprep.subr.bf16.mxu1 %v33966_v24 }
0x26ae   : > { %28492 = vmatpush1.bf16.msra.mxu1 %v33967_v46 }
0x26af   : > { %28494 = vmatprep.subr.bf16.mxu1 %v34225_v61 }
0x26b2   : > { %28496 = vmatpush1.bf16.msra.mxu1 %v34226_v48 }
0x26b3   : > { %28498 = vmatprep.subr.bf16.mxu1 %v34227_v41 }
0x26b6   : > { %28500 = vmatpush1.bf16.msra.mxu1 %v34228_v9 }
0x26b7   : > { %28502 = vmatprep.subr.bf16.mxu1 %v34393_v39  ;;  %v34408_v39 = vld [vmem:[#allocation51_spill] sm:$0xff] }
0x26b9   : > { %19979 = vmatmul.mubr.f32.vlgmr.msra.gmra.mrb[42].mxu1 %v19475_v12  ;;  %v34401_v12 = vld [vmem:[#allocation44_spill] sm:$0xff] }
0x26ba   : > { %28504 = vmatpush1.bf16.msra.mxu1 %v34394_v13  ;;  %19984 = vmatprep.mubr.f32.mxu1 %v33957_v60 }
0x26bb   : > { %28506 = vmatprep.subr.bf16.mxu1 %v34395_v30 }
0x26bd   : > { %19988 = vmatmul.mubr.f32.gmra.mrb[44].mxu1 %v19486_v21  ;;  %v34405_v21 = vld [vmem:[#allocation48_spill] sm:$0xff] }
0x26be   : > { %28508 = vmatpush1.bf16.msra.mxu1 %v34396_v14  ;;  %20154 = vmatprep.mubr.f32.mxu1 %v33957_v60 }
0x26bf   : > { %28510 = vmatprep.subr.bf16.mxu1 %v34397_v57 }
0x26c2   : > { %28512 = vmatpush1.bf16.msra.mxu1 %v34398_v6 }
0x26c3   : > { %28514 = vmatprep.subr.bf16.mxu1 %v34399_v11 }
0x26c6   : > { %28516 = vmatpush1.bf16.msra.mxu1 %v34400_v8 }
0x26c7   : > { %28518 = vmatprep.subr.bf16.mxu1 %v34401_v12 }
0x26ca   : > { %28520 = vmatpush1.bf16.msra.mxu1 %v34402_v50 }
0x26cb   : > { %28522 = vmatprep.subr.bf16.mxu1 %v34403_v3 }
0x26ce   : > { %28524 = vmatpush1.bf16.msra.mxu1 %v34404_v40 }
0x26cf   : > { %28526 = vmatprep.subr.bf16.mxu1 %v34405_v21 }
0x26d2   : > { %28528 = vmatpush1.bf16.msra.mxu1 %v34406_v4 }
0x26d3   : > { %28530 = vmatprep.subr.bf16.mxu1 %v34407_v15 }
0x26d6   : > { %28532 = vmatpush1.bf16.msra.mxu1 %v34408_v39 }
0x26d7   : > { %28534 = vmatprep.subr.bf16.mxu1 %v33955_v2  ;;  %v21747_v2 = vld [vmem:[%s29947_s11 + $0xe0] sm:$0xff] }
0x26d9   : > { %20156 = vmatmul.mubr.f32.vlgmr.msra.gmra.mrb[42].mxu1 %v33030_v44 }
0x26da   : > { %28536 = vmatpush1.bf16.msra.mxu1 %v33956_v23  ;;  %20161 = vmatprep.mubr.f32.mxu1 %v33957_v60 }
0x26db   : > { %28538 = vmatprep.subr.bf16.mxu1 %v33958_v26 }
0x26dd   : > { %20163 = vmatmul.mubr.f32.gmra.mrb[44].mxu1 %v33028_v1 }
0x26de   : > { %28540 = vmatpush1.bf16.msra.mxu1 %v33959_v34  ;;  %20265 = vmatprep.mubr.f32.mxu1 %v33957_v60 }
0x26df   : > { %28542 = vmatprep.subr.bf16.mxu1 %v33960_v25  ;;  %v21749_v25 = vld [vmem:[%s29947_s11 + $0xf0] sm:$0xff] }
0x26e2   : > { %28544 = vmatpush1.bf16.msra.mxu1 %v33961_v56 }
0x26e3   : > { %28546 = vmatprep.subr.bf16.mxu1 %v33962_v22 }
0x26e6   : > { %28548 = vmatpush1.bf16.msra.mxu1 %v33963_v37 }
0x26e7   : > { %28550 = vmatprep.subr.bf16.mxu1 %v33964_v38 }
0x26ea   : > { %28552 = vmatpush1.bf16.msra.mxu1 %v33965_v58 }
0x26eb   : > { %28554 = vmatprep.subr.bf16.mxu1 %v33966_v24 }
0x26ee   : > { %28556 = vmatpush1.bf16.msra.mxu1 %v33967_v46 }
0x26ef   : > { %28558 = vmatprep.subr.bf16.mxu1 %v34225_v61 }
0x26f2   : > { %28560 = vmatpush1.bf16.msra.mxu1 %v34226_v48 }
0x26f3   : > { %28562 = vmatprep.subr.bf16.mxu1 %v34227_v41 }
0x26f6   : > { %28564 = vmatpush1.bf16.msra.mxu1 %v34228_v9 }
0x26f9   : > { %20267 = vmatmul.mubr.f32.vlgmr.msra.gmra.mrb[42].mxu1 %v33030_v44 }
0x26fa   : > { %20272 = vmatprep.mubr.f32.mxu1 %v33957_v60 }
0x26fd   : > { %20274 = vmatmul.mubr.f32.gmra.mrb[44].mxu1 %v33028_v1 }
0x27cc   : > { %v20268_v23 = vpop.f32.mrb[42].mxu1 }
0x27cd   : > { %v20280_v26 = vadd.f32 %v21747_v2, %v20268_v23  ;;  %v33149_v34 = vpop.f32.mrb[43].mxu1 }
0x27cf   : > { %v21751_v56 = vmul.f32 -1.442695, %v20280_v26 }
0x27d0   : > { %v20275_v22 = vpop.f32.mrb[44].mxu1 }
0x27d1   : > { %29410 = vpow2.f32 %v21751_v56  ;;  %v20282_v37 = vadd.f32 %v21749_v25, %v20275_v22  ;;  %v33152_v38 = vpop.f32.mrb[45].mxu1  ;;  %v21756_v56 = vld [vmem:[%s29957_s23 + $0x78] sm:$0xff] }
0x27d3   : > { %v21753_v58 = vmul.f32 -1.442695, %v20282_v37 }
0x27d5   : > { %29412 = vpow2.f32 %v21753_v58 }
0x27db   : > { %v29411_v24 = vpop.eup %29410 }
0x27dc   : > { %v20296_v46 = vadd.f32 1.0, %v29411_v24 }
0x27de   : > { %29414 = vrcp.f32 %v20296_v46 }
0x27df   : > { %v29413_v60 = vpop.eup %29412 }
0x27e0   : > { %v20298_v61 = vadd.f32 1.0, %v29413_v60 }
0x27e2   : > { %29416 = vrcp.f32 %v20298_v61 }
0x27e8   : > { %v29415_v48 = vpop.eup %29414 }
0x27e9   : > { %v20308_v41 = vmul.f32 %v29415_v48, %v33006_v59 }
0x27eb   : > { %v20311_v9 = vand.u32 4294901760, %v20308_v41 }
0x27ec   : > { %v29417_v1 = vpop.eup %29416 }
0x27ed   : > { %v20309_v44 = vmul.f32 %v29417_v1, %v33004_v29  ;;  %v20399_v13 = vsub.f32 %v20308_v41, %v20311_v9 }
0x27ef   : > { %v20314_v30 = vand.u32 4294901760, %v20309_v44  ;;  %v20400_v14 = vand.u32 4294901760, %v20399_v13 }
0x27f1   : > { %v28565_v57 = vpack.c.bf16 %v20314_v30, %v20311_v9  ;;  %v20406_v6 = vsub.f32 %v20309_v44, %v20314_v30  ;;  %v20401_v11 = vsub.f32 %v20399_v13, %v20400_v14 }
0x27f3   : > { %28566 = vmatprep.subr.bf16.mxu0 %v28565_v57  ;;  %v20407_v8 = vand.u32 4294901760, %v20406_v6  ;;  %v28573_v12 = vpack.c.bf16 %v20406_v6, %v20399_v13  ;;  %v20402_v40 = vand.u32 4294901760, %v20401_v11 }
0x27f4   : > { %28568 = vmatpush3.bf16.msra.mxu0 %v28565_v57 }
0x27f5   : > { %v20408_v50 = vsub.f32 %v20406_v6, %v20407_v8  ;;  %v28581_v3 = vpack.c.bf16 %v20407_v8, %v20400_v14 }
0x27f7   : > { %25102 = vmatmul.mubr.f32.vlgmr.msra.gmra.mrb[32].mxu0 %v33908_v33  ;;  %v20409_v21 = vand.u32 4294901760, %v20408_v50 }
0x27f8   : > { %25108 = vmatprep.mubr.f32.mxu0 %v33909_v0 }
0x27f9   : > { %v28569_v4 = vpack.c.bf16 %v20409_v21, %v20402_v40 }
0x27fb   : > { %28570 = vmatprep.subr.bf16.mxu0 %v28569_v4 }
0x27fc   : > { %28572 = vmatpush3.bf16.msra.mxu0 %v28569_v4 }
0x27fd   : > { %28574 = vmatprep.subr.bf16.mxu0 %v28573_v12 }
0x27ff   : > { %25109 = vmatmul.mubr.f32.vlgmr.msra.gmra.mrb[32].mxu0 %v33910_v18 }
0x2800   : > { %28576 = vmatpush3.bf16.msra.mxu0 %v28573_v12  ;;  %25115 = vmatprep.mubr.f32.mxu0 %v33911_v52 }
0x2801   : > { %28578 = vmatprep.subr.bf16.mxu0 %v28565_v57 }
0x2807   : > { %25116 = vmatmul.mubr.f32.vlgmr.msra.gmra.mrb[32].mxu0 %v33912_v62 }
0x2808   : > { %28580 = vmatpush3.bf16.msra.mxu0 %v28565_v57  ;;  %25122 = vmatprep.mubr.f32.mxu0 %v33913_v27 }
0x2809   : > { %28582 = vmatprep.subr.bf16.mxu0 %v28581_v3 }
0x280f   : > { %25123 = vmatmul.mubr.f32.vlgmr.msra.gmra.mrb[32].mxu0 %v33914_v31 }
0x2810   : > { %28584 = vmatpush3.bf16.msra.mxu0 %v28581_v3  ;;  %25129 = vmatprep.mubr.f32.mxu0 %v33909_v0 }
0x2811   : > { %28586 = vmatprep.subr.bf16.mxu0 %v28565_v57 }
0x2817   : > { %25130 = vmatmul.mubr.f32.vlgmr.msra.gmra.mrb[32].mxu0 %v33910_v18 }
0x2818   : > { %28588 = vmatpush3.bf16.msra.mxu0 %v28565_v57  ;;  %25136 = vmatprep.mubr.f32.mxu0 %v33909_v0 }
0x2819   : > { %28590 = vmatprep.subr.bf16.mxu0 %v30757_v55 }
0x281f   : > { %25137 = vmatmul.mubr.f32.vlgmr.msra.gmra.mrb[32].mxu0 %v33910_v18 }
0x2820   : > { %28592 = vmatpush3.bf16.msra.mxu0 %v30757_v55 }
0x2821   : > { %28594 = vmatprep.subr.bf16.mxu0 %v30776_v28 }
0x2824   : > { %28596 = vmatpush3.bf16.msra.mxu0 %v30776_v28 }
0x2825   : > { %28598 = vmatprep.subr.bf16.mxu0 %v30791_v20 }
0x2828   : > { %28600 = vmatpush3.bf16.msra.mxu0 %v30791_v20 }
0x2829   : > { %28602 = vmatprep.subr.bf16.mxu0 %v30805_v49 }
0x282c   : > { %28604 = vmatpush3.bf16.msra.mxu0 %v30805_v49 }
0x282d   : > { %28606 = vmatprep.subr.bf16.mxu0 %v30815_v5 }
0x2830   : > { %28608 = vmatpush3.bf16.msra.mxu0 %v30815_v5 }
0x2831   : > { %28610 = vmatprep.subr.bf16.mxu0 %v30820_v7 }
0x2834   : > { %28612 = vmatpush3.bf16.msra.mxu0 %v30820_v7 }
0x2835   : > { %28614 = vmatprep.subr.bf16.mxu0 %v30824_v16 }
0x2838   : > { %28616 = vmatpush3.bf16.msra.mxu0 %v30824_v16 }
0x2839   : > { %28618 = vmatprep.subr.bf16.mxu0 %v30834_v63 }
0x283c   : > { %28620 = vmatpush3.bf16.msra.mxu0 %v30834_v63 }
0x283d   : > { %28622 = vmatprep.subr.bf16.mxu0 %v30844_v47 }
0x28f2   : > { %v25138_v33 = vpop.f32.mrb[32].mxu0 }
0x28f3   : > { %v33184_v0 = vand.u32 4294901760, %v25138_v33  ;;  %v20802_v18 = vpop.f32.mrb[33].mxu0 }
0x28f4   : > { %v33186_v52 = vand.u32 4294901760, %v20802_v18 }
0x28f5   : > { %v33189_v62 = vsub.f32 %v25138_v33, %v33184_v0 }
0x28f6   : > { %v20897_v27 = vsub.f32 %v20802_v18, %v33186_v52 }
0x28f7   : > { %v20908_v31 = vand.u32 4294901760, %v33189_v62 }
0x28f8   : > { %v20898_v15 = vand.u32 4294901760, %v20897_v27 }
0x28f9   : > { %v20909_v39 = vsub.f32 %v33189_v62, %v20908_v31 }
0x28fa   : > { %v20899_v2 = vsub.f32 %v20897_v27, %v20898_v15 }
0x28fb   : > { %v20910_v26 = vand.u32 4294901760, %v20909_v39 }
0x28fc   : > { %v20900_v23 = vand.u32 4294901760, %v20899_v2 }
0x28fe   : > { %25171 = vmatprep.mubr.f32.mxu0 %v20900_v23 }
0x28ff   : > { %25172 = vmatmul.mubr.f32.vlgmr.msra.gmra.mrb[34].mxu0 %v20910_v26 }
0x2900   : > { %28624 = vmatpush3.bf16.msra.mxu0 %v30844_v47  ;;  %25206 = vmatprep.mubr.f32.mxu0 %v33186_v52  ;;  %v34410_v47 = vld [vmem:[#allocation54_spill] sm:$0xff] }
0x2901   : > { %28626 = vmatprep.subr.bf16.mxu0 %v30981_v42 }
0x2904   : > { %28628 = vmatpush3.bf16.msra.mxu0 %v30981_v42  ;;  %v34409_v42 = vld [vmem:[#allocation53_spill] sm:$0xff] }
0x2905   : > { %28630 = vmatprep.subr.bf16.mxu0 %v30993_v45 }
0x2908   : > { %28632 = vmatpush3.bf16.msra.mxu0 %v30993_v45  ;;  %v34415_v45 = vld [vmem:[#allocation62_spill] sm:$0xff] }
0x2909   : > { %28634 = vmatprep.subr.bf16.mxu0 %v31004_v35 }
0x290c   : > { %28636 = vmatpush3.bf16.msra.mxu0 %v31004_v35  ;;  %v34416_v35 = vld [vmem:[#allocation63_spill] sm:$0xff] }
0x290d   : > { %28638 = vmatprep.subr.bf16.mxu0 %v31008_v19 }
0x2910   : > { %28640 = vmatpush3.bf16.msra.mxu0 %v31008_v19  ;;  %v34417_v19 = vld [vmem:[#allocation25_spill] sm:$0xff] }
0x2911   : > { %28642 = vmatprep.subr.bf16.mxu0 %v30865_v36 }
0x2914   : > { %28644 = vmatpush3.bf16.msra.mxu0 %v30865_v36  ;;  %v34411_v36 = vld [vmem:[#allocation55_spill] sm:$0xff] }
0x2915   : > { %28646 = vmatprep.subr.bf16.mxu0 %v30879_v54 }
0x2918   : > { %28648 = vmatpush3.bf16.msra.mxu0 %v30879_v54  ;;  %v34412_v54 = vld [vmem:[#allocation57_spill] sm:$0xff] }
0x2919   : > { %28650 = vmatprep.subr.bf16.mxu0 %v30887_v53 }
0x291c   : > { %28652 = vmatpush3.bf16.msra.mxu0 %v30887_v53  ;;  %v34413_v53 = vld [vmem:[#allocation58_spill] sm:$0xff] }
0x291d   : > { %28654 = vmatprep.subr.bf16.mxu0 %v30891_v43 }
0x291f   : > { %25207 = vmatmul.mubr.f32.vlgmr.msra.gmra.mrb[34].mxu0 %v33184_v0 }
0x2920   : > { %28656 = vmatpush3.bf16.msra.mxu0 %v30891_v43  ;;  %25241 = vmatprep.mubr.f32.mxu0 %v20897_v27  ;;  %v34414_v43 = vld [vmem:[#allocation60_spill] sm:$0xff] }
0x2921   : > { %28658 = vmatprep.subr.bf16.mxu0 %v31022_v32 }
0x2924   : > { %28660 = vmatpush3.bf16.msra.mxu0 %v31022_v32  ;;  %v34418_v32 = vld [vmem:[#allocation18_spill] sm:$0xff] }
0x2925   : > { %28662 = vmatprep.subr.bf16.mxu0 %v31030_v17 }
0x2928   : > { %28664 = vmatpush3.bf16.msra.mxu0 %v31030_v17  ;;  %v34419_v17 = vld [vmem:[#allocation19_spill] sm:$0xff] }
0x2929   : > { %28666 = vmatprep.subr.bf16.mxu0 %v31036_v10 }
0x292c   : > { %28668 = vmatpush3.bf16.msra.mxu0 %v31036_v10 }
0x292d   : > { %28670 = vmatprep.subr.bf16.mxu0 %v31042_v51 }
0x2930   : > { %28672 = vmatpush3.bf16.msra.mxu0 %v31042_v51 }
0x2931   : > { %28674 = vmatprep.subr.bf16.mxu0 %v34409_v42 }
0x2934   : > { %28676 = vmatpush3.bf16.msra.mxu0 %v34409_v42 }
0x2935   : > { %28678 = vmatprep.subr.bf16.mxu0 %v34410_v47 }
0x2938   : > { %28680 = vmatpush3.bf16.msra.mxu0 %v34410_v47 }
0x2939   : > { %28682 = vmatprep.subr.bf16.mxu0 %v34411_v36 }
0x293c   : > { %28684 = vmatpush3.bf16.msra.mxu0 %v34411_v36 }
0x293d   : > { %28686 = vmatprep.subr.bf16.mxu0 %v30757_v55 }
0x293f   : > { %25242 = vmatmul.mubr.f32.vlgmr.msra.gmra.mrb[34].mxu0 %v33189_v62 }
0x2940   : > { %28688 = vmatpush3.bf16.msra.mxu0 %v30757_v55  ;;  %25276 = vmatprep.mubr.f32.mxu0 %v20898_v15 }
0x2941   : > { %28690 = vmatprep.subr.bf16.mxu0 %v30776_v28 }
0x2944   : > { %28692 = vmatpush3.bf16.msra.mxu0 %v30776_v28 }
0x2945   : > { %28694 = vmatprep.subr.bf16.mxu0 %v30791_v20 }
0x2948   : > { %28696 = vmatpush3.bf16.msra.mxu0 %v30791_v20 }
0x2949   : > { %28698 = vmatprep.subr.bf16.mxu0 %v30805_v49 }
0x294c   : > { %28700 = vmatpush3.bf16.msra.mxu0 %v30805_v49 }
0x294d   : > { %28702 = vmatprep.subr.bf16.mxu0 %v30815_v5 }
0x2950   : > { %28704 = vmatpush3.bf16.msra.mxu0 %v30815_v5 }
0x2951   : > { %28706 = vmatprep.subr.bf16.mxu0 %v30820_v7 }
0x2954   : > { %28708 = vmatpush3.bf16.msra.mxu0 %v30820_v7 }
0x2955   : > { %28710 = vmatprep.subr.bf16.mxu0 %v30824_v16 }
0x2958   : > { %28712 = vmatpush3.bf16.msra.mxu0 %v30824_v16 }
0x2959   : > { %28714 = vmatprep.subr.bf16.mxu0 %v30834_v63 }
0x295c   : > { %28716 = vmatpush3.bf16.msra.mxu0 %v30834_v63 }
0x295d   : > { %28718 = vmatprep.subr.bf16.mxu0 %v34412_v54 }
0x295f   : > { %25277 = vmatmul.mubr.f32.vlgmr.msra.gmra.mrb[34].mxu0 %v20908_v31 }
0x2960   : > { %28720 = vmatpush3.bf16.msra.mxu0 %v34412_v54  ;;  %25311 = vmatprep.mubr.f32.mxu0 %v33186_v52 }
0x2961   : > { %28722 = vmatprep.subr.bf16.mxu0 %v34413_v53 }
0x2964   : > { %28724 = vmatpush3.bf16.msra.mxu0 %v34413_v53 }
0x2965   : > { %28726 = vmatprep.subr.bf16.mxu0 %v34414_v43 }
0x2968   : > { %28728 = vmatpush3.bf16.msra.mxu0 %v34414_v43 }
0x2969   : > { %28730 = vmatprep.subr.bf16.mxu0 %v34415_v45 }
0x296c   : > { %28732 = vmatpush3.bf16.msra.mxu0 %v34415_v45 }
0x296d   : > { %28734 = vmatprep.subr.bf16.mxu0 %v34416_v35 }
0x2970   : > { %28736 = vmatpush3.bf16.msra.mxu0 %v34416_v35 }
0x2971   : > { %28738 = vmatprep.subr.bf16.mxu0 %v34417_v19 }
0x2974   : > { %28740 = vmatpush3.bf16.msra.mxu0 %v34417_v19 }
0x2975   : > { %28742 = vmatprep.subr.bf16.mxu0 %v34418_v32 }
0x2978   : > { %28744 = vmatpush3.bf16.msra.mxu0 %v34418_v32 }
0x2979   : > { %28746 = vmatprep.subr.bf16.mxu0 %v34419_v17 }
0x297c   : > { %28748 = vmatpush3.bf16.msra.mxu0 %v34419_v17 }
0x297d   : > { %28750 = vmatprep.subr.bf16.mxu0 %v30757_v55 }
0x297f   : > { %25312 = vmatmul.mubr.f32.vlgmr.msra.gmra.mrb[34].mxu0 %v33184_v0 }
0x2980   : > { %28752 = vmatpush3.bf16.msra.mxu0 %v30757_v55  ;;  %25346 = vmatprep.mubr.f32.mxu0 %v33186_v52 }
0x2981   : > { %28754 = vmatprep.subr.bf16.mxu0 %v30776_v28 }
0x2984   : > { %28756 = vmatpush3.bf16.msra.mxu0 %v30776_v28  ;;  %v21748_v28 = vld [vmem:[%s29947_s11 + $0xe8] sm:$0xff] }
0x2985   : > { %28758 = vmatprep.subr.bf16.mxu0 %v30791_v20  ;;  %v20281_v55 = vadd.f32 %v21748_v28, %v33149_v34 }
0x2988   : > { %28760 = vmatpush3.bf16.msra.mxu0 %v30791_v20 }
0x2989   : > { %28762 = vmatprep.subr.bf16.mxu0 %v30805_v49 }
0x298c   : > { %28764 = vmatpush3.bf16.msra.mxu0 %v30805_v49  ;;  %v21750_v49 = vld [vmem:[%s29947_s11 + $0xf8] sm:$0xff] }
0x298d   : > { %28766 = vmatprep.subr.bf16.mxu0 %v30815_v5 }
0x2990   : > { %28768 = vmatpush3.bf16.msra.mxu0 %v30815_v5  ;;  %v20283_v5 = vadd.f32 %v21750_v49, %v33152_v38 }
0x2991   : > { %28770 = vmatprep.subr.bf16.mxu0 %v30820_v7 }
0x2992   : > { %v21754_v20 = vmul.f32 -1.442695, %v20283_v5 }
0x2994   : > { %28772 = vmatpush3.bf16.msra.mxu0 %v30820_v7  ;;  %v21752_v7 = vmul.f32 -1.442695, %v20281_v55  ;;  %29418 = vpow2.f32 %v21754_v20 }
0x2995   : > { %28774 = vmatprep.subr.bf16.mxu0 %v30824_v16 }
0x2996   : > { %29420 = vpow2.f32 %v21752_v7 }
0x2998   : > { %28776 = vmatpush3.bf16.msra.mxu0 %v30824_v16 }
0x2999   : > { %28778 = vmatprep.subr.bf16.mxu0 %v30834_v63 }
0x299c   : > { %28780 = vmatpush3.bf16.msra.mxu0 %v30834_v63  ;;  %v21755_v63 = vld [vmem:[%s29957_s23 + $0x70] sm:$0xff] }
0x299e   : > { %v29419_v10 = vpop.eup %29418 }
0x299f   : > { %25347 = vmatmul.mubr.f32.vlgmr.msra.gmra.mrb[34].mxu0 %v33184_v0  ;;  %v20299_v51 = vadd.f32 1.0, %v29419_v10 }
0x29a0   : > { %v29421_v16 = vpop.eup %29420 }
0x29a1   : > { %v20297_v25 = vadd.f32 1.0, %v29421_v16  ;;  %29422 = vrcp.f32 %v20299_v51 }
0x29a3   : > { %29424 = vrcp.f32 %v20297_v25 }
0x29ab   : > { %v29423_v34 = vpop.eup %29422 }
0x29ac   : > { %v21506_v46 = vsub.f32 1.0, %v29423_v34  ;;  %v21504_v41 = vmul.f32 %v29423_v34, %v33004_v29 }
0x29ad   : > { %v29425_v24 = vpop.eup %29424 }
0x29ae   : > { %v21505_v61 = vsub.f32 1.0, %v29425_v24  ;;  %v21503_v1 = vmul.f32 %v29425_v24, %v33006_v59 }
0x2a72   : > { %v25348_v22 = vpop.f32.mrb[34].mxu0 }
0x2a73   : > { %v21500_v37 = vadd.f32 %v25348_v22, %v21756_v56  ;;  %v21489_v58 = vpop.f32.mrb[35].mxu0 }
0x2a74   : > { %v21499_v38 = vadd.f32 %v21755_v63, %v21489_v58 }
0x2a75   : > { %29426 = vtanh.f32 %v21500_v37 }
0x2a76   : > { %29428 = vtanh.f32 %v21499_v38 }
0x2a7f   : > { %v29427_v60 = vpop.eup %29426 }
0x2a80   : > { %v29429_v48 = vpop.eup %29428  ;;  %v21508_v9 = vmul.f32 %v29427_v60, %v21506_v46 }
0x2a81   : > { %v21507_v44 = vmul.f32 %v29429_v48, %v21505_v61 }
0x2a82   : > { %v21510_v13 = vadd.f32 %v21508_v9, %v21504_v41 }
0x2a83   : > { %v21509_v30 = vadd.f32 %v21507_v44, %v21503_v1 }
0x2a84   : > { %21758 = vst [vmem:[%s31171_s24 + $0x78] sm:$0xff] %v21510_v13 }
0x2a85   : > { %21757 = vst [vmem:[%s31171_s24 + $0x70] sm:$0xff] %v21509_v30 }
0x2a86   : > { %29587 = shalt.err (!%p29584_p3)
}
0x2a87   : > { %s29588_s3 = scalar_lea.hbm %s33293_s10, 2048  ;;  %s29592_s7 = scalar_lea.hbm %s33346_s5, 4096 }
0x2a88   : > { %p29589_p9 = scmp.ne.s32.totalorder %s33293_s10, %s29588_s3  ;;  %p29593_p7 = scmp.lt.u32.totalorder %s33293_s10, %s33346_s5 }
0x2a89   : > { %p29594_p12 = scmp.lt.u32.totalorder %s29592_s7, %s29588_s3  ;;  %p29596_p2 = scmp.lt.u32.totalorder %s29588_s3, %s33293_s10 }
0x2a8a   : > { %p29590_p13 = pnand %p29589_p9, %p29848_p5 }
0x2a8b   : > { %p29595_p1 = por %p29594_p12, %p29593_p7 }
0x2a8c   : > { %p29591_p11 = pneg %p29590_p13 }
0x2a8d   : > { %p29597_p4 = por %p29596_p2, %p29595_p1 }
0x2a8f   : > { %p29598_p0 = pnand %p29597_p4, %p29591_p11 }
0x2a91   : > { %29601 = shalt.err (!%p29598_p0)
}
0x2a92   : > { %s29665_s2 = smov 128   ;;  %s29666_s4 = smov 8  }
0x2a93   : > { %29197 = dma.vmem_to_hbm [thread:$0]  (%p29848_p5), %s33295_s12, 2048, %s33293_s10, %s21515_s22, %s29665_s2, %s29665_s2, %s29666_s4  }
0x2a94 PF: > { %s21543_s26 = sand.u32 1, %s29640_s18   ;;  %p34420_p8 = scmp.ne.s32.totalorder %s33704_s25, 0 }
0x2a95   : > { %p34421_p6 = scmp.ge.s32.totalorder %s29652_s21, 2  ;;  %s21544_s23 = scalar_lea.sflag [#allocation4], %s21543_s26 }
0x2a97   : > { %p29217_p10 = pnand %p34421_p6, %p34420_p8 }
0x2a99   : > { %29635 = dma.done.wait (!%p29217_p10), %s21544_s23, 2048  }
0x2a9a   : > { %29637 = vsyncadd (!%p29217_p10), %s21544_s23, 4294965248  ;;  %s34422_s24 = sld [smem:[#allocation17_spill]]  ;;  %p22_p3 = scmp.ge.s32.totalorder %s29813_s8, 4  }
0x2a9b   : > { %s34423_s18 = smov %s29644_s19  ;;  %s34424_s19 = smov %s29648_s20 }
0x2a9c   : > { %s34426_s21 = smov %s29813_s8  ;;  %24 = sbr.rel (!%p22_p3) target bundleno = 13 (0xd), region = 131 }
0x2aa0   : > { %s34425_s20 = smov %s34422_s24 }
0x2aa3   :  { %21549 = vsyncpa [#allocation3], 1 }
0x2aa4   :  { %21551 = vsyncpa [#allocation3 + $0x1], 1 }
0x2aa5   :  { %21552 = vsyncpa [#allocation6], 1 }
0x2aa6   :  { %21554 = vsyncpa [#allocation6 + $0x1], 1 }
0x2aa7   :  { %21555 = vsyncpa [#allocation9], 1 }
0x2aa8   :  { %21556 = vsyncpa [#allocation4], 1 }
0x2aa9   :  { %21558 = vsyncpa [#allocation4 + $0x1], 1 }

</bundles_post_ra>
